<compile_context>
chip_gen: v7x
topology: tpu7x:2x2x1
jax: 0.10.0
libtpu: 0.0.40
codegen_flags: <defaults>
</compile_context>

<pallas_src>
import functools

import jax
import jax.numpy as jnp
from jax.experimental import pallas as pl
from jax.experimental.pallas import tpu as pltpu

BN_EPS = 1e-5
LANE = 128       # TPU lane width: HBM-stored channel dims are padded to this
IN_CH_PAD = 16   # bf16 sublane packing: pad the network-input channels to this


def _round_up(x, m):
    return (x + m - 1) // m * m


def _apply_act(x, activation):
    if activation == "relu":
        return jnp.maximum(x, 0.0)
    if activation == "selu":
        return jax.nn.selu(x)
    if activation == "swish-1":
        return x * jax.nn.sigmoid(x)
    raise ValueError(activation)


# ----------------------------------------------------------------------------
# Fused ResidualBlock Pallas kernel
# ----------------------------------------------------------------------------
def _make_block_kernel(num_layers, activation, H, W, fuse_pool):
    """num_layers x (3x3 conv + eval-BN + act) + 1x1 shortcut (+bias) +
    residual add, optionally followed by a fused global average pool."""

    def kernel(*refs):
        x_ref = refs[0]                        # (tn, H, W, Cin)       bf16
        sc_w_ref = refs[1]                     # (Cin, LANE)           bf16
        sc_b_ref = refs[2]                     # (1, LANE)             f32
        layer_refs = refs[3:3 + 3 * num_layers]
        o_ref = refs[3 + 3 * num_layers]
        pad_ref = refs[4 + 3 * num_layers]     # (tn, H+2, W+2, LANE)  f32 scratch

        tn = x_ref.shape[0]
        M = tn * H * W

        # Zero the halo scratch every step (cheap) so its border is always 0
        # and grid steps stay fully independent ("parallel" is safe on v7x).
        pad_ref[...] = jnp.zeros_like(pad_ref)

        x = x_ref[...]                                   # bf16
        cin = x.shape[-1]

        # ---- fused 1x1 shortcut conv (+ bias); result stays in VMEM/vregs ----
        sc = jnp.dot(x.reshape(M, cin), sc_w_ref[...],
                     preferred_element_type=jnp.float32)
        sc = sc + sc_b_ref[...]                          # (M, LANE) f32

        h = x.astype(jnp.float32)                        # current layer input
        y = None
        for l in range(num_layers):
            w_ref = layer_refs[3 * l]                    # (9, Cl, LANE) bf16
            scale = layer_refs[3 * l + 1][...]           # (1, LANE)     f32
            shift = layer_refs[3 * l + 2][...]
            cl = h.shape[-1]

            # Fused "im2col": write the layer input into the interior of the
            # zero-bordered halo buffer, then accumulate 9 shifted matmuls.
            pad_ref[:, 1:1 + H, 1:1 + W, :cl] = h
            acc = None
            for dy in range(3):
                for dx in range(3):
                    tap = pad_ref[:, dy:dy + H, dx:dx + W, :cl]
                    lhs = tap.reshape(M, cl).astype(jnp.bfloat16)
                    d = jnp.dot(lhs, w_ref[dy * 3 + dx],
                                preferred_element_type=jnp.float32)
                    acc = d if acc is None else acc + d
            # eval-mode BatchNorm folded to per-channel affine, then activation.
            y = _apply_act(acc * scale + shift, activation)     # (M, LANE) f32
            if l < num_layers - 1:
                h = y.reshape(tn, H, W, LANE)

        y = y + sc                                       # residual add (fused)

        if fuse_pool:
            # Fused global average pool -> per-image embedding (lane-dense).
            pooled = jnp.sum(y.reshape(tn, H * W, LANE), axis=1) * (1.0 / (H * W))
            o_ref[...] = pooled[:, None, :]              # (tn, 1, LANE) f32
        else:
            o_ref[...] = y.astype(jnp.bfloat16).reshape(tn, H, W, LANE)

    return kernel


def residual_block(x, kblock, *, activation, fuse_pool, tile_n):
    """x: (Npad, H, W, Cin) bf16 with Npad % tile_n == 0 and Cin pre-padded.
    Returns (Npad, H, W, LANE) bf16, or (Npad, 1, LANE) f32 pooled embeddings
    when fuse_pool=True."""
    n, H, W, cin = x.shape
    num_layers = len(kblock["layers"])
    assert n % tile_n == 0 and kblock["shortcut_w"].shape[0] == cin

    kernel = _make_block_kernel(num_layers, activation, H, W, fuse_pool)

    in_specs = [
        pl.BlockSpec((tile_n, H, W, cin), lambda i: (i, 0, 0, 0)),
        pl.BlockSpec((cin, LANE), lambda i: (0, 0)),
        pl.BlockSpec((1, LANE), lambda i: (0, 0)),
    ]
    args = [x, kblock["shortcut_w"], kblock["shortcut_b"]]
    for lp in kblock["layers"]:
        cl = lp["w"].shape[1]
        in_specs += [
            pl.BlockSpec((9, cl, LANE), lambda i: (0, 0, 0)),
            pl.BlockSpec((1, LANE), lambda i: (0, 0)),
            pl.BlockSpec((1, LANE), lambda i: (0, 0)),
        ]
        args += [lp["w"], lp["scale"], lp["shift"]]

    if fuse_pool:
        out_shape = jax.ShapeDtypeStruct((n, 1, LANE), jnp.float32)
        out_specs = pl.BlockSpec((tile_n, 1, LANE), lambda i: (i, 0, 0))
    else:
        out_shape = jax.ShapeDtypeStruct((n, H, W, LANE), jnp.bfloat16)
        out_specs = pl.BlockSpec((tile_n, H, W, LANE), lambda i: (i, 0, 0, 0))

    return pl.pallas_call(
        kernel,
        out_shape=out_shape,
        grid=(n // tile_n,),
        in_specs=in_specs,
        out_specs=out_specs,
        scratch_shapes=[pltpu.VMEM((tile_n, H + 2, W + 2, LANE), jnp.float32)],
        compiler_params=pltpu.CompilerParams(
            # independent image tiles -> shardable across v7x's 2 TensorCores
            dimension_semantics=("parallel",)),
    )(*args)


# ----------------------------------------------------------------------------
# Parameters (PyTorch-equivalent) and kernel-side preparation
# ----------------------------------------------------------------------------
def init_params(key, in_channels, num_layers_per_block, num_blocks,
                num_channels, growth):
    chans = [num_channels * growth ** i for i in range(num_blocks)]
    params = []
    for b in range(num_blocks):
        cin = in_channels if b == 0 else chans[b - 1]
        cout = chans[b]
        key, k_sw, k_sb = jax.random.split(key, 3)
        block = {
            # 1x1 shortcut conv (nn.Conv2d default: has bias)
            "shortcut_w": 0.1 * jax.random.normal(k_sw, (cin, cout), jnp.float32),
            "shortcut_b": 0.1 * jax.random.normal(k_sb, (cout,), jnp.float32),
            "layers": [],
        }
        lin = cin
        for _ in range(num_layers_per_block):
            key, kw, kg, kb = jax.random.split(key, 4)
            block["layers"].append(dict(
                # weight stored as (kh, kw, Cin, Cout); conv has no bias
                w=0.1 * jax.random.normal(kw, (3, 3, lin, cout), jnp.float32),
                gamma=1.0 + 0.1 * jax.random.normal(kg, (cout,), jnp.float32),
                beta=0.1 * jax.random.normal(kb, (cout,), jnp.float32),
                mean=jnp.zeros((cout,), jnp.float32),   # BN running stats (eval)
                var=jnp.ones((cout,), jnp.float32),
            ))
            lin = cout
        params.append(block)
    return params, chans


def prepare_kernel_params(params):
    """Fold eval-mode BatchNorm into per-channel scale/shift, zero-pad channel
    dims to the TPU lane width, and cast matmul operands to bf16.  Padded
    channels are exactly zero through the whole network, so slicing the final
    embedding recovers the unpadded result."""
    kparams = []
    cin_pad = _round_up(params[0]["shortcut_w"].shape[0], IN_CH_PAD)
    for block in params:
        cin_real, cout_real = block["shortcut_w"].shape
        sw = jnp.zeros((cin_pad, LANE), jnp.float32)
        sw = sw.at[:cin_real, :cout_real].set(block["shortcut_w"])
        sb = jnp.zeros((1, LANE), jnp.float32)
        sb = sb.at[0, :cout_real].set(block["shortcut_b"])
        kblock = {"shortcut_w": sw.astype(jnp.bfloat16), "shortcut_b": sb,
                  "layers": []}
        lin_pad = cin_pad
        for lp in block["layers"]:
            _, _, lci, lco = lp["w"].shape
            w = jnp.zeros((9, lin_pad, LANE), jnp.float32)
            w = w.at[:, :lci, :lco].set(lp["w"].reshape(9, lci, lco))
            inv = 1.0 / jnp.sqrt(lp["var"] + BN_EPS)
            scale = lp["gamma"] * inv
            shift = lp["beta"] - lp["mean"] * scale
            kblock["layers"].append(dict(
                w=w.astype(jnp.bfloat16),
                scale=jnp.zeros((1, LANE), jnp.float32).at[0, :lco].set(scale),
                shift=jnp.zeros((1, LANE), jnp.float32).at[0, :lco].set(shift),
            ))
            lin_pad = LANE      # padded layer outputs are LANE channels wide
        kparams.append(kblock)
        cin_pad = LANE          # the next block reads the padded block output
    return kparams


# ----------------------------------------------------------------------------
# Forward pass + pure-JAX reference
# ----------------------------------------------------------------------------
def _pick_tile_n(n, H, W):
    # Target ~512-1024 im2col rows per grid step (amortizes the ~0.35us
    # per-step overhead) while keeping >=2 grid steps when possible so the
    # "parallel" axis can be split across both v7x TensorCores.
    rows_target = max(1, 1024 // (H * W))
    return max(1, min(rows_target, pl.cdiv(n, 2))) if n > 1 else 1


def protonet_forward(inputs, kparams, *, activation="relu", out_channels):
    """inputs: (meta_batch, n_examples, C, H, W) float32 (PyTorch NCHW)."""
    mb, ne, C, H, W = inputs.shape
    N = mb * ne
    x = inputs.reshape(N, C, H, W).transpose(0, 2, 3, 1)          # -> NHWC

    tile_n = _pick_tile_n(N, H, W)
    n_pad = _round_up(N, tile_n)
    c_pad = _round_up(C, IN_CH_PAD)
    # Pad batch (exact cdiv grid, no giant-block fallback) and channels
    # (sublane/lane friendly), cast to bf16 for the MXU.
    x = jnp.pad(x, ((0, n_pad - N), (0, 0), (0, 0), (0, c_pad - C)))
    x = x.astype(jnp.bfloat16)

    nb = len(kparams)
    for b, kblock in enumerate(kparams):
        x = residual_block(x, kblock, activation=activation,
                           fuse_pool=(b == nb - 1), tile_n=tile_n)

    emb = x[:N, 0, :out_channels]                # drop batch / lane padding
    return emb.reshape(mb, ne, out_channels)


def protonet_reference(inputs, params, activation="relu"):
    """Pure-JAX f32 reference with the PyTorch module's math."""
    mb, ne, C, H, W = inputs.shape
    N = mb * ne
    x = inputs.reshape(N, C, H, W).transpose(0, 2, 3, 1)

    for block in params:
        cin = x.shape[-1]
        cout = block["shortcut_w"].shape[1]
        sc = (x.reshape(N * H * W, cin) @ block["shortcut_w"]
              + block["shortcut_b"]).reshape(N, H, W, cout)
        for lp in block["layers"]:
            cl = x.shape[-1]
            xp = jnp.pad(x, ((0, 0), (1, 1), (1, 1), (0, 0)))
            cols = [xp[:, dy:dy + H, dx:dx + W, :]
                    for dy in range(3) for dx in range(3)]
            patches = jnp.stack(cols, axis=3).reshape(N * H * W, 9 * cl)
            y = patches @ lp["w"].reshape(-1, cout)
            inv = 1.0 / jnp.sqrt(lp["var"] + BN_EPS)
            scale = lp["gamma"] * inv
            shift = lp["beta"] - lp["mean"] * scale
            x = _apply_act(y * scale + shift, activation).reshape(N, H, W, cout)
        x = x + sc
    emb = jnp.mean(x.reshape(N, H * W, x.shape[-1]), axis=1)
    return emb.reshape(mb, ne, x.shape[-1])


if __name__ == "__main__":
    key = jax.random.PRNGKey(0)
    key, kin = jax.random.split(key)

    # small config: in_channels=3, 2 blocks of 2 conv layers, channels [16, 32]
    mb, ne, C, H, W = 2, 4, 3, 8, 8
    inputs = jax.random.normal(kin, (mb, ne, C, H, W), jnp.float32)

    params, chans = init_params(key, in_channels=C, num_layers_per_block=2,
                                num_blocks=2, num_channels=16, growth=2)
    kparams = prepare_kernel_params(params)

    fwd = jax.jit(functools.partial(protonet_forward, activation="relu",
                                    out_channels=chans[-1]))
    out = jax.block_until_ready(fwd(inputs, kparams))

    ref = protonet_reference(inputs, params, activation="relu")
    assert out.shape == (mb, ne, chans[-1]), out.shape
    max_err = float(jnp.max(jnp.abs(out - ref)))
    # bf16 matmul operands (f32 MXU accumulation) -> a few-percent tolerance.
    assert jnp.allclose(out, ref, rtol=5e-2, atol=5e-2), max_err
    print("KERNEL_OK")
</pallas_src>

<mosaic_0001>
module attributes {stable_mosaic.version = 11 : i64} {
  func.func @kernel(%arg0: i32, %arg1: memref<4x8x8x16xbf16, #tpu.memory_space<vmem>>, %arg2: memref<16x128xbf16, #tpu.memory_space<vmem>>, %arg3: memref<1x128xf32, #tpu.memory_space<vmem>>, %arg4: memref<9x16x128xbf16, #tpu.memory_space<vmem>>, %arg5: memref<1x128xf32, #tpu.memory_space<vmem>>, %arg6: memref<1x128xf32, #tpu.memory_space<vmem>>, %arg7: memref<9x128x128xbf16, #tpu.memory_space<vmem>>, %arg8: memref<1x128xf32, #tpu.memory_space<vmem>>, %arg9: memref<1x128xf32, #tpu.memory_space<vmem>>, %arg10: memref<4x8x8x128xbf16, #tpu.memory_space<vmem>>, %arg11: memref<4x10x10x128xf32, #tpu.memory_space<vmem>>) attributes {dimension_semantics = [#tpu.dimension_semantics<parallel>], iteration_bounds = array<i64: 2>, scalar_prefetch = 0 : i64, scratch_operands = 1 : i64, tpu.core_type = #tpu.core_type<tc>, window_params = [{transform_indices = @transform_0, window_bounds = array<i64: 4, 8, 8, 16>}, {pipeline_mode = #tpu.pipeline_mode<synchronous>, transform_indices = @transform_1, window_bounds = array<i64: 16, 128>}, {pipeline_mode = #tpu.pipeline_mode<synchronous>, transform_indices = @transform_2, window_bounds = array<i64: 1, 128>}, {pipeline_mode = #tpu.pipeline_mode<synchronous>, transform_indices = @transform_3, window_bounds = array<i64: 9, 16, 128>}, {pipeline_mode = #tpu.pipeline_mode<synchronous>, transform_indices = @transform_4, window_bounds = array<i64: 1, 128>}, {pipeline_mode = #tpu.pipeline_mode<synchronous>, transform_indices = @transform_5, window_bounds = array<i64: 1, 128>}, {pipeline_mode = #tpu.pipeline_mode<synchronous>, transform_indices = @transform_6, window_bounds = array<i64: 9, 128, 128>}, {pipeline_mode = #tpu.pipeline_mode<synchronous>, transform_indices = @transform_7, window_bounds = array<i64: 1, 128>}, {pipeline_mode = #tpu.pipeline_mode<synchronous>, transform_indices = @transform_8, window_bounds = array<i64: 1, 128>}, {transform_indices = @transform_9, window_bounds = array<i64: 4, 8, 8, 128>}]} {
    %cst = arith.constant 0.000000e+00 : f32
    %0 = vector.broadcast %cst : f32 to vector<4x10x10x128xf32>
    %c0 = arith.constant 0 : index
    %c0_0 = arith.constant 0 : index
    %c0_1 = arith.constant 0 : index
    %c0_2 = arith.constant 0 : index
    %1 = vector.load %arg11[%c0, %c0_0, %c0_1, %c0_2] : memref<4x10x10x128xf32, #tpu.memory_space<vmem>>, vector<4x10x10x128xf32>
    tpu.vector_store %arg11[%c0, %c0_0, %c0_1, %c0_2], %0 {strides = array<i32>} : memref<4x10x10x128xf32, #tpu.memory_space<vmem>>, vector<4x10x10x128xf32>,
    %c0_3 = arith.constant 0 : index
    %c0_4 = arith.constant 0 : index
    %c0_5 = arith.constant 0 : index
    %c0_6 = arith.constant 0 : index
    %2 = vector.load %arg1[%c0_3, %c0_4, %c0_5, %c0_6] : memref<4x8x8x16xbf16, #tpu.memory_space<vmem>>, vector<4x8x8x16xbf16>
    %3 = vector.shape_cast %2 : vector<4x8x8x16xbf16> to vector<256x16xbf16>
    %c0_7 = arith.constant 0 : index
    %c0_8 = arith.constant 0 : index
    %4 = vector.load %arg2[%c0_7, %c0_8] : memref<16x128xbf16, #tpu.memory_space<vmem>>, vector<16x128xbf16>
    %cst_9 = arith.constant dense<0.000000e+00> : vector<256x128xf32>
    %5 = tpu.matmul %3, %4, %cst_9 {dimension_numbers = #tpu.dot_dimension_numbers<[1], [0], [0], [1], [0, 0, 1, 1], [], []>} : vector<256x16xbf16>, vector<16x128xbf16>, vector<256x128xf32> -> vector<256x128xf32>
    %c0_10 = arith.constant 0 : index
    %c0_11 = arith.constant 0 : index
    %6 = vector.load %arg3[%c0_10, %c0_11] : memref<1x128xf32, #tpu.memory_space<vmem>>, vector<1x128xf32>
    %7 = vector.broadcast %6 : vector<1x128xf32> to vector<256x128xf32>
    %8 = arith.addf %5, %7 : vector<256x128xf32>
    %9 = arith.extf %2 : vector<4x8x8x16xbf16> to vector<4x8x8x16xf32>
    %c0_12 = arith.constant 0 : index
    %c0_13 = arith.constant 0 : index
    %10 = vector.load %arg5[%c0_12, %c0_13] : memref<1x128xf32, #tpu.memory_space<vmem>>, vector<1x128xf32>
    %c0_14 = arith.constant 0 : index
    %c0_15 = arith.constant 0 : index
    %11 = vector.load %arg6[%c0_14, %c0_15] : memref<1x128xf32, #tpu.memory_space<vmem>>, vector<1x128xf32>
    %c0_16 = arith.constant 0 : index
    %c1 = arith.constant 1 : index
    %c1_17 = arith.constant 1 : index
    %c0_18 = arith.constant 0 : index
    %12 = vector.load %arg11[%c0_16, %c1, %c1_17, %c0_18] : memref<4x10x10x128xf32, #tpu.memory_space<vmem>>, vector<4x8x8x16xf32>
    tpu.vector_store %arg11[%c0_16, %c1, %c1_17, %c0_18], %9 {strides = array<i32>} : memref<4x10x10x128xf32, #tpu.memory_space<vmem>>, vector<4x8x8x16xf32>,
    %c0_19 = arith.constant 0 : index
    %c0_20 = arith.constant 0 : index
    %c0_21 = arith.constant 0 : index
    %c0_22 = arith.constant 0 : index
    %13 = vector.load %arg11[%c0_19, %c0_20, %c0_21, %c0_22] : memref<4x10x10x128xf32, #tpu.memory_space<vmem>>, vector<4x8x8x16xf32>
    %14 = vector.shape_cast %13 : vector<4x8x8x16xf32> to vector<256x16xf32>
    %15 = arith.truncf %14 : vector<256x16xf32> to vector<256x16xbf16>
    %c0_23 = arith.constant 0 : index
    %c0_24 = arith.constant 0 : index
    %c0_25 = arith.constant 0 : index
    %16 = vector.load %arg4[%c0_23, %c0_24, %c0_25] : memref<9x16x128xbf16, #tpu.memory_space<vmem>>, vector<1x16x128xbf16>
    %17 = vector.shape_cast %16 : vector<1x16x128xbf16> to vector<16x128xbf16>
    %cst_26 = arith.constant dense<0.000000e+00> : vector<256x128xf32>
    %18 = tpu.matmul %15, %17, %cst_26 {dimension_numbers = #tpu.dot_dimension_numbers<[1], [0], [0], [1], [0, 0, 1, 1], [], []>} : vector<256x16xbf16>, vector<16x128xbf16>, vector<256x128xf32> -> vector<256x128xf32>
    %c0_27 = arith.constant 0 : index
    %c0_28 = arith.constant 0 : index
    %c1_29 = arith.constant 1 : index
    %c0_30 = arith.constant 0 : index
    %19 = vector.load %arg11[%c0_27, %c0_28, %c1_29, %c0_30] : memref<4x10x10x128xf32, #tpu.memory_space<vmem>>, vector<4x8x8x16xf32>
    %20 = vector.shape_cast %19 : vector<4x8x8x16xf32> to vector<256x16xf32>
    %21 = arith.truncf %20 : vector<256x16xf32> to vector<256x16xbf16>
    %c1_31 = arith.constant 1 : index
    %c0_32 = arith.constant 0 : index
    %c0_33 = arith.constant 0 : index
    %22 = vector.load %arg4[%c1_31, %c0_32, %c0_33] : memref<9x16x128xbf16, #tpu.memory_space<vmem>>, vector<1x16x128xbf16>
    %23 = vector.shape_cast %22 : vector<1x16x128xbf16> to vector<16x128xbf16>
    %cst_34 = arith.constant dense<0.000000e+00> : vector<256x128xf32>
    %24 = tpu.matmul %21, %23, %cst_34 {dimension_numbers = #tpu.dot_dimension_numbers<[1], [0], [0], [1], [0, 0, 1, 1], [], []>} : vector<256x16xbf16>, vector<16x128xbf16>, vector<256x128xf32> -> vector<256x128xf32>
    %25 = arith.addf %18, %24 : vector<256x128xf32>
    %c0_35 = arith.constant 0 : index
    %c0_36 = arith.constant 0 : index
    %c2 = arith.constant 2 : index
    %c0_37 = arith.constant 0 : index
    %26 = vector.load %arg11[%c0_35, %c0_36, %c2, %c0_37] : memref<4x10x10x128xf32, #tpu.memory_space<vmem>>, vector<4x8x8x16xf32>
    %27 = vector.shape_cast %26 : vector<4x8x8x16xf32> to vector<256x16xf32>
    %28 = arith.truncf %27 : vector<256x16xf32> to vector<256x16xbf16>
    %c2_38 = arith.constant 2 : index
    %c0_39 = arith.constant 0 : index
    %c0_40 = arith.constant 0 : index
    %29 = vector.load %arg4[%c2_38, %c0_39, %c0_40] : memref<9x16x128xbf16, #tpu.memory_space<vmem>>, vector<1x16x128xbf16>
    %30 = vector.shape_cast %29 : vector<1x16x128xbf16> to vector<16x128xbf16>
    %cst_41 = arith.constant dense<0.000000e+00> : vector<256x128xf32>
    %31 = tpu.matmul %28, %30, %cst_41 {dimension_numbers = #tpu.dot_dimension_numbers<[1], [0], [0], [1], [0, 0, 1, 1], [], []>} : vector<256x16xbf16>, vector<16x128xbf16>, vector<256x128xf32> -> vector<256x128xf32>
    %32 = arith.addf %25, %31 : vector<256x128xf32>
    %c0_42 = arith.constant 0 : index
    %c1_43 = arith.constant 1 : index
    %c0_44 = arith.constant 0 : index
    %c0_45 = arith.constant 0 : index
    %33 = vector.load %arg11[%c0_42, %c1_43, %c0_44, %c0_45] : memref<4x10x10x128xf32, #tpu.memory_space<vmem>>, vector<4x8x8x16xf32>
    %34 = vector.shape_cast %33 : vector<4x8x8x16xf32> to vector<256x16xf32>
    %35 = arith.truncf %34 : vector<256x16xf32> to vector<256x16xbf16>
    %c3 = arith.constant 3 : index
    %c0_46 = arith.constant 0 : index
    %c0_47 = arith.constant 0 : index
    %36 = vector.load %arg4[%c3, %c0_46, %c0_47] : memref<9x16x128xbf16, #tpu.memory_space<vmem>>, vector<1x16x128xbf16>
    %37 = vector.shape_cast %36 : vector<1x16x128xbf16> to vector<16x128xbf16>
    %cst_48 = arith.constant dense<0.000000e+00> : vector<256x128xf32>
    %38 = tpu.matmul %35, %37, %cst_48 {dimension_numbers = #tpu.dot_dimension_numbers<[1], [0], [0], [1], [0, 0, 1, 1], [], []>} : vector<256x16xbf16>, vector<16x128xbf16>, vector<256x128xf32> -> vector<256x128xf32>
    %39 = arith.addf %32, %38 : vector<256x128xf32>
    %c0_49 = arith.constant 0 : index
    %c1_50 = arith.constant 1 : index
    %c1_51 = arith.constant 1 : index
    %c0_52 = arith.constant 0 : index
    %40 = vector.load %arg11[%c0_49, %c1_50, %c1_51, %c0_52] : memref<4x10x10x128xf32, #tpu.memory_space<vmem>>, vector<4x8x8x16xf32>
    %41 = vector.shape_cast %40 : vector<4x8x8x16xf32> to vector<256x16xf32>
    %42 = arith.truncf %41 : vector<256x16xf32> to vector<256x16xbf16>
    %c4 = arith.constant 4 : index
    %c0_53 = arith.constant 0 : index
    %c0_54 = arith.constant 0 : index
    %43 = vector.load %arg4[%c4, %c0_53, %c0_54] : memref<9x16x128xbf16, #tpu.memory_space<vmem>>, vector<1x16x128xbf16>
    %44 = vector.shape_cast %43 : vector<1x16x128xbf16> to vector<16x128xbf16>
    %cst_55 = arith.constant dense<0.000000e+00> : vector<256x128xf32>
    %45 = tpu.matmul %42, %44, %cst_55 {dimension_numbers = #tpu.dot_dimension_numbers<[1], [0], [0], [1], [0, 0, 1, 1], [], []>} : vector<256x16xbf16>, vector<16x128xbf16>, vector<256x128xf32> -> vector<256x128xf32>
    %46 = arith.addf %39, %45 : vector<256x128xf32>
    %c0_56 = arith.constant 0 : index
    %c1_57 = arith.constant 1 : index
    %c2_58 = arith.constant 2 : index
    %c0_59 = arith.constant 0 : index
    %47 = vector.load %arg11[%c0_56, %c1_57, %c2_58, %c0_59] : memref<4x10x10x128xf32, #tpu.memory_space<vmem>>, vector<4x8x8x16xf32>
    %48 = vector.shape_cast %47 : vector<4x8x8x16xf32> to vector<256x16xf32>
    %49 = arith.truncf %48 : vector<256x16xf32> to vector<256x16xbf16>
    %c5 = arith.constant 5 : index
    %c0_60 = arith.constant 0 : index
    %c0_61 = arith.constant 0 : index
    %50 = vector.load %arg4[%c5, %c0_60, %c0_61] : memref<9x16x128xbf16, #tpu.memory_space<vmem>>, vector<1x16x128xbf16>
    %51 = vector.shape_cast %50 : vector<1x16x128xbf16> to vector<16x128xbf16>
    %cst_62 = arith.constant dense<0.000000e+00> : vector<256x128xf32>
    %52 = tpu.matmul %49, %51, %cst_62 {dimension_numbers = #tpu.dot_dimension_numbers<[1], [0], [0], [1], [0, 0, 1, 1], [], []>} : vector<256x16xbf16>, vector<16x128xbf16>, vector<256x128xf32> -> vector<256x128xf32>
    %53 = arith.addf %46, %52 : vector<256x128xf32>
    %c0_63 = arith.constant 0 : index
    %c2_64 = arith.constant 2 : index
    %c0_65 = arith.constant 0 : index
    %c0_66 = arith.constant 0 : index
    %54 = vector.load %arg11[%c0_63, %c2_64, %c0_65, %c0_66] : memref<4x10x10x128xf32, #tpu.memory_space<vmem>>, vector<4x8x8x16xf32>
    %55 = vector.shape_cast %54 : vector<4x8x8x16xf32> to vector<256x16xf32>
    %56 = arith.truncf %55 : vector<256x16xf32> to vector<256x16xbf16>
    %c6 = arith.constant 6 : index
    %c0_67 = arith.constant 0 : index
    %c0_68 = arith.constant 0 : index
    %57 = vector.load %arg4[%c6, %c0_67, %c0_68] : memref<9x16x128xbf16, #tpu.memory_space<vmem>>, vector<1x16x128xbf16>
    %58 = vector.shape_cast %57 : vector<1x16x128xbf16> to vector<16x128xbf16>
    %cst_69 = arith.constant dense<0.000000e+00> : vector<256x128xf32>
    %59 = tpu.matmul %56, %58, %cst_69 {dimension_numbers = #tpu.dot_dimension_numbers<[1], [0], [0], [1], [0, 0, 1, 1], [], []>} : vector<256x16xbf16>, vector<16x128xbf16>, vector<256x128xf32> -> vector<256x128xf32>
    %60 = arith.addf %53, %59 : vector<256x128xf32>
    %c0_70 = arith.constant 0 : index
    %c2_71 = arith.constant 2 : index
    %c1_72 = arith.constant 1 : index
    %c0_73 = arith.constant 0 : index
    %61 = vector.load %arg11[%c0_70, %c2_71, %c1_72, %c0_73] : memref<4x10x10x128xf32, #tpu.memory_space<vmem>>, vector<4x8x8x16xf32>
    %62 = vector.shape_cast %61 : vector<4x8x8x16xf32> to vector<256x16xf32>
    %63 = arith.truncf %62 : vector<256x16xf32> to vector<256x16xbf16>
    %c7 = arith.constant 7 : index
    %c0_74 = arith.constant 0 : index
    %c0_75 = arith.constant 0 : index
    %64 = vector.load %arg4[%c7, %c0_74, %c0_75] : memref<9x16x128xbf16, #tpu.memory_space<vmem>>, vector<1x16x128xbf16>
    %65 = vector.shape_cast %64 : vector<1x16x128xbf16> to vector<16x128xbf16>
    %cst_76 = arith.constant dense<0.000000e+00> : vector<256x128xf32>
    %66 = tpu.matmul %63, %65, %cst_76 {dimension_numbers = #tpu.dot_dimension_numbers<[1], [0], [0], [1], [0, 0, 1, 1], [], []>} : vector<256x16xbf16>, vector<16x128xbf16>, vector<256x128xf32> -> vector<256x128xf32>
    %67 = arith.addf %60, %66 : vector<256x128xf32>
    %c0_77 = arith.constant 0 : index
    %c2_78 = arith.constant 2 : index
    %c2_79 = arith.constant 2 : index
    %c0_80 = arith.constant 0 : index
    %68 = vector.load %arg11[%c0_77, %c2_78, %c2_79, %c0_80] : memref<4x10x10x128xf32, #tpu.memory_space<vmem>>, vector<4x8x8x16xf32>
    %69 = vector.shape_cast %68 : vector<4x8x8x16xf32> to vector<256x16xf32>
    %70 = arith.truncf %69 : vector<256x16xf32> to vector<256x16xbf16>
    %c8 = arith.constant 8 : index
    %c0_81 = arith.constant 0 : index
    %c0_82 = arith.constant 0 : index
    %71 = vector.load %arg4[%c8, %c0_81, %c0_82] : memref<9x16x128xbf16, #tpu.memory_space<vmem>>, vector<1x16x128xbf16>
    %72 = vector.shape_cast %71 : vector<1x16x128xbf16> to vector<16x128xbf16>
    %cst_83 = arith.constant dense<0.000000e+00> : vector<256x128xf32>
    %73 = tpu.matmul %70, %72, %cst_83 {dimension_numbers = #tpu.dot_dimension_numbers<[1], [0], [0], [1], [0, 0, 1, 1], [], []>} : vector<256x16xbf16>, vector<16x128xbf16>, vector<256x128xf32> -> vector<256x128xf32>
    %74 = arith.addf %67, %73 : vector<256x128xf32>
    %75 = vector.broadcast %10 : vector<1x128xf32> to vector<256x128xf32>
    %76 = arith.mulf %74, %75 : vector<256x128xf32>
    %77 = vector.broadcast %11 : vector<1x128xf32> to vector<256x128xf32>
    %78 = arith.addf %76, %77 : vector<256x128xf32>
    %cst_84 = arith.constant 0.000000e+00 : f32
    %79 = vector.broadcast %cst_84 : f32 to vector<256x128xf32>
    %80 = arith.maximumf %78, %79 : vector<256x128xf32>
    %81 = vector.shape_cast %80 : vector<256x128xf32> to vector<4x8x8x128xf32>
    %c0_85 = arith.constant 0 : index
    %c0_86 = arith.constant 0 : index
    %82 = vector.load %arg8[%c0_85, %c0_86] : memref<1x128xf32, #tpu.memory_space<vmem>>, vector<1x128xf32>
    %c0_87 = arith.constant 0 : index
    %c0_88 = arith.constant 0 : index
    %83 = vector.load %arg9[%c0_87, %c0_88] : memref<1x128xf32, #tpu.memory_space<vmem>>, vector<1x128xf32>
    %c0_89 = arith.constant 0 : index
    %c1_90 = arith.constant 1 : index
    %c1_91 = arith.constant 1 : index
    %c0_92 = arith.constant 0 : index
    %84 = vector.load %arg11[%c0_89, %c1_90, %c1_91, %c0_92] : memref<4x10x10x128xf32, #tpu.memory_space<vmem>>, vector<4x8x8x128xf32>
    tpu.vector_store %arg11[%c0_89, %c1_90, %c1_91, %c0_92], %81 {strides = array<i32>} : memref<4x10x10x128xf32, #tpu.memory_space<vmem>>, vector<4x8x8x128xf32>,
    %c0_93 = arith.constant 0 : index
    %c0_94 = arith.constant 0 : index
    %c0_95 = arith.constant 0 : index
    %c0_96 = arith.constant 0 : index
    %85 = vector.load %arg11[%c0_93, %c0_94, %c0_95, %c0_96] : memref<4x10x10x128xf32, #tpu.memory_space<vmem>>, vector<4x8x8x128xf32>
    %86 = vector.shape_cast %85 : vector<4x8x8x128xf32> to vector<256x128xf32>
    %87 = arith.truncf %86 : vector<256x128xf32> to vector<256x128xbf16>
    %c0_97 = arith.constant 0 : index
    %c0_98 = arith.constant 0 : index
    %c0_99 = arith.constant 0 : index
    %88 = vector.load %arg7[%c0_97, %c0_98, %c0_99] : memref<9x128x128xbf16, #tpu.memory_space<vmem>>, vector<1x128x128xbf16>
    %89 = vector.shape_cast %88 : vector<1x128x128xbf16> to vector<128x128xbf16>
    %cst_100 = arith.constant dense<0.000000e+00> : vector<256x128xf32>
    %90 = tpu.matmul %87, %89, %cst_100 {dimension_numbers = #tpu.dot_dimension_numbers<[1], [0], [0], [1], [0, 0, 1, 1], [], []>} : vector<256x128xbf16>, vector<128x128xbf16>, vector<256x128xf32> -> vector<256x128xf32>
    %c0_101 = arith.constant 0 : index
    %c0_102 = arith.constant 0 : index
    %c1_103 = arith.constant 1 : index
    %c0_104 = arith.constant 0 : index
    %91 = vector.load %arg11[%c0_101, %c0_102, %c1_103, %c0_104] : memref<4x10x10x128xf32, #tpu.memory_space<vmem>>, vector<4x8x8x128xf32>
    %92 = vector.shape_cast %91 : vector<4x8x8x128xf32> to vector<256x128xf32>
    %93 = arith.truncf %92 : vector<256x128xf32> to vector<256x128xbf16>
    %c1_105 = arith.constant 1 : index
    %c0_106 = arith.constant 0 : index
    %c0_107 = arith.constant 0 : index
    %94 = vector.load %arg7[%c1_105, %c0_106, %c0_107] : memref<9x128x128xbf16, #tpu.memory_space<vmem>>, vector<1x128x128xbf16>
    %95 = vector.shape_cast %94 : vector<1x128x128xbf16> to vector<128x128xbf16>
    %cst_108 = arith.constant dense<0.000000e+00> : vector<256x128xf32>
    %96 = tpu.matmul %93, %95, %cst_108 {dimension_numbers = #tpu.dot_dimension_numbers<[1], [0], [0], [1], [0, 0, 1, 1], [], []>} : vector<256x128xbf16>, vector<128x128xbf16>, vector<256x128xf32> -> vector<256x128xf32>
    %97 = arith.addf %90, %96 : vector<256x128xf32>
    %c0_109 = arith.constant 0 : index
    %c0_110 = arith.constant 0 : index
    %c2_111 = arith.constant 2 : index
    %c0_112 = arith.constant 0 : index
    %98 = vector.load %arg11[%c0_109, %c0_110, %c2_111, %c0_112] : memref<4x10x10x128xf32, #tpu.memory_space<vmem>>, vector<4x8x8x128xf32>
    %99 = vector.shape_cast %98 : vector<4x8x8x128xf32> to vector<256x128xf32>
    %100 = arith.truncf %99 : vector<256x128xf32> to vector<256x128xbf16>
    %c2_113 = arith.constant 2 : index
    %c0_114 = arith.constant 0 : index
    %c0_115 = arith.constant 0 : index
    %101 = vector.load %arg7[%c2_113, %c0_114, %c0_115] : memref<9x128x128xbf16, #tpu.memory_space<vmem>>, vector<1x128x128xbf16>
    %102 = vector.shape_cast %101 : vector<1x128x128xbf16> to vector<128x128xbf16>
    %cst_116 = arith.constant dense<0.000000e+00> : vector<256x128xf32>
    %103 = tpu.matmul %100, %102, %cst_116 {dimension_numbers = #tpu.dot_dimension_numbers<[1], [0], [0], [1], [0, 0, 1, 1], [], []>} : vector<256x128xbf16>, vector<128x128xbf16>, vector<256x128xf32> -> vector<256x128xf32>
    %104 = arith.addf %97, %103 : vector<256x128xf32>
    %c0_117 = arith.constant 0 : index
    %c1_118 = arith.constant 1 : index
    %c0_119 = arith.constant 0 : index
    %c0_120 = arith.constant 0 : index
    %105 = vector.load %arg11[%c0_117, %c1_118, %c0_119, %c0_120] : memref<4x10x10x128xf32, #tpu.memory_space<vmem>>, vector<4x8x8x128xf32>
    %106 = vector.shape_cast %105 : vector<4x8x8x128xf32> to vector<256x128xf32>
    %107 = arith.truncf %106 : vector<256x128xf32> to vector<256x128xbf16>
    %c3_121 = arith.constant 3 : index
    %c0_122 = arith.constant 0 : index
    %c0_123 = arith.constant 0 : index
    %108 = vector.load %arg7[%c3_121, %c0_122, %c0_123] : memref<9x128x128xbf16, #tpu.memory_space<vmem>>, vector<1x128x128xbf16>
    %109 = vector.shape_cast %108 : vector<1x128x128xbf16> to vector<128x128xbf16>
    %cst_124 = arith.constant dense<0.000000e+00> : vector<256x128xf32>
    %110 = tpu.matmul %107, %109, %cst_124 {dimension_numbers = #tpu.dot_dimension_numbers<[1], [0], [0], [1], [0, 0, 1, 1], [], []>} : vector<256x128xbf16>, vector<128x128xbf16>, vector<256x128xf32> -> vector<256x128xf32>
    %111 = arith.addf %104, %110 : vector<256x128xf32>
    %c0_125 = arith.constant 0 : index
    %c1_126 = arith.constant 1 : index
    %c1_127 = arith.constant 1 : index
    %c0_128 = arith.constant 0 : index
    %112 = vector.load %arg11[%c0_125, %c1_126, %c1_127, %c0_128] : memref<4x10x10x128xf32, #tpu.memory_space<vmem>>, vector<4x8x8x128xf32>
    %113 = vector.shape_cast %112 : vector<4x8x8x128xf32> to vector<256x128xf32>
    %114 = arith.truncf %113 : vector<256x128xf32> to vector<256x128xbf16>
    %c4_129 = arith.constant 4 : index
    %c0_130 = arith.constant 0 : index
    %c0_131 = arith.constant 0 : index
    %115 = vector.load %arg7[%c4_129, %c0_130, %c0_131] : memref<9x128x128xbf16, #tpu.memory_space<vmem>>, vector<1x128x128xbf16>
    %116 = vector.shape_cast %115 : vector<1x128x128xbf16> to vector<128x128xbf16>
    %cst_132 = arith.constant dense<0.000000e+00> : vector<256x128xf32>
    %117 = tpu.matmul %114, %116, %cst_132 {dimension_numbers = #tpu.dot_dimension_numbers<[1], [0], [0], [1], [0, 0, 1, 1], [], []>} : vector<256x128xbf16>, vector<128x128xbf16>, vector<256x128xf32> -> vector<256x128xf32>
    %118 = arith.addf %111, %117 : vector<256x128xf32>
    %c0_133 = arith.constant 0 : index
    %c1_134 = arith.constant 1 : index
    %c2_135 = arith.constant 2 : index
    %c0_136 = arith.constant 0 : index
    %119 = vector.load %arg11[%c0_133, %c1_134, %c2_135, %c0_136] : memref<4x10x10x128xf32, #tpu.memory_space<vmem>>, vector<4x8x8x128xf32>
    %120 = vector.shape_cast %119 : vector<4x8x8x128xf32> to vector<256x128xf32>
    %121 = arith.truncf %120 : vector<256x128xf32> to vector<256x128xbf16>
    %c5_137 = arith.constant 5 : index
    %c0_138 = arith.constant 0 : index
    %c0_139 = arith.constant 0 : index
    %122 = vector.load %arg7[%c5_137, %c0_138, %c0_139] : memref<9x128x128xbf16, #tpu.memory_space<vmem>>, vector<1x128x128xbf16>
    %123 = vector.shape_cast %122 : vector<1x128x128xbf16> to vector<128x128xbf16>
    %cst_140 = arith.constant dense<0.000000e+00> : vector<256x128xf32>
    %124 = tpu.matmul %121, %123, %cst_140 {dimension_numbers = #tpu.dot_dimension_numbers<[1], [0], [0], [1], [0, 0, 1, 1], [], []>} : vector<256x128xbf16>, vector<128x128xbf16>, vector<256x128xf32> -> vector<256x128xf32>
    %125 = arith.addf %118, %124 : vector<256x128xf32>
    %c0_141 = arith.constant 0 : index
    %c2_142 = arith.constant 2 : index
    %c0_143 = arith.constant 0 : index
    %c0_144 = arith.constant 0 : index
    %126 = vector.load %arg11[%c0_141, %c2_142, %c0_143, %c0_144] : memref<4x10x10x128xf32, #tpu.memory_space<vmem>>, vector<4x8x8x128xf32>
    %127 = vector.shape_cast %126 : vector<4x8x8x128xf32> to vector<256x128xf32>
    %128 = arith.truncf %127 : vector<256x128xf32> to vector<256x128xbf16>
    %c6_145 = arith.constant 6 : index
    %c0_146 = arith.constant 0 : index
    %c0_147 = arith.constant 0 : index
    %129 = vector.load %arg7[%c6_145, %c0_146, %c0_147] : memref<9x128x128xbf16, #tpu.memory_space<vmem>>, vector<1x128x128xbf16>
    %130 = vector.shape_cast %129 : vector<1x128x128xbf16> to vector<128x128xbf16>
    %cst_148 = arith.constant dense<0.000000e+00> : vector<256x128xf32>
    %131 = tpu.matmul %128, %130, %cst_148 {dimension_numbers = #tpu.dot_dimension_numbers<[1], [0], [0], [1], [0, 0, 1, 1], [], []>} : vector<256x128xbf16>, vector<128x128xbf16>, vector<256x128xf32> -> vector<256x128xf32>
    %132 = arith.addf %125, %131 : vector<256x128xf32>
    %c0_149 = arith.constant 0 : index
    %c2_150 = arith.constant 2 : index
    %c1_151 = arith.constant 1 : index
    %c0_152 = arith.constant 0 : index
    %133 = vector.load %arg11[%c0_149, %c2_150, %c1_151, %c0_152] : memref<4x10x10x128xf32, #tpu.memory_space<vmem>>, vector<4x8x8x128xf32>
    %134 = vector.shape_cast %133 : vector<4x8x8x128xf32> to vector<256x128xf32>
    %135 = arith.truncf %134 : vector<256x128xf32> to vector<256x128xbf16>
    %c7_153 = arith.constant 7 : index
    %c0_154 = arith.constant 0 : index
    %c0_155 = arith.constant 0 : index
    %136 = vector.load %arg7[%c7_153, %c0_154, %c0_155] : memref<9x128x128xbf16, #tpu.memory_space<vmem>>, vector<1x128x128xbf16>
    %137 = vector.shape_cast %136 : vector<1x128x128xbf16> to vector<128x128xbf16>
    %cst_156 = arith.constant dense<0.000000e+00> : vector<256x128xf32>
    %138 = tpu.matmul %135, %137, %cst_156 {dimension_numbers = #tpu.dot_dimension_numbers<[1], [0], [0], [1], [0, 0, 1, 1], [], []>} : vector<256x128xbf16>, vector<128x128xbf16>, vector<256x128xf32> -> vector<256x128xf32>
    %139 = arith.addf %132, %138 : vector<256x128xf32>
    %c0_157 = arith.constant 0 : index
    %c2_158 = arith.constant 2 : index
    %c2_159 = arith.constant 2 : index
    %c0_160 = arith.constant 0 : index
    %140 = vector.load %arg11[%c0_157, %c2_158, %c2_159, %c0_160] : memref<4x10x10x128xf32, #tpu.memory_space<vmem>>, vector<4x8x8x128xf32>
    %141 = vector.shape_cast %140 : vector<4x8x8x128xf32> to vector<256x128xf32>
    %142 = arith.truncf %141 : vector<256x128xf32> to vector<256x128xbf16>
    %c8_161 = arith.constant 8 : index
    %c0_162 = arith.constant 0 : index
    %c0_163 = arith.constant 0 : index
    %143 = vector.load %arg7[%c8_161, %c0_162, %c0_163] : memref<9x128x128xbf16, #tpu.memory_space<vmem>>, vector<1x128x128xbf16>
    %144 = vector.shape_cast %143 : vector<1x128x128xbf16> to vector<128x128xbf16>
    %cst_164 = arith.constant dense<0.000000e+00> : vector<256x128xf32>
    %145 = tpu.matmul %142, %144, %cst_164 {dimension_numbers = #tpu.dot_dimension_numbers<[1], [0], [0], [1], [0, 0, 1, 1], [], []>} : vector<256x128xbf16>, vector<128x128xbf16>, vector<256x128xf32> -> vector<256x128xf32>
    %146 = arith.addf %139, %145 : vector<256x128xf32>
    %147 = vector.broadcast %82 : vector<1x128xf32> to vector<256x128xf32>
    %148 = arith.mulf %146, %147 : vector<256x128xf32>
    %149 = vector.broadcast %83 : vector<1x128xf32> to vector<256x128xf32>
    %150 = arith.addf %148, %149 : vector<256x128xf32>
    %cst_165 = arith.constant 0.000000e+00 : f32
    %151 = vector.broadcast %cst_165 : f32 to vector<256x128xf32>
    %152 = arith.maximumf %150, %151 : vector<256x128xf32>
    %153 = arith.addf %152, %8 : vector<256x128xf32>
    %154 = arith.truncf %153 : vector<256x128xf32> to vector<256x128xbf16>
    %155 = vector.shape_cast %154 : vector<256x128xbf16> to vector<4x8x8x128xbf16>
    %c0_166 = arith.constant 0 : index
    %c0_167 = arith.constant 0 : index
    %c0_168 = arith.constant 0 : index
    %c0_169 = arith.constant 0 : index
    %156 = vector.load %arg10[%c0_166, %c0_167, %c0_168, %c0_169] : memref<4x8x8x128xbf16, #tpu.memory_space<vmem>>, vector<4x8x8x128xbf16>
    tpu.vector_store %arg10[%c0_166, %c0_167, %c0_168, %c0_169], %155 {strides = array<i32>} : memref<4x8x8x128xbf16, #tpu.memory_space<vmem>>, vector<4x8x8x128xbf16>,
    return
  }
  func.func @transform_0(%arg0: i32) -> (i32, i32, i32, i32) {
    %c0_i32 = arith.constant 0 : i32
    %c0_i32_0 = arith.constant 0 : i32
    %c0_i32_1 = arith.constant 0 : i32
    %c0_i32_2 = arith.constant 0 : i32
    return %arg0, %c0_i32, %c0_i32_0, %c0_i32_1 : i32, i32, i32, i32
  }
  func.func @transform_1(%arg0: i32) -> (i32, i32) {
    %c0_i32 = arith.constant 0 : i32
    %c0_i32_0 = arith.constant 0 : i32
    %c0_i32_1 = arith.constant 0 : i32
    return %c0_i32, %c0_i32_0 : i32, i32
  }
  func.func @transform_2(%arg0: i32) -> (i32, i32) {
    %c0_i32 = arith.constant 0 : i32
    %c0_i32_0 = arith.constant 0 : i32
    %c0_i32_1 = arith.constant 0 : i32
    return %c0_i32, %c0_i32_0 : i32, i32
  }
  func.func @transform_3(%arg0: i32) -> (i32, i32, i32) {
    %c0_i32 = arith.constant 0 : i32
    %c0_i32_0 = arith.constant 0 : i32
    %c0_i32_1 = arith.constant 0 : i32
    %c0_i32_2 = arith.constant 0 : i32
    return %c0_i32, %c0_i32_0, %c0_i32_1 : i32, i32, i32
  }
  func.func @transform_4(%arg0: i32) -> (i32, i32) {
    %c0_i32 = arith.constant 0 : i32
    %c0_i32_0 = arith.constant 0 : i32
    %c0_i32_1 = arith.constant 0 : i32
    return %c0_i32, %c0_i32_0 : i32, i32
  }
  func.func @transform_5(%arg0: i32) -> (i32, i32) {
    %c0_i32 = arith.constant 0 : i32
    %c0_i32_0 = arith.constant 0 : i32
    %c0_i32_1 = arith.constant 0 : i32
    return %c0_i32, %c0_i32_0 : i32, i32
  }
  func.func @transform_6(%arg0: i32) -> (i32, i32, i32) {
    %c0_i32 = arith.constant 0 : i32
    %c0_i32_0 = arith.constant 0 : i32
    %c0_i32_1 = arith.constant 0 : i32
    %c0_i32_2 = arith.constant 0 : i32
    return %c0_i32, %c0_i32_0, %c0_i32_1 : i32, i32, i32
  }
  func.func @transform_7(%arg0: i32) -> (i32, i32) {
    %c0_i32 = arith.constant 0 : i32
    %c0_i32_0 = arith.constant 0 : i32
    %c0_i32_1 = arith.constant 0 : i32
    return %c0_i32, %c0_i32_0 : i32, i32
  }
  func.func @transform_8(%arg0: i32) -> (i32, i32) {
    %c0_i32 = arith.constant 0 : i32
    %c0_i32_0 = arith.constant 0 : i32
    %c0_i32_1 = arith.constant 0 : i32
    return %c0_i32, %c0_i32_0 : i32, i32
  }
  func.func @transform_9(%arg0: i32) -> (i32, i32, i32, i32) {
    %c0_i32 = arith.constant 0 : i32
    %c0_i32_0 = arith.constant 0 : i32
    %c0_i32_1 = arith.constant 0 : i32
    %c0_i32_2 = arith.constant 0 : i32
    return %arg0, %c0_i32, %c0_i32_0, %c0_i32_1 : i32, i32, i32, i32
  }
}

module attributes {stable_mosaic.version = 11 : i64} {
  func.func @kernel(%arg0: i32, %arg1: memref<4x8x8x128xbf16, #tpu.memory_space<vmem>>, %arg2: memref<128x128xbf16, #tpu.memory_space<vmem>>, %arg3: memref<1x128xf32, #tpu.memory_space<vmem>>, %arg4: memref<9x128x128xbf16, #tpu.memory_space<vmem>>, %arg5: memref<1x128xf32, #tpu.memory_space<vmem>>, %arg6: memref<1x128xf32, #tpu.memory_space<vmem>>, %arg7: memref<9x128x128xbf16, #tpu.memory_space<vmem>>, %arg8: memref<1x128xf32, #tpu.memory_space<vmem>>, %arg9: memref<1x128xf32, #tpu.memory_space<vmem>>, %arg10: memref<4x1x128xf32, #tpu.memory_space<vmem>>, %arg11: memref<4x10x10x128xf32, #tpu.memory_space<vmem>>) attributes {dimension_semantics = [#tpu.dimension_semantics<parallel>], iteration_bounds = array<i64: 2>, scalar_prefetch = 0 : i64, scratch_operands = 1 : i64, tpu.core_type = #tpu.core_type<tc>, window_params = [{transform_indices = @transform_0, window_bounds = array<i64: 4, 8, 8, 128>}, {pipeline_mode = #tpu.pipeline_mode<synchronous>, transform_indices = @transform_1, window_bounds = array<i64: 128, 128>}, {pipeline_mode = #tpu.pipeline_mode<synchronous>, transform_indices = @transform_2, window_bounds = array<i64: 1, 128>}, {pipeline_mode = #tpu.pipeline_mode<synchronous>, transform_indices = @transform_3, window_bounds = array<i64: 9, 128, 128>}, {pipeline_mode = #tpu.pipeline_mode<synchronous>, transform_indices = @transform_4, window_bounds = array<i64: 1, 128>}, {pipeline_mode = #tpu.pipeline_mode<synchronous>, transform_indices = @transform_5, window_bounds = array<i64: 1, 128>}, {pipeline_mode = #tpu.pipeline_mode<synchronous>, transform_indices = @transform_6, window_bounds = array<i64: 9, 128, 128>}, {pipeline_mode = #tpu.pipeline_mode<synchronous>, transform_indices = @transform_7, window_bounds = array<i64: 1, 128>}, {pipeline_mode = #tpu.pipeline_mode<synchronous>, transform_indices = @transform_8, window_bounds = array<i64: 1, 128>}, {transform_indices = @transform_9, window_bounds = array<i64: 4, 1, 128>}]} {
    %cst = arith.constant 0.000000e+00 : f32
    %0 = vector.broadcast %cst : f32 to vector<4x10x10x128xf32>
    %c0 = arith.constant 0 : index
    %c0_0 = arith.constant 0 : index
    %c0_1 = arith.constant 0 : index
    %c0_2 = arith.constant 0 : index
    %1 = vector.load %arg11[%c0, %c0_0, %c0_1, %c0_2] : memref<4x10x10x128xf32, #tpu.memory_space<vmem>>, vector<4x10x10x128xf32>
    tpu.vector_store %arg11[%c0, %c0_0, %c0_1, %c0_2], %0 {strides = array<i32>} : memref<4x10x10x128xf32, #tpu.memory_space<vmem>>, vector<4x10x10x128xf32>,
    %c0_3 = arith.constant 0 : index
    %c0_4 = arith.constant 0 : index
    %c0_5 = arith.constant 0 : index
    %c0_6 = arith.constant 0 : index
    %2 = vector.load %arg1[%c0_3, %c0_4, %c0_5, %c0_6] : memref<4x8x8x128xbf16, #tpu.memory_space<vmem>>, vector<4x8x8x128xbf16>
    %3 = vector.shape_cast %2 : vector<4x8x8x128xbf16> to vector<256x128xbf16>
    %c0_7 = arith.constant 0 : index
    %c0_8 = arith.constant 0 : index
    %4 = vector.load %arg2[%c0_7, %c0_8] : memref<128x128xbf16, #tpu.memory_space<vmem>>, vector<128x128xbf16>
    %cst_9 = arith.constant dense<0.000000e+00> : vector<256x128xf32>
    %5 = tpu.matmul %3, %4, %cst_9 {dimension_numbers = #tpu.dot_dimension_numbers<[1], [0], [0], [1], [0, 0, 1, 1], [], []>} : vector<256x128xbf16>, vector<128x128xbf16>, vector<256x128xf32> -> vector<256x128xf32>
    %c0_10 = arith.constant 0 : index
    %c0_11 = arith.constant 0 : index
    %6 = vector.load %arg3[%c0_10, %c0_11] : memref<1x128xf32, #tpu.memory_space<vmem>>, vector<1x128xf32>
    %7 = vector.broadcast %6 : vector<1x128xf32> to vector<256x128xf32>
    %8 = arith.addf %5, %7 : vector<256x128xf32>
    %9 = arith.extf %2 : vector<4x8x8x128xbf16> to vector<4x8x8x128xf32>
    %c0_12 = arith.constant 0 : index
    %c0_13 = arith.constant 0 : index
    %10 = vector.load %arg5[%c0_12, %c0_13] : memref<1x128xf32, #tpu.memory_space<vmem>>, vector<1x128xf32>
    %c0_14 = arith.constant 0 : index
    %c0_15 = arith.constant 0 : index
    %11 = vector.load %arg6[%c0_14, %c0_15] : memref<1x128xf32, #tpu.memory_space<vmem>>, vector<1x128xf32>
    %c0_16 = arith.constant 0 : index
    %c1 = arith.constant 1 : index
    %c1_17 = arith.constant 1 : index
    %c0_18 = arith.constant 0 : index
    %12 = vector.load %arg11[%c0_16, %c1, %c1_17, %c0_18] : memref<4x10x10x128xf32, #tpu.memory_space<vmem>>, vector<4x8x8x128xf32>
    tpu.vector_store %arg11[%c0_16, %c1, %c1_17, %c0_18], %9 {strides = array<i32>} : memref<4x10x10x128xf32, #tpu.memory_space<vmem>>, vector<4x8x8x128xf32>,
    %c0_19 = arith.constant 0 : index
    %c0_20 = arith.constant 0 : index
    %c0_21 = arith.constant 0 : index
    %c0_22 = arith.constant 0 : index
    %13 = vector.load %arg11[%c0_19, %c0_20, %c0_21, %c0_22] : memref<4x10x10x128xf32, #tpu.memory_space<vmem>>, vector<4x8x8x128xf32>
    %14 = vector.shape_cast %13 : vector<4x8x8x128xf32> to vector<256x128xf32>
    %15 = arith.truncf %14 : vector<256x128xf32> to vector<256x128xbf16>
    %c0_23 = arith.constant 0 : index
    %c0_24 = arith.constant 0 : index
    %c0_25 = arith.constant 0 : index
    %16 = vector.load %arg4[%c0_23, %c0_24, %c0_25] : memref<9x128x128xbf16, #tpu.memory_space<vmem>>, vector<1x128x128xbf16>
    %17 = vector.shape_cast %16 : vector<1x128x128xbf16> to vector<128x128xbf16>
    %cst_26 = arith.constant dense<0.000000e+00> : vector<256x128xf32>
    %18 = tpu.matmul %15, %17, %cst_26 {dimension_numbers = #tpu.dot_dimension_numbers<[1], [0], [0], [1], [0, 0, 1, 1], [], []>} : vector<256x128xbf16>, vector<128x128xbf16>, vector<256x128xf32> -> vector<256x128xf32>
    %c0_27 = arith.constant 0 : index
    %c0_28 = arith.constant 0 : index
    %c1_29 = arith.constant 1 : index
    %c0_30 = arith.constant 0 : index
    %19 = vector.load %arg11[%c0_27, %c0_28, %c1_29, %c0_30] : memref<4x10x10x128xf32, #tpu.memory_space<vmem>>, vector<4x8x8x128xf32>
    %20 = vector.shape_cast %19 : vector<4x8x8x128xf32> to vector<256x128xf32>
    %21 = arith.truncf %20 : vector<256x128xf32> to vector<256x128xbf16>
    %c1_31 = arith.constant 1 : index
    %c0_32 = arith.constant 0 : index
    %c0_33 = arith.constant 0 : index
    %22 = vector.load %arg4[%c1_31, %c0_32, %c0_33] : memref<9x128x128xbf16, #tpu.memory_space<vmem>>, vector<1x128x128xbf16>
    %23 = vector.shape_cast %22 : vector<1x128x128xbf16> to vector<128x128xbf16>
    %cst_34 = arith.constant dense<0.000000e+00> : vector<256x128xf32>
    %24 = tpu.matmul %21, %23, %cst_34 {dimension_numbers = #tpu.dot_dimension_numbers<[1], [0], [0], [1], [0, 0, 1, 1], [], []>} : vector<256x128xbf16>, vector<128x128xbf16>, vector<256x128xf32> -> vector<256x128xf32>
    %25 = arith.addf %18, %24 : vector<256x128xf32>
    %c0_35 = arith.constant 0 : index
    %c0_36 = arith.constant 0 : index
    %c2 = arith.constant 2 : index
    %c0_37 = arith.constant 0 : index
    %26 = vector.load %arg11[%c0_35, %c0_36, %c2, %c0_37] : memref<4x10x10x128xf32, #tpu.memory_space<vmem>>, vector<4x8x8x128xf32>
    %27 = vector.shape_cast %26 : vector<4x8x8x128xf32> to vector<256x128xf32>
    %28 = arith.truncf %27 : vector<256x128xf32> to vector<256x128xbf16>
    %c2_38 = arith.constant 2 : index
    %c0_39 = arith.constant 0 : index
    %c0_40 = arith.constant 0 : index
    %29 = vector.load %arg4[%c2_38, %c0_39, %c0_40] : memref<9x128x128xbf16, #tpu.memory_space<vmem>>, vector<1x128x128xbf16>
    %30 = vector.shape_cast %29 : vector<1x128x128xbf16> to vector<128x128xbf16>
    %cst_41 = arith.constant dense<0.000000e+00> : vector<256x128xf32>
    %31 = tpu.matmul %28, %30, %cst_41 {dimension_numbers = #tpu.dot_dimension_numbers<[1], [0], [0], [1], [0, 0, 1, 1], [], []>} : vector<256x128xbf16>, vector<128x128xbf16>, vector<256x128xf32> -> vector<256x128xf32>
    %32 = arith.addf %25, %31 : vector<256x128xf32>
    %c0_42 = arith.constant 0 : index
    %c1_43 = arith.constant 1 : index
    %c0_44 = arith.constant 0 : index
    %c0_45 = arith.constant 0 : index
    %33 = vector.load %arg11[%c0_42, %c1_43, %c0_44, %c0_45] : memref<4x10x10x128xf32, #tpu.memory_space<vmem>>, vector<4x8x8x128xf32>
    %34 = vector.shape_cast %33 : vector<4x8x8x128xf32> to vector<256x128xf32>
    %35 = arith.truncf %34 : vector<256x128xf32> to vector<256x128xbf16>
    %c3 = arith.constant 3 : index
    %c0_46 = arith.constant 0 : index
    %c0_47 = arith.constant 0 : index
    %36 = vector.load %arg4[%c3, %c0_46, %c0_47] : memref<9x128x128xbf16, #tpu.memory_space<vmem>>, vector<1x128x128xbf16>
    %37 = vector.shape_cast %36 : vector<1x128x128xbf16> to vector<128x128xbf16>
    %cst_48 = arith.constant dense<0.000000e+00> : vector<256x128xf32>
    %38 = tpu.matmul %35, %37, %cst_48 {dimension_numbers = #tpu.dot_dimension_numbers<[1], [0], [0], [1], [0, 0, 1, 1], [], []>} : vector<256x128xbf16>, vector<128x128xbf16>, vector<256x128xf32> -> vector<256x128xf32>
    %39 = arith.addf %32, %38 : vector<256x128xf32>
    %c0_49 = arith.constant 0 : index
    %c1_50 = arith.constant 1 : index
    %c1_51 = arith.constant 1 : index
    %c0_52 = arith.constant 0 : index
    %40 = vector.load %arg11[%c0_49, %c1_50, %c1_51, %c0_52] : memref<4x10x10x128xf32, #tpu.memory_space<vmem>>, vector<4x8x8x128xf32>
    %41 = vector.shape_cast %40 : vector<4x8x8x128xf32> to vector<256x128xf32>
    %42 = arith.truncf %41 : vector<256x128xf32> to vector<256x128xbf16>
    %c4 = arith.constant 4 : index
    %c0_53 = arith.constant 0 : index
    %c0_54 = arith.constant 0 : index
    %43 = vector.load %arg4[%c4, %c0_53, %c0_54] : memref<9x128x128xbf16, #tpu.memory_space<vmem>>, vector<1x128x128xbf16>
    %44 = vector.shape_cast %43 : vector<1x128x128xbf16> to vector<128x128xbf16>
    %cst_55 = arith.constant dense<0.000000e+00> : vector<256x128xf32>
    %45 = tpu.matmul %42, %44, %cst_55 {dimension_numbers = #tpu.dot_dimension_numbers<[1], [0], [0], [1], [0, 0, 1, 1], [], []>} : vector<256x128xbf16>, vector<128x128xbf16>, vector<256x128xf32> -> vector<256x128xf32>
    %46 = arith.addf %39, %45 : vector<256x128xf32>
    %c0_56 = arith.constant 0 : index
    %c1_57 = arith.constant 1 : index
    %c2_58 = arith.constant 2 : index
    %c0_59 = arith.constant 0 : index
    %47 = vector.load %arg11[%c0_56, %c1_57, %c2_58, %c0_59] : memref<4x10x10x128xf32, #tpu.memory_space<vmem>>, vector<4x8x8x128xf32>
    %48 = vector.shape_cast %47 : vector<4x8x8x128xf32> to vector<256x128xf32>
    %49 = arith.truncf %48 : vector<256x128xf32> to vector<256x128xbf16>
    %c5 = arith.constant 5 : index
    %c0_60 = arith.constant 0 : index
    %c0_61 = arith.constant 0 : index
    %50 = vector.load %arg4[%c5, %c0_60, %c0_61] : memref<9x128x128xbf16, #tpu.memory_space<vmem>>, vector<1x128x128xbf16>
    %51 = vector.shape_cast %50 : vector<1x128x128xbf16> to vector<128x128xbf16>
    %cst_62 = arith.constant dense<0.000000e+00> : vector<256x128xf32>
    %52 = tpu.matmul %49, %51, %cst_62 {dimension_numbers = #tpu.dot_dimension_numbers<[1], [0], [0], [1], [0, 0, 1, 1], [], []>} : vector<256x128xbf16>, vector<128x128xbf16>, vector<256x128xf32> -> vector<256x128xf32>
    %53 = arith.addf %46, %52 : vector<256x128xf32>
    %c0_63 = arith.constant 0 : index
    %c2_64 = arith.constant 2 : index
    %c0_65 = arith.constant 0 : index
    %c0_66 = arith.constant 0 : index
    %54 = vector.load %arg11[%c0_63, %c2_64, %c0_65, %c0_66] : memref<4x10x10x128xf32, #tpu.memory_space<vmem>>, vector<4x8x8x128xf32>
    %55 = vector.shape_cast %54 : vector<4x8x8x128xf32> to vector<256x128xf32>
    %56 = arith.truncf %55 : vector<256x128xf32> to vector<256x128xbf16>
    %c6 = arith.constant 6 : index
    %c0_67 = arith.constant 0 : index
    %c0_68 = arith.constant 0 : index
    %57 = vector.load %arg4[%c6, %c0_67, %c0_68] : memref<9x128x128xbf16, #tpu.memory_space<vmem>>, vector<1x128x128xbf16>
    %58 = vector.shape_cast %57 : vector<1x128x128xbf16> to vector<128x128xbf16>
    %cst_69 = arith.constant dense<0.000000e+00> : vector<256x128xf32>
    %59 = tpu.matmul %56, %58, %cst_69 {dimension_numbers = #tpu.dot_dimension_numbers<[1], [0], [0], [1], [0, 0, 1, 1], [], []>} : vector<256x128xbf16>, vector<128x128xbf16>, vector<256x128xf32> -> vector<256x128xf32>
    %60 = arith.addf %53, %59 : vector<256x128xf32>
    %c0_70 = arith.constant 0 : index
    %c2_71 = arith.constant 2 : index
    %c1_72 = arith.constant 1 : index
    %c0_73 = arith.constant 0 : index
    %61 = vector.load %arg11[%c0_70, %c2_71, %c1_72, %c0_73] : memref<4x10x10x128xf32, #tpu.memory_space<vmem>>, vector<4x8x8x128xf32>
    %62 = vector.shape_cast %61 : vector<4x8x8x128xf32> to vector<256x128xf32>
    %63 = arith.truncf %62 : vector<256x128xf32> to vector<256x128xbf16>
    %c7 = arith.constant 7 : index
    %c0_74 = arith.constant 0 : index
    %c0_75 = arith.constant 0 : index
    %64 = vector.load %arg4[%c7, %c0_74, %c0_75] : memref<9x128x128xbf16, #tpu.memory_space<vmem>>, vector<1x128x128xbf16>
    %65 = vector.shape_cast %64 : vector<1x128x128xbf16> to vector<128x128xbf16>
    %cst_76 = arith.constant dense<0.000000e+00> : vector<256x128xf32>
    %66 = tpu.matmul %63, %65, %cst_76 {dimension_numbers = #tpu.dot_dimension_numbers<[1], [0], [0], [1], [0, 0, 1, 1], [], []>} : vector<256x128xbf16>, vector<128x128xbf16>, vector<256x128xf32> -> vector<256x128xf32>
    %67 = arith.addf %60, %66 : vector<256x128xf32>
    %c0_77 = arith.constant 0 : index
    %c2_78 = arith.constant 2 : index
    %c2_79 = arith.constant 2 : index
    %c0_80 = arith.constant 0 : index
    %68 = vector.load %arg11[%c0_77, %c2_78, %c2_79, %c0_80] : memref<4x10x10x128xf32, #tpu.memory_space<vmem>>, vector<4x8x8x128xf32>
    %69 = vector.shape_cast %68 : vector<4x8x8x128xf32> to vector<256x128xf32>
    %70 = arith.truncf %69 : vector<256x128xf32> to vector<256x128xbf16>
    %c8 = arith.constant 8 : index
    %c0_81 = arith.constant 0 : index
    %c0_82 = arith.constant 0 : index
    %71 = vector.load %arg4[%c8, %c0_81, %c0_82] : memref<9x128x128xbf16, #tpu.memory_space<vmem>>, vector<1x128x128xbf16>
    %72 = vector.shape_cast %71 : vector<1x128x128xbf16> to vector<128x128xbf16>
    %cst_83 = arith.constant dense<0.000000e+00> : vector<256x128xf32>
    %73 = tpu.matmul %70, %72, %cst_83 {dimension_numbers = #tpu.dot_dimension_numbers<[1], [0], [0], [1], [0, 0, 1, 1], [], []>} : vector<256x128xbf16>, vector<128x128xbf16>, vector<256x128xf32> -> vector<256x128xf32>
    %74 = arith.addf %67, %73 : vector<256x128xf32>
    %75 = vector.broadcast %10 : vector<1x128xf32> to vector<256x128xf32>
    %76 = arith.mulf %74, %75 : vector<256x128xf32>
    %77 = vector.broadcast %11 : vector<1x128xf32> to vector<256x128xf32>
    %78 = arith.addf %76, %77 : vector<256x128xf32>
    %cst_84 = arith.constant 0.000000e+00 : f32
    %79 = vector.broadcast %cst_84 : f32 to vector<256x128xf32>
    %80 = arith.maximumf %78, %79 : vector<256x128xf32>
    %81 = vector.shape_cast %80 : vector<256x128xf32> to vector<4x8x8x128xf32>
    %c0_85 = arith.constant 0 : index
    %c0_86 = arith.constant 0 : index
    %82 = vector.load %arg8[%c0_85, %c0_86] : memref<1x128xf32, #tpu.memory_space<vmem>>, vector<1x128xf32>
    %c0_87 = arith.constant 0 : index
    %c0_88 = arith.constant 0 : index
    %83 = vector.load %arg9[%c0_87, %c0_88] : memref<1x128xf32, #tpu.memory_space<vmem>>, vector<1x128xf32>
    %c0_89 = arith.constant 0 : index
    %c1_90 = arith.constant 1 : index
    %c1_91 = arith.constant 1 : index
    %c0_92 = arith.constant 0 : index
    %84 = vector.load %arg11[%c0_89, %c1_90, %c1_91, %c0_92] : memref<4x10x10x128xf32, #tpu.memory_space<vmem>>, vector<4x8x8x128xf32>
    tpu.vector_store %arg11[%c0_89, %c1_90, %c1_91, %c0_92], %81 {strides = array<i32>} : memref<4x10x10x128xf32, #tpu.memory_space<vmem>>, vector<4x8x8x128xf32>,
    %c0_93 = arith.constant 0 : index
    %c0_94 = arith.constant 0 : index
    %c0_95 = arith.constant 0 : index
    %c0_96 = arith.constant 0 : index
    %85 = vector.load %arg11[%c0_93, %c0_94, %c0_95, %c0_96] : memref<4x10x10x128xf32, #tpu.memory_space<vmem>>, vector<4x8x8x128xf32>
    %86 = vector.shape_cast %85 : vector<4x8x8x128xf32> to vector<256x128xf32>
    %87 = arith.truncf %86 : vector<256x128xf32> to vector<256x128xbf16>
    %c0_97 = arith.constant 0 : index
    %c0_98 = arith.constant 0 : index
    %c0_99 = arith.constant 0 : index
    %88 = vector.load %arg7[%c0_97, %c0_98, %c0_99] : memref<9x128x128xbf16, #tpu.memory_space<vmem>>, vector<1x128x128xbf16>
    %89 = vector.shape_cast %88 : vector<1x128x128xbf16> to vector<128x128xbf16>
    %cst_100 = arith.constant dense<0.000000e+00> : vector<256x128xf32>
    %90 = tpu.matmul %87, %89, %cst_100 {dimension_numbers = #tpu.dot_dimension_numbers<[1], [0], [0], [1], [0, 0, 1, 1], [], []>} : vector<256x128xbf16>, vector<128x128xbf16>, vector<256x128xf32> -> vector<256x128xf32>
    %c0_101 = arith.constant 0 : index
    %c0_102 = arith.constant 0 : index
    %c1_103 = arith.constant 1 : index
    %c0_104 = arith.constant 0 : index
    %91 = vector.load %arg11[%c0_101, %c0_102, %c1_103, %c0_104] : memref<4x10x10x128xf32, #tpu.memory_space<vmem>>, vector<4x8x8x128xf32>
    %92 = vector.shape_cast %91 : vector<4x8x8x128xf32> to vector<256x128xf32>
    %93 = arith.truncf %92 : vector<256x128xf32> to vector<256x128xbf16>
    %c1_105 = arith.constant 1 : index
    %c0_106 = arith.constant 0 : index
    %c0_107 = arith.constant 0 : index
    %94 = vector.load %arg7[%c1_105, %c0_106, %c0_107] : memref<9x128x128xbf16, #tpu.memory_space<vmem>>, vector<1x128x128xbf16>
    %95 = vector.shape_cast %94 : vector<1x128x128xbf16> to vector<128x128xbf16>
    %cst_108 = arith.constant dense<0.000000e+00> : vector<256x128xf32>
    %96 = tpu.matmul %93, %95, %cst_108 {dimension_numbers = #tpu.dot_dimension_numbers<[1], [0], [0], [1], [0, 0, 1, 1], [], []>} : vector<256x128xbf16>, vector<128x128xbf16>, vector<256x128xf32> -> vector<256x128xf32>
    %97 = arith.addf %90, %96 : vector<256x128xf32>
    %c0_109 = arith.constant 0 : index
    %c0_110 = arith.constant 0 : index
    %c2_111 = arith.constant 2 : index
    %c0_112 = arith.constant 0 : index
    %98 = vector.load %arg11[%c0_109, %c0_110, %c2_111, %c0_112] : memref<4x10x10x128xf32, #tpu.memory_space<vmem>>, vector<4x8x8x128xf32>
    %99 = vector.shape_cast %98 : vector<4x8x8x128xf32> to vector<256x128xf32>
    %100 = arith.truncf %99 : vector<256x128xf32> to vector<256x128xbf16>
    %c2_113 = arith.constant 2 : index
    %c0_114 = arith.constant 0 : index
    %c0_115 = arith.constant 0 : index
    %101 = vector.load %arg7[%c2_113, %c0_114, %c0_115] : memref<9x128x128xbf16, #tpu.memory_space<vmem>>, vector<1x128x128xbf16>
    %102 = vector.shape_cast %101 : vector<1x128x128xbf16> to vector<128x128xbf16>
    %cst_116 = arith.constant dense<0.000000e+00> : vector<256x128xf32>
    %103 = tpu.matmul %100, %102, %cst_116 {dimension_numbers = #tpu.dot_dimension_numbers<[1], [0], [0], [1], [0, 0, 1, 1], [], []>} : vector<256x128xbf16>, vector<128x128xbf16>, vector<256x128xf32> -> vector<256x128xf32>
    %104 = arith.addf %97, %103 : vector<256x128xf32>
    %c0_117 = arith.constant 0 : index
    %c1_118 = arith.constant 1 : index
    %c0_119 = arith.constant 0 : index
    %c0_120 = arith.constant 0 : index
    %105 = vector.load %arg11[%c0_117, %c1_118, %c0_119, %c0_120] : memref<4x10x10x128xf32, #tpu.memory_space<vmem>>, vector<4x8x8x128xf32>
    %106 = vector.shape_cast %105 : vector<4x8x8x128xf32> to vector<256x128xf32>
    %107 = arith.truncf %106 : vector<256x128xf32> to vector<256x128xbf16>
    %c3_121 = arith.constant 3 : index
    %c0_122 = arith.constant 0 : index
    %c0_123 = arith.constant 0 : index
    %108 = vector.load %arg7[%c3_121, %c0_122, %c0_123] : memref<9x128x128xbf16, #tpu.memory_space<vmem>>, vector<1x128x128xbf16>
    %109 = vector.shape_cast %108 : vector<1x128x128xbf16> to vector<128x128xbf16>
    %cst_124 = arith.constant dense<0.000000e+00> : vector<256x128xf32>
    %110 = tpu.matmul %107, %109, %cst_124 {dimension_numbers = #tpu.dot_dimension_numbers<[1], [0], [0], [1], [0, 0, 1, 1], [], []>} : vector<256x128xbf16>, vector<128x128xbf16>, vector<256x128xf32> -> vector<256x128xf32>
    %111 = arith.addf %104, %110 : vector<256x128xf32>
    %c0_125 = arith.constant 0 : index
    %c1_126 = arith.constant 1 : index
    %c1_127 = arith.constant 1 : index
    %c0_128 = arith.constant 0 : index
    %112 = vector.load %arg11[%c0_125, %c1_126, %c1_127, %c0_128] : memref<4x10x10x128xf32, #tpu.memory_space<vmem>>, vector<4x8x8x128xf32>
    %113 = vector.shape_cast %112 : vector<4x8x8x128xf32> to vector<256x128xf32>
    %114 = arith.truncf %113 : vector<256x128xf32> to vector<256x128xbf16>
    %c4_129 = arith.constant 4 : index
    %c0_130 = arith.constant 0 : index
    %c0_131 = arith.constant 0 : index
    %115 = vector.load %arg7[%c4_129, %c0_130, %c0_131] : memref<9x128x128xbf16, #tpu.memory_space<vmem>>, vector<1x128x128xbf16>
    %116 = vector.shape_cast %115 : vector<1x128x128xbf16> to vector<128x128xbf16>
    %cst_132 = arith.constant dense<0.000000e+00> : vector<256x128xf32>
    %117 = tpu.matmul %114, %116, %cst_132 {dimension_numbers = #tpu.dot_dimension_numbers<[1], [0], [0], [1], [0, 0, 1, 1], [], []>} : vector<256x128xbf16>, vector<128x128xbf16>, vector<256x128xf32> -> vector<256x128xf32>
    %118 = arith.addf %111, %117 : vector<256x128xf32>
    %c0_133 = arith.constant 0 : index
    %c1_134 = arith.constant 1 : index
    %c2_135 = arith.constant 2 : index
    %c0_136 = arith.constant 0 : index
    %119 = vector.load %arg11[%c0_133, %c1_134, %c2_135, %c0_136] : memref<4x10x10x128xf32, #tpu.memory_space<vmem>>, vector<4x8x8x128xf32>
    %120 = vector.shape_cast %119 : vector<4x8x8x128xf32> to vector<256x128xf32>
    %121 = arith.truncf %120 : vector<256x128xf32> to vector<256x128xbf16>
    %c5_137 = arith.constant 5 : index
    %c0_138 = arith.constant 0 : index
    %c0_139 = arith.constant 0 : index
    %122 = vector.load %arg7[%c5_137, %c0_138, %c0_139] : memref<9x128x128xbf16, #tpu.memory_space<vmem>>, vector<1x128x128xbf16>
    %123 = vector.shape_cast %122 : vector<1x128x128xbf16> to vector<128x128xbf16>
    %cst_140 = arith.constant dense<0.000000e+00> : vector<256x128xf32>
    %124 = tpu.matmul %121, %123, %cst_140 {dimension_numbers = #tpu.dot_dimension_numbers<[1], [0], [0], [1], [0, 0, 1, 1], [], []>} : vector<256x128xbf16>, vector<128x128xbf16>, vector<256x128xf32> -> vector<256x128xf32>
    %125 = arith.addf %118, %124 : vector<256x128xf32>
    %c0_141 = arith.constant 0 : index
    %c2_142 = arith.constant 2 : index
    %c0_143 = arith.constant 0 : index
    %c0_144 = arith.constant 0 : index
    %126 = vector.load %arg11[%c0_141, %c2_142, %c0_143, %c0_144] : memref<4x10x10x128xf32, #tpu.memory_space<vmem>>, vector<4x8x8x128xf32>
    %127 = vector.shape_cast %126 : vector<4x8x8x128xf32> to vector<256x128xf32>
    %128 = arith.truncf %127 : vector<256x128xf32> to vector<256x128xbf16>
    %c6_145 = arith.constant 6 : index
    %c0_146 = arith.constant 0 : index
    %c0_147 = arith.constant 0 : index
    %129 = vector.load %arg7[%c6_145, %c0_146, %c0_147] : memref<9x128x128xbf16, #tpu.memory_space<vmem>>, vector<1x128x128xbf16>
    %130 = vector.shape_cast %129 : vector<1x128x128xbf16> to vector<128x128xbf16>
    %cst_148 = arith.constant dense<0.000000e+00> : vector<256x128xf32>
    %131 = tpu.matmul %128, %130, %cst_148 {dimension_numbers = #tpu.dot_dimension_numbers<[1], [0], [0], [1], [0, 0, 1, 1], [], []>} : vector<256x128xbf16>, vector<128x128xbf16>, vector<256x128xf32> -> vector<256x128xf32>
    %132 = arith.addf %125, %131 : vector<256x128xf32>
    %c0_149 = arith.constant 0 : index
    %c2_150 = arith.constant 2 : index
    %c1_151 = arith.constant 1 : index
    %c0_152 = arith.constant 0 : index
    %133 = vector.load %arg11[%c0_149, %c2_150, %c1_151, %c0_152] : memref<4x10x10x128xf32, #tpu.memory_space<vmem>>, vector<4x8x8x128xf32>
    %134 = vector.shape_cast %133 : vector<4x8x8x128xf32> to vector<256x128xf32>
    %135 = arith.truncf %134 : vector<256x128xf32> to vector<256x128xbf16>
    %c7_153 = arith.constant 7 : index
    %c0_154 = arith.constant 0 : index
    %c0_155 = arith.constant 0 : index
    %136 = vector.load %arg7[%c7_153, %c0_154, %c0_155] : memref<9x128x128xbf16, #tpu.memory_space<vmem>>, vector<1x128x128xbf16>
    %137 = vector.shape_cast %136 : vector<1x128x128xbf16> to vector<128x128xbf16>
    %cst_156 = arith.constant dense<0.000000e+00> : vector<256x128xf32>
    %138 = tpu.matmul %135, %137, %cst_156 {dimension_numbers = #tpu.dot_dimension_numbers<[1], [0], [0], [1], [0, 0, 1, 1], [], []>} : vector<256x128xbf16>, vector<128x128xbf16>, vector<256x128xf32> -> vector<256x128xf32>
    %139 = arith.addf %132, %138 : vector<256x128xf32>
    %c0_157 = arith.constant 0 : index
    %c2_158 = arith.constant 2 : index
    %c2_159 = arith.constant 2 : index
    %c0_160 = arith.constant 0 : index
    %140 = vector.load %arg11[%c0_157, %c2_158, %c2_159, %c0_160] : memref<4x10x10x128xf32, #tpu.memory_space<vmem>>, vector<4x8x8x128xf32>
    %141 = vector.shape_cast %140 : vector<4x8x8x128xf32> to vector<256x128xf32>
    %142 = arith.truncf %141 : vector<256x128xf32> to vector<256x128xbf16>
    %c8_161 = arith.constant 8 : index
    %c0_162 = arith.constant 0 : index
    %c0_163 = arith.constant 0 : index
    %143 = vector.load %arg7[%c8_161, %c0_162, %c0_163] : memref<9x128x128xbf16, #tpu.memory_space<vmem>>, vector<1x128x128xbf16>
    %144 = vector.shape_cast %143 : vector<1x128x128xbf16> to vector<128x128xbf16>
    %cst_164 = arith.constant dense<0.000000e+00> : vector<256x128xf32>
    %145 = tpu.matmul %142, %144, %cst_164 {dimension_numbers = #tpu.dot_dimension_numbers<[1], [0], [0], [1], [0, 0, 1, 1], [], []>} : vector<256x128xbf16>, vector<128x128xbf16>, vector<256x128xf32> -> vector<256x128xf32>
    %146 = arith.addf %139, %145 : vector<256x128xf32>
    %147 = vector.broadcast %82 : vector<1x128xf32> to vector<256x128xf32>
    %148 = arith.mulf %146, %147 : vector<256x128xf32>
    %149 = vector.broadcast %83 : vector<1x128xf32> to vector<256x128xf32>
    %150 = arith.addf %148, %149 : vector<256x128xf32>
    %cst_165 = arith.constant 0.000000e+00 : f32
    %151 = vector.broadcast %cst_165 : f32 to vector<256x128xf32>
    %152 = arith.maximumf %150, %151 : vector<256x128xf32>
    %153 = arith.addf %152, %8 : vector<256x128xf32>
    %154 = vector.shape_cast %153 : vector<256x128xf32> to vector<4x64x128xf32>
    %cst_166 = arith.constant dense<0.000000e+00> : vector<4x128xf32>
    %155 = vector.multi_reduction <add>, %154, %cst_166 [1] : vector<4x64x128xf32> to vector<4x128xf32>
    %cst_167 = arith.constant 1.562500e-02 : f32
    %156 = vector.broadcast %cst_167 : f32 to vector<4x128xf32>
    %157 = arith.mulf %155, %156 : vector<4x128xf32>
    %158 = vector.shape_cast %157 : vector<4x128xf32> to vector<4x1x128xf32>
    %c0_168 = arith.constant 0 : index
    %c0_169 = arith.constant 0 : index
    %c0_170 = arith.constant 0 : index
    %159 = vector.load %arg10[%c0_168, %c0_169, %c0_170] : memref<4x1x128xf32, #tpu.memory_space<vmem>>, vector<4x1x128xf32>
    tpu.vector_store %arg10[%c0_168, %c0_169, %c0_170], %158 {strides = array<i32>} : memref<4x1x128xf32, #tpu.memory_space<vmem>>, vector<4x1x128xf32>,
    return
  }
  func.func @transform_0(%arg0: i32) -> (i32, i32, i32, i32) {
    %c0_i32 = arith.constant 0 : i32
    %c0_i32_0 = arith.constant 0 : i32
    %c0_i32_1 = arith.constant 0 : i32
    %c0_i32_2 = arith.constant 0 : i32
    return %arg0, %c0_i32, %c0_i32_0, %c0_i32_1 : i32, i32, i32, i32
  }
  func.func @transform_1(%arg0: i32) -> (i32, i32) {
    %c0_i32 = arith.constant 0 : i32
    %c0_i32_0 = arith.constant 0 : i32
    %c0_i32_1 = arith.constant 0 : i32
    return %c0_i32, %c0_i32_0 : i32, i32
  }
  func.func @transform_2(%arg0: i32) -> (i32, i32) {
    %c0_i32 = arith.constant 0 : i32
    %c0_i32_0 = arith.constant 0 : i32
    %c0_i32_1 = arith.constant 0 : i32
    return %c0_i32, %c0_i32_0 : i32, i32
  }
  func.func @transform_3(%arg0: i32) -> (i32, i32, i32) {
    %c0_i32 = arith.constant 0 : i32
    %c0_i32_0 = arith.constant 0 : i32
    %c0_i32_1 = arith.constant 0 : i32
    %c0_i32_2 = arith.constant 0 : i32
    return %c0_i32, %c0_i32_0, %c0_i32_1 : i32, i32, i32
  }
  func.func @transform_4(%arg0: i32) -> (i32, i32) {
    %c0_i32 = arith.constant 0 : i32
    %c0_i32_0 = arith.constant 0 : i32
    %c0_i32_1 = arith.constant 0 : i32
    return %c0_i32, %c0_i32_0 : i32, i32
  }
  func.func @transform_5(%arg0: i32) -> (i32, i32) {
    %c0_i32 = arith.constant 0 : i32
    %c0_i32_0 = arith.constant 0 : i32
    %c0_i32_1 = arith.constant 0 : i32
    return %c0_i32, %c0_i32_0 : i32, i32
  }
  func.func @transform_6(%arg0: i32) -> (i32, i32, i32) {
    %c0_i32 = arith.constant 0 : i32
    %c0_i32_0 = arith.constant 0 : i32
    %c0_i32_1 = arith.constant 0 : i32
    %c0_i32_2 = arith.constant 0 : i32
    return %c0_i32, %c0_i32_0, %c0_i32_1 : i32, i32, i32
  }
  func.func @transform_7(%arg0: i32) -> (i32, i32) {
    %c0_i32 = arith.constant 0 : i32
    %c0_i32_0 = arith.constant 0 : i32
    %c0_i32_1 = arith.constant 0 : i32
    return %c0_i32, %c0_i32_0 : i32, i32
  }
  func.func @transform_8(%arg0: i32) -> (i32, i32) {
    %c0_i32 = arith.constant 0 : i32
    %c0_i32_0 = arith.constant 0 : i32
    %c0_i32_1 = arith.constant 0 : i32
    return %c0_i32, %c0_i32_0 : i32, i32
  }
  func.func @transform_9(%arg0: i32) -> (i32, i32, i32) {
    %c0_i32 = arith.constant 0 : i32
    %c0_i32_0 = arith.constant 0 : i32
    %c0_i32_1 = arith.constant 0 : i32
    return %arg0, %c0_i32, %c0_i32_0 : i32, i32, i32
  }
}

</mosaic_0001>

<bundles_post_ra>
// kernel: protonet_forward.2
= control target key start
LH: loop header
LB: loop body
LE: loop exit
PB: predicated region body
PF: predicated region fallthrough
CT: control target
= control target key end

     0   :  { %s9070_s30 = smov 0   ;;  %s10981_s0 = inlined_call_operand.vmem [shape: bf16[8,8,8,16], index: 0, kind: input, shape index: {}]   ;;  %s10982_s1 = inlined_call_operand.vmem [shape: bf16[16,128], index: 1, kind: input, shape index: {}]   ;;  %s10983_s2 = inlined_call_operand.vmem [shape: f32[1,128], index: 2, kind: input, shape index: {}]   ;;  %s10984_s3 = inlined_call_operand.vmem [shape: bf16[9,16,128], index: 3, kind: input, shape index: {}]   ;;  %s10985_s4 = inlined_call_operand.vmem [shape: f32[1,128], index: 4, kind: input, shape index: {}]   ;;  %s10986_s5 = inlined_call_operand.vmem [shape: f32[1,128], index: 5, kind: input, shape index: {}]   ;;  %s10987_s6 = inlined_call_operand.vmem [shape: bf16[9,128,128], index: 6, kind: input, shape index: {}]   ;;  %s10988_s7 = inlined_call_operand.vmem [shape: f32[1,128], index: 7, kind: input, shape index: {}]   ;;  %s10989_s8 = inlined_call_operand.vmem [shape: f32[1,128], index: 8, kind: input, shape index: {}]   ;;  %s10990_s9 = inlined_call_operand.vmem [shape: bf16[8,8,8,128], index: 9, kind: output, shape index: {}]  }
   0x1 LB: > { %s6633_s10 = sadd.s32 4294967295, %s9017_s30   ;;  %p6637_p0 = scmp.ge.s32.totalorder %s9017_s30, 1  ;;  %s9017_s30 = sphi %s9070_s30, %s19_s30  }
   0x2   : > { %p289_p1 = scmp.lt.s32.totalorder %s9017_s30, 3 }
   0x4   : > { %p290_p2 = pnand %p6637_p0, %p289_p1 }
   0x6   : > { %293 = sbr.rel (%p290_p2) target bundleno = 1602 (0x642), region = 56 }
   0xd   : > { %v9081_v0 = vld [vmem:[%s10982_s1] sm:$0xff]   ;;  %s9083_s13 = sshll.u32 %s6633_s10, 2  ;;  %v9089_v1 = vld [vmem:[%s10984_s3 + $0x8] sm:$0xff]   ;;  %v9019_v2 = vmov 0.0   ;;  %vm549_vm0 = vcmask 130048   ;;  %v9298_v58 = vld [vmem:[%s10984_s3 + $0x10] sm:$0xff]  }
   0xe   : > { %p328_p3 = scmp.lt.s32.totalorder %s9083_s13, 7  ;;  %8372 = vmatprep.subr.bf16.mxu1 %v9081_v0  ;;  %384 = vst [vmem:[#allocation2 + $0x150] sm:$0xff] %v9019_v2  ;;  %385 = vst [vmem:[#allocation2 + $0x158] sm:$0x3] %v9019_v2  ;;  %7600 = vmatprep.subr.bf16.mxu0 %v9081_v0  ;;  %v9201_v13 = vld [vmem:[%s10984_s3] sm:$0xff]  }
   0xf   : > { %386 = vst [vmem:[#allocation2 + $0x160] sm:$0xff] %v9019_v2  ;;  %387 = vst [vmem:[#allocation2 + $0x168] sm:$0x3] %v9019_v2  ;;  %8373 = vmatpush3.bf16.msra.mxu1 %v9081_v0  ;;  %7601 = vmatpush3.bf16.msra.mxu0 %v9081_v0 }
  0x10   : > { %342 = vst [vmem:[#allocation2] sm:$0xff] %v9019_v2  ;;  %343 = vst [vmem:[#allocation2 + $0x8] sm:$0x3] %v9019_v2  ;;  %s11331_s13 = smov (!%p328_p3, %s9083_s13), 7  ;;  %7634 = vmatprep.subr.bf16.mxu1 %v9089_v1 }
  0x11   : > { %344 = vst [vmem:[#allocation2 + $0x10] sm:$0xff] %v9019_v2  ;;  %345 = vst [vmem:[#allocation2 + $0x18] sm:$0x3] %v9019_v2  ;;  %s7085_s16 = sshll.u32 %s11331_s13, 5 }
  0x12   : > { %346 = vst [vmem:[#allocation2 + $0x20] sm:$0xff] %v9019_v2  ;;  %347 = vst [vmem:[#allocation2 + $0x28] sm:$0x3] %v9019_v2  ;;  %s9187_s19 = scalar_lea.vmem %s10981_s0, %s7085_s16  ;;  %s10849_s11 = scalar_lea.vmem %s10990_s9, %s7085_s16 }
  0x13   : > { %348 = vst [vmem:[#allocation2 + $0x30] sm:$0xff] %v9019_v2  ;;  %349 = vst [vmem:[#allocation2 + $0x38] sm:$0x3] %v9019_v2  ;;  %v438_v3 = vld [vmem:[%s9187_s19 + $0x40] sm:$0xff]   ;;  %v440_v4 = vld [vmem:[%s9187_s19 + $0x48] sm:$0xff]  }
  0x14   : > { %350 = vst [vmem:[#allocation2 + $0x40] sm:$0xff] %v9019_v2  ;;  %351 = vst [vmem:[#allocation2 + $0x48] sm:$0x3] %v9019_v2  ;;  %v442_v5 = vld [vmem:[%s9187_s19 + $0x50] sm:$0xff]   ;;  %v775_v6 = vunpack.c.l.bf16 %v438_v3  ;;  %v776_v7 = vunpack.c.h.bf16 %v438_v3  ;;  %v777_v8 = vunpack.c.l.bf16 %v440_v4  ;;  %v778_v9 = vunpack.c.h.bf16 %v440_v4  ;;  %v9193_v11 = vld [vmem:[%s9187_s19 + $0x58] sm:$0xff]   ;;  %7618 = vmatprep.mubr.msk.bf16.mxu1 %vm549_vm0, %v438_v3 }
  0x15   : > { %352 = vst [vmem:[#allocation2 + $0x50] sm:$0xff] %v9019_v2  ;;  %353 = vst [vmem:[#allocation2 + $0x58] sm:$0x3] %v9019_v2  ;;  %v779_v10 = vunpack.c.l.bf16 %v442_v5  ;;  %v9196_v12 = vld [vmem:[%s9187_s19 + $0x60] sm:$0xff]   ;;  %v780_v14 = vunpack.c.h.bf16 %v442_v5  ;;  %v781_v15 = vunpack.c.l.bf16 %v9193_v11  ;;  %v782_v16 = vunpack.c.h.bf16 %v9193_v11  ;;  %v9209_v17 = vld [vmem:[%s9187_s19 + $0x68] sm:$0xff]   ;;  %7619 = vmatmul.mubr.msk.bf16.vlgmr.msra.gmra.mrb[0].mxu1 %vm549_vm0, %v440_v4 }
  0x16   : > { %354 = vst [vmem:[#allocation2 + $0x60] sm:$0xff] %v9019_v2  ;;  %355 = vst [vmem:[#allocation2 + $0x68] sm:$0x3] %v9019_v2  ;;  %v9212_v18 = vld [vmem:[%s9187_s19 + $0x70] sm:$0xff]   ;;  %v9215_v19 = vld [vmem:[%s9187_s19 + $0x78] sm:$0xff]   ;;  %v783_v20 = vunpack.c.l.bf16 %v9196_v12  ;;  %v784_v21 = vunpack.c.h.bf16 %v9196_v12  ;;  %7635 = vmatpush3.bf16.msra.mxu1 %v9089_v1  ;;  %7622 = vmatprep.mubr.msk.bf16.mxu1 %vm549_vm0, %v442_v5  ;;  %v785_v25 = vunpack.c.l.bf16 %v9209_v17  ;;  %v786_v26 = vunpack.c.h.bf16 %v9209_v17 }
  0x17   : > { %356 = vst [vmem:[#allocation2 + $0x70] sm:$0xff] %v9019_v2  ;;  %357 = vst [vmem:[#allocation2 + $0x78] sm:$0x3] %v9019_v2  ;;  %v422_v22 = vld [vmem:[%s9187_s19] sm:$0xff]   ;;  %v424_v23 = vld [vmem:[%s9187_s19 + $0x8] sm:$0xff]   ;;  %v787_v27 = vunpack.c.l.bf16 %v9212_v18  ;;  %v788_v31 = vunpack.c.h.bf16 %v9212_v18  ;;  %v789_v32 = vunpack.c.l.bf16 %v9215_v19  ;;  %v790_v33 = vunpack.c.h.bf16 %v9215_v19  ;;  %7668 = vmatprep.subr.bf16.mxu1 %v9201_v13 }
  0x18   : > { %358 = vst [vmem:[#allocation2 + $0x80] sm:$0xff] %v9019_v2  ;;  %359 = vst [vmem:[#allocation2 + $0x88] sm:$0x3] %v9019_v2  ;;  %v426_v24 = vld [vmem:[%s9187_s19 + $0x10] sm:$0xff]   ;;  %v9235_v28 = vld [vmem:[%s9187_s19 + $0x18] sm:$0xff]   ;;  %v759_v36 = vunpack.c.l.bf16 %v422_v22  ;;  %v760_v37 = vunpack.c.h.bf16 %v422_v22  ;;  %v761_v38 = vunpack.c.l.bf16 %v424_v23  ;;  %v762_v39 = vunpack.c.h.bf16 %v424_v23 }
  0x19   : > { %360 = vst [vmem:[#allocation2 + $0x90] sm:$0xff] %v9019_v2  ;;  %361 = vst [vmem:[#allocation2 + $0x98] sm:$0x3] %v9019_v2  ;;  %v430_v29 = vld [vmem:[%s9187_s19 + $0x20] sm:$0xff]   ;;  %v432_v30 = vld [vmem:[%s9187_s19 + $0x28] sm:$0xff]   ;;  %v763_v40 = vunpack.c.l.bf16 %v426_v24  ;;  %v764_v41 = vunpack.c.h.bf16 %v426_v24  ;;  %v765_v42 = vunpack.c.l.bf16 %v9235_v28 }
  0x1a   : > { %362 = vst [vmem:[#allocation2 + $0xa0] sm:$0xff] %v9019_v2  ;;  %363 = vst [vmem:[#allocation2 + $0xa8] sm:$0x3] %v9019_v2  ;;  %v434_v34 = vld [vmem:[%s9187_s19 + $0x30] sm:$0xff]   ;;  %v9247_v35 = vld [vmem:[%s9187_s19 + $0x38] sm:$0xff]   ;;  %v767_v43 = vunpack.c.l.bf16 %v430_v29  ;;  %v768_v44 = vunpack.c.h.bf16 %v430_v29  ;;  %v769_v45 = vunpack.c.l.bf16 %v432_v30  ;;  %v770_v46 = vunpack.c.h.bf16 %v432_v30 }
  0x1b   : > { %364 = vst [vmem:[#allocation2 + $0xb0] sm:$0xff] %v9019_v2  ;;  %365 = vst [vmem:[#allocation2 + $0xb8] sm:$0x3] %v9019_v2  ;;  %v771_v47 = vunpack.c.l.bf16 %v434_v34  ;;  %v772_v48 = vunpack.c.h.bf16 %v434_v34  ;;  %v773_v49 = vunpack.c.l.bf16 %v9247_v35  ;;  %v876_v50 = vld [vmem:[#allocation2 + $0x1] sm:$0xff] }
  0x1c   : > { %366 = vst [vmem:[#allocation2 + $0xc0] sm:$0xff] %v9019_v2  ;;  %367 = vst [vmem:[#allocation2 + $0xc8] sm:$0x3] %v9019_v2 }
  0x1d   : > { %368 = vst [vmem:[#allocation2 + $0xd0] sm:$0xff] %v9019_v2  ;;  %369 = vst [vmem:[#allocation2 + $0xd8] sm:$0x3] %v9019_v2  ;;  %7623 = vmatmul.mubr.msk.bf16.gmra.mrb[4].mxu1 %vm549_vm0, %v9193_v11 }
  0x1e   : > { %370 = vst [vmem:[#allocation2 + $0xe0] sm:$0xff] %v9019_v2  ;;  %371 = vst [vmem:[#allocation2 + $0xe8] sm:$0x3] %v9019_v2  ;;  %7626 = vmatprep.mubr.msk.bf16.mxu1 %vm549_vm0, %v9196_v12 }
  0x1f   : > { %372 = vst [vmem:[#allocation2 + $0xf0] sm:$0xff] %v9019_v2  ;;  %373 = vst [vmem:[#allocation2 + $0xf8] sm:$0x3] %v9019_v2 }
  0x20   : > { %374 = vst [vmem:[#allocation2 + $0x100] sm:$0xff] %v9019_v2  ;;  %375 = vst [vmem:[#allocation2 + $0x108] sm:$0x3] %v9019_v2 }
  0x21   : > { %376 = vst [vmem:[#allocation2 + $0x110] sm:$0xff] %v9019_v2  ;;  %377 = vst [vmem:[#allocation2 + $0x118] sm:$0x3] %v9019_v2  ;;  %v884_v62 = vld [vmem:[#allocation2 + $0xa1] sm:$0xff] }
  0x22   : > { %378 = vst [vmem:[#allocation2 + $0x120] sm:$0xff] %v9019_v2  ;;  %379 = vst [vmem:[#allocation2 + $0x128] sm:$0x3] %v9019_v2 }
  0x23   : > { %380 = vst [vmem:[#allocation2 + $0x130] sm:$0xff] %v9019_v2  ;;  %381 = vst [vmem:[#allocation2 + $0x138] sm:$0x3] %v9019_v2 }
  0x24   : > { %382 = vst [vmem:[#allocation2 + $0x140] sm:$0xff] %v9019_v2  ;;  %383 = vst [vmem:[#allocation2 + $0x148] sm:$0x3] %v9019_v2 }
  0x25   : > { %388 = vst [vmem:[#allocation2 + $0x170] sm:$0xff] %v9019_v2  ;;  %389 = vst [vmem:[#allocation2 + $0x178] sm:$0x3] %v9019_v2  ;;  %7627 = vmatmul.mubr.msk.bf16.gmra.mrb[8].mxu1 %vm549_vm0, %v9209_v17 }
  0x26   : > { %390 = vst [vmem:[#allocation2 + $0x180] sm:$0xff] %v9019_v2  ;;  %391 = vst [vmem:[#allocation2 + $0x188] sm:$0x3] %v9019_v2  ;;  %7630 = vmatprep.mubr.msk.bf16.mxu1 %vm549_vm0, %v9212_v18 }
  0x27   : > { %392 = vst [vmem:[#allocation2 + $0x190] sm:$0xff] %v9019_v2  ;;  %393 = vst [vmem:[#allocation2 + $0x198] sm:$0x3] %v9019_v2 }
  0x28   : > { %394 = vst [vmem:[#allocation2 + $0x1a0] sm:$0xff] %v9019_v2  ;;  %395 = vst [vmem:[#allocation2 + $0x1a8] sm:$0x3] %v9019_v2 }
  0x29   : > { %396 = vst [vmem:[#allocation2 + $0x1b0] sm:$0xff] %v9019_v2  ;;  %397 = vst [vmem:[#allocation2 + $0x1b8] sm:$0x3] %v9019_v2 }
  0x2a   : > { %398 = vst [vmem:[#allocation2 + $0x1c0] sm:$0xff] %v9019_v2  ;;  %399 = vst [vmem:[#allocation2 + $0x1c8] sm:$0x3] %v9019_v2 }
  0x2b   : > { %400 = vst [vmem:[#allocation2 + $0x1d0] sm:$0xff] %v9019_v2  ;;  %401 = vst [vmem:[#allocation2 + $0x1d8] sm:$0x3] %v9019_v2 }
  0x2c   : > { %402 = vst [vmem:[#allocation2 + $0x1e0] sm:$0xff] %v9019_v2  ;;  %403 = vst [vmem:[#allocation2 + $0x1e8] sm:$0x3] %v9019_v2 }
  0x2d   : > { %404 = vst [vmem:[#allocation2 + $0x1f0] sm:$0xff] %v9019_v2  ;;  %405 = vst [vmem:[#allocation2 + $0x1f8] sm:$0x3] %v9019_v2  ;;  %7631 = vmatmul.mubr.msk.bf16.gmra.mrb[12].mxu1 %vm549_vm0, %v9215_v19 }
  0x2e   : > { %406 = vst [vmem:[#allocation2 + $0x200] sm:$0xff] %v9019_v2  ;;  %407 = vst [vmem:[#allocation2 + $0x208] sm:$0x3] %v9019_v2 }
  0x2f   : > { %408 = vst [vmem:[#allocation2 + $0x210] sm:$0xff] %v9019_v2  ;;  %409 = vst [vmem:[#allocation2 + $0x218] sm:$0x3] %v9019_v2 }
  0x30   : > { %410 = vst [vmem:[#allocation2 + $0x220] sm:$0xff] %v9019_v2  ;;  %411 = vst [vmem:[#allocation2 + $0x228] sm:$0x3] %v9019_v2 }
  0x31   : > { %412 = vst [vmem:[#allocation2 + $0x230] sm:$0xff] %v9019_v2  ;;  %413 = vst [vmem:[#allocation2 + $0x238] sm:$0x3] %v9019_v2 }
  0x32   : > { %414 = vst [vmem:[#allocation2 + $0x240] sm:$0xff] %v9019_v2  ;;  %415 = vst [vmem:[#allocation2 + $0x248] sm:$0x3] %v9019_v2 }
  0x33   : > { %416 = vst [vmem:[#allocation2 + $0x250] sm:$0xff] %v9019_v2  ;;  %417 = vst [vmem:[#allocation2 + $0x258] sm:$0x3] %v9019_v2  ;;  %v900_v22 = vld [vmem:[#allocation2 + $0x1e1] sm:$0xff] }
  0x34   : > { %418 = vst [vmem:[#allocation2 + $0x260] sm:$0xff] %v9019_v2  ;;  %419 = vst [vmem:[#allocation2 + $0x268] sm:$0x3] %v9019_v2 }
  0x35   : > { %420 = vst [vmem:[#allocation2 + $0x270] sm:$0xff] %v9019_v2  ;;  %421 = vst [vmem:[#allocation2 + $0x278] sm:$0x3] %v9019_v2 }
  0x36   : > { %810 = vst.msk [vmem:[#allocation2 + $0x151] sm:$0xff] %vm549_vm0, %v775_v6  ;;  %811 = vst.msk [vmem:[#allocation2 + $0x161] sm:$0xff] %vm549_vm0, %v776_v7 }
  0x37   : > { %812 = vst.msk [vmem:[#allocation2 + $0x171] sm:$0xff] %vm549_vm0, %v777_v8  ;;  %813 = vst.msk [vmem:[#allocation2 + $0x181] sm:$0xff] %vm549_vm0, %v778_v9  ;;  %v892_v9 = vld [vmem:[#allocation2 + $0x141] sm:$0xff] }
  0x38   : > { %814 = vst.msk [vmem:[#allocation2 + $0x191] sm:$0xff] %vm549_vm0, %v779_v10  ;;  %815 = vst.msk [vmem:[#allocation2 + $0x1a1] sm:$0xff] %vm549_vm0, %v780_v14 }
  0x39   : > { %816 = vst.msk [vmem:[#allocation2 + $0x1b1] sm:$0xff] %vm549_vm0, %v781_v15  ;;  %817 = vst.msk [vmem:[#allocation2 + $0x1c1] sm:$0xff] %vm549_vm0, %v782_v16 }
  0x3a   : > { %818 = vst.msk [vmem:[#allocation2 + $0x1f1] sm:$0xff] %vm549_vm0, %v783_v20  ;;  %819 = vst.msk [vmem:[#allocation2 + $0x201] sm:$0xff] %vm549_vm0, %v784_v21 }
  0x3b   : > { %820 = vst.msk [vmem:[#allocation2 + $0x211] sm:$0xff] %vm549_vm0, %v785_v25  ;;  %821 = vst.msk [vmem:[#allocation2 + $0x221] sm:$0xff] %vm549_vm0, %v786_v26 }
  0x3c   : > { %822 = vst.msk [vmem:[#allocation2 + $0x231] sm:$0xff] %vm549_vm0, %v787_v27  ;;  %823 = vst.msk [vmem:[#allocation2 + $0x241] sm:$0xff] %vm549_vm0, %v788_v31 }
  0x3d   : > { %824 = vst.msk [vmem:[#allocation2 + $0x251] sm:$0xff] %vm549_vm0, %v789_v32  ;;  %825 = vst.msk [vmem:[#allocation2 + $0x261] sm:$0xff] %vm549_vm0, %v790_v33  ;;  %v9330_v10 = vld [vmem:[#allocation2 + $0x151] sm:$0xff]  ;;  %v9341_v15 = vld [vmem:[#allocation2 + $0x161] sm:$0xff] }
  0x3e   : > { %794 = vst.msk [vmem:[#allocation2 + $0x11] sm:$0xff] %vm549_vm0, %v759_v36  ;;  %795 = vst.msk [vmem:[#allocation2 + $0x21] sm:$0xff] %vm549_vm0, %v760_v37  ;;  %v916_v14 = vpack.c.bf16 %v9330_v10, %v892_v9  ;;  %v9343_v16 = vld [vmem:[#allocation2 + $0x171] sm:$0xff]  ;;  %v9346_v17 = vld [vmem:[#allocation2 + $0x181] sm:$0xff] }
  0x3f   : > { %796 = vst.msk [vmem:[#allocation2 + $0x31] sm:$0xff] %vm549_vm0, %v761_v38  ;;  %797 = vst.msk [vmem:[#allocation2 + $0x41] sm:$0xff] %vm549_vm0, %v762_v39  ;;  %v9348_v18 = vld [vmem:[#allocation2 + $0x191] sm:$0xff]  ;;  %v917_v19 = vpack.c.bf16 %v9343_v16, %v9341_v15  ;;  %v9355_v21 = vld [vmem:[#allocation2 + $0x1a1] sm:$0xff] }
  0x40   : > { %798 = vst.msk [vmem:[#allocation2 + $0x51] sm:$0xff] %vm549_vm0, %v763_v40  ;;  %799 = vst.msk [vmem:[#allocation2 + $0x61] sm:$0xff] %vm549_vm0, %v764_v41  ;;  %v918_v20 = vpack.c.bf16 %v9348_v18, %v9346_v17  ;;  %v9358_v23 = vld [vmem:[#allocation2 + $0x1b1] sm:$0xff] }
  0x41   : > { %800 = vst.msk [vmem:[#allocation2 + $0x71] sm:$0xff] %vm549_vm0, %v765_v42  ;;  %802 = vst.msk [vmem:[#allocation2 + $0xb1] sm:$0xff] %vm549_vm0, %v767_v43  ;;  %v9360_v24 = vld [vmem:[#allocation2 + $0x1f1] sm:$0xff]  ;;  %v919_v25 = vpack.c.bf16 %v9358_v23, %v9355_v21  ;;  %v9366_v27 = vld [vmem:[#allocation2 + $0x201] sm:$0xff] }
  0x42   : > { %803 = vst.msk [vmem:[#allocation2 + $0xc1] sm:$0xff] %vm549_vm0, %v768_v44  ;;  %804 = vst.msk [vmem:[#allocation2 + $0xd1] sm:$0xff] %vm549_vm0, %v769_v45  ;;  %v920_v26 = vpack.c.bf16 %v9360_v24, %v900_v22  ;;  %v9368_v29 = vld [vmem:[#allocation2 + $0x211] sm:$0xff]  ;;  %v9371_v30 = vld [vmem:[#allocation2 + $0x221] sm:$0xff]  ;;  %v766_v45 = vunpack.c.h.bf16 %v9235_v28 }
  0x43   : > { %805 = vst.msk [vmem:[#allocation2 + $0xe1] sm:$0xff] %vm549_vm0, %v770_v46  ;;  %806 = vst.msk [vmem:[#allocation2 + $0xf1] sm:$0xff] %vm549_vm0, %v771_v47  ;;  %v9373_v31 = vld [vmem:[#allocation2 + $0x231] sm:$0xff]  ;;  %v921_v32 = vpack.c.bf16 %v9368_v29, %v9366_v27  ;;  %v9381_v34 = vld [vmem:[#allocation2 + $0x241] sm:$0xff] }
  0x44   : > { %807 = vst.msk [vmem:[#allocation2 + $0x101] sm:$0xff] %vm549_vm0, %v772_v48  ;;  %808 = vst.msk [vmem:[#allocation2 + $0x111] sm:$0xff] %vm549_vm0, %v773_v49  ;;  %v922_v33 = vpack.c.bf16 %v9373_v31, %v9371_v30  ;;  %v9383_v36 = vld [vmem:[#allocation2 + $0x251] sm:$0xff]  ;;  %v9478_v22 = vld [vmem:[#allocation2 + $0x180] sm:$0xff] }
  0x45   : > { %v9279_v51 = vld [vmem:[#allocation2 + $0x11] sm:$0xff]  ;;  %v9285_v53 = vld [vmem:[#allocation2 + $0x21] sm:$0xff]  ;;  %11080 = vst [vmem:[#allocation3_spill] sm:$0xff] %v9371_v30  ;;  %11081 = vst [vmem:[#allocation4_spill] sm:$0xff] %v9373_v31  ;;  %v923_v38 = vpack.c.bf16 %v9383_v36, %v9381_v34 }
  0x46   : > { %v908_v52 = vpack.c.bf16 %v9279_v51, %v876_v50  ;;  %v9287_v54 = vld [vmem:[#allocation2 + $0x31] sm:$0xff]  ;;  %v9289_v55 = vld [vmem:[#allocation2 + $0x41] sm:$0xff]  ;;  %11082 = vst [vmem:[#allocation5_spill] sm:$0xff] %v9381_v34  ;;  %11083 = vst [vmem:[#allocation6_spill] sm:$0xff] %v9383_v36 }
  0x47   : > { %v9291_v56 = vld [vmem:[#allocation2 + $0x51] sm:$0xff]  ;;  %v909_v57 = vpack.c.bf16 %v9287_v54, %v9285_v53  ;;  %v9305_v60 = vld [vmem:[#allocation2 + $0x61] sm:$0xff]  ;;  %801 = vst.msk [vmem:[#allocation2 + $0x81] sm:$0xff] %vm549_vm0, %v766_v45 }
  0x48   : > { %7636 = vmatprep.mubr.msk.bf16.mxu1 %vm549_vm0, %v908_v52  ;;  %v910_v59 = vpack.c.bf16 %v9291_v56, %v9289_v55  ;;  %v9307_v61 = vld [vmem:[#allocation2 + $0x71] sm:$0xff]  ;;  %v9393_v40 = vld [vmem:[#allocation2 + $0x20] sm:$0xff] }
  0x49   : > { %7637 = vmatmul.mubr.msk.bf16.vlgmr.msra.gmra.mrb[16].mxu1 %vm549_vm0, %v909_v57  ;;  %v9309_v63 = vld [vmem:[#allocation2 + $0xb1] sm:$0xff]  ;;  %v911_v0 = vpack.c.bf16 %v9307_v61, %v9305_v60  ;;  %v9316_v3 = vld [vmem:[#allocation2 + $0xc1] sm:$0xff] }
  0x4a   : > { %7669 = vmatpush3.bf16.msra.mxu1 %v9201_v13  ;;  %7640 = vmatprep.mubr.msk.bf16.mxu1 %vm549_vm0, %v910_v59  ;;  %v912_v1 = vpack.c.bf16 %v9309_v63, %v884_v62  ;;  %v9318_v4 = vld [vmem:[#allocation2 + $0xd1] sm:$0xff]  ;;  %v9321_v5 = vld [vmem:[#allocation2 + $0xe1] sm:$0xff] }
  0x4b   : > { %7702 = vmatprep.subr.bf16.mxu1 %v9298_v58  ;;  %v9323_v6 = vld [vmem:[#allocation2 + $0xf1] sm:$0xff]  ;;  %v913_v7 = vpack.c.bf16 %v9318_v4, %v9316_v3  ;;  %v9333_v11 = vld [vmem:[#allocation2 + $0x101] sm:$0xff] }
  0x4c   : > { %v914_v8 = vpack.c.bf16 %v9323_v6, %v9321_v5  ;;  %v9335_v12 = vld [vmem:[#allocation2 + $0x111] sm:$0xff]  ;;  %v9397_v42 = vld [vmem:[#allocation2 + $0x40] sm:$0xff] }
  0x4d   : > { %v915_v13 = vpack.c.bf16 %v9335_v12, %v9333_v11  ;;  %v9385_v37 = vld [vmem:[#allocation2 + $0x10] sm:$0xff]  ;;  %v9413_v47 = vld [vmem:[%s10984_s3 + $0x18] sm:$0xff]   ;;  %v9421_v28 = vld [vmem:[#allocation2 + $0x60] sm:$0xff] }
  0x4e   : > { %v858_v39 = vpack.c.bf16 %v9385_v37, %v9019_v2  ;;  %v9395_v41 = vld [vmem:[#allocation2 + $0x30] sm:$0xff]  ;;  %v9437_v57 = vld [vmem:[#allocation2 + $0xc0] sm:$0xff] }
  0x4f   : > { %v9399_v43 = vld [vmem:[#allocation2 + $0x50] sm:$0xff]  ;;  %v9403_v44 = vpack.c.bf16 %v9395_v41, %v9393_v40  ;;  %v9441_v59 = vld [vmem:[#allocation2 + $0xe0] sm:$0xff] }
  0x50   : > { %v9408_v46 = vpack.c.bf16 %v9399_v43, %v9397_v42  ;;  %v9423_v48 = vld [vmem:[#allocation2 + $0x70] sm:$0xff] }
  0x51   : > { %7641 = vmatmul.mubr.msk.bf16.gmra.mrb[20].mxu1 %vm549_vm0, %v911_v0  ;;  %11084 = vst [vmem:[#allocation7_spill] sm:$0xff] %v9403_v44  ;;  %v9425_v49 = vld [vmem:[#allocation2 + $0xb0] sm:$0xff]  ;;  %v9430_v50 = vpack.c.bf16 %v9423_v48, %v9421_v28 }
  0x52   : > { %7644 = vmatprep.mubr.msk.bf16.mxu1 %vm549_vm0, %v912_v1  ;;  %11085 = vst [vmem:[#allocation8_spill] sm:$0xff] %v9408_v46  ;;  %v862_v52 = vpack.c.bf16 %v9425_v49, %v9019_v2  ;;  %v9443_v62 = vld [vmem:[#allocation2 + $0xf0] sm:$0xff]  ;;  %v774_v1 = vunpack.c.h.bf16 %v9247_v35 }
  0x53   : > { %11086 = vst [vmem:[#allocation9_spill] sm:$0xff] %v9430_v50  ;;  %v9461_v9 = vld [vmem:[#allocation2 + $0x110] sm:$0xff] }
  0x54   : > { %809 = vst.msk [vmem:[#allocation2 + $0x121] sm:$0xff] %vm549_vm0, %v774_v1  ;;  %v9509_v1 = vld [vmem:[#allocation2 + $0x200] sm:$0xff]  ;;  %v9549_v36 = vld [vmem:[#allocation2 + $0x52] sm:$0xff] }
  0x55   : > { %11100 = vst [vmem:[#allocation23_spill] sm:$0xff] %v9549_v36  ;;  %v9590_v31 = vld [vmem:[#allocation2 + $0xf2] sm:$0xff] }
  0x56   : > { %11110 = vst [vmem:[#allocation33_spill] sm:$0xff] %v9590_v31 }
  0x59   : > { %7645 = vmatmul.mubr.msk.bf16.gmra.mrb[24].mxu1 %vm549_vm0, %v913_v7  ;;  %v9452_v7 = vpack.c.bf16 %v9443_v62, %v9441_v59 }
  0x5a   : > { %7648 = vmatprep.mubr.msk.bf16.mxu1 %vm549_vm0, %v914_v8  ;;  %v9459_v8 = vld [vmem:[#allocation2 + $0x100] sm:$0xff] }
  0x5b   : > { %11088 = vst [vmem:[#allocation11_spill] sm:$0xff] %v9452_v7  ;;  %v9467_v35 = vpack.c.bf16 %v9461_v9, %v9459_v8 }
  0x5d   : > { %11089 = vst [vmem:[#allocation12_spill] sm:$0xff] %v9467_v35 }
  0x61   : > { %7649 = vmatmul.mubr.msk.bf16.gmra.mrb[28].mxu1 %vm549_vm0, %v915_v13  ;;  %v9463_v13 = vld [vmem:[#allocation2 + $0x150] sm:$0xff] }
  0x62   : > { %7652 = vmatprep.mubr.msk.bf16.mxu1 %vm549_vm0, %v916_v14  ;;  %v866_v14 = vpack.c.bf16 %v9463_v13, %v9019_v2 }
  0x69   : > { %7653 = vmatmul.mubr.msk.bf16.gmra.mrb[32].mxu1 %vm549_vm0, %v917_v19  ;;  %v9474_v19 = vld [vmem:[#allocation2 + $0x160] sm:$0xff] }
  0x6a   : > { %7656 = vmatprep.mubr.msk.bf16.mxu1 %vm549_vm0, %v918_v20  ;;  %v9476_v20 = vld [vmem:[#allocation2 + $0x170] sm:$0xff] }
  0x71   : > { %7657 = vmatmul.mubr.msk.bf16.gmra.mrb[36].mxu1 %vm549_vm0, %v919_v25  ;;  %v9480_v25 = vld [vmem:[#allocation2 + $0x190] sm:$0xff] }
  0x72   : > { %7660 = vmatprep.mubr.msk.bf16.mxu1 %vm549_vm0, %v920_v26  ;;  %v9484_v26 = vpack.c.bf16 %v9476_v20, %v9474_v19 }
  0x74   : > { %11090 = vst [vmem:[#allocation13_spill] sm:$0xff] %v9484_v26 }
  0x79   : > { %7661 = vmatmul.mubr.msk.bf16.gmra.mrb[40].mxu1 %vm549_vm0, %v921_v32  ;;  %v9488_v32 = vpack.c.bf16 %v9480_v25, %v9478_v22 }
  0x7a   : > { %7664 = vmatprep.mubr.msk.bf16.mxu1 %vm549_vm0, %v922_v33  ;;  %v9494_v33 = vld [vmem:[#allocation2 + $0x1a0] sm:$0xff] }
  0x7b   : > { %11091 = vst [vmem:[#allocation14_spill] sm:$0xff] %v9488_v32 }
  0x81   : > { %7665 = vmatmul.mubr.msk.bf16.gmra.mrb[44].mxu1 %vm549_vm0, %v923_v38  ;;  %v9496_v38 = vld [vmem:[#allocation2 + $0x1b0] sm:$0xff] }
  0x82   : > { %7670 = vmatprep.mubr.msk.bf16.mxu1 %vm549_vm0, %v858_v39  ;;  %v9498_v39 = vld [vmem:[#allocation2 + $0x1f0] sm:$0xff]  ;;  %v9502_v45 = vpack.c.bf16 %v9496_v38, %v9494_v33 }
  0x84   : > { %11092 = vst [vmem:[#allocation15_spill] sm:$0xff] %v9502_v45 }
  0x89   : > { %7671 = vmatmul.mubr.msk.bf16.vlgmr.msra.gmra.mrb[16].mxu1 %vm549_vm0, %v9403_v44  ;;  %v9547_v44 = vld [vmem:[#allocation2 + $0x42] sm:$0xff] }
  0x8a   : > { %7703 = vmatpush3.bf16.msra.mxu1 %v9298_v58  ;;  %7674 = vmatprep.mubr.msk.bf16.mxu1 %vm549_vm0, %v9408_v46  ;;  %v9439_v58 = vld [vmem:[#allocation2 + $0xd0] sm:$0xff]  ;;  %11099 = vst [vmem:[#allocation22_spill] sm:$0xff] %v9547_v44 }
  0x8b   : > { %7736 = vmatprep.subr.bf16.mxu1 %v9413_v47  ;;  %v9447_v0 = vpack.c.bf16 %v9439_v58, %v9437_v57 }
  0x8d   : > { %11087 = vst [vmem:[#allocation10_spill] sm:$0xff] %v9447_v0 }
  0x91   : > { %7675 = vmatmul.mubr.msk.bf16.gmra.mrb[20].mxu1 %vm549_vm0, %v9430_v50 }
  0x92   : > { %7678 = vmatprep.mubr.msk.bf16.mxu1 %vm549_vm0, %v862_v52  ;;  %v870_v52 = vpack.c.bf16 %v9498_v39, %v9019_v2 }
  0x99   : > { %7679 = vmatmul.mubr.msk.bf16.gmra.mrb[24].mxu1 %vm549_vm0, %v9447_v0  ;;  %v9533_v0 = vld [vmem:[#allocation2 + $0x12] sm:$0xff] }
  0x9a   : > { %7682 = vmatprep.mubr.msk.bf16.mxu1 %vm549_vm0, %v9452_v7  ;;  %v1357_v7 = vld [vmem:[#allocation2 + $0x2] sm:$0xff]  ;;  %11095 = vst [vmem:[#allocation18_spill] sm:$0xff] %v9533_v0 }
  0x9b   : > { %v1389_v46 = vpack.c.bf16 %v9533_v0, %v1357_v7  ;;  %v9557_v7 = vpack.c.bf16 %v9549_v36, %v9547_v44  ;;  %v9573_v36 = vld [vmem:[#allocation2 + $0xb2] sm:$0xff]  ;;  %v9588_v0 = vld [vmem:[#allocation2 + $0xe2] sm:$0xff] }
  0x9c   : > { %11105 = vst [vmem:[#allocation28_spill] sm:$0xff] %v9573_v36  ;;  %11109 = vst [vmem:[#allocation32_spill] sm:$0xff] %v9588_v0 }
  0x9d   : > { %11102 = vst [vmem:[#allocation25_spill] sm:$0xff] %v9557_v7 }
  0xa1   : > { %7683 = vmatmul.mubr.msk.bf16.gmra.mrb[28].mxu1 %vm549_vm0, %v9467_v35 }
  0xa2   : > { %7686 = vmatprep.mubr.msk.bf16.mxu1 %vm549_vm0, %v866_v14  ;;  %v9511_v14 = vld [vmem:[#allocation2 + $0x210] sm:$0xff] }
  0xa3   : > { %v9519_v35 = vpack.c.bf16 %v9511_v14, %v9509_v1 }
  0xa5   : > { %11093 = vst [vmem:[#allocation16_spill] sm:$0xff] %v9519_v35 }
  0xa9   : > { %7687 = vmatmul.mubr.msk.bf16.gmra.mrb[32].mxu1 %vm549_vm0, %v9484_v26  ;;  %v9515_v26 = vld [vmem:[#allocation2 + $0x230] sm:$0xff] }
  0xaa   : > { %7690 = vmatprep.mubr.msk.bf16.mxu1 %vm549_vm0, %v9488_v32  ;;  %v9513_v32 = vld [vmem:[#allocation2 + $0x220] sm:$0xff] }
  0xab   : > { %v9523_v2 = vpack.c.bf16 %v9515_v26, %v9513_v32 }
  0xad   : > { %11094 = vst [vmem:[#allocation17_spill] sm:$0xff] %v9523_v2 }
  0xb1   : > { %7691 = vmatmul.mubr.msk.bf16.gmra.mrb[36].mxu1 %vm549_vm0, %v9502_v45  ;;  %v9531_v45 = vld [vmem:[#allocation2 + $0x250] sm:$0xff] }
  0xb2   : > { %7694 = vmatprep.mubr.msk.bf16.mxu1 %vm549_vm0, %v870_v52  ;;  %v9529_v52 = vld [vmem:[#allocation2 + $0x240] sm:$0xff] }
  0xb3   : > { %v9537_v50 = vpack.c.bf16 %v9531_v45, %v9529_v52 }
  0xb5   : > { %11096 = vst [vmem:[#allocation19_spill] sm:$0xff] %v9537_v50 }
  0xb9   : > { %7695 = vmatmul.mubr.msk.bf16.gmra.mrb[40].mxu1 %vm549_vm0, %v9519_v35  ;;  %v9543_v35 = vld [vmem:[#allocation2 + $0x22] sm:$0xff] }
  0xba   : > { %7698 = vmatprep.mubr.msk.bf16.mxu1 %vm549_vm0, %v9523_v2  ;;  %11097 = vst [vmem:[#allocation20_spill] sm:$0xff] %v9543_v35  ;;  %v9545_v2 = vld [vmem:[#allocation2 + $0x32] sm:$0xff] }
  0xbb   : > { %11098 = vst [vmem:[#allocation21_spill] sm:$0xff] %v9545_v2  ;;  %v9553_v34 = vpack.c.bf16 %v9545_v2, %v9543_v35  ;;  %v9571_v2 = vld [vmem:[#allocation2 + $0x72] sm:$0xff]  ;;  %v1365_v35 = vld [vmem:[#allocation2 + $0xa2] sm:$0xff] }
  0xbc   : > { %11104 = vst [vmem:[#allocation27_spill] sm:$0xff] %v9571_v2 }
  0xbd   : > { %11101 = vst [vmem:[#allocation24_spill] sm:$0xff] %v9553_v34 }
  0xc1   : > { %7699 = vmatmul.mubr.msk.bf16.gmra.mrb[44].mxu1 %vm549_vm0, %v9537_v50  ;;  %v9569_v50 = vld [vmem:[#allocation2 + $0x62] sm:$0xff] }
  0xc2   : > { %7704 = vmatprep.mubr.msk.bf16.mxu1 %vm549_vm0, %v1389_v46  ;;  %v9562_v46 = vld [vmem:[%s10984_s3 + $0x20] sm:$0xff]   ;;  %11103 = vst [vmem:[#allocation26_spill] sm:$0xff] %v9569_v50  ;;  %v9578_v44 = vpack.c.bf16 %v9571_v2, %v9569_v50  ;;  %v9608_v2 = vld [vmem:[#allocation2 + $0x152] sm:$0xff] }
  0xc3   : > { %11115 = vst [vmem:[#allocation38_spill] sm:$0xff] %v9608_v2 }
  0xc4   : > { %11106 = vst [vmem:[#allocation29_spill] sm:$0xff] %v9578_v44 }
  0xc9   : > { %7705 = vmatmul.mubr.msk.bf16.vlgmr.msra.gmra.mrb[16].mxu1 %vm549_vm0, %v9553_v34  ;;  %v1393_v34 = vpack.c.bf16 %v9573_v36, %v1365_v35  ;;  %v9598_v35 = vpack.c.bf16 %v9590_v31, %v9588_v0  ;;  %v1373_v36 = vld [vmem:[#allocation2 + $0x142] sm:$0xff] }
  0xca   : > { %7737 = vmatpush3.bf16.msra.mxu1 %v9413_v47  ;;  %7708 = vmatprep.mubr.msk.bf16.mxu1 %vm549_vm0, %v9557_v7  ;;  %v9584_v47 = vld [vmem:[#allocation2 + $0xc2] sm:$0xff]  ;;  %v9586_v7 = vld [vmem:[#allocation2 + $0xd2] sm:$0xff]  ;;  %v1397_v31 = vpack.c.bf16 %v9608_v2, %v1373_v36 }
  0xcb   : > { %7770 = vmatprep.subr.bf16.mxu1 %v9562_v46  ;;  %11107 = vst [vmem:[#allocation30_spill] sm:$0xff] %v9584_v47  ;;  %11108 = vst [vmem:[#allocation31_spill] sm:$0xff] %v9586_v7  ;;  %v9594_v30 = vpack.c.bf16 %v9586_v7, %v9584_v47  ;;  %v9622_v0 = vld [vmem:[#allocation2 + $0x182] sm:$0xff]  ;;  %v9624_v47 = vld [vmem:[#allocation2 + $0x192] sm:$0xff] }
  0xcc   : > { %11112 = vst [vmem:[#allocation35_spill] sm:$0xff] %v9598_v35  ;;  %11119 = vst [vmem:[#allocation42_spill] sm:$0xff] %v9622_v0  ;;  %v9632_v36 = vpack.c.bf16 %v9624_v47, %v9622_v0  ;;  %v1381_v2 = vld [vmem:[#allocation2 + $0x1e2] sm:$0xff] }
  0xcd   : > { %11111 = vst [vmem:[#allocation34_spill] sm:$0xff] %v9594_v30  ;;  %11120 = vst [vmem:[#allocation43_spill] sm:$0xff] %v9624_v47  ;;  %v9656_v0 = vld [vmem:[#allocation2 + $0x222] sm:$0xff] }
  0xce   : > { %11122 = vst [vmem:[#allocation45_spill] sm:$0xff] %v9632_v36  ;;  %11127 = vst [vmem:[#allocation50_spill] sm:$0xff] %v9656_v0 }
  0xd1   : > { %7709 = vmatmul.mubr.msk.bf16.gmra.mrb[20].mxu1 %vm549_vm0, %v9578_v44  ;;  %v9606_v44 = vld [vmem:[#allocation2 + $0x112] sm:$0xff] }
  0xd2   : > { %7712 = vmatprep.mubr.msk.bf16.mxu1 %vm549_vm0, %v1393_v34  ;;  %v9604_v34 = vld [vmem:[#allocation2 + $0x102] sm:$0xff]  ;;  %11114 = vst [vmem:[#allocation37_spill] sm:$0xff] %v9606_v44 }
  0xd3   : > { %11113 = vst [vmem:[#allocation36_spill] sm:$0xff] %v9604_v34  ;;  %v9612_v7 = vpack.c.bf16 %v9606_v44, %v9604_v34  ;;  %v9642_v44 = vld [vmem:[#allocation2 + $0x1f2] sm:$0xff] }
  0xd4   : > { %11124 = vst [vmem:[#allocation47_spill] sm:$0xff] %v9642_v44  ;;  %v1401_v47 = vpack.c.bf16 %v9642_v44, %v1381_v2 }
  0xd5   : > { %11116 = vst [vmem:[#allocation39_spill] sm:$0xff] %v9612_v7 }
  0xd9   : > { %7713 = vmatmul.mubr.msk.bf16.gmra.mrb[24].mxu1 %vm549_vm0, %v9594_v30  ;;  %v9618_v30 = vld [vmem:[#allocation2 + $0x162] sm:$0xff] }
  0xda   : > { %7716 = vmatprep.mubr.msk.bf16.mxu1 %vm549_vm0, %v9598_v35  ;;  %11117 = vst [vmem:[#allocation40_spill] sm:$0xff] %v9618_v30  ;;  %v9620_v35 = vld [vmem:[#allocation2 + $0x172] sm:$0xff] }
  0xdb   : > { %11118 = vst [vmem:[#allocation41_spill] sm:$0xff] %v9620_v35  ;;  %v9628_v50 = vpack.c.bf16 %v9620_v35, %v9618_v30  ;;  %v9658_v30 = vld [vmem:[#allocation2 + $0x232] sm:$0xff] }
  0xdc   : > { %11128 = vst [vmem:[#allocation51_spill] sm:$0xff] %v9658_v30  ;;  %v9666_v2 = vpack.c.bf16 %v9658_v30, %v9656_v0 }
  0xdd   : > { %11121 = vst [vmem:[#allocation44_spill] sm:$0xff] %v9628_v50 }
  0xde   : > { %11130 = vst [vmem:[#allocation53_spill] sm:$0xff] %v9666_v2 }
  0xe1   : > { %7717 = vmatmul.mubr.msk.bf16.gmra.mrb[28].mxu1 %vm549_vm0, %v9612_v7  ;;  %v9640_v7 = vld [vmem:[#allocation2 + $0x1b2] sm:$0xff] }
  0xe2   : > { %7720 = vmatprep.mubr.msk.bf16.mxu1 %vm549_vm0, %v1397_v31  ;;  %v9638_v31 = vld [vmem:[#allocation2 + $0x1a2] sm:$0xff]  ;;  %11123 = vst [vmem:[#allocation46_spill] sm:$0xff] %v9640_v7 }
  0xe3   : > { %v9646_v35 = vpack.c.bf16 %v9640_v7, %v9638_v31 }
  0xe5   : > { %11125 = vst [vmem:[#allocation48_spill] sm:$0xff] %v9646_v35 }
  0xe8   : > { %v9676_v44 = vpop.f32.mrb[0].mxu1 }
  0xe9   : > { %7721 = vmatmul.mubr.msk.bf16.gmra.mrb[32].mxu1 %vm549_vm0, %v9628_v50  ;;  %v9652_v50 = vld [vmem:[#allocation2 + $0x202] sm:$0xff]  ;;  %11132 = vst [vmem:[#allocation55_spill] sm:$0xff] %v9676_v44  ;;  %v9678_v7 = vpop.f32.mrb[1].mxu1 }
  0xea   : > { %7724 = vmatprep.mubr.msk.bf16.mxu1 %vm549_vm0, %v9632_v36  ;;  %v9654_v36 = vld [vmem:[#allocation2 + $0x212] sm:$0xff]  ;;  %11133 = vst [vmem:[#allocation56_spill] sm:$0xff] %v9678_v7  ;;  %v9684_v30 = vpop.f32.mrb[2].mxu1  ;;  %v1688_v7 = vpack.c.bf16 %v9397_v42, %v9395_v41 }
  0xeb   : > { %11126 = vst [vmem:[#allocation49_spill] sm:$0xff] %v9654_v36  ;;  %v9662_v34 = vpack.c.bf16 %v9654_v36, %v9652_v50  ;;  %11134 = vst [vmem:[#allocation57_spill] sm:$0xff] %v9684_v30  ;;  %v9688_v0 = vpop.f32.mrb[3].mxu1  ;;  %v1689_v30 = vpack.c.bf16 %v9421_v28, %v9399_v43 }
  0xec   : > { %11135 = vst [vmem:[#allocation58_spill] sm:$0xff] %v9688_v0 }
  0xed   : > { %11129 = vst [vmem:[#allocation52_spill] sm:$0xff] %v9662_v34 }
  0xf1   : > { %7725 = vmatmul.mubr.msk.bf16.gmra.mrb[36].mxu1 %vm549_vm0, %v9646_v35  ;;  %v9674_v35 = vld [vmem:[#allocation2 + $0x252] sm:$0xff] }
  0xf2   : > { %7728 = vmatprep.mubr.msk.bf16.mxu1 %vm549_vm0, %v1401_v47  ;;  %v9672_v47 = vld [vmem:[#allocation2 + $0x242] sm:$0xff]  ;;  %11131 = vst [vmem:[#allocation54_spill] sm:$0xff] %v9674_v35 }
  0xf3   : > { %v9682_v36 = vpack.c.bf16 %v9674_v35, %v9672_v47 }
  0xf9   : > { %7729 = vmatmul.mubr.msk.bf16.gmra.mrb[40].mxu1 %vm549_vm0, %v9662_v34  ;;  %v1687_v34 = vpack.c.bf16 %v9393_v40, %v9385_v37  ;;  %v8909_v40 = vld [vmem:[%s10984_s3 + $0x28] sm:$0xff]  }
  0xfa   : > { %7732 = vmatprep.mubr.msk.bf16.mxu1 %vm549_vm0, %v9666_v2  ;;  %v9693_v2 = vpop.f32.mrb[4].mxu1 }
  0xfb   : > { %11136 = vst [vmem:[#allocation59_spill] sm:$0xff] %v9693_v2  ;;  %v9695_v44 = vpop.f32.mrb[5].mxu1 }
  0xfc   : > { %11137 = vst [vmem:[#allocation60_spill] sm:$0xff] %v9695_v44  ;;  %v9699_v35 = vpop.f32.mrb[6].mxu1 }
  0xfd   : > { %11138 = vst [vmem:[#allocation61_spill] sm:$0xff] %v9699_v35  ;;  %v9703_v37 = vpop.f32.mrb[7].mxu1 }
  0xfe   : > { %11139 = vst [vmem:[#allocation62_spill] sm:$0xff] %v9703_v37  ;;  %v9713_v41 = vpop.f32.mrb[8].mxu1  ;;  %v1691_v37 = vpack.c.bf16 %v9437_v57, %v9425_v49  ;;  %v9741_v49 = vld [vmem:[#allocation2 + $0x120] sm:$0xff] }
  0xff   : > { %11140 = vst [vmem:[#allocation63_spill] sm:$0xff] %v9713_v41  ;;  %v9715_v42 = vpop.f32.mrb[9].mxu1  ;;  %v1694_v57 = vpack.c.bf16 %v9741_v49, %v9461_v9  ;;  %v1699_v9 = vpack.c.bf16 %v9509_v1, %v9498_v39  ;;  %v11155_v39 = vld [vmem:[#allocation22_spill] sm:$0xff]  ;;  %v11156_v1 = vld [vmem:[#allocation23_spill] sm:$0xff] }
 0x100   : > { %11141 = vst [vmem:[#allocation64_spill] sm:$0xff] %v9715_v42  ;;  %v9719_v28 = vpop.f32.mrb[10].mxu1  ;;  %v1692_v42 = vpack.c.bf16 %v9441_v59, %v9439_v58  ;;  %v1696_v58 = vpack.c.bf16 %v9478_v22, %v9476_v20  ;;  %v1697_v59 = vpack.c.bf16 %v9494_v33, %v9480_v25  ;;  %v9769_v20 = vld [vmem:[#allocation2 + $0x260] sm:$0xff]  ;;  %v1985_v25 = vpack.c.bf16 %v9285_v53, %v9279_v51  ;;  %v8910_v33 = vld [vmem:[%s10984_s3 + $0x30] sm:$0xff]  }
 0x101   : > { %7733 = vmatmul.mubr.msk.bf16.gmra.mrb[44].mxu1 %vm549_vm0, %v9682_v36  ;;  %11142 = vst [vmem:[#allocation65_spill] sm:$0xff] %v9719_v28  ;;  %v1702_v22 = vpack.c.bf16 %v9769_v20, %v9531_v45  ;;  %v9786_v51 = vld [vmem:[#allocation2 + $0x81] sm:$0xff] }
 0x102   : > { %7738 = vmatprep.mubr.msk.bf16.mxu1 %vm549_vm0, %v1687_v34  ;;  %v9711_v34 = vld [vmem:[#allocation2 + $0x80] sm:$0xff]  ;;  %v1988_v53 = vpack.c.bf16 %v9786_v51, %v9307_v61 }
 0x103   : > { %v1690_v43 = vpack.c.bf16 %v9711_v34, %v9423_v48  ;;  %v1693_v48 = vpack.c.bf16 %v9459_v8, %v9443_v62  ;;  %v9755_v62 = vld [vmem:[#allocation2 + $0x1c0] sm:$0xff] }
 0x104   : > { %v1698_v8 = vpack.c.bf16 %v9755_v62, %v9496_v38 }
 0x109   : > { %7739 = vmatmul.mubr.msk.bf16.vlgmr.msra.gmra.mrb[16].mxu1 %vm549_vm0, %v1688_v7  ;;  %v9723_v7 = vpop.f32.mrb[11].mxu1 }
 0x10a   : > { %7771 = vmatpush3.bf16.msra.mxu1 %v9562_v46  ;;  %7742 = vmatprep.mubr.msk.bf16.mxu1 %vm549_vm0, %v1689_v30  ;;  %11143 = vst [vmem:[#allocation66_spill] sm:$0xff] %v9723_v7  ;;  %v9727_v30 = vpop.f32.mrb[12].mxu1 }
 0x10b   : > { %7804 = vmatprep.subr.bf16.mxu1 %v8909_v40  ;;  %11144 = vst [vmem:[#allocation67_spill] sm:$0xff] %v9727_v30  ;;  %v9729_v46 = vpop.f32.mrb[13].mxu1 }
 0x10c   : > { %11145 = vst [vmem:[#allocation68_spill] sm:$0xff] %v9729_v46  ;;  %v9733_v41 = vpop.f32.mrb[14].mxu1 }
 0x10d   : > { %11146 = vst [vmem:[#allocation69_spill] sm:$0xff] %v9733_v41  ;;  %v9737_v28 = vpop.f32.mrb[15].mxu1 }
 0x10e   : > { %11147 = vst [vmem:[#allocation70_spill] sm:$0xff] %v9737_v28 }
 0x111   : > { %7743 = vmatmul.mubr.msk.bf16.gmra.mrb[20].mxu1 %vm549_vm0, %v1690_v43  ;;  %v11158_v43 = vld [vmem:[#allocation27_spill] sm:$0xff] }
 0x112   : > { %7746 = vmatprep.mubr.msk.bf16.mxu1 %vm549_vm0, %v1691_v37  ;;  %v1695_v37 = vpack.c.bf16 %v9474_v19, %v9463_v13  ;;  %v1700_v13 = vpack.c.bf16 %v9513_v32, %v9511_v14  ;;  %v1701_v19 = vpack.c.bf16 %v9529_v52, %v9515_v26  ;;  %v1986_v32 = vpack.c.bf16 %v9289_v55, %v9287_v54  ;;  %v11157_v14 = vld [vmem:[#allocation26_spill] sm:$0xff] }
 0x113   : > { %v1987_v26 = vpack.c.bf16 %v9305_v60, %v9291_v56  ;;  %v1989_v54 = vpack.c.bf16 %v9316_v3, %v9309_v63  ;;  %v1990_v55 = vpack.c.bf16 %v9321_v5, %v9318_v4  ;;  %v1991_v56 = vpack.c.bf16 %v9333_v11, %v9323_v6  ;;  %v9800_v60 = vld [vmem:[#allocation2 + $0x121] sm:$0xff] }
 0x114   : > { %v1992_v61 = vpack.c.bf16 %v9800_v60, %v9335_v12  ;;  %v1993_v63 = vpack.c.bf16 %v9341_v15, %v9330_v10  ;;  %v1994_v3 = vpack.c.bf16 %v9346_v17, %v9343_v16  ;;  %v1995_v4 = vpack.c.bf16 %v9355_v21, %v9348_v18  ;;  %v9814_v5 = vld [vmem:[#allocation2 + $0x1c1] sm:$0xff]  ;;  %v11150_v16 = vld [vmem:[#allocation5_spill] sm:$0xff]  ;;  %v11151_v21 = vld [vmem:[#allocation6_spill] sm:$0xff] }
 0x115   : > { %v1996_v6 = vpack.c.bf16 %v9814_v5, %v9358_v23  ;;  %v1997_v10 = vpack.c.bf16 %v9366_v27, %v9360_v24  ;;  %v11148_v11 = vld [vmem:[#allocation3_spill] sm:$0xff]  ;;  %v11149_v15 = vld [vmem:[#allocation4_spill] sm:$0xff]  ;;  %v11152_v24 = vld [vmem:[#allocation18_spill] sm:$0xff]  ;;  %v2285_v52 = vpack.c.bf16 %v11157_v14, %v11156_v1 }
 0x116   : > { %v1998_v12 = vpack.c.bf16 %v11148_v11, %v9368_v29  ;;  %v1999_v17 = vpack.c.bf16 %v11150_v16, %v11149_v15  ;;  %v9828_v18 = vld [vmem:[#allocation2 + $0x261] sm:$0xff]  ;;  %v11154_v29 = vld [vmem:[#allocation21_spill] sm:$0xff]  ;;  %v11174_v16 = vld [vmem:[#allocation50_spill] sm:$0xff] }
 0x117   : > { %v2000_v23 = vpack.c.bf16 %v9828_v18, %v11151_v21  ;;  %v11153_v27 = vld [vmem:[#allocation20_spill] sm:$0xff]  ;;  %v2284_v45 = vpack.c.bf16 %v11155_v39, %v11154_v29  ;;  %v11172_v11 = vld [vmem:[#allocation47_spill] sm:$0xff]  ;;  %v11173_v15 = vld [vmem:[#allocation49_spill] sm:$0xff] }
 0x118   : > { %v2283_v38 = vpack.c.bf16 %v11153_v27, %v11152_v24  ;;  %v11176_v24 = vld [vmem:[#allocation54_spill] sm:$0xff]  ;;  %v11178_v29 = vld [vmem:[#allocation8_spill] sm:$0xff]  ;;  %v9901_v39 = vld [vmem:[#allocation2] sm:$0xff] }
 0x119   : > { %7747 = vmatmul.mubr.msk.bf16.gmra.mrb[24].mxu1 %vm549_vm0, %v1692_v42  ;;  %v9845_v42 = vld [vmem:[#allocation2 + $0x82] sm:$0xff]  ;;  %v11180_v1 = vld [vmem:[#allocation10_spill] sm:$0xff] }
 0x11a   : > { %7750 = vmatprep.mubr.msk.bf16.mxu1 %vm549_vm0, %v1693_v48  ;;  %v2286_v48 = vpack.c.bf16 %v9845_v42, %v11158_v43  ;;  %v11181_v14 = vld [vmem:[#allocation11_spill] sm:$0xff]  ;;  %v11183_v43 = vld [vmem:[#allocation13_spill] sm:$0xff] }
 0x121   : > { %7751 = vmatmul.mubr.msk.bf16.gmra.mrb[28].mxu1 %vm549_vm0, %v1694_v57  ;;  %v11159_v57 = vld [vmem:[#allocation28_spill] sm:$0xff] }
 0x122   : > { %7754 = vmatprep.mubr.msk.bf16.mxu1 %vm549_vm0, %v1695_v37  ;;  %v11160_v37 = vld [vmem:[#allocation30_spill] sm:$0xff] }
 0x129   : > { %7755 = vmatmul.mubr.msk.bf16.gmra.mrb[32].mxu1 %vm549_vm0, %v1696_v58  ;;  %v2287_v58 = vpack.c.bf16 %v11160_v37, %v11159_v57  ;;  %v2593_v57 = vpack.c.bf16 %v9901_v39, %v9755_v62  ;;  %v11186_v37 = vld [vmem:[#allocation16_spill] sm:$0xff]  ;;  %v9002_v62 = vld [vmem:[%s9187_s19] sm:$0xff]  }
 0x12a   : > { %7758 = vmatprep.mubr.msk.bf16.mxu1 %vm549_vm0, %v1697_v59  ;;  %v11161_v59 = vld [vmem:[#allocation31_spill] sm:$0xff]  ;;  %7602 = vmatprep.mubr.msk.bf16.mxu0 %vm549_vm0, %v9002_v62 }
 0x131   : > { %7759 = vmatmul.mubr.msk.bf16.gmra.mrb[36].mxu1 %vm549_vm0, %v1698_v8  ;;  %v11162_v8 = vld [vmem:[#allocation32_spill] sm:$0xff] }
 0x132   : > { %7762 = vmatprep.mubr.msk.bf16.mxu1 %vm549_vm0, %v1699_v9  ;;  %v2288_v9 = vpack.c.bf16 %v11162_v8, %v11161_v59  ;;  %v2848_v59 = vld [vmem:[#allocation2 + $0x21] sm:$0xff]  ;;  %v2849_v8 = vld [vmem:[#allocation2 + $0x31] sm:$0xff] }
 0x139   : > { %7763 = vmatmul.mubr.msk.bf16.gmra.mrb[40].mxu1 %vm549_vm0, %v1700_v13  ;;  %v11163_v13 = vld [vmem:[#allocation33_spill] sm:$0xff] }
 0x13a   : > { %7766 = vmatprep.mubr.msk.bf16.mxu1 %vm549_vm0, %v1701_v19  ;;  %v11164_v19 = vld [vmem:[#allocation36_spill] sm:$0xff] }
 0x141   : > { %7767 = vmatmul.mubr.msk.bf16.gmra.mrb[44].mxu1 %vm549_vm0, %v1702_v22  ;;  %v2289_v22 = vpack.c.bf16 %v11164_v19, %v11163_v13  ;;  %v2880_v13 = vpack.c.bf16 %v2849_v8, %v2848_v59  ;;  %v9003_v19 = vld [vmem:[%s9187_s19 + $0x8] sm:$0xff]   ;;  %v2875_v59 = vld [vmem:[#allocation2 + $0x231] sm:$0xff] }
 0x142   : > { %7772 = vmatprep.mubr.msk.bf16.mxu1 %vm549_vm0, %v1985_v25  ;;  %v9859_v25 = vld [vmem:[#allocation2 + $0x122] sm:$0xff]  ;;  %7603 = vmatmul.mubr.msk.bf16.vlgmr.msra.gmra.mrb[0].mxu0 %vm549_vm0, %v9003_v19  ;;  %v2879_v19 = vld [vmem:[#allocation2 + $0x271] sm:$0xff] }
 0x143   : > { %v2876_v8 = vld [vmem:[#allocation2 + $0x241] sm:$0xff] }
 0x149   : > { %7773 = vmatmul.mubr.msk.bf16.vlgmr.msra.gmra.mrb[16].mxu1 %vm549_vm0, %v1986_v32  ;;  %v11165_v32 = vld [vmem:[#allocation37_spill] sm:$0xff] }
 0x14a   : > { %7805 = vmatpush3.bf16.msra.mxu1 %v8909_v40  ;;  %7776 = vmatprep.mubr.msk.bf16.mxu1 %vm549_vm0, %v1987_v26  ;;  %v8911_v40 = vld [vmem:[%s10984_s3 + $0x38] sm:$0xff]   ;;  %v2290_v26 = vpack.c.bf16 %v9859_v25, %v11165_v32  ;;  %v9004_v32 = vld [vmem:[%s9187_s19 + $0x10] sm:$0xff]  }
 0x14b   : > { %7838 = vmatprep.subr.bf16.mxu1 %v8910_v33  ;;  %7606 = vmatprep.mubr.msk.bf16.mxu0 %vm549_vm0, %v9004_v32  ;;  %v11190_v32 = vld [vmem:[#allocation25_spill] sm:$0xff] }
 0x151   : > { %7777 = vmatmul.mubr.msk.bf16.gmra.mrb[20].mxu1 %vm549_vm0, %v1988_v53  ;;  %v11167_v53 = vld [vmem:[#allocation40_spill] sm:$0xff] }
 0x152   : > { %7780 = vmatprep.mubr.msk.bf16.mxu1 %vm549_vm0, %v1989_v54 }
 0x159   : > { %7781 = vmatmul.mubr.msk.bf16.gmra.mrb[24].mxu1 %vm549_vm0, %v1990_v55  ;;  %v11168_v55 = vld [vmem:[#allocation41_spill] sm:$0xff] }
 0x15a   : > { %7784 = vmatprep.mubr.msk.bf16.mxu1 %vm549_vm0, %v1991_v56  ;;  %v11169_v56 = vld [vmem:[#allocation42_spill] sm:$0xff] }
 0x161   : > { %7785 = vmatmul.mubr.msk.bf16.gmra.mrb[28].mxu1 %vm549_vm0, %v1992_v61  ;;  %v2292_v61 = vpack.c.bf16 %v11169_v56, %v11168_v55 }
 0x162   : > { %7788 = vmatprep.mubr.msk.bf16.mxu1 %vm549_vm0, %v1993_v63  ;;  %v11170_v63 = vld [vmem:[#allocation43_spill] sm:$0xff] }
 0x169   : > { %7789 = vmatmul.mubr.msk.bf16.gmra.mrb[32].mxu1 %vm549_vm0, %v1994_v3  ;;  %v2293_v3 = vpack.c.bf16 %v9638_v31, %v11170_v63  ;;  %v11175_v31 = vld [vmem:[#allocation51_spill] sm:$0xff]  ;;  %v9005_v63 = vld [vmem:[%s9187_s19 + $0x18] sm:$0xff]  }
 0x16a   : > { %7792 = vmatprep.mubr.msk.bf16.mxu1 %vm549_vm0, %v1995_v4  ;;  %v9873_v4 = vld [vmem:[#allocation2 + $0x1c2] sm:$0xff]  ;;  %v2297_v21 = vpack.c.bf16 %v9672_v47, %v11175_v31  ;;  %v11179_v47 = vld [vmem:[#allocation9_spill] sm:$0xff]  ;;  %7607 = vmatmul.mubr.msk.bf16.gmra.mrb[4].mxu0 %vm549_vm0, %v9005_v63 }
 0x16b   : > { %v2859_v31 = vld [vmem:[#allocation2 + $0xf1] sm:$0xff]  ;;  %v11197_v63 = vld [vmem:[#allocation48_spill] sm:$0xff] }
 0x171   : > { %7793 = vmatmul.mubr.msk.bf16.gmra.mrb[36].mxu1 %vm549_vm0, %v1996_v6  ;;  %v11171_v6 = vld [vmem:[#allocation46_spill] sm:$0xff] }
 0x172   : > { %7796 = vmatprep.mubr.msk.bf16.mxu1 %vm549_vm0, %v1997_v10  ;;  %v2294_v10 = vpack.c.bf16 %v9873_v4, %v11171_v6  ;;  %v2855_v6 = vld [vmem:[#allocation2 + $0x91] sm:$0xff] }
 0x179   : > { %7797 = vmatmul.mubr.msk.bf16.gmra.mrb[40].mxu1 %vm549_vm0, %v1998_v12  ;;  %v2295_v12 = vpack.c.bf16 %v9652_v50, %v11172_v11  ;;  %v11177_v50 = vld [vmem:[#allocation7_spill] sm:$0xff] }
 0x17a   : > { %7800 = vmatprep.mubr.msk.bf16.mxu1 %vm549_vm0, %v1999_v17  ;;  %v2296_v17 = vpack.c.bf16 %v11174_v16, %v11173_v15  ;;  %v2856_v11 = vld [vmem:[#allocation2 + $0xc1] sm:$0xff]  ;;  %v2883_v15 = vpack.c.bf16 %v2855_v6, %v9786_v51  ;;  %v2863_v51 = vld [vmem:[#allocation2 + $0x131] sm:$0xff] }
 0x181   : > { %7801 = vmatmul.mubr.msk.bf16.gmra.mrb[44].mxu1 %vm549_vm0, %v2000_v23  ;;  %v9887_v23 = vld [vmem:[#allocation2 + $0x262] sm:$0xff] }
 0x182   : > { %7806 = vmatprep.mubr.msk.bf16.mxu1 %vm549_vm0, %v2283_v38  ;;  %v2298_v27 = vpack.c.bf16 %v9887_v23, %v11176_v24  ;;  %v8912_v38 = vld [vmem:[%s10984_s3 + $0x40] sm:$0xff]   ;;  %v2861_v24 = vld [vmem:[#allocation2 + $0x111] sm:$0xff] }
 0x189   : > { %7807 = vmatmul.mubr.msk.bf16.vlgmr.msra.gmra.mrb[16].mxu1 %vm549_vm0, %v2284_v45  ;;  %v2585_v45 = vpack.c.bf16 %v9901_v39, %v9711_v34  ;;  %v11184_v34 = vld [vmem:[#allocation14_spill] sm:$0xff] }
 0x18a   : > { %7839 = vmatpush3.bf16.msra.mxu1 %v8910_v33  ;;  %7810 = vmatprep.mubr.msk.bf16.mxu1 %vm549_vm0, %v2285_v52  ;;  %v11166_v33 = vld [vmem:[#allocation38_spill] sm:$0xff]  ;;  %v11182_v52 = vld [vmem:[#allocation12_spill] sm:$0xff] }
 0x18b   : > { %7872 = vmatprep.subr.bf16.mxu1 %v8911_v40  ;;  %v2291_v54 = vpack.c.bf16 %v11167_v53, %v11166_v33  ;;  %v2851_v33 = vld [vmem:[#allocation2 + $0x51] sm:$0xff]  ;;  %v2852_v53 = vld [vmem:[#allocation2 + $0x61] sm:$0xff] }
 0x191   : > { %7811 = vmatmul.mubr.msk.bf16.gmra.mrb[20].mxu1 %vm549_vm0, %v2286_v48  ;;  %v11185_v48 = vld [vmem:[#allocation15_spill] sm:$0xff] }
 0x192   : > { %7814 = vmatprep.mubr.msk.bf16.mxu1 %vm549_vm0, %v2287_v58  ;;  %v11188_v58 = vld [vmem:[#allocation19_spill] sm:$0xff] }
 0x199   : > { %7815 = vmatmul.mubr.msk.bf16.gmra.mrb[24].mxu1 %vm549_vm0, %v2288_v9  ;;  %v2597_v9 = vpack.c.bf16 %v9901_v39, %v9769_v20  ;;  %v8914_v20 = vld [vmem:[%s10987_s6 + $0x48] sm:$0xff]  }
 0x19a   : > { %7818 = vmatprep.mubr.msk.bf16.mxu1 %vm549_vm0, %v2289_v22  ;;  %v8913_v22 = vld [vmem:[%s10987_s6 + $0x40] sm:$0xff]  }
 0x19b   : > { %7940 = vmatprep.subr.bf16.mxu0 %v8913_v22 }
 0x19c   : > { %7941 = vmatpush3.bf16.msra.mxu0 %v8913_v22  ;;  %v2895_v22 = vpack.c.bf16 %v2879_v19, %v9828_v18  ;;  %v11193_v18 = vld [vmem:[#allocation35_spill] sm:$0xff] }
 0x19d   : > { %7942 = vmatprep.subr.bf16.mxu0 %v8914_v20 }
 0x1a0   : > { %7943 = vmatpush3.bf16.msra.mxu0 %v8914_v20 }
 0x1a1   : > { %7819 = vmatmul.mubr.msk.bf16.gmra.mrb[28].mxu1 %vm549_vm0, %v2290_v26  ;;  %v2850_v26 = vld [vmem:[#allocation2 + $0x41] sm:$0xff] }
 0x1a2   : > { %7822 = vmatprep.mubr.msk.bf16.mxu1 %vm549_vm0, %v2291_v54  ;;  %v2853_v54 = vld [vmem:[#allocation2 + $0x71] sm:$0xff]  ;;  %v2881_v55 = vpack.c.bf16 %v2851_v33, %v2850_v26 }
 0x1a3   : > { %v2882_v56 = vpack.c.bf16 %v2853_v54, %v2852_v53  ;;  %v11191_v26 = vld [vmem:[#allocation29_spill] sm:$0xff]  ;;  %v11192_v53 = vld [vmem:[#allocation34_spill] sm:$0xff]  ;;  %v11194_v54 = vld [vmem:[#allocation39_spill] sm:$0xff] }
 0x1a4   : > { %v3153_v33 = vld [vmem:[#allocation2 + $0x92] sm:$0xff] }
 0x1a5   : > { %v3181_v20 = vpack.c.bf16 %v3153_v33, %v9845_v42  ;;  %v11196_v42 = vld [vmem:[#allocation45_spill] sm:$0xff] }
 0x1a9   : > { %7823 = vmatmul.mubr.msk.bf16.gmra.mrb[32].mxu1 %vm549_vm0, %v2292_v61  ;;  %v8915_v61 = vld [vmem:[%s10987_s6 + $0x50] sm:$0xff]  }
 0x1aa   : > { %7826 = vmatprep.mubr.msk.bf16.mxu1 %vm549_vm0, %v2293_v3  ;;  %v9006_v3 = vld [vmem:[%s9187_s19 + $0x20] sm:$0xff]   ;;  %7944 = vmatprep.subr.bf16.mxu0 %v8915_v61 }
 0x1ab   : > { %7945 = vmatpush3.bf16.msra.mxu0 %v8915_v61  ;;  %7610 = vmatprep.mubr.msk.bf16.mxu0 %vm549_vm0, %v9006_v3  ;;  %v11195_v61 = vld [vmem:[#allocation44_spill] sm:$0xff]  ;;  %v3169_v3 = vld [vmem:[#allocation2 + $0x1d2] sm:$0xff] }
 0x1ac   : > { %v3189_v6 = vpack.c.bf16 %v3169_v3, %v9873_v4  ;;  %v8917_v4 = vld [vmem:[%s10987_s6 + $0x60] sm:$0xff]  }
 0x1b1   : > { %7827 = vmatmul.mubr.msk.bf16.gmra.mrb[36].mxu1 %vm549_vm0, %v2294_v10  ;;  %v8916_v10 = vld [vmem:[%s10987_s6 + $0x58] sm:$0xff]  }
 0x1b2   : > { %7830 = vmatprep.mubr.msk.bf16.mxu1 %vm549_vm0, %v2295_v12  ;;  %v2857_v12 = vld [vmem:[#allocation2 + $0xd1] sm:$0xff]  ;;  %7946 = vmatprep.subr.bf16.mxu0 %v8916_v10 }
 0x1b3   : > { %v2884_v16 = vpack.c.bf16 %v2857_v12, %v2856_v11  ;;  %7947 = vmatpush3.bf16.msra.mxu0 %v8916_v10  ;;  %v11198_v10 = vld [vmem:[#allocation52_spill] sm:$0xff]  ;;  %v3177_v11 = vld [vmem:[#allocation2 + $0x272] sm:$0xff] }
 0x1b4   : > { %v3193_v12 = vpack.c.bf16 %v3177_v11, %v9887_v23  ;;  %7948 = vmatprep.subr.bf16.mxu0 %v8917_v4  ;;  %v8919_v23 = vld [vmem:[%s10987_s6 + $0x70] sm:$0xff]  }
 0x1b7   : > { %7949 = vmatpush3.bf16.msra.mxu0 %v8917_v4 }
 0x1b9   : > { %7831 = vmatmul.mubr.msk.bf16.gmra.mrb[40].mxu1 %vm549_vm0, %v2296_v17  ;;  %v2858_v17 = vld [vmem:[#allocation2 + $0xe1] sm:$0xff] }
 0x1ba   : > { %7834 = vmatprep.mubr.msk.bf16.mxu1 %vm549_vm0, %v2297_v21  ;;  %v2860_v21 = vld [vmem:[#allocation2 + $0x101] sm:$0xff] }
 0x1c1   : > { %7835 = vmatmul.mubr.msk.bf16.gmra.mrb[44].mxu1 %vm549_vm0, %v2298_v27  ;;  %v2885_v27 = vpack.c.bf16 %v2859_v31, %v2858_v17  ;;  %v9008_v17 = vld [vmem:[%s9187_s19 + $0x30] sm:$0xff]   ;;  %v8920_v31 = vld [vmem:[%s10987_s6 + $0x78] sm:$0xff]  }
 0x1c2   : > { %7840 = vmatprep.mubr.msk.bf16.mxu1 %vm549_vm0, %v11177_v50  ;;  %v2886_v50 = vpack.c.bf16 %v2861_v24, %v2860_v21  ;;  %v8921_v21 = vld [vmem:[%s10987_s6] sm:$0xff]  }
 0x1c3   : > { %v10031_v24 = vld [vmem:[%s10985_s4] ss:$0 sm:$0xff] }
 0x1c9   : > { %7841 = vmatmul.mubr.msk.bf16.vlgmr.msra.gmra.mrb[16].mxu1 %vm549_vm0, %v11178_v29  ;;  %v2865_v29 = vld [vmem:[#allocation2 + $0x171] sm:$0xff] }
 0x1ca   : > { %7873 = vmatpush3.bf16.msra.mxu1 %v8911_v40  ;;  %7844 = vmatprep.mubr.msk.bf16.mxu1 %vm549_vm0, %v11179_v47  ;;  %v2589_v40 = vpack.c.bf16 %v9901_v39, %v9741_v49  ;;  %v11187_v49 = vld [vmem:[#allocation17_spill] sm:$0xff]  ;;  %v2887_v47 = vpack.c.bf16 %v2863_v51, %v9800_v60 }
 0x1cb   : > { %7906 = vmatprep.subr.bf16.mxu1 %v8912_v38 }
 0x1d1   : > { %7845 = vmatmul.mubr.msk.bf16.gmra.mrb[20].mxu1 %vm549_vm0, %v2585_v45 }
 0x1d2   : > { %7848 = vmatprep.mubr.msk.bf16.mxu1 %vm549_vm0, %v11180_v1  ;;  %v2866_v1 = vld [vmem:[#allocation2 + $0x181] sm:$0xff] }
 0x1d9   : > { %7849 = vmatmul.mubr.msk.bf16.gmra.mrb[24].mxu1 %vm549_vm0, %v11181_v14  ;;  %v2867_v14 = vld [vmem:[#allocation2 + $0x191] sm:$0xff] }
 0x1da   : > { %7852 = vmatprep.mubr.msk.bf16.mxu1 %vm549_vm0, %v11182_v52  ;;  %v2868_v52 = vld [vmem:[#allocation2 + $0x1a1] sm:$0xff] }
 0x1e1   : > { %7853 = vmatmul.mubr.msk.bf16.gmra.mrb[28].mxu1 %vm549_vm0, %v2589_v40  ;;  %v2869_v40 = vld [vmem:[#allocation2 + $0x1b1] sm:$0xff] }
 0x1e2   : > { %7856 = vmatprep.mubr.msk.bf16.mxu1 %vm549_vm0, %v11183_v43  ;;  %v2889_v43 = vpack.c.bf16 %v2867_v14, %v2866_v1 }
 0x1e9   : > { %7857 = vmatmul.mubr.msk.bf16.gmra.mrb[32].mxu1 %vm549_vm0, %v11184_v34  ;;  %v2890_v34 = vpack.c.bf16 %v2869_v40, %v2868_v52 }
 0x1ea   : > { %7860 = vmatprep.mubr.msk.bf16.mxu1 %vm549_vm0, %v11185_v48  ;;  %v2871_v48 = vld [vmem:[#allocation2 + $0x1d1] sm:$0xff] }
 0x1eb   : > { %v2891_v60 = vpack.c.bf16 %v2871_v48, %v9814_v5  ;;  %v11189_v5 = vld [vmem:[#allocation24_spill] sm:$0xff] }
 0x1ec   : > { %v3650_v48 = vld [vmem:[#allocation2 + $0x1] sm:$0xff] }
 0x1f1   : > { %7861 = vmatmul.mubr.msk.bf16.gmra.mrb[36].mxu1 %vm549_vm0, %v2593_v57  ;;  %v2872_v57 = vld [vmem:[#allocation2 + $0x201] sm:$0xff] }
 0x1f2   : > { %7864 = vmatprep.mubr.msk.bf16.mxu1 %vm549_vm0, %v11186_v37  ;;  %v2873_v37 = vld [vmem:[#allocation2 + $0x211] sm:$0xff] }
 0x1f9   : > { %7865 = vmatmul.mubr.msk.bf16.gmra.mrb[40].mxu1 %vm549_vm0, %v11187_v49  ;;  %v2892_v49 = vpack.c.bf16 %v2873_v37, %v2872_v57 }
 0x1fa   : > { %7868 = vmatprep.mubr.msk.bf16.mxu1 %vm549_vm0, %v11188_v58  ;;  %v2874_v58 = vld [vmem:[#allocation2 + $0x221] sm:$0xff] }
 0x201   : > { %7869 = vmatmul.mubr.msk.bf16.gmra.mrb[44].mxu1 %vm549_vm0, %v2597_v9  ;;  %v2877_v9 = vld [vmem:[#allocation2 + $0x251] sm:$0xff] }
 0x202   : > { %7874 = vmatprep.mubr.msk.bf16.mxu1 %vm549_vm0, %v2880_v13  ;;  %v2893_v13 = vpack.c.bf16 %v2875_v59, %v2874_v58  ;;  %v2894_v62 = vpack.c.bf16 %v2877_v9, %v2876_v8 }
 0x209   : > { %7875 = vmatmul.mubr.msk.bf16.vlgmr.msra.gmra.mrb[16].mxu1 %vm549_vm0, %v2881_v55  ;;  %v3161_v55 = vld [vmem:[#allocation2 + $0x132] sm:$0xff] }
 0x20a   : > { %7907 = vmatpush3.bf16.msra.mxu1 %v8912_v38  ;;  %7878 = vmatprep.mubr.msk.bf16.mxu1 %vm549_vm0, %v2882_v56  ;;  %v2864_v38 = vld [vmem:[#allocation2 + $0x161] sm:$0xff]  ;;  %v3185_v56 = vpack.c.bf16 %v3161_v55, %v9859_v25  ;;  %v11199_v25 = vld [vmem:[#allocation53_spill] sm:$0xff] }
 0x20b   : > { %v2888_v45 = vpack.c.bf16 %v2865_v29, %v2864_v38 }
 0x211   : > { %7879 = vmatmul.mubr.msk.bf16.gmra.mrb[20].mxu1 %vm549_vm0, %v2883_v15  ;;  %v9007_v15 = vld [vmem:[%s9187_s19 + $0x28] sm:$0xff]  }
 0x212   : > { %7882 = vmatprep.mubr.msk.bf16.mxu1 %vm549_vm0, %v2884_v16  ;;  %7611 = vmatmul.mubr.msk.bf16.gmra.mrb[8].mxu0 %vm549_vm0, %v9007_v15  ;;  %v8918_v16 = vld [vmem:[%s10987_s6 + $0x68] sm:$0xff]  }
 0x213   : > { %7950 = vmatprep.subr.bf16.mxu0 %v8918_v16  ;;  %7614 = vmatprep.mubr.msk.bf16.mxu0 %vm549_vm0, %v9008_v17 }
 0x214   : > { %7951 = vmatpush3.bf16.msra.mxu0 %v8918_v16 }
 0x215   : > { %7952 = vmatprep.subr.bf16.mxu0 %v8919_v23  ;;  %v10260_v0 = vpop.f32.mrb[0].mxu0 }
 0x216   : > { %11213 = vst [vmem:[#allocation31_spill] sm:$0xff] %v10260_v0 }
 0x218   : > { %7953 = vmatpush3.bf16.msra.mxu0 %v8919_v23 }
 0x219   : > { %7883 = vmatmul.mubr.msk.bf16.gmra.mrb[24].mxu1 %vm549_vm0, %v2885_v27  ;;  %7954 = vmatprep.subr.bf16.mxu0 %v8920_v31  ;;  %v10036_v27 = vld [vmem:[%s10986_s5] ss:$0 sm:$0xff] }
 0x21a   : > { %7886 = vmatprep.mubr.msk.bf16.mxu1 %vm549_vm0, %v2886_v50 }
 0x21c   : > { %7955 = vmatpush3.bf16.msra.mxu0 %v8920_v31 }
 0x21d   : > { %7988 = vmatprep.subr.bf16.mxu0 %v8921_v21 }
 0x221   : > { %7887 = vmatmul.mubr.msk.bf16.gmra.mrb[28].mxu1 %vm549_vm0, %v2887_v47 }
 0x222   : > { %7890 = vmatprep.mubr.msk.bf16.mxu1 %vm549_vm0, %v2888_v45 }
 0x229   : > { %7891 = vmatmul.mubr.msk.bf16.gmra.mrb[32].mxu1 %vm549_vm0, %v2889_v43 }
 0x22a   : > { %7894 = vmatprep.mubr.msk.bf16.mxu1 %vm549_vm0, %v2890_v34 }
 0x231   : > { %7895 = vmatmul.mubr.msk.bf16.gmra.mrb[36].mxu1 %vm549_vm0, %v2891_v60 }
 0x232   : > { %7898 = vmatprep.mubr.msk.bf16.mxu1 %vm549_vm0, %v2892_v49 }
 0x239   : > { %7899 = vmatmul.mubr.msk.bf16.gmra.mrb[40].mxu1 %vm549_vm0, %v2893_v13 }
 0x23a   : > { %7902 = vmatprep.mubr.msk.bf16.mxu1 %vm549_vm0, %v2894_v62 }
 0x241   : > { %7903 = vmatmul.mubr.msk.bf16.gmra.mrb[44].mxu1 %vm549_vm0, %v2895_v22  ;;  %v8922_v22 = vld [vmem:[%s10987_s6 + $0x8] sm:$0xff]  }
 0x242   : > { %7908 = vmatprep.mubr.msk.bf16.mxu1 %vm549_vm0, %v11189_v5 }
 0x249   : > { %7909 = vmatmul.mubr.msk.bf16.vlgmr.msra.gmra.mrb[16].mxu1 %vm549_vm0, %v11190_v32 }
 0x24a   : > { %7912 = vmatprep.mubr.msk.bf16.mxu1 %vm549_vm0, %v11191_v26 }
 0x251   : > { %7913 = vmatmul.mubr.msk.bf16.gmra.mrb[20].mxu1 %vm549_vm0, %v3181_v20 }
 0x252   : > { %7916 = vmatprep.mubr.msk.bf16.mxu1 %vm549_vm0, %v11192_v53 }
 0x259   : > { %7917 = vmatmul.mubr.msk.bf16.gmra.mrb[24].mxu1 %vm549_vm0, %v11193_v18 }
 0x25a   : > { %7920 = vmatprep.mubr.msk.bf16.mxu1 %vm549_vm0, %v11194_v54 }
 0x261   : > { %7921 = vmatmul.mubr.msk.bf16.gmra.mrb[28].mxu1 %vm549_vm0, %v3185_v56  ;;  %v8923_v56 = vld [vmem:[%s10987_s6 + $0x10] sm:$0xff]  }
 0x262   : > { %7924 = vmatprep.mubr.msk.bf16.mxu1 %vm549_vm0, %v11195_v61 }
 0x269   : > { %7925 = vmatmul.mubr.msk.bf16.gmra.mrb[32].mxu1 %vm549_vm0, %v11196_v42 }
 0x26a   : > { %7928 = vmatprep.mubr.msk.bf16.mxu1 %vm549_vm0, %v11197_v63 }
 0x271   : > { %7929 = vmatmul.mubr.msk.bf16.gmra.mrb[36].mxu1 %vm549_vm0, %v3189_v6 }
 0x272   : > { %7932 = vmatprep.mubr.msk.bf16.mxu1 %vm549_vm0, %v11198_v10 }
 0x279   : > { %7933 = vmatmul.mubr.msk.bf16.gmra.mrb[40].mxu1 %vm549_vm0, %v11199_v25 }
 0x27a   : > { %7936 = vmatprep.mubr.msk.bf16.mxu1 %vm549_vm0, %v9682_v36  ;;  %v9009_v36 = vld [vmem:[%s9187_s19 + $0x38] sm:$0xff]  }
 0x27b   : > { %7615 = vmatmul.mubr.msk.bf16.gmra.mrb[12].mxu0 %vm549_vm0, %v9009_v36 }
 0x281   : > { %7937 = vmatmul.mubr.msk.bf16.gmra.mrb[44].mxu1 %vm549_vm0, %v3193_v12 }
 0x31c   : > { %v7910_v50 = vpop.f32.mrb[16].mxu1 }
 0x31d   : > { %v3452_v51 = vmul.f32 %v7910_v50, %v10031_v24  ;;  %v3285_v38 = vpop.f32.mrb[17].mxu1  ;;  %v8924_v50 = vld [vmem:[%s10987_s6 + $0x18] sm:$0xff]  }
 0x31e   : > { %v3450_v29 = vmul.f32 %v10031_v24, %v3285_v38  ;;  %v7911_v47 = vpop.f32.mrb[18].mxu1 }
 0x31f   : > { %v3490_v45 = vadd.f32 %v10036_v27, %v3452_v51  ;;  %v3453_v1 = vmul.f32 %v7911_v47, %v10031_v24  ;;  %v3288_v14 = vpop.f32.mrb[19].mxu1 }
 0x320   : > { %v3488_v52 = vadd.f32 %v10036_v27, %v3450_v29  ;;  %v3451_v40 = vmul.f32 %v10031_v24, %v3288_v14 }
 0x321   : > { %v3522_v43 = vmax.f32 %v3490_v45, 0.0  ;;  %v3491_v34 = vadd.f32 %v10036_v27, %v3453_v1 }
 0x322   : > { %v3520_v57 = vmax.f32 %v3488_v52, 0.0  ;;  %v3489_v37 = vadd.f32 %v10036_v27, %v3451_v40 }
 0x323   : > { %3556 = vst [vmem:[#allocation2 + $0x31] sm:$0xff] %v3522_v43  ;;  %v3523_v60 = vmax.f32 %v3491_v34, 0.0 }
 0x324   : > { %3554 = vst [vmem:[#allocation2 + $0x11] sm:$0xff] %v3520_v57  ;;  %v3521_v49 = vmax.f32 %v3489_v37, 0.0  ;;  %v7914_v58 = vpop.f32.mrb[20].mxu1  ;;  %v3682_v59 = vpack.c.bf16 %v3520_v57, %v3650_v48  ;;  %v3658_v37 = vld [vmem:[#allocation2 + $0xa1] sm:$0xff] }
 0x325   : > { %3557 = vst [vmem:[#allocation2 + $0x41] sm:$0xff] %v3523_v60  ;;  %v3456_v8 = vmul.f32 %v7914_v58, %v10031_v24  ;;  %v3301_v9 = vpop.f32.mrb[21].mxu1 }
 0x326   : > { %3555 = vst [vmem:[#allocation2 + $0x21] sm:$0xff] %v3521_v49  ;;  %v3454_v13 = vmul.f32 %v10031_v24, %v3301_v9  ;;  %v7915_v62 = vpop.f32.mrb[22].mxu1  ;;  %7956 = vmatprep.mubr.bf16.mxu0 %v3682_v59  ;;  %v3683_v19 = vpack.c.bf16 %v3522_v43, %v3521_v49  ;;  %v8925_v59 = vld [vmem:[%s10987_s6 + $0x20] sm:$0xff]  }
 0x327   : > { %v3494_v5 = vadd.f32 %v10036_v27, %v3456_v8  ;;  %v3457_v32 = vmul.f32 %v7915_v62, %v10031_v24  ;;  %v3304_v26 = vpop.f32.mrb[23].mxu1 }
 0x328   : > { %v3492_v33 = vadd.f32 %v10036_v27, %v3454_v13  ;;  %v3455_v20 = vmul.f32 %v10031_v24, %v3304_v26  ;;  %7957 = vmatmul.mubr.bf16.vlgmr.msra.gmra.mrb[16].mxu0 %v3683_v19 }
 0x329   : > { %v3526_v53 = vmax.f32 %v3494_v5, 0.0  ;;  %v3495_v18 = vadd.f32 %v10036_v27, %v3457_v32  ;;  %7989 = vmatpush3.bf16.msra.mxu0 %v8921_v21 }
 0x32a   : > { %v3524_v54 = vmax.f32 %v3492_v33, 0.0  ;;  %v3493_v55 = vadd.f32 %v10036_v27, %v3455_v20  ;;  %7990 = vmatprep.subr.bf16.mxu0 %v8922_v22  ;;  %v10060_v42 = vld [vmem:[#allocation2 + $0x30] sm:$0xff] }
 0x32b   : > { %3560 = vst [vmem:[#allocation2 + $0x71] sm:$0xff] %v3526_v53  ;;  %v3527_v61 = vmax.f32 %v3495_v18, 0.0  ;;  %v10064_v25 = vld [vmem:[#allocation2 + $0x32] sm:$0xff] }
 0x32c   : > { %3558 = vst [vmem:[#allocation2 + $0x51] sm:$0xff] %v3524_v54  ;;  %v3525_v63 = vmax.f32 %v3493_v55, 0.0  ;;  %v7918_v3 = vpop.f32.mrb[24].mxu1  ;;  %v3684_v6 = vpack.c.bf16 %v3524_v54, %v3523_v60  ;;  %v10062_v10 = vld [vmem:[#allocation2 + $0x40] sm:$0xff]  ;;  %v10081_v51 = vld [vmem:[#allocation2 + $0x10] sm:$0xff] }
 0x32d   : > { %v10066_v11 = vld [vmem:[#allocation2 + $0x42] sm:$0xff]  ;;  %3561 = vst [vmem:[#allocation2 + $0x81] sm:$0xff] %v3527_v61  ;;  %v3460_v12 = vmul.f32 %v7918_v3, %v10031_v24  ;;  %v3317_v15 = vpop.f32.mrb[25].mxu1  ;;  %7991 = vmatpush3.bf16.msra.mxu0 %v8922_v22  ;;  %v10087_v1 = vld [vmem:[#allocation2 + $0x12] sm:$0xff] }
 0x32e   : > { %v10069_v4 = vld [vmem:[#allocation2 + $0x20] sm:$0xff]  ;;  %3559 = vst [vmem:[#allocation2 + $0x61] sm:$0xff] %v3525_v63  ;;  %v3458_v23 = vmul.f32 %v10031_v24, %v3317_v15  ;;  %v7919_v31 = vpop.f32.mrb[26].mxu1  ;;  %7960 = vmatprep.mubr.bf16.mxu0 %v3684_v6  ;;  %v3685_v21 = vpack.c.bf16 %v3526_v53, %v3525_v63  ;;  %7992 = vmatprep.subr.bf16.mxu0 %v8923_v56  ;;  %v10093_v43 = vld [vmem:[#allocation2 + $0x31] sm:$0xff]  ;;  %v8926_v53 = vld [vmem:[%s10987_s6 + $0x28] sm:$0xff]  }
 0x32f   : > { %v10071_v16 = vld [vmem:[#allocation2 + $0x22] sm:$0xff]  ;;  %v3498_v29 = vadd.f32 %v10036_v27, %v3460_v12  ;;  %v3461_v47 = vmul.f32 %v7919_v31, %v10031_v24  ;;  %v3320_v45 = vpop.f32.mrb[27].mxu1 }
 0x330   : > { %v10083_v38 = vld [vmem:[#allocation2 + $0x21] sm:$0xff]  ;;  %v3496_v52 = vadd.f32 %v10036_v27, %v3458_v23  ;;  %v3459_v40 = vmul.f32 %v10031_v24, %v3320_v45  ;;  %7961 = vmatmul.mubr.bf16.gmra.mrb[20].mxu0 %v3685_v21  ;;  %v8927_v45 = vld [vmem:[%s10987_s6 + $0x30] sm:$0xff]  }
 0x331   : > { %v3530_v48 = vmax.f32 %v3498_v29, 0.0  ;;  %v3499_v57 = vadd.f32 %v10036_v27, %v3461_v47  ;;  %7993 = vmatpush3.bf16.msra.mxu0 %v8923_v56 }
 0x332   : > { %v3528_v49 = vmax.f32 %v3496_v52, 0.0  ;;  %v3497_v58 = vadd.f32 %v10036_v27, %v3459_v40  ;;  %7994 = vmatprep.subr.bf16.mxu0 %v8924_v50  ;;  %v10136_v52 = vld [vmem:[#allocation2 + $0x71] sm:$0xff] }
 0x333   : > { %3564 = vst [vmem:[#allocation2 + $0xd1] sm:$0xff] %v3530_v48  ;;  %v3531_v8 = vmax.f32 %v3499_v57, 0.0  ;;  %v10113_v18 = vld [vmem:[#allocation2 + $0x50] sm:$0xff]  ;;  %11202 = vst [vmem:[#allocation5_spill] sm:$0xff] %v10136_v52 }
 0x334   : > { %3562 = vst [vmem:[#allocation2 + $0xb1] sm:$0xff] %v3528_v49  ;;  %v3529_v9 = vmax.f32 %v3497_v58, 0.0  ;;  %v7922_v13 = vpop.f32.mrb[28].mxu1  ;;  %v3686_v62 = vpack.c.bf16 %v3528_v49, %v3658_v37  ;;  %v10117_v61 = vld [vmem:[#allocation2 + $0x52] sm:$0xff] }
 0x335   : > { %3565 = vst [vmem:[#allocation2 + $0xe1] sm:$0xff] %v3531_v8  ;;  %v3464_v19 = vmul.f32 %v7922_v13, %v10031_v24  ;;  %v3333_v22 = vpop.f32.mrb[29].mxu1  ;;  %7995 = vmatpush3.bf16.msra.mxu0 %v8924_v50  ;;  %v10105_v5 = vld [vmem:[#allocation2 + $0x60] sm:$0xff]  ;;  %v10121_v3 = vld [vmem:[#allocation2 + $0x51] sm:$0xff] }
 0x336   : > { %v10107_v32 = vld [vmem:[#allocation2 + $0x62] sm:$0xff]  ;;  %3563 = vst [vmem:[#allocation2 + $0xc1] sm:$0xff] %v3529_v9  ;;  %v3462_v26 = vmul.f32 %v10031_v24, %v3333_v22  ;;  %v7923_v33 = vpop.f32.mrb[30].mxu1  ;;  %7964 = vmatprep.mubr.bf16.mxu0 %v3686_v62  ;;  %v3687_v20 = vpack.c.bf16 %v3530_v48, %v3529_v9  ;;  %7996 = vmatprep.subr.bf16.mxu0 %v8925_v59  ;;  %11200 = vst [vmem:[#allocation3_spill] sm:$0xff] %v10121_v3 }
 0x337   : > { %v3502_v54 = vadd.f32 %v10036_v27, %v3464_v19  ;;  %v3465_v55 = vmul.f32 %v7923_v33, %v10031_v24  ;;  %v3336_v56 = vpop.f32.mrb[31].mxu1  ;;  %v10125_v15 = vld [vmem:[#allocation2 + $0x61] sm:$0xff] }
 0x338   : > { %v3500_v6 = vadd.f32 %v10036_v27, %v3462_v26  ;;  %v3463_v12 = vmul.f32 %v10031_v24, %v3336_v56  ;;  %7965 = vmatmul.mubr.bf16.gmra.mrb[24].mxu0 %v3687_v20  ;;  %11201 = vst [vmem:[#allocation4_spill] sm:$0xff] %v10125_v15  ;;  %v10130_v50 = vld [vmem:[#allocation2 + $0x41] sm:$0xff] }
 0x339   : > { %v3534_v31 = vmax.f32 %v3502_v54, 0.0  ;;  %v3503_v21 = vadd.f32 %v10036_v27, %v3465_v55  ;;  %7997 = vmatpush3.bf16.msra.mxu0 %v8925_v59 }
 0x33a   : > { %v3532_v29 = vmax.f32 %v3500_v6, 0.0  ;;  %v3501_v47 = vadd.f32 %v10036_v27, %v3463_v12  ;;  %7998 = vmatprep.subr.bf16.mxu0 %v8926_v53  ;;  %v10140_v57 = vld [vmem:[#allocation2 + $0xd0] sm:$0xff] }
 0x33b   : > { %3568 = vst [vmem:[#allocation2 + $0x111] sm:$0xff] %v3534_v31  ;;  %v3535_v48 = vmax.f32 %v3503_v21, 0.0  ;;  %v10146_v13 = vld [vmem:[#allocation2 + $0xd2] sm:$0xff] }
 0x33c   : > { %3566 = vst [vmem:[#allocation2 + $0xf1] sm:$0xff] %v3532_v29  ;;  %v3533_v49 = vmax.f32 %v3501_v47, 0.0  ;;  %v7926_v58 = vpop.f32.mrb[32].mxu1  ;;  %v3688_v59 = vpack.c.bf16 %v3532_v29, %v3531_v8  ;;  %v10144_v9 = vld [vmem:[#allocation2 + $0xe0] sm:$0xff]  ;;  %v10163_v6 = vld [vmem:[#allocation2 + $0xb0] sm:$0xff] }
 0x33d   : > { %v10148_v62 = vld [vmem:[#allocation2 + $0xe2] sm:$0xff]  ;;  %3569 = vst [vmem:[#allocation2 + $0x121] sm:$0xff] %v3535_v48  ;;  %v3468_v19 = vmul.f32 %v7926_v58, %v10031_v24  ;;  %v3349_v22 = vpop.f32.mrb[33].mxu1  ;;  %7999 = vmatpush3.bf16.msra.mxu0 %v8926_v53  ;;  %v8928_v53 = vld [vmem:[%s10987_s6 + $0x38] sm:$0xff]  }
 0x33e   : > { %v10151_v26 = vld [vmem:[#allocation2 + $0xc0] sm:$0xff]  ;;  %3567 = vst [vmem:[#allocation2 + $0x101] sm:$0xff] %v3533_v49  ;;  %v3466_v54 = vmul.f32 %v10031_v24, %v3349_v22  ;;  %v7927_v55 = vpop.f32.mrb[34].mxu1  ;;  %7968 = vmatprep.mubr.bf16.mxu0 %v3688_v59  ;;  %v3689_v56 = vpack.c.bf16 %v3534_v31, %v3533_v49  ;;  %8000 = vmatprep.subr.bf16.mxu0 %v8927_v45  ;;  %v10169_v48 = vld [vmem:[#allocation2 + $0xb2] sm:$0xff] }
 0x33f   : > { %v10153_v33 = vld [vmem:[#allocation2 + $0xc2] sm:$0xff]  ;;  %v3506_v21 = vadd.f32 %v10036_v27, %v3468_v19  ;;  %v3469_v29 = vmul.f32 %v7927_v55, %v10031_v24  ;;  %v3352_v47 = vpop.f32.mrb[35].mxu1  ;;  %v10175_v59 = vld [vmem:[#allocation2 + $0xd1] sm:$0xff] }
 0x340   : > { %v10165_v12 = vld [vmem:[#allocation2 + $0xc1] sm:$0xff]  ;;  %v3504_v31 = vadd.f32 %v10036_v27, %v3466_v54  ;;  %v3467_v49 = vmul.f32 %v10031_v24, %v3352_v47  ;;  %7969 = vmatmul.mubr.bf16.gmra.mrb[28].mxu0 %v3689_v56  ;;  %11204 = vst [vmem:[#allocation18_spill] sm:$0xff] %v10175_v59 }
 0x341   : > { %11203 = vst [vmem:[#allocation6_spill] sm:$0xff] %v10165_v12  ;;  %v3538_v37 = vmax.f32 %v3506_v21, 0.0  ;;  %v3507_v19 = vadd.f32 %v10036_v27, %v3469_v29  ;;  %v3666_v55 = vld [vmem:[#allocation2 + $0x141] sm:$0xff]  ;;  %8001 = vmatpush3.bf16.msra.mxu0 %v8927_v45 }
 0x342   : > { %v3536_v60 = vmax.f32 %v3504_v31, 0.0  ;;  %v3505_v8 = vadd.f32 %v10036_v27, %v3467_v49  ;;  %8002 = vmatprep.subr.bf16.mxu0 %v8928_v53  ;;  %v10186_v54 = vld [vmem:[%s10987_s6 + $0x80] sm:$0xff]   ;;  %v10215_v63 = vld [vmem:[#allocation2 + $0x111] sm:$0xff] }
 0x343   : > { %3572 = vst [vmem:[#allocation2 + $0x171] sm:$0xff] %v3538_v37  ;;  %v3539_v56 = vmax.f32 %v3507_v19, 0.0  ;;  %v10203_v34 = vld [vmem:[#allocation2 + $0xf1] sm:$0xff]  ;;  %v10212_v20 = vld [vmem:[#allocation2 + $0xe1] sm:$0xff]  ;;  %11209 = vst [vmem:[#allocation26_spill] sm:$0xff] %v10215_v63 }
 0x344   : > { %3570 = vst [vmem:[#allocation2 + $0x151] sm:$0xff] %v3536_v60  ;;  %v3537_v21 = vmax.f32 %v3505_v8, 0.0  ;;  %v7930_v47 = vpop.f32.mrb[36].mxu1  ;;  %v3690_v29 = vpack.c.bf16 %v3536_v60, %v3666_v55  ;;  %v10195_v8 = vld [vmem:[#allocation2 + $0xf0] sm:$0xff]  ;;  %11206 = vst [vmem:[#allocation21_spill] sm:$0xff] %v10203_v34 }
 0x345   : > { %3573 = vst [vmem:[#allocation2 + $0x181] sm:$0xff] %v3539_v56  ;;  %v3472_v45 = vmul.f32 %v7930_v47, %v10031_v24  ;;  %v3365_v22 = vpop.f32.mrb[37].mxu1  ;;  %8003 = vmatpush3.bf16.msra.mxu0 %v8928_v53  ;;  %v10189_v31 = vld [vmem:[#allocation2 + $0x100] sm:$0xff]  ;;  %v10199_v53 = vld [vmem:[#allocation2 + $0xf2] sm:$0xff]  ;;  %11208 = vst [vmem:[#allocation23_spill] sm:$0xff] %v10212_v20 }
 0x346   : > { %v10191_v49 = vld [vmem:[#allocation2 + $0x102] sm:$0xff]  ;;  %3571 = vst [vmem:[#allocation2 + $0x161] sm:$0xff] %v3537_v21  ;;  %v3470_v40 = vmul.f32 %v10031_v24, %v3365_v22  ;;  %v7931_v23 = vpop.f32.mrb[38].mxu1  ;;  %7972 = vmatprep.mubr.bf16.mxu0 %v3690_v29  ;;  %v3691_v36 = vpack.c.bf16 %v3538_v37, %v3537_v21  ;;  %8036 = vmatprep.subr.bf16.mxu0 %v10186_v54  ;;  %11205 = vst [vmem:[#allocation20_spill] sm:$0xff] %v10199_v53 }
 0x347   : > { %v3510_v60 = vadd.f32 %v10036_v27, %v3472_v45  ;;  %v3473_v19 = vmul.f32 %v7931_v23, %v10031_v24  ;;  %v3368_v55 = vpop.f32.mrb[39].mxu1  ;;  %v10207_v21 = vld [vmem:[#allocation2 + $0x101] sm:$0xff] }
 0x348   : > { %v3508_v22 = vadd.f32 %v10036_v27, %v3470_v40  ;;  %v3471_v37 = vmul.f32 %v10031_v24, %v3368_v55  ;;  %7973 = vmatmul.mubr.bf16.gmra.mrb[32].mxu0 %v3691_v36  ;;  %11207 = vst [vmem:[#allocation22_spill] sm:$0xff] %v10207_v21 }
 0x349   : > { %v3542_v45 = vmax.f32 %v3510_v60, 0.0  ;;  %v3511_v23 = vadd.f32 %v10036_v27, %v3473_v19 }
 0x34a   : > { %v3540_v58 = vmax.f32 %v3508_v22, 0.0  ;;  %v3509_v47 = vadd.f32 %v10036_v27, %v3471_v37  ;;  %v10219_v55 = vld [vmem:[#allocation2 + $0x170] sm:$0xff] }
 0x34b   : > { %3576 = vst [vmem:[#allocation2 + $0x1b1] sm:$0xff] %v3542_v45  ;;  %v3543_v36 = vmax.f32 %v3511_v23, 0.0  ;;  %v10227_v37 = vld [vmem:[#allocation2 + $0x172] sm:$0xff] }
 0x34c   : > { %3574 = vst [vmem:[#allocation2 + $0x191] sm:$0xff] %v3540_v58  ;;  %v10223_v60 = vmax.f32 %v3509_v47, 0.0  ;;  %v7934_v19 = vpop.f32.mrb[40].mxu1  ;;  %v3692_v17 = vpack.c.bf16 %v3540_v58, %v3539_v56  ;;  %v10225_v22 = vld [vmem:[#allocation2 + $0x180] sm:$0xff]  ;;  %v10249_v35 = vld [vmem:[#allocation2 + $0x152] sm:$0xff] }
 0x34d   : > { %v10229_v14 = vld [vmem:[#allocation2 + $0x182] sm:$0xff]  ;;  %3577 = vst [vmem:[#allocation2 + $0x1c1] sm:$0xff] %v3543_v36  ;;  %v3476_v40 = vmul.f32 %v7934_v19, %v10031_v24  ;;  %v3381_v23 = vpop.f32.mrb[41].mxu1  ;;  %v10243_v19 = vld [vmem:[#allocation2 + $0x150] sm:$0xff] }
 0x34e   : > { %11210 = vst [vmem:[#allocation27_spill] sm:$0xff] %v10223_v60  ;;  %v10232_v28 = vld [vmem:[#allocation2 + $0x160] sm:$0xff]  ;;  %3575 = vst [vmem:[#allocation2 + $0x1a1] sm:$0xff] %v10223_v60  ;;  %v3474_v56 = vmul.f32 %v10031_v24, %v3381_v23  ;;  %v7935_v29 = vpop.f32.mrb[42].mxu1  ;;  %7976 = vmatprep.mubr.bf16.mxu0 %v3692_v17  ;;  %v3693_v36 = vpack.c.bf16 %v3542_v45, %v10223_v60  ;;  %v10255_v45 = vld [vmem:[#allocation2 + $0x171] sm:$0xff] }
 0x34f   : > { %v10234_v41 = vld [vmem:[#allocation2 + $0x162] sm:$0xff]  ;;  %v3514_v30 = vadd.f32 %v10036_v27, %v3476_v40  ;;  %v3477_v7 = vmul.f32 %v7935_v29, %v10031_v24  ;;  %v3384_v47 = vpop.f32.mrb[43].mxu1  ;;  %11212 = vst [vmem:[#allocation30_spill] sm:$0xff] %v10255_v45 }
 0x350   : > { %v10245_v46 = vld [vmem:[#allocation2 + $0x161] sm:$0xff]  ;;  %v3512_v23 = vadd.f32 %v10036_v27, %v3474_v56  ;;  %v3475_v17 = vmul.f32 %v10031_v24, %v3384_v47  ;;  %7977 = vmatmul.mubr.bf16.gmra.mrb[36].mxu0 %v3693_v36 }
 0x351   : > { %11211 = vst [vmem:[#allocation28_spill] sm:$0xff] %v10245_v46  ;;  %v3546_v2 = vmax.f32 %v3514_v30, 0.0  ;;  %v3515_v40 = vadd.f32 %v10036_v27, %v3477_v7  ;;  %v3674_v29 = vld [vmem:[#allocation2 + $0x1e1] sm:$0xff] }
 0x352   : > { %v10264_v58 = vmax.f32 %v3512_v23, 0.0  ;;  %v3513_v56 = vadd.f32 %v10036_v27, %v3475_v17 }
 0x353   : > { %3580 = vst [vmem:[#allocation2 + $0x211] sm:$0xff] %v3546_v2  ;;  %v10267_v47 = vmax.f32 %v3515_v40, 0.0  ;;  %v10282_v45 = vld [vmem:[#allocation2 + $0x190] sm:$0xff] }
 0x354   : > { %11214 = vst [vmem:[#allocation32_spill] sm:$0xff] %v10264_v58  ;;  %3578 = vst [vmem:[#allocation2 + $0x1f1] sm:$0xff] %v10264_v58  ;;  %v10270_v36 = vmax.f32 %v3513_v56, 0.0  ;;  %v7938_v30 = vpop.f32.mrb[44].mxu1  ;;  %v3694_v7 = vpack.c.bf16 %v10264_v58, %v3674_v29  ;;  %v10286_v63 = vld [vmem:[#allocation2 + $0x192] sm:$0xff] }
 0x355   : > { %11215 = vst [vmem:[#allocation33_spill] sm:$0xff] %v10267_v47  ;;  %3581 = vst [vmem:[#allocation2 + $0x221] sm:$0xff] %v10267_v47  ;;  %v3480_v44 = vmul.f32 %v7938_v30, %v10031_v24  ;;  %v3397_v0 = vpop.f32.mrb[45].mxu1  ;;  %v10275_v60 = vld [vmem:[#allocation2 + $0x1a0] sm:$0xff] }
 0x356   : > { %11216 = vst [vmem:[#allocation36_spill] sm:$0xff] %v10270_v36  ;;  %v10277_v23 = vld [vmem:[#allocation2 + $0x1a2] sm:$0xff]  ;;  %3579 = vst [vmem:[#allocation2 + $0x201] sm:$0xff] %v10270_v36  ;;  %v3478_v17 = vmul.f32 %v10031_v24, %v3397_v0  ;;  %v7939_v40 = vpop.f32.mrb[46].mxu1  ;;  %7980 = vmatprep.mubr.bf16.mxu0 %v3694_v7  ;;  %v3695_v56 = vpack.c.bf16 %v3546_v2, %v10270_v36  ;;  %v10294_v2 = vpop.f32.mrb[1].mxu0 }
 0x357   : > { %v3518_v29 = vadd.f32 %v10036_v27, %v3480_v44  ;;  %v3481_v46 = vmul.f32 %v7939_v40, %v10031_v24  ;;  %v3400_v30 = vpop.f32.mrb[47].mxu1  ;;  %11217 = vst [vmem:[#allocation37_spill] sm:$0xff] %v10294_v2  ;;  %v10299_v59 = vpop.f32.mrb[2].mxu0  ;;  %v10341_v36 = vld [vmem:[#allocation2 + $0x181] sm:$0xff] }
 0x358   : > { %v3516_v0 = vadd.f32 %v10036_v27, %v3478_v17  ;;  %v3479_v7 = vmul.f32 %v10031_v24, %v3400_v30  ;;  %7981 = vmatmul.mubr.bf16.gmra.mrb[40].mxu0 %v3695_v56  ;;  %11218 = vst [vmem:[#allocation38_spill] sm:$0xff] %v10299_v59  ;;  %v10304_v34 = vpop.f32.mrb[3].mxu0  ;;  %v10310_v30 = vld [vmem:[#allocation2 + $0x191] sm:$0xff]  ;;  %11225 = vst [vmem:[#allocation49_spill] sm:$0xff] %v10341_v36  ;;  %v3619_v59 = vpack.c.bf16 %v10060_v42, %v10069_v4 }
 0x359   : > { %v3550_v40 = vmax.f32 %v3518_v29, 0.0  ;;  %v3519_v20 = vadd.f32 %v10036_v27, %v3481_v46  ;;  %11220 = vst [vmem:[#allocation41_spill] sm:$0xff] %v10304_v34  ;;  %v10308_v56 = vpop.f32.mrb[4].mxu0  ;;  %11222 = vst [vmem:[#allocation43_spill] sm:$0xff] %v10310_v30 }
 0x35a   : > { %v10301_v12 = vmax.f32 %v3516_v0, 0.0  ;;  %v3517_v21 = vadd.f32 %v10036_v27, %v3479_v7  ;;  %v10306_v24 = vld [vmem:[#allocation2 + $0x210] sm:$0xff]  ;;  %11221 = vst [vmem:[#allocation42_spill] sm:$0xff] %v10308_v56 }
 0x35b   : > { %3584 = vst [vmem:[#allocation2 + $0x251] sm:$0xff] %v3550_v40  ;;  %v3551_v17 = vmax.f32 %v3519_v20, 0.0  ;;  %v10319_v27 = vld [vmem:[#allocation2 + $0x212] sm:$0xff] }
 0x35c   : > { %11219 = vst [vmem:[#allocation40_spill] sm:$0xff] %v10301_v12  ;;  %3582 = vst [vmem:[#allocation2 + $0x231] sm:$0xff] %v10301_v12  ;;  %v10313_v29 = vmax.f32 %v3517_v21, 0.0  ;;  %v3696_v46 = vpack.c.bf16 %v10301_v12, %v10267_v47  ;;  %v10317_v0 = vld [vmem:[#allocation2 + $0x220] sm:$0xff]  ;;  %v10323_v20 = vld [vmem:[#allocation2 + $0x1f0] sm:$0xff]  ;;  %v3618_v21 = vpack.c.bf16 %v10081_v51, %v9901_v39 }
 0x35d   : > { %v10321_v7 = vld [vmem:[#allocation2 + $0x222] sm:$0xff]  ;;  %3585 = vst [vmem:[#allocation2 + $0x261] sm:$0xff] %v3551_v17  ;;  %v10331_v34 = vpack.c.bf16 %v3551_v17, %v3550_v40  ;;  %v10337_v47 = vld [vmem:[#allocation2 + $0x1f2] sm:$0xff] }
 0x35e   : > { %11223 = vst [vmem:[#allocation46_spill] sm:$0xff] %v10313_v29  ;;  %v10325_v44 = vld [vmem:[#allocation2 + $0x200] sm:$0xff]  ;;  %3583 = vst [vmem:[#allocation2 + $0x241] sm:$0xff] %v10313_v29  ;;  %7984 = vmatprep.mubr.bf16.mxu0 %v3696_v46  ;;  %v3697_v2 = vpack.c.bf16 %v3550_v40, %v10313_v29  ;;  %v10351_v40 = vpop.f32.mrb[5].mxu0  ;;  %v8931_v12 = vld [vmem:[%s10987_s6 + $0x90] sm:$0xff]  }
 0x35f   : > { %v10327_v56 = vld [vmem:[#allocation2 + $0x202] sm:$0xff]  ;;  %11224 = vst [vmem:[#allocation47_spill] sm:$0xff] %v10331_v34  ;;  %11226 = vst [vmem:[#allocation50_spill] sm:$0xff] %v10351_v40  ;;  %v10353_v34 = vpop.f32.mrb[6].mxu0  ;;  %v10388_v46 = vld [vmem:[#allocation2 + $0x70] sm:$0xff] }
 0x360   : > { %7985 = vmatmul.mubr.bf16.gmra.mrb[44].mxu0 %v3697_v2  ;;  %11227 = vst [vmem:[#allocation51_spill] sm:$0xff] %v10353_v34  ;;  %v10355_v58 = vpop.f32.mrb[7].mxu0  ;;  %v8930_v2 = vld [vmem:[%s10987_s6 + $0x88] sm:$0xff]  }
 0x361   : > { %8004 = vmatprep.mubr.bf16.mxu0 %v3618_v21  ;;  %11228 = vst [vmem:[#allocation54_spill] sm:$0xff] %v10355_v58  ;;  %v3620_v58 = vpack.c.bf16 %v10113_v18, %v10062_v10  ;;  %v10376_v34 = vpop.f32.mrb[8].mxu0 }
 0x362   : > { %11229 = vst [vmem:[#allocation7_spill] sm:$0xff] %v10376_v34  ;;  %v10379_v40 = vpop.f32.mrb[9].mxu0 }
 0x363   : > { %v10357_v52 = vld [vmem:[#allocation2 + $0x230] sm:$0xff]  ;;  %11230 = vst [vmem:[#allocation8_spill] sm:$0xff] %v10379_v40  ;;  %v10384_v21 = vpop.f32.mrb[10].mxu0 }
 0x364   : > { %v10361_v3 = vld [vmem:[#allocation2 + $0x232] sm:$0xff]  ;;  %11231 = vst [vmem:[#allocation9_spill] sm:$0xff] %v10384_v21  ;;  %v10386_v29 = vpop.f32.mrb[11].mxu0 }
 0x365   : > { %v10359_v15 = vld [vmem:[#allocation2 + $0x240] sm:$0xff]  ;;  %11232 = vst [vmem:[#allocation10_spill] sm:$0xff] %v10386_v29  ;;  %v10397_v21 = vpop.f32.mrb[12].mxu0 }
 0x366   : > { %v10363_v17 = vld [vmem:[#allocation2 + $0x242] sm:$0xff]  ;;  %11233 = vst [vmem:[#allocation11_spill] sm:$0xff] %v10397_v21  ;;  %v10402_v29 = vpop.f32.mrb[13].mxu0  ;;  %v10436_v21 = vld [vmem:[#allocation2 + $0x1b0] sm:$0xff] }
 0x367   : > { %11234 = vst [vmem:[#allocation12_spill] sm:$0xff] %v10402_v29  ;;  %v10404_v40 = vpop.f32.mrb[14].mxu0  ;;  %v10425_v29 = vld [vmem:[#allocation2] sm:$0xff] }
 0x368   : > { %8005 = vmatmul.mubr.bf16.vlgmr.msra.gmra.mrb[16].mxu0 %v3619_v59  ;;  %v3621_v59 = vpack.c.bf16 %v10388_v46, %v10105_v5  ;;  %11235 = vst [vmem:[#allocation13_spill] sm:$0xff] %v10404_v40  ;;  %v10406_v34 = vpop.f32.mrb[15].mxu0  ;;  %v8936_v40 = vld [vmem:[%s10987_s6 + $0xb8] sm:$0xff]   ;;  %11237 = vst [vmem:[#allocation15_spill] sm:$0xff] %v10425_v29 }
 0x369   : > { %8037 = vmatpush3.bf16.msra.mxu0 %v10186_v54  ;;  %8008 = vmatprep.mubr.bf16.mxu0 %v3620_v58  ;;  %v8932_v54 = vld [vmem:[%s10987_s6 + $0x98] sm:$0xff]   ;;  %v3622_v58 = vpack.c.bf16 %v10163_v6, %v9901_v39  ;;  %11236 = vst [vmem:[#allocation14_spill] sm:$0xff] %v10406_v34  ;;  %v3623_v39 = vpack.c.bf16 %v10140_v57, %v10151_v26 }
 0x36a   : > { %8038 = vmatprep.subr.bf16.mxu0 %v8930_v2 }
 0x36d   : > { %8039 = vmatpush3.bf16.msra.mxu0 %v8930_v2  ;;  %v8933_v2 = vld [vmem:[%s10987_s6 + $0xa0] sm:$0xff]  }
 0x36e   : > { %8040 = vmatprep.subr.bf16.mxu0 %v8931_v12 }
 0x370   : > { %8009 = vmatmul.mubr.bf16.gmra.mrb[20].mxu0 %v3621_v59  ;;  %v3624_v59 = vpack.c.bf16 %v10195_v8, %v10144_v9 }
 0x371   : > { %8012 = vmatprep.mubr.bf16.mxu0 %v3622_v58  ;;  %8041 = vmatpush3.bf16.msra.mxu0 %v8931_v12  ;;  %v8934_v12 = vld [vmem:[%s10987_s6 + $0xa8] sm:$0xff]   ;;  %v8935_v58 = vld [vmem:[%s10987_s6 + $0xb0] sm:$0xff]  }
 0x372   : > { %8042 = vmatprep.subr.bf16.mxu0 %v8932_v54 }
 0x375   : > { %8043 = vmatpush3.bf16.msra.mxu0 %v8932_v54  ;;  %v10418_v54 = vld [vmem:[#allocation2 + $0x110] sm:$0xff] }
 0x376   : > { %8044 = vmatprep.subr.bf16.mxu0 %v8933_v2  ;;  %v3625_v34 = vpack.c.bf16 %v10418_v54, %v10189_v31 }
 0x378   : > { %8013 = vmatmul.mubr.bf16.gmra.mrb[24].mxu0 %v3623_v39  ;;  %v8937_v39 = vld [vmem:[%s10987_s6 + $0xc0] sm:$0xff]  }
 0x379   : > { %8016 = vmatprep.mubr.bf16.mxu0 %v3624_v59  ;;  %8045 = vmatpush3.bf16.msra.mxu0 %v8933_v2  ;;  %v3626_v2 = vpack.c.bf16 %v10243_v19, %v10425_v29  ;;  %v3628_v59 = vpack.c.bf16 %v10282_v45, %v10225_v22 }
 0x37a   : > { %8046 = vmatprep.subr.bf16.mxu0 %v8934_v12 }
 0x37d   : > { %8047 = vmatpush3.bf16.msra.mxu0 %v8934_v12  ;;  %v3627_v12 = vpack.c.bf16 %v10219_v55, %v10232_v28 }
 0x37e   : > { %8048 = vmatprep.subr.bf16.mxu0 %v8935_v58 }
 0x380   : > { %8017 = vmatmul.mubr.bf16.gmra.mrb[28].mxu0 %v3625_v34  ;;  %v3629_v34 = vpack.c.bf16 %v10436_v21, %v10275_v60 }
 0x381   : > { %8020 = vmatprep.mubr.bf16.mxu0 %v3626_v2  ;;  %8049 = vmatpush3.bf16.msra.mxu0 %v8935_v58  ;;  %v3630_v58 = vpack.c.bf16 %v10323_v20, %v10425_v29  ;;  %v3632_v2 = vpack.c.bf16 %v10357_v52, %v10317_v0  ;;  %v8940_v29 = vld [vmem:[%s10987_s6 + $0xd8] sm:$0xff]  }
 0x382   : > { %8050 = vmatprep.subr.bf16.mxu0 %v8936_v40 }
 0x385   : > { %8051 = vmatpush3.bf16.msra.mxu0 %v8936_v40  ;;  %v3631_v40 = vpack.c.bf16 %v10306_v24, %v10325_v44 }
 0x386   : > { %8084 = vmatprep.subr.bf16.mxu0 %v8937_v39 }
 0x388   : > { %8021 = vmatmul.mubr.bf16.gmra.mrb[32].mxu0 %v3627_v12  ;;  %v4133_v12 = vld [vmem:[#allocation2 + $0x2] sm:$0xff] }
 0x389   : > { %8024 = vmatprep.mubr.bf16.mxu0 %v3628_v59  ;;  %v10446_v59 = vld [vmem:[#allocation2 + $0x250] sm:$0xff]  ;;  %v4165_v36 = vpack.c.bf16 %v10087_v1, %v4133_v12 }
 0x38a   : > { %v3633_v30 = vpack.c.bf16 %v10446_v59, %v10359_v15 }
 0x390   : > { %8025 = vmatmul.mubr.bf16.gmra.mrb[36].mxu0 %v3629_v34  ;;  %v4166_v34 = vpack.c.bf16 %v10064_v25, %v10071_v16 }
 0x391   : > { %8028 = vmatprep.mubr.bf16.mxu0 %v3630_v58  ;;  %v8938_v58 = vld [vmem:[%s10987_s6 + $0xc8] sm:$0xff]  }
 0x398   : > { %8029 = vmatmul.mubr.bf16.gmra.mrb[40].mxu0 %v3631_v40  ;;  %v4167_v40 = vpack.c.bf16 %v10117_v61, %v10066_v11 }
 0x399   : > { %8032 = vmatprep.mubr.bf16.mxu0 %v3632_v2  ;;  %v8939_v2 = vld [vmem:[%s10987_s6 + $0xd0] sm:$0xff]  }
 0x3a0   : > { %8033 = vmatmul.mubr.bf16.gmra.mrb[44].mxu0 %v3633_v30  ;;  %v4141_v30 = vld [vmem:[#allocation2 + $0xa2] sm:$0xff] }
 0x3a1   : > { %8052 = vmatprep.mubr.bf16.mxu0 %v4165_v36  ;;  %v10461_v36 = vld [vmem:[#allocation2 + $0x72] sm:$0xff] }
 0x3a2   : > { %v4168_v12 = vpack.c.bf16 %v10461_v36, %v10107_v32 }
 0x3a8   : > { %8053 = vmatmul.mubr.bf16.vlgmr.msra.gmra.mrb[16].mxu0 %v4166_v34  ;;  %v8941_v34 = vld [vmem:[%s10987_s6 + $0xe0] sm:$0xff]  }
 0x3a9   : > { %8085 = vmatpush3.bf16.msra.mxu0 %v8937_v39  ;;  %8056 = vmatprep.mubr.bf16.mxu0 %v4167_v40  ;;  %v4169_v39 = vpack.c.bf16 %v10169_v48, %v4141_v30  ;;  %v8942_v40 = vld [vmem:[%s10987_s6 + $0xe8] sm:$0xff]   ;;  %v4171_v30 = vpack.c.bf16 %v10199_v53, %v10148_v62  ;;  %v8944_v53 = vld [vmem:[%s10987_s6 + $0xf8] sm:$0xff]  }
 0x3aa   : > { %8086 = vmatprep.subr.bf16.mxu0 %v8938_v58 }
 0x3ad   : > { %8087 = vmatpush3.bf16.msra.mxu0 %v8938_v58  ;;  %v4170_v58 = vpack.c.bf16 %v10146_v13, %v10153_v33 }
 0x3ae   : > { %8088 = vmatprep.subr.bf16.mxu0 %v8939_v2 }
 0x3b0   : > { %8057 = vmatmul.mubr.bf16.gmra.mrb[20].mxu0 %v4168_v12  ;;  %v10482_v12 = vld [vmem:[#allocation2 + $0x112] sm:$0xff] }
 0x3b1   : > { %8060 = vmatprep.mubr.bf16.mxu0 %v4169_v39  ;;  %8089 = vmatpush3.bf16.msra.mxu0 %v8939_v2  ;;  %v8943_v2 = vld [vmem:[%s10987_s6 + $0xf0] sm:$0xff]   ;;  %11238 = vst [vmem:[#allocation16_spill] sm:$0xff] %v10482_v12  ;;  %v4172_v39 = vpack.c.bf16 %v10482_v12, %v10191_v49  ;;  %v4157_v12 = vld [vmem:[#allocation2 + $0x1e2] sm:$0xff] }
 0x3b2   : > { %8090 = vmatprep.subr.bf16.mxu0 %v8940_v29 }
 0x3b5   : > { %8091 = vmatpush3.bf16.msra.mxu0 %v8940_v29  ;;  %v4149_v29 = vld [vmem:[#allocation2 + $0x142] sm:$0xff] }
 0x3b6   : > { %8092 = vmatprep.subr.bf16.mxu0 %v8941_v34 }
 0x3b8   : > { %8061 = vmatmul.mubr.bf16.gmra.mrb[24].mxu0 %v4170_v58  ;;  %v4173_v58 = vpack.c.bf16 %v10249_v35, %v4149_v29  ;;  %v10497_v29 = vld [vmem:[#allocation2 + $0x1b2] sm:$0xff] }
 0x3b9   : > { %8064 = vmatprep.mubr.bf16.mxu0 %v4171_v30  ;;  %8093 = vmatpush3.bf16.msra.mxu0 %v8941_v34  ;;  %v8945_v34 = vld [vmem:[%s10987_s6 + $0x100] sm:$0xff]   ;;  %v4175_v30 = vpack.c.bf16 %v10286_v63, %v10229_v14  ;;  %11239 = vst [vmem:[#allocation17_spill] sm:$0xff] %v10497_v29 }
 0x3ba   : > { %8094 = vmatprep.subr.bf16.mxu0 %v8942_v40 }
 0x3bd   : > { %8095 = vmatpush3.bf16.msra.mxu0 %v8942_v40  ;;  %v4174_v40 = vpack.c.bf16 %v10227_v37, %v10234_v41 }
 0x3be   : > { %8096 = vmatprep.subr.bf16.mxu0 %v8943_v2 }
 0x3c0   : > { %8065 = vmatmul.mubr.bf16.gmra.mrb[28].mxu0 %v4172_v39  ;;  %v4177_v39 = vpack.c.bf16 %v10337_v47, %v4157_v12  ;;  %v8946_v12 = vld [vmem:[%s10987_s6 + $0x108] sm:$0xff]  }
 0x3c1   : > { %8068 = vmatprep.mubr.bf16.mxu0 %v4173_v58  ;;  %8097 = vmatpush3.bf16.msra.mxu0 %v8943_v2  ;;  %v4176_v2 = vpack.c.bf16 %v10497_v29, %v10277_v23  ;;  %v4179_v58 = vpack.c.bf16 %v10361_v3, %v10321_v7  ;;  %v11240_v29 = vpack.c.bf16 %v10069_v4, %v10081_v51  ;;  %v10525_v4 = vld [vmem:[#allocation2 + $0x80] sm:$0xff] }
 0x3c2   : > { %8098 = vmatprep.subr.bf16.mxu0 %v8944_v53  ;;  %v4474_v51 = vpack.c.bf16 %v10525_v4, %v10388_v46  ;;  %v11244_v46 = vpack.c.bf16 %v10144_v9, %v10140_v57  ;;  %v8952_v57 = vld [vmem:[%s10987_s6 + $0x138] sm:$0xff]   ;;  %v11246_v9 = vpack.c.bf16 %v10232_v28, %v10243_v19  ;;  %v11249_v19 = vpack.c.bf16 %v10325_v44, %v10323_v20  ;;  %v8955_v20 = vld [vmem:[%s10987_s6 + $0x150] sm:$0xff]  }
 0x3c3   : > { %v4778_v44 = vpack.c.bf16 %v10130_v50, %v10093_v43 }
 0x3c5   : > { %8099 = vmatpush3.bf16.msra.mxu0 %v8944_v53  ;;  %v4178_v53 = vpack.c.bf16 %v10319_v27, %v10327_v56 }
 0x3c6   : > { %8132 = vmatprep.subr.bf16.mxu0 %v8945_v34 }
 0x3c8   : > { %8069 = vmatmul.mubr.bf16.gmra.mrb[32].mxu0 %v4174_v40  ;;  %v10506_v40 = vld [vmem:[#allocation2 + $0x252] sm:$0xff] }
 0x3c9   : > { %8072 = vmatprep.mubr.bf16.mxu0 %v4175_v30  ;;  %v4180_v30 = vpack.c.bf16 %v10506_v40, %v10363_v17 }
 0x3d0   : > { %8073 = vmatmul.mubr.bf16.gmra.mrb[36].mxu0 %v4176_v2  ;;  %v11241_v2 = vpack.c.bf16 %v10062_v10, %v10060_v42  ;;  %v8948_v42 = vld [vmem:[%s10987_s6 + $0x118] sm:$0xff]   ;;  %v11243_v10 = vpack.c.bf16 %v10151_v26, %v10163_v6  ;;  %v11245_v26 = vpack.c.bf16 %v10189_v31, %v10195_v8  ;;  %v8951_v6 = vld [vmem:[%s10987_s6 + $0x130] sm:$0xff]   ;;  %v8953_v31 = vld [vmem:[%s10987_s6 + $0x140] sm:$0xff]   ;;  %v11247_v8 = vpack.c.bf16 %v10225_v22, %v10219_v55 }
 0x3d1   : > { %8076 = vmatprep.mubr.bf16.mxu0 %v4177_v39  ;;  %v11242_v39 = vpack.c.bf16 %v10105_v5, %v10113_v18  ;;  %v8949_v5 = vld [vmem:[%s10987_s6 + $0x120] sm:$0xff]   ;;  %v8950_v18 = vld [vmem:[%s10987_s6 + $0x128] sm:$0xff]   ;;  %v11251_v55 = vpack.c.bf16 %v10359_v15, %v10357_v52 }
 0x3d2   : > { %v11253_v15 = vld [vmem:[#allocation4_spill] sm:$0xff] }
 0x3d8   : > { %8077 = vmatmul.mubr.bf16.gmra.mrb[40].mxu0 %v4178_v53  ;;  %v8947_v53 = vld [vmem:[%s10987_s6 + $0x110] sm:$0xff]  }
 0x3d9   : > { %8080 = vmatprep.mubr.bf16.mxu0 %v4179_v58  ;;  %v10569_v58 = vld [vmem:[#allocation2 + $0x1c0] sm:$0xff] }
 0x3da   : > { %v4482_v28 = vpack.c.bf16 %v10569_v58, %v10436_v21 }
 0x3e0   : > { %8081 = vmatmul.mubr.bf16.gmra.mrb[44].mxu0 %v4180_v30  ;;  %v11250_v30 = vpack.c.bf16 %v10317_v0, %v10306_v24  ;;  %v8954_v24 = vld [vmem:[%s10987_s6 + $0x148] sm:$0xff]   ;;  %v11252_v0 = vld [vmem:[#allocation3_spill] sm:$0xff] }
 0x3e1   : > { %8100 = vmatprep.mubr.bf16.mxu0 %v11240_v29  ;;  %v4779_v52 = vpack.c.bf16 %v11253_v15, %v11252_v0 }
 0x3e8   : > { %8101 = vmatmul.mubr.bf16.vlgmr.msra.gmra.mrb[16].mxu0 %v11241_v2 }
 0x3e9   : > { %8133 = vmatpush3.bf16.msra.mxu0 %v8945_v34  ;;  %8104 = vmatprep.mubr.bf16.mxu0 %v11242_v39  ;;  %v10550_v34 = vld [vmem:[#allocation2 + $0x120] sm:$0xff]  ;;  %v4753_v39 = vld [vmem:[#allocation2 + $0xb1] sm:$0xff] }
 0x3ea   : > { %8134 = vmatprep.subr.bf16.mxu0 %v8946_v12  ;;  %v4478_v29 = vpack.c.bf16 %v10550_v34, %v10418_v54  ;;  %v11248_v54 = vpack.c.bf16 %v10275_v60, %v10282_v45  ;;  %v10582_v60 = vld [vmem:[#allocation2 + $0x260] sm:$0xff]  ;;  %v4745_v45 = vld [vmem:[#allocation2 + $0x11] sm:$0xff] }
 0x3eb   : > { %v4486_v22 = vpack.c.bf16 %v10582_v60, %v10446_v59  ;;  %v4777_v21 = vpack.c.bf16 %v10083_v38, %v4745_v45  ;;  %v10597_v59 = vld [vmem:[#allocation2 + $0x81] sm:$0xff]  ;;  %v11262_v45 = vld [vmem:[#allocation30_spill] sm:$0xff] }
 0x3ed   : > { %8135 = vmatpush3.bf16.msra.mxu0 %v8946_v12  ;;  %v11254_v12 = vld [vmem:[#allocation5_spill] sm:$0xff] }
 0x3ee   : > { %8136 = vmatprep.subr.bf16.mxu0 %v8947_v53  ;;  %v4780_v2 = vpack.c.bf16 %v10597_v59, %v11254_v12 }
 0x3f0   : > { %8105 = vmatmul.mubr.bf16.gmra.mrb[20].mxu0 %v4474_v51  ;;  %v11255_v51 = vld [vmem:[#allocation6_spill] sm:$0xff] }
 0x3f1   : > { %8108 = vmatprep.mubr.bf16.mxu0 %v11243_v10  ;;  %8137 = vmatpush3.bf16.msra.mxu0 %v8947_v53  ;;  %v8956_v53 = vld [vmem:[%s10987_s6 + $0x158] sm:$0xff]   ;;  %v8957_v10 = vld [vmem:[%s10987_s6 + $0x160] sm:$0xff]  }
 0x3f2   : > { %8138 = vmatprep.subr.bf16.mxu0 %v8948_v42 }
 0x3f5   : > { %8139 = vmatpush3.bf16.msra.mxu0 %v8948_v42  ;;  %v4781_v42 = vpack.c.bf16 %v11255_v51, %v4753_v39  ;;  %v10635_v39 = vld [vmem:[#allocation2 + $0x1b1] sm:$0xff] }
 0x3f6   : > { %8140 = vmatprep.subr.bf16.mxu0 %v8949_v5 }
 0x3f8   : > { %8109 = vmatmul.mubr.bf16.gmra.mrb[24].mxu0 %v11244_v46 }
 0x3f9   : > { %8112 = vmatprep.mubr.bf16.mxu0 %v11245_v26  ;;  %8141 = vmatpush3.bf16.msra.mxu0 %v8949_v5  ;;  %v11256_v5 = vld [vmem:[#allocation18_spill] sm:$0xff]  ;;  %v8958_v26 = vld [vmem:[%s10987_s6 + $0x168] sm:$0xff]  }
 0x3fa   : > { %8142 = vmatprep.subr.bf16.mxu0 %v8950_v18 }
 0x3fd   : > { %8143 = vmatpush3.bf16.msra.mxu0 %v8950_v18  ;;  %v11257_v18 = vld [vmem:[#allocation23_spill] sm:$0xff] }
 0x3fe   : > { %8144 = vmatprep.subr.bf16.mxu0 %v8951_v6  ;;  %v4782_v46 = vpack.c.bf16 %v11257_v18, %v11256_v5 }
 0x400   : > { %8113 = vmatmul.mubr.bf16.gmra.mrb[28].mxu0 %v4478_v29  ;;  %v11259_v29 = vld [vmem:[#allocation22_spill] sm:$0xff] }
 0x401   : > { %8116 = vmatprep.mubr.bf16.mxu0 %v11246_v9  ;;  %8145 = vmatpush3.bf16.msra.mxu0 %v8951_v6  ;;  %v11258_v6 = vld [vmem:[#allocation21_spill] sm:$0xff] }
 0x402   : > { %8146 = vmatprep.subr.bf16.mxu0 %v8952_v57  ;;  %v8959_v9 = vld [vmem:[%s10987_s6 + $0x170] sm:$0xff]  }
 0x405   : > { %8147 = vmatpush3.bf16.msra.mxu0 %v8952_v57  ;;  %v4783_v57 = vpack.c.bf16 %v11259_v29, %v11258_v6 }
 0x406   : > { %8180 = vmatprep.subr.bf16.mxu0 %v8953_v31 }
 0x408   : > { %8117 = vmatmul.mubr.bf16.gmra.mrb[32].mxu0 %v11247_v8  ;;  %v11260_v8 = vld [vmem:[#allocation26_spill] sm:$0xff] }
 0x409   : > { %8120 = vmatprep.mubr.bf16.mxu0 %v11248_v54 }
 0x410   : > { %8121 = vmatmul.mubr.bf16.gmra.mrb[36].mxu0 %v4482_v28  ;;  %v4761_v28 = vld [vmem:[#allocation2 + $0x151] sm:$0xff] }
 0x411   : > { %8124 = vmatprep.mubr.bf16.mxu0 %v11249_v19  ;;  %v8960_v19 = vld [vmem:[%s10987_s6 + $0x178] sm:$0xff]  }
 0x418   : > { %8125 = vmatmul.mubr.bf16.gmra.mrb[40].mxu0 %v11250_v30  ;;  %v11261_v30 = vld [vmem:[#allocation28_spill] sm:$0xff] }
 0x419   : > { %8128 = vmatprep.mubr.bf16.mxu0 %v11251_v55  ;;  %v4785_v55 = vpack.c.bf16 %v11261_v30, %v4761_v28  ;;  %v11271_v28 = vld [vmem:[#allocation40_spill] sm:$0xff] }
 0x420   : > { %8129 = vmatmul.mubr.bf16.gmra.mrb[44].mxu0 %v4486_v22  ;;  %v8961_v22 = vld [vmem:[%s10987_s6 + $0x180] sm:$0xff]  }
 0x421   : > { %8148 = vmatprep.mubr.bf16.mxu0 %v4777_v21  ;;  %v11263_v21 = vld [vmem:[#allocation49_spill] sm:$0xff] }
 0x428   : > { %8149 = vmatmul.mubr.bf16.vlgmr.msra.gmra.mrb[16].mxu0 %v4778_v44  ;;  %v4786_v44 = vpack.c.bf16 %v11263_v21, %v11262_v45 }
 0x429   : > { %8181 = vmatpush3.bf16.msra.mxu0 %v8953_v31  ;;  %8152 = vmatprep.mubr.bf16.mxu0 %v4779_v52  ;;  %v10618_v31 = vld [vmem:[#allocation2 + $0x121] sm:$0xff] }
 0x42a   : > { %8182 = vmatprep.subr.bf16.mxu0 %v8954_v24  ;;  %v4784_v54 = vpack.c.bf16 %v10618_v31, %v11260_v8  ;;  %v11265_v52 = vld [vmem:[#allocation27_spill] sm:$0xff] }
 0x42d   : > { %8183 = vmatpush3.bf16.msra.mxu0 %v8954_v24  ;;  %v11264_v24 = vld [vmem:[#allocation43_spill] sm:$0xff] }
 0x42e   : > { %8184 = vmatprep.subr.bf16.mxu0 %v8955_v20 }
 0x430   : > { %8153 = vmatmul.mubr.bf16.gmra.mrb[20].mxu0 %v4780_v2  ;;  %v10633_v2 = vld [vmem:[#allocation2 + $0x1c1] sm:$0xff] }
 0x431   : > { %8156 = vmatprep.mubr.bf16.mxu0 %v4781_v42  ;;  %8185 = vmatpush3.bf16.msra.mxu0 %v8955_v20  ;;  %v4787_v20 = vpack.c.bf16 %v11265_v52, %v11264_v24  ;;  %v11266_v42 = vld [vmem:[#allocation36_spill] sm:$0xff] }
 0x432   : > { %8186 = vmatprep.subr.bf16.mxu0 %v8956_v53  ;;  %v8962_v52 = vld [vmem:[%s10987_s6 + $0x188] sm:$0xff]  }
 0x435   : > { %8187 = vmatpush3.bf16.msra.mxu0 %v8956_v53  ;;  %v4788_v53 = vpack.c.bf16 %v10633_v2, %v10635_v39 }
 0x436   : > { %8188 = vmatprep.subr.bf16.mxu0 %v8957_v10 }
 0x438   : > { %8157 = vmatmul.mubr.bf16.gmra.mrb[24].mxu0 %v4782_v46 }
 0x439   : > { %8160 = vmatprep.mubr.bf16.mxu0 %v4783_v57  ;;  %8189 = vmatpush3.bf16.msra.mxu0 %v8957_v10  ;;  %v11267_v10 = vld [vmem:[#allocation32_spill] sm:$0xff]  ;;  %v11269_v57 = vld [vmem:[#allocation33_spill] sm:$0xff] }
 0x43a   : > { %8190 = vmatprep.subr.bf16.mxu0 %v8958_v26  ;;  %v11268_v46 = vpack.c.bf16 %v11266_v42, %v11267_v10  ;;  %v8963_v42 = vld [vmem:[%s10987_s6 + $0x190] sm:$0xff]   ;;  %v10690_v10 = vld [vmem:[#allocation2 + $0x122] sm:$0xff] }
 0x43d   : > { %8191 = vmatpush3.bf16.msra.mxu0 %v8958_v26  ;;  %v10642_v26 = vld [vmem:[#allocation2 + $0x211] sm:$0xff] }
 0x43e   : > { %8192 = vmatprep.subr.bf16.mxu0 %v8959_v9 }
 0x440   : > { %8161 = vmatmul.mubr.bf16.gmra.mrb[28].mxu0 %v4784_v54  ;;  %v11270_v54 = vld [vmem:[#allocation46_spill] sm:$0xff] }
 0x441   : > { %8164 = vmatprep.mubr.bf16.mxu0 %v4785_v55  ;;  %8193 = vmatpush3.bf16.msra.mxu0 %v8959_v9  ;;  %v4790_v9 = vpack.c.bf16 %v11269_v57, %v10642_v26  ;;  %v11273_v55 = vld [vmem:[#allocation47_spill] sm:$0xff] }
 0x442   : > { %8194 = vmatprep.subr.bf16.mxu0 %v8960_v19 }
 0x445   : > { %8195 = vmatpush3.bf16.msra.mxu0 %v8960_v19  ;;  %v11272_v19 = vpack.c.bf16 %v11270_v54, %v11271_v28  ;;  %v11284_v54 = vpack.c.bf16 %v10277_v23, %v10286_v63  ;;  %v10709_v28 = vld [vmem:[#allocation2 + $0x1c2] sm:$0xff] }
 0x446   : > { %8228 = vmatprep.subr.bf16.mxu0 %v8961_v22  ;;  %v10722_v63 = vld [vmem:[#allocation2 + $0x262] sm:$0xff] }
 0x447   : > { %v5098_v23 = vpack.c.bf16 %v10722_v63, %v10506_v40  ;;  %v5365_v40 = vld [vmem:[#allocation2 + $0xc0] sm:$0xff] }
 0x448   : > { %8165 = vmatmul.mubr.bf16.gmra.mrb[32].mxu0 %v4786_v44  ;;  %v11274_v44 = vpack.c.bf16 %v10071_v16, %v10087_v1  ;;  %v10665_v16 = vld [vmem:[#allocation2 + $0x82] sm:$0xff] }
 0x449   : > { %8168 = vmatprep.mubr.bf16.mxu0 %v4787_v20  ;;  %v11275_v20 = vpack.c.bf16 %v10066_v11, %v10064_v25  ;;  %v5086_v1 = vpack.c.bf16 %v10665_v16, %v10461_v36  ;;  %v8964_v25 = vld [vmem:[%s10987_s6 + $0x198] sm:$0xff]   ;;  %v11277_v11 = vpack.c.bf16 %v10153_v33, %v10169_v48  ;;  %v11278_v36 = vpack.c.bf16 %v10148_v62, %v10146_v13  ;;  %v8967_v48 = vld [vmem:[%s10987_s6 + $0x1b0] sm:$0xff]  }
 0x44a   : > { %v8968_v13 = vld [vmem:[%s10987_s6 + $0x1b8] sm:$0xff]   ;;  %v11282_v62 = vpack.c.bf16 %v10234_v41, %v10249_v35  ;;  %v11285_v35 = vld [vmem:[#allocation17_spill] sm:$0xff] }
 0x44b   : > { %v5094_v41 = vpack.c.bf16 %v10709_v28, %v11285_v35 }
 0x450   : > { %8169 = vmatmul.mubr.bf16.gmra.mrb[36].mxu0 %v4788_v53  ;;  %v11276_v53 = vpack.c.bf16 %v10107_v32, %v10117_v61  ;;  %v8965_v32 = vld [vmem:[%s10987_s6 + $0x1a0] sm:$0xff]   ;;  %v8966_v61 = vld [vmem:[%s10987_s6 + $0x1a8] sm:$0xff]  }
 0x451   : > { %8172 = vmatprep.mubr.bf16.mxu0 %v11268_v46  ;;  %v11281_v46 = vld [vmem:[#allocation16_spill] sm:$0xff] }
 0x452   : > { %v5090_v57 = vpack.c.bf16 %v10690_v10, %v11281_v46  ;;  %v8974_v46 = vld [vmem:[%s10987_s6 + $0x1e8] sm:$0xff]  }
 0x458   : > { %8173 = vmatmul.mubr.bf16.gmra.mrb[40].mxu0 %v4790_v9  ;;  %v11283_v9 = vpack.c.bf16 %v10229_v14, %v10227_v37  ;;  %v11288_v14 = vpack.c.bf16 %v10363_v17, %v10361_v3  ;;  %v5357_v37 = vld [vmem:[#allocation2 + $0x20] sm:$0xff]  ;;  %v8970_v3 = vld [vmem:[%s10987_s6 + $0x1c8] sm:$0xff]   ;;  %v8971_v17 = vld [vmem:[%s10987_s6 + $0x1d0] sm:$0xff]  }
 0x459   : > { %8176 = vmatprep.mubr.bf16.mxu0 %v11272_v19  ;;  %v11286_v19 = vpack.c.bf16 %v10327_v56, %v10337_v47  ;;  %v5360_v47 = vld [vmem:[#allocation2 + $0x50] sm:$0xff]  ;;  %v5361_v56 = vld [vmem:[#allocation2 + $0x60] sm:$0xff] }
 0x460   : > { %8177 = vmatmul.mubr.bf16.gmra.mrb[44].mxu0 %v11273_v55  ;;  %v11287_v55 = vpack.c.bf16 %v10321_v7, %v10319_v27  ;;  %v5362_v27 = vld [vmem:[#allocation2 + $0x70] sm:$0xff] }
 0x461   : > { %8196 = vmatprep.mubr.bf16.mxu0 %v11274_v44  ;;  %v5358_v44 = vld [vmem:[#allocation2 + $0x30] sm:$0xff]  ;;  %v5391_v7 = vpack.c.bf16 %v5362_v27, %v5361_v56  ;;  %v5383_v27 = vld [vmem:[#allocation2 + $0x220] sm:$0xff] }
 0x468   : > { %8197 = vmatmul.mubr.bf16.vlgmr.msra.gmra.mrb[16].mxu0 %v11275_v20  ;;  %v5359_v20 = vld [vmem:[#allocation2 + $0x40] sm:$0xff] }
 0x469   : > { %8229 = vmatpush3.bf16.msra.mxu0 %v8961_v22  ;;  %8200 = vmatprep.mubr.bf16.mxu0 %v11276_v53  ;;  %v11279_v22 = vld [vmem:[#allocation20_spill] sm:$0xff]  ;;  %v5390_v53 = vpack.c.bf16 %v5360_v47, %v5359_v20  ;;  %v5382_v47 = vld [vmem:[#allocation2 + $0x210] sm:$0xff] }
 0x46a   : > { %8230 = vmatprep.subr.bf16.mxu0 %v8962_v52  ;;  %v11280_v33 = vpack.c.bf16 %v10191_v49, %v11279_v22  ;;  %v8969_v49 = vld [vmem:[%s10987_s6 + $0x1c0] sm:$0xff]   ;;  %v5384_v20 = vld [vmem:[#allocation2 + $0x230] sm:$0xff] }
 0x46b   : > { %v5369_v22 = vld [vmem:[#allocation2 + $0x100] sm:$0xff] }
 0x46d   : > { %8231 = vmatpush3.bf16.msra.mxu0 %v8962_v52  ;;  %v5389_v52 = vpack.c.bf16 %v5358_v44, %v5357_v37  ;;  %v5378_v37 = vld [vmem:[#allocation2 + $0x1b0] sm:$0xff]  ;;  %v5381_v44 = vld [vmem:[#allocation2 + $0x200] sm:$0xff] }
 0x46e   : > { %8232 = vmatprep.subr.bf16.mxu0 %v8963_v42  ;;  %v5401_v56 = vpack.c.bf16 %v5382_v47, %v5381_v44  ;;  %v5981_v44 = vld [vmem:[#allocation2 + $0x102] sm:$0xff] }
 0x470   : > { %8201 = vmatmul.mubr.bf16.gmra.mrb[20].mxu0 %v5086_v1 }
 0x471   : > { %8204 = vmatprep.mubr.bf16.mxu0 %v11277_v11  ;;  %8233 = vmatpush3.bf16.msra.mxu0 %v8963_v42  ;;  %v11289_v42 = vld [vmem:[#allocation15_spill] sm:$0xff]  ;;  %v8972_v11 = vld [vmem:[%s10987_s6 + $0x1d8] sm:$0xff]  }
 0x472   : > { %8234 = vmatprep.subr.bf16.mxu0 %v8964_v25  ;;  %v5392_v1 = vpack.c.bf16 %v11289_v42, %v10525_v4 }
 0x475   : > { %8235 = vmatpush3.bf16.msra.mxu0 %v8964_v25  ;;  %v5366_v25 = vld [vmem:[#allocation2 + $0xd0] sm:$0xff] }
 0x476   : > { %8236 = vmatprep.subr.bf16.mxu0 %v8965_v32 }
 0x478   : > { %8205 = vmatmul.mubr.bf16.gmra.mrb[24].mxu0 %v11278_v36  ;;  %v5368_v36 = vld [vmem:[#allocation2 + $0xf0] sm:$0xff] }
 0x479   : > { %8208 = vmatprep.mubr.bf16.mxu0 %v11280_v33  ;;  %8237 = vmatpush3.bf16.msra.mxu0 %v8965_v32  ;;  %v5393_v32 = vpack.c.bf16 %v5366_v25, %v5365_v40  ;;  %v5367_v33 = vld [vmem:[#allocation2 + $0xe0] sm:$0xff]  ;;  %v5404_v40 = vpack.c.bf16 %v11289_v42, %v10582_v60  ;;  %v11291_v25 = vpack.c.bf16 %v11252_v0, %v10130_v50  ;;  %v8979_v60 = vld [vmem:[%s10987_s6 + $0x210] sm:$0xff]   ;;  %v8980_v50 = vld [vmem:[%s10987_s6 + $0x218] sm:$0xff]  }
 0x47a   : > { %8238 = vmatprep.subr.bf16.mxu0 %v8966_v61  ;;  %v5394_v4 = vpack.c.bf16 %v5368_v36, %v5367_v33  ;;  %v11293_v0 = vpack.c.bf16 %v11256_v5, %v11255_v51  ;;  %v11295_v51 = vpack.c.bf16 %v11260_v8, %v11259_v29  ;;  %v8983_v5 = vld [vmem:[%s10987_s6 + $0x230] sm:$0xff]   ;;  %v5683_v29 = vld [vmem:[#allocation2 + $0x1a1] sm:$0xff] }
 0x47b   : > { %v5705_v8 = vpack.c.bf16 %v10635_v39, %v5683_v29  ;;  %v5687_v36 = vld [vmem:[#allocation2 + $0x201] sm:$0xff] }
 0x47c   : > { %v5707_v33 = vpack.c.bf16 %v10642_v26, %v5687_v36  ;;  %v5693_v39 = vld [vmem:[#allocation2 + $0x261] sm:$0xff] }
 0x47d   : > { %8239 = vmatpush3.bf16.msra.mxu0 %v8966_v61  ;;  %v8973_v61 = vld [vmem:[%s10987_s6 + $0x1e0] sm:$0xff]  }
 0x47e   : > { %8240 = vmatprep.subr.bf16.mxu0 %v8967_v48  ;;  %v5973_v26 = vld [vmem:[#allocation2 + $0x62] sm:$0xff] }
 0x480   : > { %8209 = vmatmul.mubr.bf16.gmra.mrb[28].mxu0 %v5090_v57 }
 0x481   : > { %8212 = vmatprep.mubr.bf16.mxu0 %v11282_v62  ;;  %8241 = vmatpush3.bf16.msra.mxu0 %v8967_v48  ;;  %v5370_v48 = vld [vmem:[#allocation2 + $0x110] sm:$0xff]  ;;  %v5373_v62 = vld [vmem:[#allocation2 + $0x160] sm:$0xff] }
 0x482   : > { %8242 = vmatprep.subr.bf16.mxu0 %v8968_v13  ;;  %v5395_v57 = vpack.c.bf16 %v5370_v48, %v5369_v22 }
 0x485   : > { %8243 = vmatpush3.bf16.msra.mxu0 %v8968_v13  ;;  %v8975_v13 = vld [vmem:[%s10987_s6 + $0x1f0] sm:$0xff]  }
 0x486   : > { %8276 = vmatprep.subr.bf16.mxu0 %v8969_v49 }
 0x488   : > { %8213 = vmatmul.mubr.bf16.gmra.mrb[32].mxu0 %v11283_v9  ;;  %v5374_v9 = vld [vmem:[#allocation2 + $0x170] sm:$0xff] }
 0x489   : > { %8216 = vmatprep.mubr.bf16.mxu0 %v11284_v54  ;;  %v8976_v54 = vld [vmem:[%s10987_s6 + $0x1f8] sm:$0xff]   ;;  %v5397_v35 = vpack.c.bf16 %v5374_v9, %v5373_v62  ;;  %v5971_v9 = vld [vmem:[#allocation2 + $0x42] sm:$0xff] }
 0x48a   : > { %v5970_v62 = vld [vmem:[#allocation2 + $0x32] sm:$0xff] }
 0x490   : > { %8217 = vmatmul.mubr.bf16.gmra.mrb[36].mxu0 %v5094_v41  ;;  %v8977_v41 = vld [vmem:[%s10987_s6 + $0x200] sm:$0xff]  }
 0x491   : > { %8220 = vmatprep.mubr.bf16.mxu0 %v11286_v19  ;;  %v5376_v19 = vld [vmem:[#allocation2 + $0x190] sm:$0xff] }
 0x498   : > { %8221 = vmatmul.mubr.bf16.gmra.mrb[40].mxu0 %v11287_v55  ;;  %v5377_v55 = vld [vmem:[#allocation2 + $0x1a0] sm:$0xff] }
 0x499   : > { %8224 = vmatprep.mubr.bf16.mxu0 %v11288_v14  ;;  %v5375_v14 = vld [vmem:[#allocation2 + $0x180] sm:$0xff] }
 0x4a0   : > { %8225 = vmatmul.mubr.bf16.gmra.mrb[44].mxu0 %v5098_v23  ;;  %v5399_v23 = vpack.c.bf16 %v5378_v37, %v5377_v55  ;;  %v5977_v55 = vld [vmem:[#allocation2 + $0xc2] sm:$0xff] }
 0x4a1   : > { %8244 = vmatprep.mubr.bf16.mxu0 %v5389_v52  ;;  %v5400_v52 = vpack.c.bf16 %v11289_v42, %v10569_v58  ;;  %v8978_v58 = vld [vmem:[%s10987_s6 + $0x208] sm:$0xff]  }
 0x4a8   : > { %8245 = vmatmul.mubr.bf16.vlgmr.msra.gmra.mrb[16].mxu0 %v5390_v53  ;;  %v5385_v53 = vld [vmem:[#allocation2 + $0x240] sm:$0xff] }
 0x4a9   : > { %8277 = vmatpush3.bf16.msra.mxu0 %v8969_v49  ;;  %8248 = vmatprep.mubr.bf16.mxu0 %v5391_v7  ;;  %v5396_v49 = vpack.c.bf16 %v11289_v42, %v10550_v34  ;;  %v5398_v34 = vpack.c.bf16 %v5376_v19, %v5375_v14  ;;  %v5386_v7 = vld [vmem:[#allocation2 + $0x250] sm:$0xff] }
 0x4aa   : > { %8278 = vmatprep.subr.bf16.mxu0 %v8970_v3  ;;  %v5678_v42 = vld [vmem:[#allocation2 + $0x131] sm:$0xff] }
 0x4ab   : > { %v5976_v19 = vld [vmem:[#allocation2 + $0x92] sm:$0xff] }
 0x4ac   : > { %v6004_v14 = vpack.c.bf16 %v5976_v19, %v10665_v16  ;;  %v5988_v16 = vld [vmem:[#allocation2 + $0x192] sm:$0xff] }
 0x4ad   : > { %8279 = vmatpush3.bf16.msra.mxu0 %v8970_v3  ;;  %v5402_v3 = vpack.c.bf16 %v5384_v20, %v5383_v27  ;;  %v5985_v27 = vld [vmem:[#allocation2 + $0x162] sm:$0xff] }
 0x4ae   : > { %8280 = vmatprep.subr.bf16.mxu0 %v8971_v17 }
 0x4b0   : > { %8249 = vmatmul.mubr.bf16.gmra.mrb[20].mxu0 %v5392_v1  ;;  %v11290_v1 = vpack.c.bf16 %v10093_v43, %v10083_v38  ;;  %v5670_v38 = vld [vmem:[#allocation2 + $0x91] sm:$0xff] }
 0x4b1   : > { %8252 = vmatprep.mubr.bf16.mxu0 %v5393_v32  ;;  %8281 = vmatpush3.bf16.msra.mxu0 %v8971_v17  ;;  %v5403_v17 = vpack.c.bf16 %v5386_v7, %v5385_v53  ;;  %v5698_v43 = vpack.c.bf16 %v5670_v38, %v10597_v59  ;;  %v8982_v59 = vld [vmem:[%s10987_s6 + $0x228] sm:$0xff]   ;;  %v5702_v32 = vpack.c.bf16 %v5678_v42, %v10618_v31  ;;  %v5686_v31 = vld [vmem:[#allocation2 + $0x1d1] sm:$0xff] }
 0x4b2   : > { %8282 = vmatprep.subr.bf16.mxu0 %v8972_v11  ;;  %v5706_v22 = vpack.c.bf16 %v5686_v31, %v10633_v2  ;;  %v5972_v2 = vld [vmem:[#allocation2 + $0x52] sm:$0xff]  ;;  %v5993_v38 = vld [vmem:[#allocation2 + $0x202] sm:$0xff] }
 0x4b3   : > { %v5984_v53 = vld [vmem:[#allocation2 + $0x132] sm:$0xff] }
 0x4b4   : > { %v5986_v7 = vld [vmem:[#allocation2 + $0x172] sm:$0xff] }
 0x4b5   : > { %8283 = vmatpush3.bf16.msra.mxu0 %v8972_v11  ;;  %v11292_v11 = vpack.c.bf16 %v11254_v12, %v11253_v15  ;;  %v8981_v15 = vld [vmem:[%s10987_s6 + $0x220] sm:$0xff]   ;;  %v11294_v12 = vpack.c.bf16 %v11258_v6, %v11257_v18  ;;  %v8984_v18 = vld [vmem:[%s10987_s6 + $0x238] sm:$0xff]   ;;  %v11296_v6 = vpack.c.bf16 %v11262_v45, %v11261_v30 }
 0x4b6   : > { %8284 = vmatprep.subr.bf16.mxu0 %v8973_v61  ;;  %v5690_v30 = vld [vmem:[#allocation2 + $0x231] sm:$0xff]  ;;  %v5691_v45 = vld [vmem:[#allocation2 + $0x241] sm:$0xff] }
 0x4b7   : > { %v6000_v42 = vld [vmem:[#allocation2 + $0x272] sm:$0xff] }
 0x4b8   : > { %8253 = vmatmul.mubr.bf16.gmra.mrb[24].mxu0 %v5394_v4  ;;  %v5689_v4 = vld [vmem:[#allocation2 + $0x221] sm:$0xff] }
 0x4b9   : > { %8256 = vmatprep.mubr.bf16.mxu0 %v5395_v57  ;;  %8285 = vmatpush3.bf16.msra.mxu0 %v8973_v61  ;;  %v11297_v61 = vpack.c.bf16 %v11264_v24, %v11263_v21  ;;  %v5708_v48 = vpack.c.bf16 %v5690_v30, %v5689_v4  ;;  %v5694_v21 = vld [vmem:[#allocation2 + $0x271] sm:$0xff]  ;;  %v5969_v24 = vld [vmem:[#allocation2 + $0x22] sm:$0xff] }
 0x4ba   : > { %8286 = vmatprep.subr.bf16.mxu0 %v8974_v46  ;;  %v11298_v4 = vld [vmem:[#allocation31_spill] sm:$0xff] }
 0x4bd   : > { %8287 = vmatpush3.bf16.msra.mxu0 %v8974_v46  ;;  %v5692_v46 = vld [vmem:[#allocation2 + $0x251] sm:$0xff] }
 0x4be   : > { %8288 = vmatprep.subr.bf16.mxu0 %v8975_v13  ;;  %v5709_v57 = vpack.c.bf16 %v5692_v46, %v5691_v45 }
 0x4c0   : > { %8257 = vmatmul.mubr.bf16.gmra.mrb[28].mxu0 %v5396_v49  ;;  %v6001_v49 = vpack.c.bf16 %v5970_v62, %v5969_v24  ;;  %v11300_v62 = vld [vmem:[#allocation38_spill] sm:$0xff] }
 0x4c1   : > { %8260 = vmatprep.mubr.bf16.mxu0 %v5397_v35  ;;  %8289 = vmatpush3.bf16.msra.mxu0 %v8975_v13  ;;  %v5710_v13 = vpack.c.bf16 %v5694_v21, %v5693_v39  ;;  %v5974_v35 = vld [vmem:[#allocation2 + $0x72] sm:$0xff] }
 0x4c2   : > { %8290 = vmatprep.subr.bf16.mxu0 %v8976_v54  ;;  %v11299_v39 = vld [vmem:[#allocation37_spill] sm:$0xff] }
 0x4c5   : > { %8291 = vmatpush3.bf16.msra.mxu0 %v8976_v54  ;;  %v6002_v54 = vpack.c.bf16 %v5972_v2, %v5971_v9  ;;  %v11301_v9 = vld [vmem:[#allocation41_spill] sm:$0xff] }
 0x4c6   : > { %8324 = vmatprep.subr.bf16.mxu0 %v8977_v41 }
 0x4c8   : > { %8261 = vmatmul.mubr.bf16.gmra.mrb[32].mxu0 %v5398_v34  ;;  %v5978_v34 = vld [vmem:[#allocation2 + $0xd2] sm:$0xff] }
 0x4c9   : > { %8264 = vmatprep.mubr.bf16.mxu0 %v5399_v23  ;;  %v6005_v37 = vpack.c.bf16 %v5978_v34, %v5977_v55  ;;  %v5980_v23 = vld [vmem:[#allocation2 + $0xf2] sm:$0xff] }
 0x4d0   : > { %8265 = vmatmul.mubr.bf16.gmra.mrb[36].mxu0 %v5400_v52  ;;  %v5979_v52 = vld [vmem:[#allocation2 + $0xe2] sm:$0xff] }
 0x4d1   : > { %8268 = vmatprep.mubr.bf16.mxu0 %v5401_v56  ;;  %v6006_v47 = vpack.c.bf16 %v5980_v23, %v5979_v52  ;;  %v5982_v56 = vld [vmem:[#allocation2 + $0x112] sm:$0xff] }
 0x4d2   : > { %v6007_v20 = vpack.c.bf16 %v5982_v56, %v5981_v44 }
 0x4d8   : > { %8269 = vmatmul.mubr.bf16.gmra.mrb[40].mxu0 %v5402_v3  ;;  %v6008_v3 = vpack.c.bf16 %v5984_v53, %v10690_v10  ;;  %v5996_v10 = vld [vmem:[#allocation2 + $0x232] sm:$0xff] }
 0x4d9   : > { %8272 = vmatprep.mubr.bf16.mxu0 %v5403_v17  ;;  %v6009_v17 = vpack.c.bf16 %v5986_v7, %v5985_v27  ;;  %v11302_v7 = vld [vmem:[#allocation42_spill] sm:$0xff] }
 0x4e0   : > { %8273 = vmatmul.mubr.bf16.gmra.mrb[44].mxu0 %v5404_v40  ;;  %v5989_v40 = vld [vmem:[#allocation2 + $0x1a2] sm:$0xff] }
 0x4e1   : > { %8292 = vmatprep.mubr.bf16.mxu0 %v11290_v1  ;;  %v5987_v1 = vld [vmem:[#allocation2 + $0x182] sm:$0xff] }
 0x4e8   : > { %8293 = vmatmul.mubr.bf16.vlgmr.msra.gmra.mrb[16].mxu0 %v11291_v25  ;;  %v5990_v25 = vld [vmem:[#allocation2 + $0x1b2] sm:$0xff] }
 0x4e9   : > { %8325 = vmatpush3.bf16.msra.mxu0 %v8977_v41  ;;  %8296 = vmatprep.mubr.bf16.mxu0 %v11292_v11  ;;  %v6003_v41 = vpack.c.bf16 %v5974_v35, %v5973_v26  ;;  %v6011_v11 = vpack.c.bf16 %v5990_v25, %v5989_v40 }
 0x4ea   : > { %8326 = vmatprep.subr.bf16.mxu0 %v8978_v58 }
 0x4ed   : > { %8327 = vmatpush3.bf16.msra.mxu0 %v8978_v58  ;;  %v6010_v58 = vpack.c.bf16 %v5988_v16, %v5987_v1  ;;  %v11303_v1 = vld [vmem:[#allocation50_spill] sm:$0xff] }
 0x4ee   : > { %8328 = vmatprep.subr.bf16.mxu0 %v8979_v60 }
 0x4f0   : > { %8297 = vmatmul.mubr.bf16.gmra.mrb[20].mxu0 %v5698_v43 }
 0x4f1   : > { %8300 = vmatprep.mubr.bf16.mxu0 %v11293_v0  ;;  %8329 = vmatpush3.bf16.msra.mxu0 %v8979_v60  ;;  %v5992_v60 = vld [vmem:[#allocation2 + $0x1d2] sm:$0xff] }
 0x4f2   : > { %8330 = vmatprep.subr.bf16.mxu0 %v8980_v50  ;;  %v6012_v43 = vpack.c.bf16 %v5992_v60, %v10709_v28  ;;  %v10815_v28 = vld [vmem:[%s10988_s7] ss:$0 sm:$0xff] }
 0x4f3   : > { %v11304_v60 = vld [vmem:[#allocation51_spill] sm:$0xff] }
 0x4f5   : > { %8331 = vmatpush3.bf16.msra.mxu0 %v8980_v50  ;;  %v5994_v50 = vld [vmem:[#allocation2 + $0x212] sm:$0xff] }
 0x4f6   : > { %8332 = vmatprep.subr.bf16.mxu0 %v8981_v15  ;;  %v6013_v0 = vpack.c.bf16 %v5994_v50, %v5993_v38 }
 0x4f8   : > { %8301 = vmatmul.mubr.bf16.gmra.mrb[24].mxu0 %v11294_v12 }
 0x4f9   : > { %8304 = vmatprep.mubr.bf16.mxu0 %v11295_v51  ;;  %8333 = vmatpush3.bf16.msra.mxu0 %v8981_v15  ;;  %v5997_v15 = vld [vmem:[#allocation2 + $0x242] sm:$0xff]  ;;  %v5998_v51 = vld [vmem:[#allocation2 + $0x252] sm:$0xff] }
 0x4fa   : > { %8334 = vmatprep.subr.bf16.mxu0 %v8982_v59 }
 0x4fd   : > { %8335 = vmatpush3.bf16.msra.mxu0 %v8982_v59  ;;  %v5995_v59 = vld [vmem:[#allocation2 + $0x222] sm:$0xff] }
 0x4fe   : > { %8336 = vmatprep.subr.bf16.mxu0 %v8983_v5  ;;  %v6014_v12 = vpack.c.bf16 %v5996_v10, %v5995_v59 }
 0x500   : > { %8305 = vmatmul.mubr.bf16.gmra.mrb[28].mxu0 %v5702_v32  ;;  %v6016_v32 = vpack.c.bf16 %v6000_v42, %v10722_v63 }
 0x501   : > { %8308 = vmatprep.mubr.bf16.mxu0 %v11296_v6  ;;  %8337 = vmatpush3.bf16.msra.mxu0 %v8983_v5  ;;  %v6015_v5 = vpack.c.bf16 %v5998_v51, %v5997_v15 }
 0x502   : > { %8338 = vmatprep.subr.bf16.mxu0 %v8984_v18 }
 0x505   : > { %8339 = vmatpush3.bf16.msra.mxu0 %v8984_v18  ;;  %v10820_v18 = vld [vmem:[%s10989_s8] ss:$0 sm:$0xff] }
 0x508   : > { %8309 = vmatmul.mubr.bf16.gmra.mrb[32].mxu0 %v11297_v61 }
 0x509   : > { %8312 = vmatprep.mubr.bf16.mxu0 %v5705_v8 }
 0x510   : > { %8313 = vmatmul.mubr.bf16.gmra.mrb[36].mxu0 %v5706_v22 }
 0x511   : > { %8316 = vmatprep.mubr.bf16.mxu0 %v5707_v33  ;;  %v10829_v33 = vld [vmem:[%s10983_s2] ss:$0 sm:$0xff] }
 0x512   : > { %v633_v21 = vadd.f32 %v10829_v33, %v11299_v39  ;;  %v660_v38 = vadd.f32 %v11304_v60, %v10829_v33 }
 0x518   : > { %8317 = vmatmul.mubr.bf16.gmra.mrb[40].mxu0 %v5708_v48  ;;  %v641_v48 = vadd.f32 %v11298_v4, %v10829_v33 }
 0x519   : > { %8320 = vmatprep.mubr.bf16.mxu0 %v5709_v57 }
 0x520   : > { %8321 = vmatmul.mubr.bf16.gmra.mrb[44].mxu0 %v5710_v13 }
 0x521   : > { %8340 = vmatprep.mubr.bf16.mxu0 %v6001_v49  ;;  %v644_v49 = vadd.f32 %v11300_v62, %v10829_v33 }
 0x528   : > { %8341 = vmatmul.mubr.bf16.vlgmr.msra.gmra.mrb[16].mxu0 %v6002_v54  ;;  %v636_v54 = vadd.f32 %v10829_v33, %v11301_v9 }
 0x529   : > { %8344 = vmatprep.mubr.bf16.mxu0 %v6003_v41 }
 0x530   : > { %8345 = vmatmul.mubr.bf16.gmra.mrb[20].mxu0 %v6004_v14 }
 0x531   : > { %8348 = vmatprep.mubr.bf16.mxu0 %v6005_v37 }
 0x538   : > { %8349 = vmatmul.mubr.bf16.gmra.mrb[24].mxu0 %v6006_v47 }
 0x539   : > { %8352 = vmatprep.mubr.bf16.mxu0 %v6007_v20 }
 0x540   : > { %8353 = vmatmul.mubr.bf16.gmra.mrb[28].mxu0 %v6008_v3 }
 0x541   : > { %8356 = vmatprep.mubr.bf16.mxu0 %v6009_v17  ;;  %v657_v17 = vadd.f32 %v11302_v7, %v10829_v33 }
 0x548   : > { %8357 = vmatmul.mubr.bf16.gmra.mrb[32].mxu0 %v6010_v58  ;;  %v649_v58 = vadd.f32 %v10829_v33, %v11303_v1 }
 0x549   : > { %8360 = vmatprep.mubr.bf16.mxu0 %v6011_v11 }
 0x550   : > { %8361 = vmatmul.mubr.bf16.gmra.mrb[36].mxu0 %v6012_v43 }
 0x551   : > { %8364 = vmatprep.mubr.bf16.mxu0 %v6013_v0  ;;  %v11305_v0 = vld [vmem:[#allocation54_spill] sm:$0xff] }
 0x552   : > { %v652_v10 = vadd.f32 %v10829_v33, %v11305_v0 }
 0x558   : > { %8365 = vmatmul.mubr.bf16.gmra.mrb[40].mxu0 %v6014_v12 }
 0x559   : > { %8368 = vmatprep.mubr.bf16.mxu0 %v6015_v5 }
 0x560   : > { %8369 = vmatmul.mubr.bf16.gmra.mrb[44].mxu0 %v6016_v32 }
 0x5fb   : > { %v8342_v6 = vpop.f32.mrb[16].mxu0 }
 0x5fc   : > { %v6283_v29 = vmul.f32 %v8342_v6, %v10815_v28  ;;  %v6116_v8 = vpop.f32.mrb[17].mxu0 }
 0x5fd   : > { %v6281_v61 = vmul.f32 %v10815_v28, %v6116_v8  ;;  %v8343_v31 = vpop.f32.mrb[18].mxu0 }
 0x5fe   : > { %v6321_v63 = vadd.f32 %v10820_v18, %v6283_v29  ;;  %v6284_v36 = vmul.f32 %v8343_v31, %v10815_v28  ;;  %v6119_v22 = vpop.f32.mrb[19].mxu0 }
 0x5ff   : > { %v6319_v30 = vadd.f32 %v10820_v18, %v6281_v61  ;;  %v6282_v45 = vmul.f32 %v10815_v28, %v6119_v22 }
 0x600   : > { %v6353_v46 = vmax.f32 %v6321_v63, 0.0  ;;  %v6322_v57 = vadd.f32 %v10820_v18, %v6284_v36 }
 0x601   : > { %v6351_v24 = vmax.f32 %v6319_v30, 0.0  ;;  %v6320_v13 = vadd.f32 %v10820_v18, %v6282_v45  ;;  %v11306_v45 = vld [vmem:[#allocation7_spill] sm:$0xff] }
 0x602   : > { %v6385_v2 = vadd.f32 %v6353_v46, %v641_v48  ;;  %v6354_v26 = vmax.f32 %v6322_v57, 0.0  ;;  %v673_v4 = vadd.f32 %v11306_v45, %v10829_v33  ;;  %v11307_v57 = vld [vmem:[#allocation8_spill] sm:$0xff] }
 0x603   : > { %v6383_v35 = vadd.f32 %v6351_v24, %v633_v21  ;;  %v6352_v41 = vmax.f32 %v6320_v13, 0.0  ;;  %v8346_v19 = vpop.f32.mrb[20].mxu0  ;;  %v665_v39 = vadd.f32 %v10829_v33, %v11307_v57  ;;  %v11308_v13 = vld [vmem:[#allocation9_spill] sm:$0xff] }
 0x604   : > { %v6386_v55 = vadd.f32 %v6354_v26, %v644_v49  ;;  %v6287_v14 = vmul.f32 %v8346_v19, %v10815_v28  ;;  %v6132_v34 = vpop.f32.mrb[21].mxu0  ;;  %v676_v62 = vadd.f32 %v11308_v13, %v10829_v33  ;;  %v11309_v26 = vld [vmem:[#allocation10_spill] sm:$0xff] }
 0x605   : > { %v6384_v37 = vadd.f32 %v6352_v41, %v636_v54  ;;  %v6285_v23 = vmul.f32 %v10815_v28, %v6132_v34  ;;  %v8347_v44 = vpop.f32.mrb[22].mxu0  ;;  %v668_v9 = vadd.f32 %v10829_v33, %v11309_v26 }
 0x606   : > { %v7127_v52 = vpack.c.bf16 %v6386_v55, %v6385_v2  ;;  %v6325_v47 = vadd.f32 %v10820_v18, %v6287_v14  ;;  %v6288_v56 = vmul.f32 %v8347_v44, %v10815_v28  ;;  %v6135_v20 = vpop.f32.mrb[23].mxu0 }
 0x607   : > { %v7122_v53 = vpack.c.bf16 %v6384_v37, %v6383_v35  ;;  %v6323_v27 = vadd.f32 %v10820_v18, %v6285_v23  ;;  %v6286_v3 = vmul.f32 %v10815_v28, %v6135_v20 }
 0x608   : > { %7199 = vst [vmem:[%s10849_s11 + $0x8] sm:$0xff] %v7127_v52   ;;  %v6357_v16 = vmax.f32 %v6325_v47, 0.0  ;;  %v6326_v40 = vadd.f32 %v10820_v18, %v6288_v56 }
 0x609   : > { %7123 = vst [vmem:[%s10849_s11] sm:$0xff] %v7122_v53   ;;  %v6355_v25 = vmax.f32 %v6323_v27, 0.0  ;;  %v6324_v11 = vadd.f32 %v10820_v18, %v6286_v3  ;;  %v11310_v3 = vld [vmem:[#allocation11_spill] sm:$0xff] }
 0x60a   : > { %v6389_v43 = vadd.f32 %v6357_v16, %v657_v17  ;;  %v6358_v50 = vmax.f32 %v6326_v40, 0.0  ;;  %v689_v7 = vadd.f32 %v11310_v3, %v10829_v33  ;;  %v11311_v40 = vld [vmem:[#allocation12_spill] sm:$0xff] }
 0x60b   : > { %v6387_v15 = vadd.f32 %v6355_v25, %v649_v58  ;;  %v6356_v59 = vmax.f32 %v6324_v11, 0.0  ;;  %v8350_v12 = vpop.f32.mrb[24].mxu0  ;;  %v681_v1 = vadd.f32 %v10829_v33, %v11311_v40  ;;  %v11312_v11 = vld [vmem:[#allocation13_spill] sm:$0xff] }
 0x60c   : > { %v6390_v51 = vadd.f32 %v6358_v50, %v660_v38  ;;  %v6291_v5 = vmul.f32 %v8350_v12, %v10815_v28  ;;  %v6148_v42 = vpop.f32.mrb[25].mxu0  ;;  %v692_v60 = vadd.f32 %v11312_v11, %v10829_v33  ;;  %v11313_v50 = vld [vmem:[#allocation14_spill] sm:$0xff] }
 0x60d   : > { %v6388_v32 = vadd.f32 %v6356_v59, %v652_v10  ;;  %v6289_v6 = vmul.f32 %v10815_v28, %v6148_v42  ;;  %v8351_v29 = vpop.f32.mrb[26].mxu0  ;;  %v684_v0 = vadd.f32 %v10829_v33, %v11313_v50 }
 0x60e   : > { %v7137_v8 = vpack.c.bf16 %v6390_v51, %v6389_v43  ;;  %v6329_v61 = vadd.f32 %v10820_v18, %v6291_v5  ;;  %v6292_v31 = vmul.f32 %v8351_v29, %v10815_v28  ;;  %v6151_v63 = vpop.f32.mrb[27].mxu0 }
 0x60f   : > { %v7132_v36 = vpack.c.bf16 %v6388_v32, %v6387_v15  ;;  %v6327_v22 = vadd.f32 %v10820_v18, %v6289_v6  ;;  %v6290_v30 = vmul.f32 %v10815_v28, %v6151_v63 }
 0x610   : > { %7201 = vst [vmem:[%s10849_s11 + $0x18] sm:$0xff] %v7137_v8   ;;  %v6361_v48 = vmax.f32 %v6329_v61, 0.0  ;;  %v6330_v46 = vadd.f32 %v10820_v18, %v6292_v31 }
 0x611   : > { %7200 = vst [vmem:[%s10849_s11 + $0x10] sm:$0xff] %v7132_v36   ;;  %v6359_v21 = vmax.f32 %v6327_v22, 0.0  ;;  %v6328_v24 = vadd.f32 %v10820_v18, %v6290_v30  ;;  %v11314_v30 = vld [vmem:[#allocation55_spill] sm:$0xff] }
 0x612   : > { %v6393_v49 = vadd.f32 %v6361_v48, %v673_v4  ;;  %v6362_v2 = vmax.f32 %v6330_v46, 0.0  ;;  %v705_v45 = vadd.f32 %v11314_v30, %v10829_v33  ;;  %v11315_v46 = vld [vmem:[#allocation56_spill] sm:$0xff] }
 0x613   : > { %v6391_v54 = vadd.f32 %v6359_v21, %v665_v39  ;;  %v6360_v35 = vmax.f32 %v6328_v24, 0.0  ;;  %v8354_v41 = vpop.f32.mrb[28].mxu0  ;;  %v697_v57 = vadd.f32 %v10829_v33, %v11315_v46  ;;  %v11316_v24 = vld [vmem:[#allocation57_spill] sm:$0xff] }
 0x614   : > { %v6394_v19 = vadd.f32 %v6362_v2, %v676_v62  ;;  %v6295_v55 = vmul.f32 %v8354_v41, %v10815_v28  ;;  %v6164_v14 = vpop.f32.mrb[29].mxu0  ;;  %v708_v13 = vadd.f32 %v11316_v24, %v10829_v33  ;;  %v11317_v2 = vld [vmem:[#allocation58_spill] sm:$0xff] }
 0x615   : > { %v6392_v34 = vadd.f32 %v6360_v35, %v668_v9  ;;  %v6293_v37 = vmul.f32 %v10815_v28, %v6164_v14  ;;  %v8355_v23 = vpop.f32.mrb[30].mxu0  ;;  %v700_v26 = vadd.f32 %v10829_v33, %v11317_v2 }
 0x616   : > { %v7147_v44 = vpack.c.bf16 %v6394_v19, %v6393_v49  ;;  %v6333_v52 = vadd.f32 %v10820_v18, %v6295_v55  ;;  %v6296_v47 = vmul.f32 %v8355_v23, %v10815_v28  ;;  %v6167_v56 = vpop.f32.mrb[31].mxu0 }
 0x617   : > { %v7142_v20 = vpack.c.bf16 %v6392_v34, %v6391_v54  ;;  %v6331_v53 = vadd.f32 %v10820_v18, %v6293_v37  ;;  %v6294_v27 = vmul.f32 %v10815_v28, %v6167_v56 }
 0x618   : > { %7203 = vst [vmem:[%s10849_s11 + $0x28] sm:$0xff] %v7147_v44   ;;  %v6365_v17 = vmax.f32 %v6333_v52, 0.0  ;;  %v6334_v16 = vadd.f32 %v10820_v18, %v6296_v47 }
 0x619   : > { %7202 = vst [vmem:[%s10849_s11 + $0x20] sm:$0xff] %v7142_v20   ;;  %v6363_v58 = vmax.f32 %v6331_v53, 0.0  ;;  %v6332_v25 = vadd.f32 %v10820_v18, %v6294_v27  ;;  %v11318_v27 = vld [vmem:[#allocation59_spill] sm:$0xff] }
 0x61a   : > { %v6397_v38 = vadd.f32 %v6365_v17, %v689_v7  ;;  %v6366_v43 = vmax.f32 %v6334_v16, 0.0  ;;  %v721_v3 = vadd.f32 %v11318_v27, %v10829_v33  ;;  %v11319_v16 = vld [vmem:[#allocation60_spill] sm:$0xff] }
 0x61b   : > { %v6395_v10 = vadd.f32 %v6363_v58, %v681_v1  ;;  %v6364_v15 = vmax.f32 %v6332_v25, 0.0  ;;  %v8358_v59 = vpop.f32.mrb[32].mxu0  ;;  %v713_v40 = vadd.f32 %v10829_v33, %v11319_v16  ;;  %v11320_v25 = vld [vmem:[#allocation61_spill] sm:$0xff] }
 0x61c   : > { %v6398_v12 = vadd.f32 %v6366_v43, %v692_v60  ;;  %v6299_v51 = vmul.f32 %v8358_v59, %v10815_v28  ;;  %v6180_v5 = vpop.f32.mrb[33].mxu0  ;;  %v724_v11 = vadd.f32 %v11320_v25, %v10829_v33  ;;  %v11321_v43 = vld [vmem:[#allocation62_spill] sm:$0xff] }
 0x61d   : > { %v6396_v42 = vadd.f32 %v6364_v15, %v684_v0  ;;  %v6297_v32 = vmul.f32 %v10815_v28, %v6180_v5  ;;  %v8359_v6 = vpop.f32.mrb[34].mxu0  ;;  %v716_v50 = vadd.f32 %v10829_v33, %v11321_v43 }
 0x61e   : > { %v7157_v29 = vpack.c.bf16 %v6398_v12, %v6397_v38  ;;  %v6337_v8 = vadd.f32 %v10820_v18, %v6299_v51  ;;  %v6300_v61 = vmul.f32 %v8359_v6, %v10815_v28  ;;  %v6183_v31 = vpop.f32.mrb[35].mxu0 }
 0x61f   : > { %v7152_v63 = vpack.c.bf16 %v6396_v42, %v6395_v10  ;;  %v6335_v36 = vadd.f32 %v10820_v18, %v6297_v32  ;;  %v6298_v22 = vmul.f32 %v10815_v28, %v6183_v31 }
 0x620   : > { %7205 = vst [vmem:[%s10849_s11 + $0x38] sm:$0xff] %v7157_v29   ;;  %v6369_v4 = vmax.f32 %v6337_v8, 0.0  ;;  %v6338_v48 = vadd.f32 %v10820_v18, %v6300_v61 }
 0x621   : > { %7204 = vst [vmem:[%s10849_s11 + $0x30] sm:$0xff] %v7152_v63   ;;  %v6367_v39 = vmax.f32 %v6335_v36, 0.0  ;;  %v6336_v21 = vadd.f32 %v10820_v18, %v6298_v22  ;;  %v11322_v22 = vld [vmem:[#allocation63_spill] sm:$0xff] }
 0x622   : > { %v6401_v62 = vadd.f32 %v6369_v4, %v705_v45  ;;  %v6370_v49 = vmax.f32 %v6338_v48, 0.0  ;;  %v737_v30 = vadd.f32 %v11322_v22, %v10829_v33  ;;  %v11323_v48 = vld [vmem:[#allocation64_spill] sm:$0xff] }
 0x623   : > { %v6399_v9 = vadd.f32 %v6367_v39, %v697_v57  ;;  %v6368_v54 = vmax.f32 %v6336_v21, 0.0  ;;  %v8362_v35 = vpop.f32.mrb[36].mxu0  ;;  %v729_v46 = vadd.f32 %v10829_v33, %v11323_v48  ;;  %v11324_v21 = vld [vmem:[#allocation65_spill] sm:$0xff] }
 0x624   : > { %v6402_v41 = vadd.f32 %v6370_v49, %v708_v13  ;;  %v6303_v19 = vmul.f32 %v8362_v35, %v10815_v28  ;;  %v6196_v55 = vpop.f32.mrb[37].mxu0  ;;  %v740_v24 = vadd.f32 %v11324_v21, %v10829_v33  ;;  %v11325_v49 = vld [vmem:[#allocation66_spill] sm:$0xff] }
 0x625   : > { %v6400_v14 = vadd.f32 %v6368_v54, %v700_v26  ;;  %v6301_v34 = vmul.f32 %v10815_v28, %v6196_v55  ;;  %v8363_v37 = vpop.f32.mrb[38].mxu0  ;;  %v732_v2 = vadd.f32 %v10829_v33, %v11325_v49 }
 0x626   : > { %v7167_v23 = vpack.c.bf16 %v6402_v41, %v6401_v62  ;;  %v6341_v44 = vadd.f32 %v10820_v18, %v6303_v19  ;;  %v6304_v52 = vmul.f32 %v8363_v37, %v10815_v28  ;;  %v6199_v47 = vpop.f32.mrb[39].mxu0 }
 0x627   : > { %v7162_v56 = vpack.c.bf16 %v6400_v14, %v6399_v9  ;;  %v6339_v20 = vadd.f32 %v10820_v18, %v6301_v34  ;;  %v6302_v53 = vmul.f32 %v10815_v28, %v6199_v47 }
 0x628   : > { %7207 = vst [vmem:[%s10849_s11 + $0x48] sm:$0xff] %v7167_v23   ;;  %v6373_v7 = vmax.f32 %v6341_v44, 0.0  ;;  %v6342_v17 = vadd.f32 %v10820_v18, %v6304_v52 }
 0x629   : > { %7206 = vst [vmem:[%s10849_s11 + $0x40] sm:$0xff] %v7162_v56   ;;  %v6371_v1 = vmax.f32 %v6339_v20, 0.0  ;;  %v6340_v58 = vadd.f32 %v10820_v18, %v6302_v53  ;;  %v11326_v53 = vld [vmem:[#allocation67_spill] sm:$0xff] }
 0x62a   : > { %v6405_v60 = vadd.f32 %v6373_v7, %v721_v3  ;;  %v6374_v38 = vmax.f32 %v6342_v17, 0.0  ;;  %v753_v27 = vadd.f32 %v11326_v53, %v10829_v33  ;;  %v11327_v17 = vld [vmem:[#allocation68_spill] sm:$0xff] }
 0x62b   : > { %v6403_v0 = vadd.f32 %v6371_v1, %v713_v40  ;;  %v6372_v10 = vmax.f32 %v6340_v58, 0.0  ;;  %v8366_v15 = vpop.f32.mrb[40].mxu0  ;;  %v745_v16 = vadd.f32 %v10829_v33, %v11327_v17  ;;  %v11328_v58 = vld [vmem:[#allocation69_spill] sm:$0xff] }
 0x62c   : > { %v6406_v59 = vadd.f32 %v6374_v38, %v724_v11  ;;  %v6307_v12 = vmul.f32 %v8366_v15, %v10815_v28  ;;  %v6212_v51 = vpop.f32.mrb[41].mxu0  ;;  %v756_v25 = vadd.f32 %v11328_v58, %v10829_v33 }
 0x62d   : > { %v6404_v5 = vadd.f32 %v6372_v10, %v716_v50  ;;  %v6305_v42 = vmul.f32 %v10815_v28, %v6212_v51  ;;  %v8367_v32 = vpop.f32.mrb[42].mxu0 }
 0x62e   : > { %v7177_v6 = vpack.c.bf16 %v6406_v59, %v6405_v60  ;;  %v6345_v29 = vadd.f32 %v10820_v18, %v6307_v12  ;;  %v6308_v8 = vmul.f32 %v8367_v32, %v10815_v28  ;;  %v6215_v61 = vpop.f32.mrb[43].mxu0  ;;  %v11329_v60 = vld [vmem:[#allocation70_spill] sm:$0xff] }
 0x62f   : > { %v7172_v31 = vpack.c.bf16 %v6404_v5, %v6403_v0  ;;  %v6343_v63 = vadd.f32 %v10820_v18, %v6305_v42  ;;  %v6306_v36 = vmul.f32 %v10815_v28, %v6215_v61  ;;  %v748_v38 = vadd.f32 %v10829_v33, %v11329_v60 }
 0x630   : > { %7209 = vst [vmem:[%s10849_s11 + $0x58] sm:$0xff] %v7177_v6   ;;  %v6377_v45 = vmax.f32 %v6345_v29, 0.0  ;;  %v6346_v4 = vadd.f32 %v10820_v18, %v6308_v8 }
 0x631   : > { %7208 = vst [vmem:[%s10849_s11 + $0x50] sm:$0xff] %v7172_v31   ;;  %v6375_v57 = vmax.f32 %v6343_v63, 0.0  ;;  %v6344_v39 = vadd.f32 %v10820_v18, %v6306_v36 }
 0x632   : > { %v6409_v13 = vadd.f32 %v6377_v45, %v737_v30  ;;  %v6378_v62 = vmax.f32 %v6346_v4, 0.0 }
 0x633   : > { %v6407_v26 = vadd.f32 %v6375_v57, %v729_v46  ;;  %v6376_v9 = vmax.f32 %v6344_v39, 0.0  ;;  %v8370_v54 = vpop.f32.mrb[44].mxu0 }
 0x634   : > { %v6410_v35 = vadd.f32 %v6378_v62, %v740_v24  ;;  %v6311_v41 = vmul.f32 %v8370_v54, %v10815_v28  ;;  %v6228_v19 = vpop.f32.mrb[45].mxu0 }
 0x635   : > { %v6408_v55 = vadd.f32 %v6376_v9, %v732_v2  ;;  %v6309_v14 = vmul.f32 %v10815_v28, %v6228_v19  ;;  %v8371_v34 = vpop.f32.mrb[46].mxu0 }
 0x636   : > { %v7187_v37 = vpack.c.bf16 %v6410_v35, %v6409_v13  ;;  %v6349_v23 = vadd.f32 %v10820_v18, %v6311_v41  ;;  %v6312_v44 = vmul.f32 %v8371_v34, %v10815_v28  ;;  %v6231_v52 = vpop.f32.mrb[47].mxu0 }
 0x637   : > { %v7182_v47 = vpack.c.bf16 %v6408_v55, %v6407_v26  ;;  %v6347_v56 = vadd.f32 %v10820_v18, %v6309_v14  ;;  %v6310_v20 = vmul.f32 %v10815_v28, %v6231_v52 }
 0x638   : > { %7211 = vst [vmem:[%s10849_s11 + $0x68] sm:$0xff] %v7187_v37   ;;  %v6381_v3 = vmax.f32 %v6349_v23, 0.0  ;;  %v6350_v7 = vadd.f32 %v10820_v18, %v6312_v44 }
 0x639   : > { %7210 = vst [vmem:[%s10849_s11 + $0x60] sm:$0xff] %v7182_v47   ;;  %v6379_v40 = vmax.f32 %v6347_v56, 0.0  ;;  %v6348_v1 = vadd.f32 %v10820_v18, %v6310_v20 }
 0x63a   : > { %v6413_v28 = vadd.f32 %v6381_v3, %v753_v27  ;;  %v6382_v11 = vmax.f32 %v6350_v7, 0.0 }
 0x63b   : > { %v6411_v43 = vadd.f32 %v6379_v40, %v745_v16  ;;  %v6380_v50 = vmax.f32 %v6348_v1, 0.0 }
 0x63c   : > { %v6414_v0 = vadd.f32 %v6382_v11, %v756_v25 }
 0x63d   : > { %v6412_v10 = vadd.f32 %v6380_v50, %v748_v38 }
 0x63e   : > { %v7197_v15 = vpack.c.bf16 %v6414_v0, %v6413_v28 }
 0x63f   : > { %v7192_v59 = vpack.c.bf16 %v6412_v10, %v6411_v43 }
 0x640   : > { %7213 = vst [vmem:[%s10849_s11 + $0x78] sm:$0xff] %v7197_v15  }
 0x641   : > { %7212 = vst [vmem:[%s10849_s11 + $0x70] sm:$0xff] %v7192_v59  }
 0x642 PF: > { %s19_s30 = sadd.s32 1, %s9017_s30  }
 0x643   : > { %p16_p4 = scmp.ge.s32.totalorder %s19_s30, 4  }
 0x645   :  { %18 = sbr.rel (!%p16_p4) target bundleno = 1 (0x1), region = 104 }

// kernel: protonet_forward.3
= control target key start
LH: loop header
LB: loop body
LE: loop exit
PB: predicated region body
PF: predicated region fallthrough
CT: control target
= control target key end

     0   :  { %14 = vsyncpa [#allocation4], 0  ;;  %s11304_s0 = inlined_call_operand.vmem [shape: bf16[8,8,8,128], index: 0, kind: input, shape index: {}]   ;;  %s11305_s1 = inlined_call_operand.vmem [shape: bf16[128,128], index: 1, kind: input, shape index: {}]   ;;  %s11306_s2 = inlined_call_operand.vmem [shape: f32[1,128], index: 2, kind: input, shape index: {}]   ;;  %s11307_s3 = inlined_call_operand.vmem [shape: bf16[9,128,128], index: 3, kind: input, shape index: {}]   ;;  %s11308_s4 = inlined_call_operand.vmem [shape: f32[1,128], index: 4, kind: input, shape index: {}]   ;;  %s11309_s5 = inlined_call_operand.vmem [shape: f32[1,128], index: 5, kind: input, shape index: {}]   ;;  %s11310_s6 = inlined_call_operand.vmem [shape: bf16[9,128,128], index: 6, kind: input, shape index: {}]   ;;  %s11311_s7 = inlined_call_operand.vmem [shape: f32[1,128], index: 7, kind: input, shape index: {}]   ;;  %s11312_s8 = inlined_call_operand.vmem [shape: f32[1,128], index: 8, kind: input, shape index: {}]   ;;  %s11313_s9 = inlined_call_operand.hbm [shape: f32[8,1,128], index: 9, kind: output, shape index: {}]  }
   0x1   :  { %16 = vsyncpa [#allocation4 + $0x1], 0  ;;  %s9352_s30 = smov 0   ;;  %s9354_s10 = smov 0  }
   0x2   :  { %s9356_s11 = smov 0   ;;  %s9358_s12 = smov 0  }
   0x3 LB: > { %s9373_s13 = sadd.s32 4294967295, %s9296_s12   ;;  %s6642_s14 = sadd.s32 4294967294, %s9296_s12   ;;  %s9296_s12 = sphi %s9358_s12, %s11520_s12   ;;  %s9292_s11 = sphi %s9356_s11, %s11519_s11   ;;  %s9288_s10 = sphi %s9354_s10, %s11518_s10   ;;  %s9284_s30 = sphi %s9352_s30, %s11517_s30  }
   0x4   : > { %s9377_s15 = sadd.s32 1, %s9296_s12   ;;  %s223_s16 = sadd.s32 1, %s9292_s11 }
   0x5   : > { %s220_s17 = ssub.s32 %s9296_s12, %s9377_s15  ;;  %p233_p0 = scmp.ne.s32.totalorder %s9292_s11, %s9288_s10 }
   0x6   : > { %p221_p1 = scmp.eq.s32.totalorder %s220_s17, 0  ;;  %p234_p2 = scmp.eq.s32.totalorder %s9373_s13, 1 }
   0x7   : > { %p239_p3 = scmp.ne.s32.totalorder %s9288_s10, %s9284_s30  ;;  %p240_p4 = scmp.eq.s32.totalorder %s6642_s14, 1 }
   0x8   : > { %s9388_s18 = scalar_select %p221_p1, %s9292_s11, %s223_s16  }
   0x9   : > { %p9390_p5 = por %p234_p2, %p233_p0  ;;  %p9394_p6 = por %p240_p4, %p239_p3 }
   0xa   : > { %p6645_p7 = scmp.ge.s32.totalorder %s9296_s12, 1  ;;  %p292_p8 = scmp.lt.s32.totalorder %s9296_s12, 3 }
   0xc   : > { %p293_p9 = pnand %p6645_p7, %p292_p8 }
   0xe   : > { %296 = sbr.rel (%p293_p9) target bundleno = 1647 (0x66f), region = 56 }
  0x15   : > { %v9403_v0 = vld [vmem:[%s11305_s1] sm:$0xff]   ;;  %s6647_s23 = sshll.u32 %s9373_s13, 2  ;;  %v9409_v1 = vld [vmem:[%s11305_s1 + $0x8] sm:$0xff]   ;;  %v9298_v2 = vmov 0.0   ;;  %v9026_v3 = vld [vmem:[%s11305_s1 + $0x10] sm:$0xff]   ;;  %s326_s14 = sand.u32 1, %s9288_s10  }
  0x16   : > { %p330_p10 = scmp.lt.s32.totalorder %s6647_s23, 7  ;;  %8454 = vmatprep.subr.bf16.mxu1 %v9403_v0  ;;  %7542 = vmatprep.subr.bf16.mxu0 %v9403_v0  ;;  %380 = vst [vmem:[#allocation2 + $0x150] sm:$0xff] %v9298_v2  ;;  %381 = vst [vmem:[#allocation2 + $0x158] sm:$0x3] %v9298_v2  ;;  %v9027_v4 = vld [vmem:[%s11305_s1 + $0x18] sm:$0xff]   ;;  %v9028_v15 = vld [vmem:[%s11305_s1 + $0x20] sm:$0xff]  }
  0x17   : > { %8462 = vmatpush3.bf16.msra.mxu1 %v9403_v0  ;;  %382 = vst [vmem:[#allocation2 + $0x160] sm:$0xff] %v9298_v2  ;;  %383 = vst [vmem:[#allocation2 + $0x168] sm:$0x3] %v9298_v2  ;;  %7543 = vmatpush3.bf16.msra.mxu0 %v9403_v0  ;;  %v9029_v27 = vld [vmem:[%s11305_s1 + $0x28] sm:$0xff]   ;;  %v9030_v40 = vld [vmem:[%s11305_s1 + $0x30] sm:$0xff]   ;;  %s6646_s17 = sshll.u32 %s326_s14, 2 }
  0x18   : > { %s11522_s23 = smov (!%p330_p10, %s6647_s23), 7  ;;  %338 = vst [vmem:[#allocation2] sm:$0xff] %v9298_v2  ;;  %339 = vst [vmem:[#allocation2 + $0x8] sm:$0x3] %v9298_v2  ;;  %8455 = vmatprep.subr.bf16.mxu1 %v9409_v1  ;;  %7544 = vmatprep.subr.bf16.mxu0 %v9409_v1  ;;  %v9031_v53 = vld [vmem:[%s11305_s1 + $0x38] sm:$0xff]   ;;  %v9034_v61 = vld [vmem:[%s11307_s3 + $0x40] sm:$0xff]  }
  0x19   : > { %340 = vst [vmem:[#allocation2 + $0x10] sm:$0xff] %v9298_v2  ;;  %341 = vst [vmem:[#allocation2 + $0x18] sm:$0x3] %v9298_v2  ;;  %s7084_s28 = sshll.u32 %s11522_s23, 5  ;;  %v9035_v62 = vld [vmem:[%s11307_s3 + $0x48] sm:$0xff]   ;;  %v9038_v63 = vld [vmem:[%s11307_s3 + $0x50] sm:$0xff]  }
  0x1a   : > { %342 = vst [vmem:[#allocation2 + $0x20] sm:$0xff] %v9298_v2  ;;  %343 = vst [vmem:[#allocation2 + $0x28] sm:$0x3] %v9298_v2  ;;  %s9506_s16 = scalar_lea.vmem %s11304_s0, %s7084_s28  ;;  %v9039_v0 = vld [vmem:[%s11307_s3 + $0x58] sm:$0xff]   ;;  %s11198_s21 = scalar_lea.vmem [#allocation3], %s6646_s17 }
  0x1b   : > { %344 = vst [vmem:[#allocation2 + $0x30] sm:$0xff] %v9298_v2  ;;  %345 = vst [vmem:[#allocation2 + $0x38] sm:$0x3] %v9298_v2  ;;  %8463 = vmatpush3.bf16.msra.mxu1 %v9409_v1  ;;  %7545 = vmatpush3.bf16.msra.mxu0 %v9409_v1  ;;  %v9514_v5 = vld [vmem:[%s9506_s16 + $0x40] sm:$0xff]   ;;  %v9519_v8 = vld [vmem:[%s9506_s16 + $0x48] sm:$0xff]   ;;  %s7085_s22 = sshll.u32 %s9373_s13, 6 }
  0x1c   : > { %346 = vst [vmem:[#allocation2 + $0x40] sm:$0xff] %v9298_v2  ;;  %347 = vst [vmem:[#allocation2 + $0x48] sm:$0x3] %v9298_v2  ;;  %8456 = vmatprep.subr.bf16.mxu1 %v9026_v3  ;;  %7546 = vmatprep.subr.bf16.mxu0 %v9026_v3  ;;  %v794_v6 = vunpack.c.l.bf16 %v9514_v5  ;;  %v795_v7 = vunpack.c.h.bf16 %v9514_v5  ;;  %v796_v9 = vunpack.c.l.bf16 %v9519_v8  ;;  %v797_v10 = vunpack.c.h.bf16 %v9519_v8  ;;  %v9524_v11 = vld [vmem:[%s9506_s16 + $0x50] sm:$0xff]   ;;  %v9532_v14 = vld [vmem:[%s9506_s16 + $0x58] sm:$0xff]   ;;  %s6580_s23 = sshll.u32 %s11198_s21, 4  ;;  %s11256_s26 = scalar_lea.hbm %s11313_s9, %s7085_s22  ;;  %s11258_s23 = int_to_ptr.vmem [resolvable:$true] %s6580_s23 }
  0x1d   : > { %348 = vst [vmem:[#allocation2 + $0x50] sm:$0xff] %v9298_v2  ;;  %349 = vst [vmem:[#allocation2 + $0x58] sm:$0x3] %v9298_v2  ;;  %7574 = vmatprep.mubr.bf16.mxu1 %v9514_v5  ;;  %v798_v12 = vunpack.c.l.bf16 %v9524_v11  ;;  %v799_v13 = vunpack.c.h.bf16 %v9524_v11  ;;  %v800_v16 = vunpack.c.l.bf16 %v9532_v14  ;;  %v801_v17 = vunpack.c.h.bf16 %v9532_v14  ;;  %v9542_v19 = vld [vmem:[%s9506_s16 + $0x60] sm:$0xff]   ;;  %v9549_v23 = vld [vmem:[%s9506_s16 + $0x68] sm:$0xff]   ;;  %s9234_s27 = scalar_lea.vmem %s11258_s23, 64 }
  0x1e   : > { %350 = vst [vmem:[#allocation2 + $0x60] sm:$0xff] %v9298_v2  ;;  %351 = vst [vmem:[#allocation2 + $0x68] sm:$0x3] %v9298_v2  ;;  %v9539_v18 = vpack.c.bf16 %v796_v9, %v795_v7  ;;  %v802_v21 = vunpack.c.l.bf16 %v9542_v19  ;;  %v803_v22 = vunpack.c.h.bf16 %v9542_v19  ;;  %v804_v24 = vunpack.c.l.bf16 %v9549_v23  ;;  %v9561_v28 = vld [vmem:[%s9506_s16 + $0x70] sm:$0xff]   ;;  %v9566_v31 = vld [vmem:[%s9506_s16 + $0x78] sm:$0xff]   ;;  %p9235_p11 = scmp.ne.s32.totalorder %s11258_s23, %s9234_s27  ;;  %s9299_s13 = smov [#allocation3]  }
  0x1f   : > { %352 = vst [vmem:[#allocation2 + $0x70] sm:$0xff] %v9298_v2  ;;  %353 = vst [vmem:[#allocation2 + $0x78] sm:$0x3] %v9298_v2  ;;  %8464 = vmatpush3.bf16.msra.mxu1 %v9026_v3  ;;  %7547 = vmatpush3.bf16.msra.mxu0 %v9026_v3  ;;  %v9544_v20 = vpack.c.bf16 %v798_v12, %v797_v10  ;;  %v805_v25 = vunpack.c.h.bf16 %v9549_v23  ;;  %v9553_v26 = vpack.c.bf16 %v800_v16, %v799_v13  ;;  %v9571_v34 = vld [vmem:[%s9506_s16] sm:$0xff]   ;;  %v9577_v37 = vld [vmem:[%s9506_s16 + $0x8] sm:$0xff]   ;;  %s9238_s28 = sshll.u32 %s9299_s13, 4  ;;  %s9239_s28 = int_to_ptr.vmem [resolvable:$false] %s9238_s28 }
  0x20   : > { %354 = vst [vmem:[#allocation2 + $0x80] sm:$0xff] %v9298_v2  ;;  %355 = vst [vmem:[#allocation2 + $0x88] sm:$0x3] %v9298_v2  ;;  %8457 = vmatprep.subr.bf16.mxu1 %v9027_v4  ;;  %7548 = vmatprep.subr.bf16.mxu0 %v9027_v4  ;;  %v806_v29 = vunpack.c.l.bf16 %v9561_v28  ;;  %v807_v30 = vunpack.c.h.bf16 %v9561_v28  ;;  %v808_v32 = vunpack.c.l.bf16 %v9566_v31  ;;  %v809_v33 = vunpack.c.h.bf16 %v9566_v31  ;;  %v9587_v42 = vld [vmem:[%s9506_s16 + $0x10] sm:$0xff]   ;;  %v9598_v46 = vld [vmem:[%s9506_s16 + $0x18] sm:$0xf]  ;;  %p9236_p12 = pnand %p9235_p11, %p9390_p5  ;;  %p9241_p0 = scmp.lt.s32.totalorder %s11258_s23, %s9239_s28 }
  0x21   : > { %356 = vst [vmem:[#allocation2 + $0x90] sm:$0xff] %v9298_v2  ;;  %357 = vst [vmem:[#allocation2 + $0x98] sm:$0x3] %v9298_v2  ;;  %v9573_v35 = vpack.c.bf16 %v804_v24, %v803_v22  ;;  %v778_v36 = vunpack.c.l.bf16 %v9571_v34  ;;  %v779_v38 = vunpack.c.h.bf16 %v9571_v34  ;;  %v780_v41 = vunpack.c.l.bf16 %v9577_v37  ;;  %v9607_v49 = vld [vmem:[%s9506_s16 + $0x20] sm:$0xff]   ;;  %v9615_v51 = vld [vmem:[%s9506_s16 + $0x28] sm:$0xff]   ;;  %s9240_s29 = scalar_lea.vmem %s9239_s28, 128 }
  0x22   : > { %358 = vst [vmem:[#allocation2 + $0xa0] sm:$0xff] %v9298_v2  ;;  %359 = vst [vmem:[#allocation2 + $0xa8] sm:$0x3] %v9298_v2  ;;  %v9580_v39 = vpack.c.bf16 %v806_v29, %v805_v25  ;;  %v781_v43 = vunpack.c.h.bf16 %v9577_v37  ;;  %v9590_v44 = vpack.c.bf16 %v808_v32, %v807_v30  ;;  %v782_v45 = vunpack.c.l.bf16 %v9587_v42  ;;  %v9625_v55 = vld [vmem:[%s9506_s16 + $0x30] sm:$0xff]   ;;  %v9629_v57 = vld [vmem:[%s9506_s16 + $0x38] sm:$0xf]  ;;  %p9237_p13 = pneg %p9236_p12  ;;  %p9242_p1 = scmp.lt.s32.totalorder %s9240_s29, %s9234_s27 }
  0x23   : > { %360 = vst [vmem:[#allocation2 + $0xb0] sm:$0xff] %v9298_v2  ;;  %361 = vst [vmem:[#allocation2 + $0xb8] sm:$0x3] %v9298_v2  ;;  %8465 = vmatpush3.bf16.msra.mxu1 %v9027_v4  ;;  %7549 = vmatpush3.bf16.msra.mxu0 %v9027_v4  ;;  %v783_v47 = vunpack.c.h.bf16 %v9587_v42  ;;  %v784_v48 = vunpack.c.l.bf16 %v9598_v46  ;;  %v786_v50 = vunpack.c.l.bf16 %v9607_v49  ;;  %v787_v52 = vunpack.c.h.bf16 %v9607_v49  ;;  %v9042_v1 = vld [vmem:[%s11307_s3 + $0x60] sm:$0xff]   ;;  %v9046_v3 = vld [vmem:[%s11307_s3 + $0x70] sm:$0xff]  }
  0x24   : > { %362 = vst [vmem:[#allocation2 + $0xc0] sm:$0xff] %v9298_v2  ;;  %363 = vst [vmem:[#allocation2 + $0xc8] sm:$0x3] %v9298_v2  ;;  %8458 = vmatprep.subr.bf16.mxu1 %v9028_v15  ;;  %7550 = vmatprep.subr.bf16.mxu0 %v9028_v15  ;;  %v788_v54 = vunpack.c.l.bf16 %v9615_v51  ;;  %v789_v56 = vunpack.c.h.bf16 %v9615_v51  ;;  %v790_v58 = vunpack.c.l.bf16 %v9625_v55  ;;  %v791_v59 = vunpack.c.h.bf16 %v9625_v55  ;;  %v909_v4 = vld [vmem:[#allocation2 + $0x1] sm:$0xff]  ;;  %v9059_v46 = vld [vmem:[%s11307_s3 + $0x98] sm:$0xff]   ;;  %p9243_p2 = por %p9242_p1, %p9241_p0 }
  0x25   : > { %364 = vst [vmem:[#allocation2 + $0xd0] sm:$0xff] %v9298_v2  ;;  %365 = vst [vmem:[#allocation2 + $0xd8] sm:$0x3] %v9298_v2  ;;  %v792_v60 = vunpack.c.l.bf16 %v9629_v57  ;;  %v9745_v34 = vld [vmem:[#allocation2] sm:$0xff]  ;;  %v9057_v37 = vld [vmem:[%s11307_s3 + $0x88] sm:$0xff]  }
  0x26   : > { %366 = vst [vmem:[#allocation2 + $0xe0] sm:$0xff] %v9298_v2  ;;  %367 = vst [vmem:[#allocation2 + $0xe8] sm:$0x3] %v9298_v2  ;;  %v9060_v51 = vld [vmem:[%s11307_s3 + $0xa0] sm:$0xff]   ;;  %p9244_p3 = pnand %p9243_p2, %p9237_p13 }
  0x27   : > { %368 = vst [vmem:[#allocation2 + $0xf0] sm:$0xff] %v9298_v2  ;;  %369 = vst [vmem:[#allocation2 + $0xf8] sm:$0x3] %v9298_v2  ;;  %8466 = vmatpush3.bf16.msra.mxu1 %v9028_v15  ;;  %7551 = vmatpush3.bf16.msra.mxu0 %v9028_v15  ;;  %v944_v15 = vpack.c.bf16 %v784_v48, %v783_v47 }
  0x28   : > { %370 = vst [vmem:[#allocation2 + $0x100] sm:$0xff] %v9298_v2  ;;  %371 = vst [vmem:[#allocation2 + $0x108] sm:$0x3] %v9298_v2  ;;  %8459 = vmatprep.subr.bf16.mxu1 %v9029_v27  ;;  %7552 = vmatprep.subr.bf16.mxu0 %v9029_v27 }
  0x29   : > { %372 = vst [vmem:[#allocation2 + $0x110] sm:$0xff] %v9298_v2  ;;  %373 = vst [vmem:[#allocation2 + $0x118] sm:$0x3] %v9298_v2 }
  0x2a   : > { %374 = vst [vmem:[#allocation2 + $0x120] sm:$0xff] %v9298_v2  ;;  %375 = vst [vmem:[#allocation2 + $0x128] sm:$0x3] %v9298_v2 }
  0x2b   : > { %376 = vst [vmem:[#allocation2 + $0x130] sm:$0xff] %v9298_v2  ;;  %377 = vst [vmem:[#allocation2 + $0x138] sm:$0x3] %v9298_v2  ;;  %8467 = vmatpush3.bf16.msra.mxu1 %v9029_v27  ;;  %7553 = vmatpush3.bf16.msra.mxu0 %v9029_v27 }
  0x2c   : > { %378 = vst [vmem:[#allocation2 + $0x140] sm:$0xff] %v9298_v2  ;;  %379 = vst [vmem:[#allocation2 + $0x148] sm:$0x3] %v9298_v2  ;;  %8460 = vmatprep.subr.bf16.mxu1 %v9030_v40  ;;  %7554 = vmatprep.subr.bf16.mxu0 %v9030_v40 }
  0x2d   : > { %384 = vst [vmem:[#allocation2 + $0x170] sm:$0xff] %v9298_v2  ;;  %385 = vst [vmem:[#allocation2 + $0x178] sm:$0x3] %v9298_v2 }
  0x2e   : > { %386 = vst [vmem:[#allocation2 + $0x180] sm:$0xff] %v9298_v2  ;;  %387 = vst [vmem:[#allocation2 + $0x188] sm:$0x3] %v9298_v2 }
  0x2f   : > { %388 = vst [vmem:[#allocation2 + $0x190] sm:$0xff] %v9298_v2  ;;  %389 = vst [vmem:[#allocation2 + $0x198] sm:$0x3] %v9298_v2  ;;  %8468 = vmatpush3.bf16.msra.mxu1 %v9030_v40  ;;  %7555 = vmatpush3.bf16.msra.mxu0 %v9030_v40 }
  0x30   : > { %390 = vst [vmem:[#allocation2 + $0x1a0] sm:$0xff] %v9298_v2  ;;  %391 = vst [vmem:[#allocation2 + $0x1a8] sm:$0x3] %v9298_v2  ;;  %8461 = vmatprep.subr.bf16.mxu1 %v9031_v53  ;;  %7556 = vmatprep.subr.bf16.mxu0 %v9031_v53 }
  0x31   : > { %392 = vst [vmem:[#allocation2 + $0x1b0] sm:$0xff] %v9298_v2  ;;  %393 = vst [vmem:[#allocation2 + $0x1b8] sm:$0x3] %v9298_v2 }
  0x32   : > { %394 = vst [vmem:[#allocation2 + $0x1c0] sm:$0xff] %v9298_v2  ;;  %395 = vst [vmem:[#allocation2 + $0x1c8] sm:$0x3] %v9298_v2 }
  0x33   : > { %396 = vst [vmem:[#allocation2 + $0x1d0] sm:$0xff] %v9298_v2  ;;  %397 = vst [vmem:[#allocation2 + $0x1d8] sm:$0x3] %v9298_v2  ;;  %8469 = vmatpush3.bf16.msra.mxu1 %v9031_v53  ;;  %7557 = vmatpush3.bf16.msra.mxu0 %v9031_v53  ;;  %v925_v27 = vld [vmem:[#allocation2 + $0x141] sm:$0xff] }
  0x34   : > { %398 = vst [vmem:[#allocation2 + $0x1e0] sm:$0xff] %v9298_v2  ;;  %399 = vst [vmem:[#allocation2 + $0x1e8] sm:$0x3] %v9298_v2  ;;  %7590 = vmatprep.subr.bf16.mxu1 %v9034_v61 }
  0x35   : > { %400 = vst [vmem:[#allocation2 + $0x1f0] sm:$0xff] %v9298_v2  ;;  %401 = vst [vmem:[#allocation2 + $0x1f8] sm:$0x3] %v9298_v2 }
  0x36   : > { %402 = vst [vmem:[#allocation2 + $0x200] sm:$0xff] %v9298_v2  ;;  %403 = vst [vmem:[#allocation2 + $0x208] sm:$0x3] %v9298_v2  ;;  %7575 = vmatmul.mubr.bf16.vlgmr.msra.gmra.mrb[0].mxu1 %v9519_v8  ;;  %v941_v8 = vpack.c.bf16 %v778_v36, %v909_v4  ;;  %v9064_v4 = vld [vmem:[%s11307_s3 + $0xc0] sm:$0xff]  }
  0x37   : > { %404 = vst [vmem:[#allocation2 + $0x210] sm:$0xff] %v9298_v2  ;;  %405 = vst [vmem:[#allocation2 + $0x218] sm:$0x3] %v9298_v2  ;;  %7591 = vmatpush3.bf16.msra.mxu1 %v9034_v61  ;;  %7578 = vmatprep.mubr.bf16.mxu1 %v9524_v11  ;;  %v9049_v11 = vld [vmem:[%s11307_s3 + $0x8] sm:$0xff]  }
  0x38   : > { %406 = vst [vmem:[#allocation2 + $0x220] sm:$0xff] %v9298_v2  ;;  %407 = vst [vmem:[#allocation2 + $0x228] sm:$0x3] %v9298_v2  ;;  %7592 = vmatprep.subr.bf16.mxu1 %v9035_v62 }
  0x39   : > { %408 = vst [vmem:[#allocation2 + $0x230] sm:$0xff] %v9298_v2  ;;  %409 = vst [vmem:[#allocation2 + $0x238] sm:$0x3] %v9298_v2 }
  0x3a   : > { %410 = vst [vmem:[#allocation2 + $0x240] sm:$0xff] %v9298_v2  ;;  %411 = vst [vmem:[#allocation2 + $0x248] sm:$0x3] %v9298_v2 }
  0x3b   : > { %412 = vst [vmem:[#allocation2 + $0x250] sm:$0xff] %v9298_v2  ;;  %413 = vst [vmem:[#allocation2 + $0x258] sm:$0x3] %v9298_v2  ;;  %7593 = vmatpush3.bf16.msra.mxu1 %v9035_v62 }
  0x3c   : > { %414 = vst [vmem:[#allocation2 + $0x260] sm:$0xff] %v9298_v2  ;;  %415 = vst [vmem:[#allocation2 + $0x268] sm:$0x3] %v9298_v2  ;;  %7594 = vmatprep.subr.bf16.mxu1 %v9038_v63 }
  0x3d   : > { %416 = vst [vmem:[#allocation2 + $0x270] sm:$0xff] %v9298_v2  ;;  %417 = vst [vmem:[#allocation2 + $0x278] sm:$0x3] %v9298_v2  ;;  %v9043_v2 = vld [vmem:[%s11307_s3 + $0x68] sm:$0xff]  }
  0x3e   : > { %829 = vst [vmem:[#allocation2 + $0x151] sm:$0xff] %v794_v6  ;;  %830 = vst [vmem:[#allocation2 + $0x161] sm:$0xff] %v795_v7  ;;  %7579 = vmatmul.mubr.bf16.gmra.mrb[4].mxu1 %v9532_v14  ;;  %v9047_v7 = vld [vmem:[%s11307_s3 + $0x78] sm:$0xff]   ;;  %v9050_v14 = vld [vmem:[%s11307_s3 + $0x10] sm:$0xff]  }
  0x3f   : > { %831 = vst [vmem:[#allocation2 + $0x171] sm:$0xff] %v796_v9  ;;  %832 = vst [vmem:[#allocation2 + $0x181] sm:$0xff] %v797_v10  ;;  %7595 = vmatpush3.bf16.msra.mxu1 %v9038_v63  ;;  %7582 = vmatprep.mubr.bf16.mxu1 %v9542_v19  ;;  %v9048_v9 = vld [vmem:[%s11307_s3] sm:$0xff]   ;;  %v942_v10 = vpack.c.bf16 %v780_v41, %v779_v38  ;;  %v9063_v63 = vld [vmem:[%s11307_s3 + $0xb8] sm:$0xff]  }
  0x40   : > { %833 = vst [vmem:[#allocation2 + $0x191] sm:$0xff] %v798_v12  ;;  %834 = vst [vmem:[#allocation2 + $0x1a1] sm:$0xff] %v799_v13  ;;  %7596 = vmatprep.subr.bf16.mxu1 %v9039_v0  ;;  %v943_v12 = vpack.c.bf16 %v782_v45, %v781_v43  ;;  %v917_v13 = vld [vmem:[#allocation2 + $0xa1] sm:$0xff] }
  0x41   : > { %835 = vst [vmem:[#allocation2 + $0x1b1] sm:$0xff] %v800_v16  ;;  %836 = vst [vmem:[#allocation2 + $0x1c1] sm:$0xff] %v801_v17  ;;  %v9051_v16 = vld [vmem:[%s11307_s3 + $0x18] sm:$0xff]   ;;  %v945_v17 = vpack.c.bf16 %v786_v50, %v917_v13 }
  0x42   : > { %837 = vst [vmem:[#allocation2 + $0x1f1] sm:$0xff] %v802_v21  ;;  %838 = vst [vmem:[#allocation2 + $0x201] sm:$0xff] %v803_v22  ;;  %v9052_v22 = vld [vmem:[%s11307_s3 + $0x20] sm:$0xff]  }
  0x43   : > { %839 = vst [vmem:[#allocation2 + $0x211] sm:$0xff] %v804_v24  ;;  %840 = vst [vmem:[#allocation2 + $0x221] sm:$0xff] %v805_v25  ;;  %7597 = vmatpush3.bf16.msra.mxu1 %v9039_v0  ;;  %v9053_v24 = vld [vmem:[%s11307_s3 + $0x28] sm:$0xff]   ;;  %v947_v25 = vpack.c.bf16 %v790_v58, %v789_v56 }
  0x44   : > { %841 = vst [vmem:[#allocation2 + $0x231] sm:$0xff] %v806_v29  ;;  %842 = vst [vmem:[#allocation2 + $0x241] sm:$0xff] %v807_v30  ;;  %7598 = vmatprep.subr.bf16.mxu1 %v9042_v1  ;;  %v948_v29 = vpack.c.bf16 %v792_v60, %v791_v59  ;;  %v9055_v30 = vld [vmem:[%s11307_s3 + $0x38] sm:$0xff]  }
  0x45   : > { %843 = vst [vmem:[#allocation2 + $0x251] sm:$0xff] %v808_v32  ;;  %844 = vst [vmem:[#allocation2 + $0x261] sm:$0xff] %v809_v33  ;;  %v9056_v32 = vld [vmem:[%s11307_s3 + $0x80] sm:$0xff]  }
  0x46   : > { %813 = vst [vmem:[#allocation2 + $0x11] sm:$0xff] %v778_v36  ;;  %814 = vst [vmem:[#allocation2 + $0x21] sm:$0xff] %v779_v38  ;;  %7583 = vmatmul.mubr.bf16.gmra.mrb[8].mxu1 %v9549_v23  ;;  %v946_v23 = vpack.c.bf16 %v788_v54, %v787_v52  ;;  %v933_v33 = vld [vmem:[#allocation2 + $0x1e1] sm:$0xff] }
  0x47   : > { %815 = vst [vmem:[#allocation2 + $0x31] sm:$0xff] %v780_v41  ;;  %816 = vst [vmem:[#allocation2 + $0x41] sm:$0xff] %v781_v43  ;;  %7599 = vmatpush3.bf16.msra.mxu1 %v9042_v1  ;;  %7586 = vmatprep.mubr.bf16.mxu1 %v9561_v28  ;;  %v9054_v28 = vld [vmem:[%s11307_s3 + $0x30] sm:$0xff]   ;;  %v953_v5 = vpack.c.bf16 %v802_v21, %v933_v33  ;;  %v9825_v0 = vld [vmem:[#allocation2 + $0x160] sm:$0xff] }
  0x48   : > { %817 = vst [vmem:[#allocation2 + $0x51] sm:$0xff] %v782_v45  ;;  %818 = vst [vmem:[#allocation2 + $0x61] sm:$0xff] %v783_v47  ;;  %7600 = vmatprep.subr.bf16.mxu1 %v9043_v2  ;;  %v9058_v43 = vld [vmem:[%s11307_s3 + $0x90] sm:$0xff]  }
  0x49   : > { %819 = vst [vmem:[#allocation2 + $0x71] sm:$0xff] %v784_v48  ;;  %821 = vst [vmem:[#allocation2 + $0xb1] sm:$0xff] %v786_v50  ;;  %v9827_v1 = vld [vmem:[#allocation2 + $0x170] sm:$0xff] }
  0x4a   : > { %822 = vst [vmem:[#allocation2 + $0xc1] sm:$0xff] %v787_v52  ;;  %823 = vst [vmem:[#allocation2 + $0xd1] sm:$0xff] %v788_v54  ;;  %v433_v52 = vld [vmem:[%s9506_s16 + $0x3c] sm:$0xf] }
  0x4b   : > { %824 = vst [vmem:[#allocation2 + $0xe1] sm:$0xff] %v789_v56  ;;  %825 = vst [vmem:[#allocation2 + $0xf1] sm:$0xff] %v790_v58  ;;  %7601 = vmatpush3.bf16.msra.mxu1 %v9043_v2  ;;  %v9801_v54 = vunpack.c.l.bf16 %v433_v52  ;;  %v9061_v56 = vld [vmem:[%s11307_s3 + $0xa8] sm:$0xff]   ;;  %v9829_v2 = vld [vmem:[#allocation2 + $0x180] sm:$0xff] }
  0x4c   : > { %826 = vst [vmem:[#allocation2 + $0x101] sm:$0xff] %v791_v59  ;;  %827 = vst [vmem:[#allocation2 + $0x111] sm:$0xff] %v792_v60  ;;  %7602 = vmatprep.subr.bf16.mxu1 %v9046_v3  ;;  %v9813_v59 = vld [vmem:[#allocation2 + $0x150] sm:$0xff] }
  0x4d   : > { %11360 = vst [vmem:[#allocation6_spill] sm:$0xff] %v9745_v34  ;;  %828 = vst [vmem:[#allocation2 + $0x121] sm:$0xff] %v9801_v54  ;;  %v9062_v60 = vld [vmem:[%s11307_s3 + $0xb0] sm:$0xff]   ;;  %v885_v62 = vpack.c.bf16 %v9813_v59, %v9745_v34 }
  0x4e   : > { %7587 = vmatmul.mubr.bf16.gmra.mrb[12].mxu1 %v9566_v31  ;;  %v949_v31 = vpack.c.bf16 %v794_v6, %v925_v27  ;;  %v9742_v6 = vld [vmem:[#allocation2 + $0x10] sm:$0xff]  ;;  %v9754_v19 = vld [vmem:[#allocation2 + $0x40] sm:$0xff] }
  0x4f   : > { %7603 = vmatpush3.bf16.msra.mxu1 %v9046_v3  ;;  %7606 = vmatprep.mubr.bf16.mxu1 %v941_v8  ;;  %v9751_v36 = vld [vmem:[#allocation2 + $0x30] sm:$0xff]  ;;  %v9771_v40 = vld [vmem:[#allocation2 + $0x60] sm:$0xff] }
  0x50   : > { %7604 = vmatprep.subr.bf16.mxu1 %v9047_v7  ;;  %v9756_v21 = vld [vmem:[#allocation2 + $0x50] sm:$0xff]  ;;  %v1392_v27 = vld [vmem:[#allocation2 + $0x2] sm:$0xff] }
  0x51   : > { %v9773_v41 = vld [vmem:[#allocation2 + $0x70] sm:$0xff]  ;;  %v9787_v47 = vld [vmem:[#allocation2 + $0xc0] sm:$0xff] }
  0x52   : > { %v9775_v42 = vld [vmem:[#allocation2 + $0xb0] sm:$0xff]  ;;  %v9791_v49 = vld [vmem:[#allocation2 + $0xe0] sm:$0xff] }
  0x53   : > { %7605 = vmatpush3.bf16.msra.mxu1 %v9047_v7  ;;  %v881_v45 = vpack.c.bf16 %v9775_v42, %v9745_v34  ;;  %v9789_v48 = vld [vmem:[#allocation2 + $0xd0] sm:$0xff]  ;;  %v9809_v57 = vld [vmem:[#allocation2 + $0x100] sm:$0xff]  ;;  %v886_v7 = vpack.c.bf16 %v9827_v1, %v9825_v0 }
  0x54   : > { %7638 = vmatprep.subr.bf16.mxu1 %v9048_v9  ;;  %v9793_v50 = vld [vmem:[#allocation2 + $0xf0] sm:$0xff]  ;;  %v882_v53 = vpack.c.bf16 %v9789_v48, %v9787_v47  ;;  %v9875_v33 = vld [vmem:[#allocation2 + $0x42] sm:$0xff] }
  0x55   : > { %v883_v55 = vpack.c.bf16 %v9793_v50, %v9791_v49  ;;  %v9811_v58 = vld [vmem:[#allocation2 + $0x110] sm:$0xff] }
  0x56   : > { %7607 = vmatmul.mubr.bf16.vlgmr.msra.gmra.mrb[16].mxu1 %v942_v10  ;;  %v884_v61 = vpack.c.bf16 %v9811_v58, %v9809_v57  ;;  %v9831_v3 = vld [vmem:[#allocation2 + $0x190] sm:$0xff] }
  0x57   : > { %7639 = vmatpush3.bf16.msra.mxu1 %v9048_v9  ;;  %7610 = vmatprep.mubr.bf16.mxu1 %v943_v12  ;;  %v887_v8 = vpack.c.bf16 %v9831_v3, %v9829_v2  ;;  %v9840_v9 = vld [vmem:[#allocation2 + $0x1a0] sm:$0xff]  ;;  %v9842_v10 = vld [vmem:[#allocation2 + $0x1b0] sm:$0xff] }
  0x58   : > { %7640 = vmatprep.subr.bf16.mxu1 %v9049_v11  ;;  %v888_v12 = vpack.c.bf16 %v9842_v10, %v9840_v9 }
  0x5b   : > { %7641 = vmatpush3.bf16.msra.mxu1 %v9049_v11  ;;  %v9844_v11 = vld [vmem:[#allocation2 + $0x1f0] sm:$0xff] }
  0x5c   : > { %7642 = vmatprep.subr.bf16.mxu1 %v9050_v14  ;;  %v889_v13 = vpack.c.bf16 %v9844_v11, %v9745_v34 }
  0x5e   : > { %7611 = vmatmul.mubr.bf16.gmra.mrb[20].mxu1 %v944_v15  ;;  %v9852_v15 = vld [vmem:[#allocation2 + $0x210] sm:$0xff] }
  0x5f   : > { %7614 = vmatprep.mubr.bf16.mxu1 %v945_v17  ;;  %7643 = vmatpush3.bf16.msra.mxu1 %v9050_v14  ;;  %v9850_v14 = vld [vmem:[#allocation2 + $0x200] sm:$0xff]  ;;  %v9856_v17 = vld [vmem:[#allocation2 + $0x230] sm:$0xff] }
  0x60   : > { %7644 = vmatprep.subr.bf16.mxu1 %v9051_v16 }
  0x63   : > { %7645 = vmatpush3.bf16.msra.mxu1 %v9051_v16  ;;  %v9854_v16 = vld [vmem:[#allocation2 + $0x220] sm:$0xff] }
  0x64   : > { %7646 = vmatprep.subr.bf16.mxu1 %v9052_v22 }
  0x66   : > { %7615 = vmatmul.mubr.bf16.gmra.mrb[24].mxu1 %v946_v23  ;;  %v891_v23 = vpack.c.bf16 %v9856_v17, %v9854_v16 }
  0x67   : > { %7618 = vmatprep.mubr.bf16.mxu1 %v947_v25  ;;  %7647 = vmatpush3.bf16.msra.mxu1 %v9052_v22  ;;  %v890_v22 = vpack.c.bf16 %v9852_v15, %v9850_v14  ;;  %v9864_v25 = vld [vmem:[#allocation2 + $0x250] sm:$0xff] }
  0x68   : > { %7648 = vmatprep.subr.bf16.mxu1 %v9053_v24 }
  0x6b   : > { %7649 = vmatpush3.bf16.msra.mxu1 %v9053_v24  ;;  %v9862_v24 = vld [vmem:[#allocation2 + $0x240] sm:$0xff] }
  0x6c   : > { %7650 = vmatprep.subr.bf16.mxu1 %v9054_v28 }
  0x6e   : > { %7619 = vmatmul.mubr.bf16.gmra.mrb[28].mxu1 %v948_v29  ;;  %v892_v29 = vpack.c.bf16 %v9864_v25, %v9862_v24 }
  0x6f   : > { %7622 = vmatprep.mubr.bf16.mxu1 %v949_v31  ;;  %7651 = vmatpush3.bf16.msra.mxu1 %v9054_v28  ;;  %v9866_v28 = vld [vmem:[#allocation2 + $0x12] sm:$0xff]  ;;  %v9871_v31 = vld [vmem:[#allocation2 + $0x22] sm:$0xff] }
  0x70   : > { %7652 = vmatprep.subr.bf16.mxu1 %v9055_v30 }
  0x73   : > { %7653 = vmatpush3.bf16.msra.mxu1 %v9055_v30  ;;  %v1424_v30 = vpack.c.bf16 %v9866_v28, %v1392_v27 }
  0x74   : > { %7686 = vmatprep.subr.bf16.mxu1 %v9056_v32 }
  0x76   : > { %7623 = vmatmul.mubr.bf16.gmra.mrb[32].mxu1 %v9539_v18  ;;  %v877_v18 = vpack.c.bf16 %v9742_v6, %v9745_v34 }
  0x77   : > { %7626 = vmatprep.mubr.bf16.mxu1 %v9544_v20  ;;  %v9749_v20 = vld [vmem:[#allocation2 + $0x20] sm:$0xff] }
  0x7e   : > { %7627 = vmatmul.mubr.bf16.gmra.mrb[36].mxu1 %v9553_v26  ;;  %v9759_v26 = vld [vmem:[%s9506_s16 + $0x1c] sm:$0xf] }
  0x7f   : > { %7630 = vmatprep.mubr.bf16.mxu1 %v953_v5  ;;  %v11314_v38 = vunpack.c.l.bf16 %v9759_v26  ;;  %v9877_v5 = vld [vmem:[#allocation2 + $0x52] sm:$0xff] }
  0x81   : > { %820 = vst [vmem:[#allocation2 + $0x81] sm:$0xff] %v11314_v38  ;;  %v9970_v38 = vld [vmem:[#allocation2 + $0x242] sm:$0xff] }
  0x86   : > { %7631 = vmatmul.mubr.bf16.gmra.mrb[40].mxu1 %v9573_v35  ;;  %v878_v35 = vpack.c.bf16 %v9751_v36, %v9749_v20 }
  0x87   : > { %7634 = vmatprep.mubr.bf16.mxu1 %v9580_v39  ;;  %v879_v39 = vpack.c.bf16 %v9756_v21, %v9754_v19 }
  0x8e   : > { %7635 = vmatmul.mubr.bf16.gmra.mrb[44].mxu1 %v9590_v44  ;;  %v880_v44 = vpack.c.bf16 %v9773_v41, %v9771_v40 }
  0x8f   : > { %7654 = vmatprep.mubr.bf16.mxu1 %v877_v18 }
  0x96   : > { %7655 = vmatmul.mubr.bf16.vlgmr.msra.gmra.mrb[16].mxu1 %v878_v35  ;;  %v1426_v35 = vpack.c.bf16 %v9877_v5, %v9875_v33 }
  0x97   : > { %7687 = vmatpush3.bf16.msra.mxu1 %v9056_v32  ;;  %7658 = vmatprep.mubr.bf16.mxu1 %v879_v39  ;;  %v9873_v32 = vld [vmem:[#allocation2 + $0x32] sm:$0xff]  ;;  %v9886_v39 = vld [vmem:[#allocation2 + $0x62] sm:$0xff] }
  0x98   : > { %7688 = vmatprep.subr.bf16.mxu1 %v9057_v37  ;;  %v1425_v18 = vpack.c.bf16 %v9873_v32, %v9871_v31 }
  0x9b   : > { %7689 = vmatpush3.bf16.msra.mxu1 %v9057_v37  ;;  %v9065_v37 = vld [vmem:[%s11307_s3 + $0xc8] sm:$0xff]  }
  0x9c   : > { %7690 = vmatprep.subr.bf16.mxu1 %v9058_v43 }
  0x9e   : > { %7659 = vmatmul.mubr.bf16.gmra.mrb[20].mxu1 %v880_v44  ;;  %v1400_v44 = vld [vmem:[#allocation2 + $0xa2] sm:$0xff] }
  0x9f   : > { %7662 = vmatprep.mubr.bf16.mxu1 %v881_v45  ;;  %7691 = vmatpush3.bf16.msra.mxu1 %v9058_v43  ;;  %v9888_v43 = vld [vmem:[#allocation2 + $0x72] sm:$0xff] }
  0xa0   : > { %7692 = vmatprep.subr.bf16.mxu1 %v9059_v46  ;;  %v9890_v45 = vld [vmem:[#allocation2 + $0xb2] sm:$0xff] }
  0xa1   : > { %v1428_v52 = vpack.c.bf16 %v9890_v45, %v1400_v44  ;;  %v9940_v44 = vld [vmem:[#allocation2 + $0x192] sm:$0xff] }
  0xa3   : > { %7693 = vmatpush3.bf16.msra.mxu1 %v9059_v46  ;;  %v9066_v46 = vld [vmem:[%s11307_s3 + $0xd0] sm:$0xff]  }
  0xa4   : > { %7694 = vmatprep.subr.bf16.mxu1 %v9060_v51 }
  0xa6   : > { %7663 = vmatmul.mubr.bf16.gmra.mrb[24].mxu1 %v882_v53  ;;  %v9067_v53 = vld [vmem:[%s11307_s3 + $0xd8] sm:$0xff]  }
  0xa7   : > { %7666 = vmatprep.mubr.bf16.mxu1 %v883_v55  ;;  %7695 = vmatpush3.bf16.msra.mxu1 %v9060_v51  ;;  %v1427_v51 = vpack.c.bf16 %v9888_v43, %v9886_v39  ;;  %v9901_v55 = vld [vmem:[#allocation2 + $0xc2] sm:$0xff] }
  0xa8   : > { %7696 = vmatprep.subr.bf16.mxu1 %v9061_v56 }
  0xab   : > { %7697 = vmatpush3.bf16.msra.mxu1 %v9061_v56  ;;  %v9903_v56 = vld [vmem:[#allocation2 + $0xd2] sm:$0xff] }
  0xac   : > { %7698 = vmatprep.subr.bf16.mxu1 %v9062_v60 }
  0xae   : > { %7667 = vmatmul.mubr.bf16.gmra.mrb[28].mxu1 %v884_v61  ;;  %v9907_v61 = vld [vmem:[#allocation2 + $0xf2] sm:$0xff] }
  0xaf   : > { %7670 = vmatprep.mubr.bf16.mxu1 %v885_v62  ;;  %7699 = vmatpush3.bf16.msra.mxu1 %v9062_v60  ;;  %v9905_v60 = vld [vmem:[#allocation2 + $0xe2] sm:$0xff] }
  0xb0   : > { %7700 = vmatprep.subr.bf16.mxu1 %v9063_v63  ;;  %v9068_v62 = vld [vmem:[%s11307_s3 + $0xe0] sm:$0xff]  }
  0xb3   : > { %7701 = vmatpush3.bf16.msra.mxu1 %v9063_v63  ;;  %v1429_v63 = vpack.c.bf16 %v9903_v56, %v9901_v55 }
  0xb4   : > { %7734 = vmatprep.subr.bf16.mxu1 %v9064_v4 }
  0xb6   : > { %7671 = vmatmul.mubr.bf16.gmra.mrb[32].mxu1 %v886_v7  ;;  %v9069_v7 = vld [vmem:[%s11307_s3 + $0xe8] sm:$0xff]  }
  0xb7   : > { %7674 = vmatprep.mubr.bf16.mxu1 %v887_v8  ;;  %v9919_v8 = vld [vmem:[#allocation2 + $0x102] sm:$0xff] }
  0xbe   : > { %7675 = vmatmul.mubr.bf16.gmra.mrb[36].mxu1 %v888_v12  ;;  %v9921_v12 = vld [vmem:[#allocation2 + $0x112] sm:$0xff] }
  0xbf   : > { %7678 = vmatprep.mubr.bf16.mxu1 %v889_v13  ;;  %v1408_v13 = vld [vmem:[#allocation2 + $0x142] sm:$0xff]  ;;  %v1431_v27 = vpack.c.bf16 %v9921_v12, %v9919_v8 }
  0xc6   : > { %7679 = vmatmul.mubr.bf16.gmra.mrb[40].mxu1 %v890_v22  ;;  %v9923_v22 = vld [vmem:[#allocation2 + $0x152] sm:$0xff] }
  0xc7   : > { %7682 = vmatprep.mubr.bf16.mxu1 %v891_v23  ;;  %v9070_v23 = vld [vmem:[%s11307_s3 + $0xf0] sm:$0xff]  }
  0xce   : > { %7683 = vmatmul.mubr.bf16.gmra.mrb[44].mxu1 %v892_v29  ;;  %v1432_v29 = vpack.c.bf16 %v9923_v22, %v1408_v13 }
  0xcf   : > { %7702 = vmatprep.mubr.bf16.mxu1 %v1424_v30  ;;  %v9071_v30 = vld [vmem:[%s11307_s3 + $0xf8] sm:$0xff]  }
  0xd6   : > { %7703 = vmatmul.mubr.bf16.vlgmr.msra.gmra.mrb[16].mxu1 %v1425_v18  ;;  %v9934_v18 = vld [vmem:[#allocation2 + $0x162] sm:$0xff] }
  0xd7   : > { %7735 = vmatpush3.bf16.msra.mxu1 %v9064_v4  ;;  %7706 = vmatprep.mubr.bf16.mxu1 %v1426_v35  ;;  %v1430_v4 = vpack.c.bf16 %v9907_v61, %v9905_v60  ;;  %v9936_v35 = vld [vmem:[#allocation2 + $0x172] sm:$0xff] }
  0xd8   : > { %7736 = vmatprep.subr.bf16.mxu1 %v9065_v37 }
  0xdb   : > { %7737 = vmatpush3.bf16.msra.mxu1 %v9065_v37  ;;  %v9938_v37 = vld [vmem:[#allocation2 + $0x182] sm:$0xff] }
  0xdc   : > { %7738 = vmatprep.subr.bf16.mxu1 %v9066_v46 }
  0xde   : > { %7707 = vmatmul.mubr.bf16.gmra.mrb[20].mxu1 %v1427_v51  ;;  %v1433_v51 = vpack.c.bf16 %v9936_v35, %v9934_v18 }
  0xdf   : > { %7710 = vmatprep.mubr.bf16.mxu1 %v1428_v52  ;;  %7739 = vmatpush3.bf16.msra.mxu1 %v9066_v46  ;;  %v9072_v46 = vld [vmem:[%s11307_s3 + $0x100] sm:$0xff]   ;;  %v1434_v52 = vpack.c.bf16 %v9940_v44, %v9938_v37 }
  0xe0   : > { %7740 = vmatprep.subr.bf16.mxu1 %v9067_v53 }
  0xe3   : > { %7741 = vmatpush3.bf16.msra.mxu1 %v9067_v53  ;;  %v9949_v53 = vld [vmem:[#allocation2 + $0x1a2] sm:$0xff] }
  0xe4   : > { %7742 = vmatprep.subr.bf16.mxu1 %v9068_v62 }
  0xe6   : > { %7711 = vmatmul.mubr.bf16.gmra.mrb[24].mxu1 %v1429_v63  ;;  %v1416_v63 = vld [vmem:[#allocation2 + $0x1e2] sm:$0xff] }
  0xe7   : > { %7714 = vmatprep.mubr.bf16.mxu1 %v1430_v4  ;;  %7743 = vmatpush3.bf16.msra.mxu1 %v9068_v62  ;;  %v9951_v62 = vld [vmem:[#allocation2 + $0x1b2] sm:$0xff] }
  0xe8   : > { %7744 = vmatprep.subr.bf16.mxu1 %v9069_v7  ;;  %v9953_v4 = vld [vmem:[#allocation2 + $0x1f2] sm:$0xff] }
  0xe9   : > { %11361 = vst [vmem:[#allocation7_spill] sm:$0xff] %v9953_v4  ;;  %v1436_v13 = vpack.c.bf16 %v9953_v4, %v1416_v63  ;;  %v9972_v63 = vld [vmem:[#allocation2 + $0x252] sm:$0xff] }
  0xea   : > { %11364 = vst [vmem:[#allocation10_spill] sm:$0xff] %v9972_v63  ;;  %v1439_v34 = vpack.c.bf16 %v9972_v63, %v9970_v38  ;;  %v1732_v63 = vpack.c.bf16 %v9771_v40, %v9756_v21 }
  0xeb   : > { %7745 = vmatpush3.bf16.msra.mxu1 %v9069_v7  ;;  %v1435_v7 = vpack.c.bf16 %v9951_v62, %v9949_v53 }
  0xec   : > { %7746 = vmatprep.subr.bf16.mxu1 %v9070_v23 }
  0xee   : > { %7715 = vmatmul.mubr.bf16.gmra.mrb[28].mxu1 %v1431_v27  ;;  %v9960_v27 = vld [vmem:[#allocation2 + $0x212] sm:$0xff] }
  0xef   : > { %7718 = vmatprep.mubr.bf16.mxu1 %v1432_v29  ;;  %7747 = vmatpush3.bf16.msra.mxu1 %v9070_v23  ;;  %v9958_v23 = vld [vmem:[#allocation2 + $0x202] sm:$0xff]  ;;  %11363 = vst [vmem:[#allocation9_spill] sm:$0xff] %v9960_v27 }
  0xf0   : > { %7748 = vmatprep.subr.bf16.mxu1 %v9071_v30  ;;  %11362 = vst [vmem:[#allocation8_spill] sm:$0xff] %v9958_v23  ;;  %v9962_v29 = vld [vmem:[#allocation2 + $0x222] sm:$0xff] }
  0xf3   : > { %7749 = vmatpush3.bf16.msra.mxu1 %v9071_v30  ;;  %v9964_v30 = vld [vmem:[#allocation2 + $0x232] sm:$0xff] }
  0xf4   : > { %7782 = vmatprep.subr.bf16.mxu1 %v9072_v46 }
  0xf6   : > { %7719 = vmatmul.mubr.bf16.gmra.mrb[32].mxu1 %v1433_v51  ;;  %v1437_v51 = vpack.c.bf16 %v9960_v27, %v9958_v23  ;;  %v1730_v27 = vpack.c.bf16 %v9749_v20, %v9742_v6  ;;  %v9073_v6 = vld [vmem:[%s11307_s3 + $0x108] sm:$0xff]   ;;  %v9074_v20 = vld [vmem:[%s11307_s3 + $0x110] sm:$0xff]  }
  0xf7   : > { %7722 = vmatprep.mubr.bf16.mxu1 %v1434_v52  ;;  %v1438_v52 = vpack.c.bf16 %v9964_v30, %v9962_v29 }
  0xfe   : > { %7723 = vmatmul.mubr.bf16.gmra.mrb[36].mxu1 %v1435_v7 }
  0xff   : > { %7726 = vmatprep.mubr.bf16.mxu1 %v1436_v13 }
 0x106   : > { %7727 = vmatmul.mubr.bf16.gmra.mrb[40].mxu1 %v1437_v51 }
 0x107   : > { %7730 = vmatprep.mubr.bf16.mxu1 %v1438_v52 }
 0x109   : > { %v9974_v7 = vpop.f32.mrb[0].mxu1 }
 0x10a   : > { %11365 = vst [vmem:[#allocation11_spill] sm:$0xff] %v9974_v7  ;;  %v9976_v13 = vpop.f32.mrb[1].mxu1  ;;  %v1731_v7 = vpack.c.bf16 %v9754_v19, %v9751_v36 }
 0x10b   : > { %11366 = vst [vmem:[#allocation12_spill] sm:$0xff] %v9976_v13  ;;  %v9980_v4 = vpop.f32.mrb[2].mxu1 }
 0x10c   : > { %11367 = vst [vmem:[#allocation13_spill] sm:$0xff] %v9980_v4  ;;  %v9984_v23 = vpop.f32.mrb[3].mxu1 }
 0x10d   : > { %11368 = vst [vmem:[#allocation14_spill] sm:$0xff] %v9984_v23 }
 0x10e   : > { %7731 = vmatmul.mubr.bf16.gmra.mrb[44].mxu1 %v1439_v34  ;;  %v10001_v34 = vld [vmem:[#allocation2 + $0x80] sm:$0xff] }
 0x10f   : > { %7750 = vmatprep.mubr.bf16.mxu1 %v1730_v27  ;;  %v1733_v21 = vpack.c.bf16 %v10001_v34, %v9773_v41  ;;  %v9076_v41 = vld [vmem:[%s11307_s3 + $0x120] sm:$0xff]  }
 0x111   : > { %v9986_v51 = vpop.f32.mrb[4].mxu1 }
 0x112   : > { %11369 = vst [vmem:[#allocation15_spill] sm:$0xff] %v9986_v51  ;;  %v9988_v52 = vpop.f32.mrb[5].mxu1 }
 0x113   : > { %11370 = vst [vmem:[#allocation16_spill] sm:$0xff] %v9988_v52  ;;  %v9992_v13 = vpop.f32.mrb[6].mxu1 }
 0x114   : > { %11371 = vst [vmem:[#allocation17_spill] sm:$0xff] %v9992_v13  ;;  %v9996_v4 = vpop.f32.mrb[7].mxu1 }
 0x115   : > { %11372 = vst [vmem:[#allocation18_spill] sm:$0xff] %v9996_v4 }
 0x116   : > { %7751 = vmatmul.mubr.bf16.vlgmr.msra.gmra.mrb[16].mxu1 %v1731_v7 }
 0x117   : > { %7783 = vmatpush3.bf16.msra.mxu1 %v9072_v46  ;;  %7754 = vmatprep.mubr.bf16.mxu1 %v1732_v63  ;;  %v1734_v46 = vpack.c.bf16 %v9787_v47, %v9775_v42  ;;  %v9075_v63 = vld [vmem:[%s11307_s3 + $0x118] sm:$0xff]   ;;  %v1735_v42 = vpack.c.bf16 %v9791_v49, %v9789_v48  ;;  %v9078_v48 = vld [vmem:[%s11307_s3 + $0x130] sm:$0xff]  }
 0x118   : > { %7784 = vmatprep.subr.bf16.mxu1 %v9073_v6 }
 0x119   : > { %v10006_v36 = vpop.f32.mrb[8].mxu1 }
 0x11a   : > { %11373 = vst [vmem:[#allocation19_spill] sm:$0xff] %v10006_v36  ;;  %v10008_v19 = vpop.f32.mrb[9].mxu1 }
 0x11b   : > { %11374 = vst [vmem:[#allocation20_spill] sm:$0xff] %v10008_v19  ;;  %v10012_v40 = vpop.f32.mrb[10].mxu1  ;;  %7785 = vmatpush3.bf16.msra.mxu1 %v9073_v6 }
 0x11c   : > { %11375 = vst [vmem:[#allocation21_spill] sm:$0xff] %v10012_v40  ;;  %v10016_v27 = vpop.f32.mrb[11].mxu1  ;;  %7786 = vmatprep.subr.bf16.mxu1 %v9074_v20 }
 0x11d   : > { %11376 = vst [vmem:[#allocation22_spill] sm:$0xff] %v10016_v27  ;;  %v1736_v27 = vpack.c.bf16 %v9809_v57, %v9793_v50  ;;  %v1738_v50 = vpack.c.bf16 %v9825_v0, %v9813_v59  ;;  %v9079_v57 = vld [vmem:[%s11307_s3 + $0x138] sm:$0xff]   ;;  %v1740_v59 = vpack.c.bf16 %v9840_v9, %v9831_v3  ;;  %v10058_v0 = vld [vmem:[#allocation2 + $0x1c0] sm:$0xff] }
 0x11e   : > { %7755 = vmatmul.mubr.bf16.gmra.mrb[20].mxu1 %v1733_v21  ;;  %v10068_v3 = vld [vmem:[#allocation2 + $0x260] sm:$0xff] }
 0x11f   : > { %7758 = vmatprep.mubr.bf16.mxu1 %v1734_v46  ;;  %7787 = vmatpush3.bf16.msra.mxu1 %v9074_v20  ;;  %v9077_v20 = vld [vmem:[%s11307_s3 + $0x128] sm:$0xff]   ;;  %v10039_v46 = vld [vmem:[#allocation2 + $0x120] sm:$0xff]  ;;  %v1745_v9 = vpack.c.bf16 %v10068_v3, %v9864_v25  ;;  %v9213_v25 = vld [vmem:[#allocation2 + $0x71] sm:$0xff] }
 0x120   : > { %7788 = vmatprep.subr.bf16.mxu1 %v9075_v63  ;;  %v1737_v49 = vpack.c.bf16 %v10039_v46, %v9811_v58  ;;  %v1739_v58 = vpack.c.bf16 %v9829_v2, %v9827_v1  ;;  %v1743_v1 = vpack.c.bf16 %v9854_v16, %v9852_v15  ;;  %v1744_v2 = vpack.c.bf16 %v9862_v24, %v9856_v17  ;;  %v9212_v15 = vld [vmem:[#allocation2 + $0x61] sm:$0xff]  ;;  %v9082_v24 = vld [vmem:[%s11307_s3 + $0x150] sm:$0xff]  }
 0x121   : > { %v10024_v7 = vpop.f32.mrb[12].mxu1  ;;  %v9081_v17 = vld [vmem:[%s11307_s3 + $0x148] sm:$0xff]  }
 0x122   : > { %11377 = vst [vmem:[#allocation23_spill] sm:$0xff] %v10024_v7  ;;  %v10026_v6 = vpop.f32.mrb[13].mxu1 }
 0x123   : > { %11378 = vst [vmem:[#allocation24_spill] sm:$0xff] %v10026_v6  ;;  %v10030_v47 = vpop.f32.mrb[14].mxu1  ;;  %7789 = vmatpush3.bf16.msra.mxu1 %v9075_v63  ;;  %v1741_v63 = vpack.c.bf16 %v10058_v0, %v9842_v10  ;;  %v9208_v10 = vld [vmem:[#allocation2 + $0x21] sm:$0xff] }
 0x124   : > { %11379 = vst [vmem:[#allocation25_spill] sm:$0xff] %v10030_v47  ;;  %v10034_v21 = vpop.f32.mrb[15].mxu1  ;;  %7790 = vmatprep.subr.bf16.mxu1 %v9076_v41 }
 0x125   : > { %11380 = vst [vmem:[#allocation26_spill] sm:$0xff] %v10034_v21 }
 0x126   : > { %7759 = vmatmul.mubr.bf16.gmra.mrb[24].mxu1 %v1735_v42  ;;  %v9207_v42 = vld [vmem:[#allocation2 + $0x11] sm:$0xff] }
 0x127   : > { %7762 = vmatprep.mubr.bf16.mxu1 %v1736_v27  ;;  %7791 = vmatpush3.bf16.msra.mxu1 %v9076_v41  ;;  %v9080_v27 = vld [vmem:[%s11307_s3 + $0x140] sm:$0xff]   ;;  %v1742_v41 = vpack.c.bf16 %v9850_v14, %v9844_v11  ;;  %v9209_v11 = vld [vmem:[#allocation2 + $0x31] sm:$0xff] }
 0x128   : > { %7792 = vmatprep.subr.bf16.mxu1 %v9077_v20  ;;  %v9210_v14 = vld [vmem:[#allocation2 + $0x41] sm:$0xff] }
 0x12b   : > { %7793 = vmatpush3.bf16.msra.mxu1 %v9077_v20  ;;  %v2036_v20 = vpack.c.bf16 %v9208_v10, %v9207_v42  ;;  %v9219_v42 = vld [vmem:[#allocation2 + $0x101] sm:$0xff] }
 0x12c   : > { %7794 = vmatprep.subr.bf16.mxu1 %v9078_v48 }
 0x12e   : > { %7763 = vmatmul.mubr.bf16.gmra.mrb[28].mxu1 %v1737_v49  ;;  %v9211_v49 = vld [vmem:[#allocation2 + $0x51] sm:$0xff] }
 0x12f   : > { %7766 = vmatprep.mubr.bf16.mxu1 %v1738_v50  ;;  %7795 = vmatpush3.bf16.msra.mxu1 %v9078_v48  ;;  %v2037_v48 = vpack.c.bf16 %v9210_v14, %v9209_v11  ;;  %v2038_v16 = vpack.c.bf16 %v9212_v15, %v9211_v49  ;;  %v11381_v50 = vunpack.c.l.bf16 %v9759_v26  ;;  %v9217_v26 = vld [vmem:[#allocation2 + $0xe1] sm:$0xff]  ;;  %v2020_v11 = vld [vmem:[#allocation2 + $0x151] sm:$0xff] }
 0x130   : > { %7796 = vmatprep.subr.bf16.mxu1 %v9079_v57  ;;  %v10089_v14 = vld [vmem:[#allocation2 + $0x161] sm:$0xff]  ;;  %v9220_v49 = vld [vmem:[#allocation2 + $0x111] sm:$0xff] }
 0x131   : > { %v2043_v15 = vpack.c.bf16 %v9801_v54, %v9220_v49 }
 0x133   : > { %7797 = vmatpush3.bf16.msra.mxu1 %v9079_v57  ;;  %v2039_v57 = vpack.c.bf16 %v11381_v50, %v9213_v25  ;;  %v10101_v25 = vld [vmem:[#allocation2 + $0x181] sm:$0xff]  ;;  %v10103_v50 = vld [vmem:[#allocation2 + $0x191] sm:$0xff] }
 0x134   : > { %7830 = vmatprep.subr.bf16.mxu1 %v9080_v27 }
 0x136   : > { %7767 = vmatmul.mubr.bf16.gmra.mrb[32].mxu1 %v1739_v58  ;;  %v9214_v58 = vld [vmem:[#allocation2 + $0xb1] sm:$0xff] }
 0x137   : > { %7770 = vmatprep.mubr.bf16.mxu1 %v1740_v59  ;;  %v9215_v59 = vld [vmem:[#allocation2 + $0xc1] sm:$0xff] }
 0x13e   : > { %7771 = vmatmul.mubr.bf16.gmra.mrb[36].mxu1 %v1741_v63  ;;  %v2040_v63 = vpack.c.bf16 %v9215_v59, %v9214_v58  ;;  %v9088_v58 = vld [vmem:[%s11307_s3 + $0x180] sm:$0xff]  }
 0x13f   : > { %7774 = vmatprep.mubr.bf16.mxu1 %v1742_v41  ;;  %v9083_v41 = vld [vmem:[%s11307_s3 + $0x158] sm:$0xff]  }
 0x146   : > { %7775 = vmatmul.mubr.bf16.gmra.mrb[40].mxu1 %v1743_v1  ;;  %v9216_v1 = vld [vmem:[#allocation2 + $0xd1] sm:$0xff] }
 0x147   : > { %7778 = vmatprep.mubr.bf16.mxu1 %v1744_v2  ;;  %v2041_v2 = vpack.c.bf16 %v9217_v26, %v9216_v1  ;;  %v2028_v1 = vld [vmem:[#allocation2 + $0x1f1] sm:$0xff]  ;;  %v10118_v26 = vld [vmem:[#allocation2 + $0x201] sm:$0xff] }
 0x14e   : > { %7779 = vmatmul.mubr.bf16.gmra.mrb[44].mxu1 %v1745_v9  ;;  %v9218_v9 = vld [vmem:[#allocation2 + $0xf1] sm:$0xff] }
 0x14f   : > { %7798 = vmatprep.mubr.bf16.mxu1 %v2036_v20  ;;  %v2042_v10 = vpack.c.bf16 %v9219_v42, %v9218_v9  ;;  %v9085_v20 = vld [vmem:[%s11307_s3 + $0x168] sm:$0xff]   ;;  %v2048_v9 = vpack.c.bf16 %v10118_v26, %v2028_v1  ;;  %v10123_v42 = vld [vmem:[#allocation2 + $0x211] sm:$0xff]  ;;  %v2344_v1 = vpack.c.bf16 %v9886_v39, %v9877_v5  ;;  %v9092_v5 = vld [vmem:[%s11307_s3 + $0x1a0] sm:$0xff]   ;;  %v2347_v39 = vpack.c.bf16 %v9905_v60, %v9903_v56 }
 0x150   : > { %v2350_v60 = vpack.c.bf16 %v9934_v18, %v9923_v22  ;;  %v2352_v22 = vpack.c.bf16 %v9949_v53, %v9940_v44  ;;  %v10191_v18 = vld [vmem:[#allocation2 + $0x1c2] sm:$0xff] }
 0x151   : > { %v10201_v44 = vld [vmem:[#allocation2 + $0x262] sm:$0xff] }
 0x152   : > { %v2617_v53 = vld [vmem:[#allocation2 + $0x20] sm:$0xff] }
 0x156   : > { %7799 = vmatmul.mubr.bf16.vlgmr.msra.gmra.mrb[16].mxu1 %v2037_v48  ;;  %v9086_v48 = vld [vmem:[%s11307_s3 + $0x170] sm:$0xff]  }
 0x157   : > { %7831 = vmatpush3.bf16.msra.mxu1 %v9080_v27  ;;  %7802 = vmatprep.mubr.bf16.mxu1 %v2038_v16  ;;  %v9084_v27 = vld [vmem:[%s11307_s3 + $0x160] sm:$0xff]   ;;  %v2044_v16 = vpack.c.bf16 %v10089_v14, %v2020_v11 }
 0x158   : > { %7832 = vmatprep.subr.bf16.mxu1 %v9081_v17  ;;  %v10129_v11 = vld [vmem:[#allocation2 + $0x241] sm:$0xff] }
 0x15b   : > { %7833 = vmatpush3.bf16.msra.mxu1 %v9081_v17  ;;  %v9087_v17 = vld [vmem:[%s11307_s3 + $0x178] sm:$0xff]  }
 0x15c   : > { %7834 = vmatprep.subr.bf16.mxu1 %v9082_v24 }
 0x15e   : > { %7803 = vmatmul.mubr.bf16.gmra.mrb[20].mxu1 %v2039_v57  ;;  %v10105_v57 = vld [vmem:[#allocation2 + $0x1a1] sm:$0xff] }
 0x15f   : > { %7806 = vmatprep.mubr.bf16.mxu1 %v2040_v63  ;;  %7835 = vmatpush3.bf16.msra.mxu1 %v9082_v24  ;;  %v10099_v24 = vld [vmem:[#allocation2 + $0x171] sm:$0xff]  ;;  %v2046_v63 = vpack.c.bf16 %v10105_v57, %v10103_v50 }
 0x160   : > { %7836 = vmatprep.subr.bf16.mxu1 %v9083_v41  ;;  %v2045_v59 = vpack.c.bf16 %v10101_v25, %v10099_v24 }
 0x163   : > { %7837 = vmatpush3.bf16.msra.mxu1 %v9083_v41  ;;  %v10114_v41 = vld [vmem:[#allocation2 + $0x1b1] sm:$0xff] }
 0x164   : > { %7838 = vmatprep.subr.bf16.mxu1 %v9084_v27 }
 0x166   : > { %7807 = vmatmul.mubr.bf16.gmra.mrb[24].mxu1 %v2041_v2 }
 0x167   : > { %7810 = vmatprep.mubr.bf16.mxu1 %v2042_v10  ;;  %7839 = vmatpush3.bf16.msra.mxu1 %v9084_v27  ;;  %v10116_v27 = vld [vmem:[#allocation2 + $0x1c1] sm:$0xff] }
 0x168   : > { %7840 = vmatprep.subr.bf16.mxu1 %v9085_v20  ;;  %v2047_v2 = vpack.c.bf16 %v10116_v27, %v10114_v41  ;;  %v10125_v10 = vld [vmem:[#allocation2 + $0x221] sm:$0xff] }
 0x16b   : > { %7841 = vmatpush3.bf16.msra.mxu1 %v9085_v20  ;;  %v10127_v20 = vld [vmem:[#allocation2 + $0x231] sm:$0xff] }
 0x16c   : > { %7842 = vmatprep.subr.bf16.mxu1 %v9086_v48  ;;  %v2050_v49 = vpack.c.bf16 %v10129_v11, %v10127_v20 }
 0x16e   : > { %7811 = vmatmul.mubr.bf16.gmra.mrb[28].mxu1 %v2043_v15  ;;  %v10135_v15 = vld [vmem:[#allocation2 + $0x251] sm:$0xff] }
 0x16f   : > { %7814 = vmatprep.mubr.bf16.mxu1 %v2044_v16  ;;  %7843 = vmatpush3.bf16.msra.mxu1 %v9086_v48  ;;  %v2049_v48 = vpack.c.bf16 %v10125_v10, %v10123_v42  ;;  %v10137_v16 = vld [vmem:[#allocation2 + $0x261] sm:$0xff] }
 0x170   : > { %7844 = vmatprep.subr.bf16.mxu1 %v9087_v17 }
 0x173   : > { %7845 = vmatpush3.bf16.msra.mxu1 %v9087_v17  ;;  %v2051_v17 = vpack.c.bf16 %v10137_v16, %v10135_v15 }
 0x174   : > { %7878 = vmatprep.subr.bf16.mxu1 %v9088_v58 }
 0x176   : > { %7815 = vmatmul.mubr.bf16.gmra.mrb[32].mxu1 %v2045_v59  ;;  %v2342_v59 = vpack.c.bf16 %v9871_v31, %v9866_v28  ;;  %v9090_v28 = vld [vmem:[%s11307_s3 + $0x190] sm:$0xff]  }
 0x177   : > { %7818 = vmatprep.mubr.bf16.mxu1 %v2046_v63  ;;  %v2343_v63 = vpack.c.bf16 %v9875_v33, %v9873_v32  ;;  %v2346_v32 = vpack.c.bf16 %v9901_v55, %v9890_v45  ;;  %v9091_v33 = vld [vmem:[%s11307_s3 + $0x198] sm:$0xff]   ;;  %v9093_v45 = vld [vmem:[%s11307_s3 + $0x1a8] sm:$0xff]  }
 0x178   : > { %v10172_v55 = vld [vmem:[#allocation2 + $0x122] sm:$0xff] }
 0x179   : > { %v2349_v56 = vpack.c.bf16 %v10172_v55, %v9921_v12  ;;  %v2351_v12 = vpack.c.bf16 %v9938_v37, %v9936_v35  ;;  %v2356_v37 = vpack.c.bf16 %v9970_v38, %v9964_v30  ;;  %v9097_v38 = vld [vmem:[%s11307_s3 + $0x1c8] sm:$0xff]   ;;  %v2625_v30 = vld [vmem:[#allocation2 + $0xc0] sm:$0xff] }
 0x17e   : > { %7819 = vmatmul.mubr.bf16.gmra.mrb[36].mxu1 %v2047_v2  ;;  %v9089_v2 = vld [vmem:[%s11307_s3 + $0x188] sm:$0xff]  }
 0x17f   : > { %7822 = vmatprep.mubr.bf16.mxu1 %v2048_v9  ;;  %v10150_v9 = vld [vmem:[#allocation2 + $0x82] sm:$0xff] }
 0x180   : > { %v2345_v31 = vpack.c.bf16 %v10150_v9, %v9888_v43  ;;  %v2348_v43 = vpack.c.bf16 %v9919_v8, %v9907_v61  ;;  %v9095_v61 = vld [vmem:[%s11307_s3 + $0x1b8] sm:$0xff]   ;;  %v9096_v8 = vld [vmem:[%s11307_s3 + $0x1c0] sm:$0xff]  }
 0x186   : > { %7823 = vmatmul.mubr.bf16.gmra.mrb[40].mxu1 %v2049_v48  ;;  %v2353_v48 = vpack.c.bf16 %v10191_v18, %v9951_v62 }
 0x187   : > { %7826 = vmatprep.mubr.bf16.mxu1 %v2050_v49  ;;  %v11382_v49 = vld [vmem:[#allocation7_spill] sm:$0xff] }
 0x18e   : > { %7827 = vmatmul.mubr.bf16.gmra.mrb[44].mxu1 %v2051_v17  ;;  %v11383_v17 = vld [vmem:[#allocation8_spill] sm:$0xff] }
 0x18f   : > { %7846 = vmatprep.mubr.bf16.mxu1 %v2342_v59  ;;  %v2354_v59 = vpack.c.bf16 %v11383_v17, %v11382_v49  ;;  %v9100_v49 = vld [vmem:[%s11307_s3 + $0x1e0] sm:$0xff]  }
 0x196   : > { %7847 = vmatmul.mubr.bf16.vlgmr.msra.gmra.mrb[16].mxu1 %v2343_v63  ;;  %v11384_v63 = vld [vmem:[#allocation9_spill] sm:$0xff] }
 0x197   : > { %7879 = vmatpush3.bf16.msra.mxu1 %v9088_v58  ;;  %7850 = vmatprep.mubr.bf16.mxu1 %v2344_v1  ;;  %v9094_v58 = vld [vmem:[%s11307_s3 + $0x1b0] sm:$0xff]   ;;  %v2355_v35 = vpack.c.bf16 %v9962_v29, %v11384_v63  ;;  %v2633_v63 = vld [vmem:[#allocation2 + $0x160] sm:$0xff] }
 0x198   : > { %7880 = vmatprep.subr.bf16.mxu1 %v9089_v2  ;;  %v2618_v1 = vld [vmem:[#allocation2 + $0x30] sm:$0xff] }
 0x19b   : > { %7881 = vmatpush3.bf16.msra.mxu1 %v9089_v2  ;;  %v11385_v2 = vld [vmem:[#allocation10_spill] sm:$0xff] }
 0x19c   : > { %7882 = vmatprep.subr.bf16.mxu1 %v9090_v28  ;;  %v2357_v62 = vpack.c.bf16 %v10201_v44, %v11385_v2  ;;  %v9103_v2 = vld [vmem:[%s11307_s3 + $0x1f8] sm:$0xff]  }
 0x19e   : > { %7851 = vmatmul.mubr.bf16.gmra.mrb[20].mxu1 %v2345_v31  ;;  %v2619_v31 = vld [vmem:[#allocation2 + $0x40] sm:$0xff] }
 0x19f   : > { %7854 = vmatprep.mubr.bf16.mxu1 %v2346_v32  ;;  %7883 = vmatpush3.bf16.msra.mxu1 %v9090_v28  ;;  %v2649_v28 = vpack.c.bf16 %v2618_v1, %v2617_v53  ;;  %v2620_v32 = vld [vmem:[#allocation2 + $0x50] sm:$0xff] }
 0x1a0   : > { %7884 = vmatprep.subr.bf16.mxu1 %v9091_v33  ;;  %v2650_v29 = vpack.c.bf16 %v2620_v32, %v2619_v31  ;;  %v2637_v31 = vld [vmem:[#allocation2 + $0x1a0] sm:$0xff]  ;;  %v2638_v32 = vld [vmem:[#allocation2 + $0x1b0] sm:$0xff] }
 0x1a3   : > { %7885 = vmatpush3.bf16.msra.mxu1 %v9091_v33  ;;  %v2621_v33 = vld [vmem:[#allocation2 + $0x60] sm:$0xff] }
 0x1a4   : > { %7886 = vmatprep.subr.bf16.mxu1 %v9092_v5 }
 0x1a6   : > { %7855 = vmatmul.mubr.bf16.gmra.mrb[24].mxu1 %v2347_v39 }
 0x1a7   : > { %7858 = vmatprep.mubr.bf16.mxu1 %v2348_v43  ;;  %7887 = vmatpush3.bf16.msra.mxu1 %v9092_v5  ;;  %v2622_v5 = vld [vmem:[#allocation2 + $0x70] sm:$0xff] }
 0x1a8   : > { %7888 = vmatprep.subr.bf16.mxu1 %v9093_v45  ;;  %v2651_v39 = vpack.c.bf16 %v2622_v5, %v2621_v33  ;;  %v2626_v43 = vld [vmem:[#allocation2 + $0xd0] sm:$0xff]  ;;  %v9104_v33 = vld [vmem:[%s11307_s3 + $0x200] sm:$0xff]   ;;  %v2659_v5 = vpack.c.bf16 %v2638_v32, %v2637_v31  ;;  %v9225_v31 = vld [vmem:[%s9506_s16 + $0x18] sm:$0xf] }
 0x1a9   : > { %v9226_v32 = vld [vmem:[%s9506_s16 + $0x1c] sm:$0xf] }
 0x1ab   : > { %7889 = vmatpush3.bf16.msra.mxu1 %v9093_v45  ;;  %v9098_v45 = vld [vmem:[%s11307_s3 + $0x1d0] sm:$0xff]  }
 0x1ac   : > { %7890 = vmatprep.subr.bf16.mxu1 %v9094_v58 }
 0x1ae   : > { %7859 = vmatmul.mubr.bf16.gmra.mrb[28].mxu1 %v2349_v56 }
 0x1af   : > { %7862 = vmatprep.mubr.bf16.mxu1 %v2350_v60  ;;  %7891 = vmatpush3.bf16.msra.mxu1 %v9094_v58  ;;  %v11386_v58 = vld [vmem:[#allocation6_spill] sm:$0xff]  ;;  %v2653_v60 = vpack.c.bf16 %v2626_v43, %v2625_v30 }
 0x1b0   : > { %7892 = vmatprep.subr.bf16.mxu1 %v9095_v61  ;;  %v2652_v56 = vpack.c.bf16 %v11386_v58, %v10001_v34  ;;  %v2656_v53 = vpack.c.bf16 %v11386_v58, %v10039_v46  ;;  %v2644_v58 = vld [vmem:[#allocation2 + $0x230] sm:$0xff] }
 0x1b3   : > { %7893 = vmatpush3.bf16.msra.mxu1 %v9095_v61  ;;  %v9099_v61 = vld [vmem:[%s11307_s3 + $0x1d8] sm:$0xff]  }
 0x1b4   : > { %7926 = vmatprep.subr.bf16.mxu1 %v9096_v8 }
 0x1b6   : > { %7863 = vmatmul.mubr.bf16.gmra.mrb[32].mxu1 %v2351_v12  ;;  %v2628_v12 = vld [vmem:[#allocation2 + $0xf0] sm:$0xff] }
 0x1b7   : > { %7866 = vmatprep.mubr.bf16.mxu1 %v2352_v22  ;;  %v2629_v22 = vld [vmem:[#allocation2 + $0x100] sm:$0xff] }
 0x1be   : > { %7867 = vmatmul.mubr.bf16.gmra.mrb[36].mxu1 %v2353_v48  ;;  %v2630_v48 = vld [vmem:[#allocation2 + $0x110] sm:$0xff] }
 0x1bf   : > { %7870 = vmatprep.mubr.bf16.mxu1 %v2354_v59  ;;  %v2655_v17 = vpack.c.bf16 %v2630_v48, %v2629_v22  ;;  %v9101_v59 = vld [vmem:[%s11307_s3 + $0x1e8] sm:$0xff]   ;;  %v2924_v22 = vld [vmem:[#allocation2 + $0x31] sm:$0xff] }
 0x1c6   : > { %7871 = vmatmul.mubr.bf16.gmra.mrb[40].mxu1 %v2355_v35  ;;  %v2634_v35 = vld [vmem:[#allocation2 + $0x170] sm:$0xff] }
 0x1c7   : > { %7874 = vmatprep.mubr.bf16.mxu1 %v2356_v37  ;;  %v9102_v37 = vld [vmem:[%s11307_s3 + $0x1f0] sm:$0xff]   ;;  %v2657_v1 = vpack.c.bf16 %v2634_v35, %v2633_v63  ;;  %v2925_v63 = vld [vmem:[#allocation2 + $0x41] sm:$0xff] }
 0x1c8   : > { %v2926_v35 = vld [vmem:[#allocation2 + $0x51] sm:$0xff] }
 0x1ce   : > { %7875 = vmatmul.mubr.bf16.gmra.mrb[44].mxu1 %v2357_v62  ;;  %v2635_v62 = vld [vmem:[#allocation2 + $0x180] sm:$0xff] }
 0x1cf   : > { %7894 = vmatprep.mubr.bf16.mxu1 %v2649_v28  ;;  %v2636_v28 = vld [vmem:[#allocation2 + $0x190] sm:$0xff] }
 0x1d0   : > { %v2658_v46 = vpack.c.bf16 %v2636_v28, %v2635_v62  ;;  %v9105_v62 = vld [vmem:[%s11307_s3 + $0x208] sm:$0xff]   ;;  %v9118_v28 = vld [vmem:[%s11310_s6 + $0x50] sm:$0xff]  }
 0x1d6   : > { %7895 = vmatmul.mubr.bf16.vlgmr.msra.gmra.mrb[16].mxu1 %v2650_v29  ;;  %v2641_v29 = vld [vmem:[#allocation2 + $0x200] sm:$0xff] }
 0x1d7   : > { %7927 = vmatpush3.bf16.msra.mxu1 %v9096_v8  ;;  %7898 = vmatprep.mubr.bf16.mxu1 %v2651_v39  ;;  %v2627_v8 = vld [vmem:[#allocation2 + $0xe0] sm:$0xff]  ;;  %v2642_v39 = vld [vmem:[#allocation2 + $0x210] sm:$0xff] }
 0x1d8   : > { %7928 = vmatprep.subr.bf16.mxu1 %v9097_v38  ;;  %v2654_v34 = vpack.c.bf16 %v2628_v12, %v2627_v8  ;;  %v2661_v43 = vpack.c.bf16 %v2642_v39, %v2641_v29  ;;  %v2923_v12 = vld [vmem:[#allocation2 + $0x21] sm:$0xff]  ;;  %v2932_v39 = vld [vmem:[#allocation2 + $0xd1] sm:$0xff] }
 0x1d9   : > { %v2931_v29 = vld [vmem:[#allocation2 + $0xc1] sm:$0xff] }
 0x1db   : > { %7929 = vmatpush3.bf16.msra.mxu1 %v9097_v38  ;;  %v10233_v38 = vld [vmem:[#allocation2] sm:$0xff] }
 0x1dc   : > { %7930 = vmatprep.subr.bf16.mxu1 %v9098_v45  ;;  %v2660_v30 = vpack.c.bf16 %v10233_v38, %v10058_v0  ;;  %v2664_v48 = vpack.c.bf16 %v10233_v38, %v10068_v3  ;;  %v2955_v0 = vpack.c.bf16 %v2924_v22, %v2923_v12  ;;  %v2928_v3 = vld [vmem:[#allocation2 + $0x71] sm:$0xff]  ;;  %v9108_v12 = vld [vmem:[%s11307_s3 + $0x220] sm:$0xff]  }
 0x1de   : > { %7899 = vmatmul.mubr.bf16.gmra.mrb[20].mxu1 %v2652_v56  ;;  %v2645_v56 = vld [vmem:[#allocation2 + $0x240] sm:$0xff] }
 0x1df   : > { %7902 = vmatprep.mubr.bf16.mxu1 %v2653_v60  ;;  %7931 = vmatpush3.bf16.msra.mxu1 %v9098_v45  ;;  %v2643_v45 = vld [vmem:[#allocation2 + $0x220] sm:$0xff]  ;;  %v2646_v60 = vld [vmem:[#allocation2 + $0x250] sm:$0xff] }
 0x1e0   : > { %7932 = vmatprep.subr.bf16.mxu1 %v9099_v61  ;;  %v2663_v8 = vpack.c.bf16 %v2646_v60, %v2645_v56  ;;  %v2933_v56 = vld [vmem:[#allocation2 + $0xe1] sm:$0xff]  ;;  %v2934_v60 = vld [vmem:[#allocation2 + $0xf1] sm:$0xff] }
 0x1e1   : > { %v2960_v22 = vpack.c.bf16 %v2934_v60, %v2933_v56  ;;  %v3248_v56 = vld [vmem:[#allocation2 + $0x192] sm:$0xff]  ;;  %v3249_v60 = vld [vmem:[#allocation2 + $0x1a2] sm:$0xff] }
 0x1e3   : > { %7933 = vmatpush3.bf16.msra.mxu1 %v9099_v61  ;;  %v2662_v61 = vpack.c.bf16 %v2644_v58, %v2643_v45  ;;  %v2959_v58 = vpack.c.bf16 %v2932_v39, %v2931_v29 }
 0x1e4   : > { %7934 = vmatprep.subr.bf16.mxu1 %v9100_v49 }
 0x1e6   : > { %7903 = vmatmul.mubr.bf16.gmra.mrb[24].mxu1 %v2654_v34  ;;  %v9223_v34 = vld [vmem:[%s9506_s16 + $0x8] sm:$0xff]  }
 0x1e7   : > { %7906 = vmatprep.mubr.bf16.mxu1 %v2655_v17  ;;  %7935 = vmatpush3.bf16.msra.mxu1 %v9100_v49  ;;  %v9222_v49 = vld [vmem:[%s9506_s16] sm:$0xff]  }
 0x1e8   : > { %7936 = vmatprep.subr.bf16.mxu1 %v9101_v59  ;;  %v9114_v17 = vld [vmem:[%s11310_s6 + $0x40] sm:$0xff]   ;;  %7558 = vmatprep.mubr.bf16.mxu0 %v9222_v49  ;;  %v2938_v49 = vld [vmem:[#allocation2 + $0x131] sm:$0xff] }
 0x1e9   : > { %8022 = vmatprep.subr.bf16.mxu0 %v9114_v17  ;;  %7559 = vmatmul.mubr.bf16.vlgmr.msra.gmra.mrb[0].mxu0 %v9223_v34  ;;  %v9110_v34 = vld [vmem:[%s11307_s3 + $0x230] sm:$0xff]  }
 0x1ea   : > { %8023 = vmatpush3.bf16.msra.mxu0 %v9114_v17  ;;  %v2962_v17 = vpack.c.bf16 %v2938_v49, %v9801_v54  ;;  %v2946_v54 = vld [vmem:[#allocation2 + $0x1d1] sm:$0xff] }
 0x1eb   : > { %7937 = vmatpush3.bf16.msra.mxu1 %v9101_v59  ;;  %v9224_v59 = vld [vmem:[%s9506_s16 + $0x10] sm:$0xff]  }
 0x1ec   : > { %7938 = vmatprep.subr.bf16.mxu1 %v9102_v37  ;;  %7562 = vmatprep.mubr.bf16.mxu0 %v9224_v59  ;;  %v2963_v59 = vpack.c.bf16 %v10099_v24, %v10089_v14  ;;  %v2966_v14 = vpack.c.bf16 %v2946_v54, %v10116_v27  ;;  %v2967_v24 = vpack.c.bf16 %v10123_v42, %v10118_v26  ;;  %v3231_v27 = vld [vmem:[#allocation2 + $0x42] sm:$0xff]  ;;  %v3232_v26 = vld [vmem:[#allocation2 + $0x52] sm:$0xff] }
 0x1ed   : > { %v3233_v42 = vld [vmem:[#allocation2 + $0x62] sm:$0xff]  ;;  %v3260_v54 = vld [vmem:[#allocation2 + $0x272] sm:$0xff] }
 0x1ee   : > { %7907 = vmatmul.mubr.bf16.gmra.mrb[28].mxu1 %v2656_v53  ;;  %v2927_v53 = vld [vmem:[#allocation2 + $0x61] sm:$0xff] }
 0x1ef   : > { %7910 = vmatprep.mubr.bf16.mxu1 %v2657_v1  ;;  %7939 = vmatpush3.bf16.msra.mxu1 %v9102_v37  ;;  %v9115_v37 = vld [vmem:[%s11310_s6 + $0x48] sm:$0xff]   ;;  %v2956_v1 = vpack.c.bf16 %v2926_v35, %v2925_v63  ;;  %v9111_v63 = vld [vmem:[%s11307_s3 + $0x238] sm:$0xff]   ;;  %v2964_v35 = vpack.c.bf16 %v10103_v50, %v10101_v25  ;;  %v2969_v25 = vpack.c.bf16 %v10135_v15, %v10129_v11 }
 0x1f0   : > { %7940 = vmatprep.subr.bf16.mxu1 %v9103_v2  ;;  %8024 = vmatprep.subr.bf16.mxu0 %v9115_v37  ;;  %v2954_v50 = vld [vmem:[#allocation2 + $0x271] sm:$0xff] }
 0x1f1   : > { %8025 = vmatpush3.bf16.msra.mxu0 %v9115_v37  ;;  %v2965_v37 = vpack.c.bf16 %v10114_v41, %v10105_v57  ;;  %v3229_v57 = vld [vmem:[#allocation2 + $0x22] sm:$0xff]  ;;  %v3230_v41 = vld [vmem:[#allocation2 + $0x32] sm:$0xff] }
 0x1f2   : > { %8026 = vmatprep.subr.bf16.mxu0 %v9118_v28  ;;  %v3238_v11 = vld [vmem:[#allocation2 + $0xd2] sm:$0xff] }
 0x1f3   : > { %7941 = vmatpush3.bf16.msra.mxu1 %v9103_v2  ;;  %v2957_v2 = vpack.c.bf16 %v2928_v3, %v2927_v53  ;;  %v2968_v53 = vpack.c.bf16 %v10127_v20, %v10125_v10  ;;  %v2970_v3 = vpack.c.bf16 %v2954_v50, %v10137_v16  ;;  %v3236_v10 = vld [vmem:[#allocation2 + $0x92] sm:$0xff]  ;;  %v3237_v20 = vld [vmem:[#allocation2 + $0xc2] sm:$0xff] }
 0x1f4   : > { %7974 = vmatprep.subr.bf16.mxu1 %v9104_v33  ;;  %v3264_v15 = vpack.c.bf16 %v3236_v10, %v10150_v9  ;;  %v3239_v16 = vld [vmem:[#allocation2 + $0xe2] sm:$0xff]  ;;  %v9230_v50 = vld [vmem:[%s9506_s16 + $0x30] sm:$0xff]  }
 0x1f5   : > { %8027 = vmatpush3.bf16.msra.mxu0 %v9118_v28  ;;  %v3247_v9 = vld [vmem:[#allocation2 + $0x182] sm:$0xff] }
 0x1f6   : > { %7911 = vmatmul.mubr.bf16.gmra.mrb[32].mxu1 %v2658_v46  ;;  %v6654_v46 = vcombine.low %v9225_v31, %v9226_v32  ;;  %v3265_v31 = vpack.c.bf16 %v3238_v11, %v3237_v20  ;;  %v3240_v32 = vld [vmem:[#allocation2 + $0xf2] sm:$0xff] }
 0x1f7   : > { %7914 = vmatprep.mubr.bf16.mxu1 %v2659_v5  ;;  %v2930_v5 = vld [vmem:[#allocation2 + $0x91] sm:$0xff]  ;;  %v3266_v29 = vpack.c.bf16 %v3240_v32, %v3239_v16 }
 0x1f8   : > { %7563 = vmatmul.mubr.bf16.gmra.mrb[4].mxu0 %v6654_v46  ;;  %v3241_v46 = vld [vmem:[#allocation2 + $0x102] sm:$0xff] }
 0x1fe   : > { %7915 = vmatmul.mubr.bf16.gmra.mrb[36].mxu1 %v2660_v30  ;;  %v9106_v30 = vld [vmem:[%s11307_s3 + $0x210] sm:$0xff]  }
 0x1ff   : > { %7918 = vmatprep.mubr.bf16.mxu1 %v2661_v43  ;;  %v9227_v43 = vld [vmem:[#allocation2 + $0x81] sm:$0xff] }
 0x200   : > { %v2958_v45 = vpack.c.bf16 %v2930_v5, %v9227_v43  ;;  %v3242_v5 = vld [vmem:[#allocation2 + $0x112] sm:$0xff]  ;;  %v3245_v43 = vld [vmem:[#allocation2 + $0x162] sm:$0xff] }
 0x201   : > { %v3267_v39 = vpack.c.bf16 %v3242_v5, %v3241_v46 }
 0x206   : > { %7919 = vmatmul.mubr.bf16.gmra.mrb[40].mxu1 %v2662_v61  ;;  %v2935_v61 = vld [vmem:[#allocation2 + $0x101] sm:$0xff] }
 0x207   : > { %7922 = vmatprep.mubr.bf16.mxu1 %v2663_v8  ;;  %v2936_v8 = vld [vmem:[#allocation2 + $0x111] sm:$0xff] }
 0x20e   : > { %7923 = vmatmul.mubr.bf16.gmra.mrb[44].mxu1 %v2664_v48  ;;  %v2961_v48 = vpack.c.bf16 %v2936_v8, %v2935_v61  ;;  %v3250_v61 = vld [vmem:[#allocation2 + $0x1b2] sm:$0xff]  ;;  %v3270_v8 = vpack.c.bf16 %v3248_v56, %v3247_v9 }
 0x20f   : > { %7942 = vmatprep.mubr.bf16.mxu1 %v2955_v0  ;;  %v9109_v0 = vld [vmem:[%s11307_s3 + $0x228] sm:$0xff]  }
 0x216   : > { %7943 = vmatmul.mubr.bf16.vlgmr.msra.gmra.mrb[16].mxu1 %v2956_v1  ;;  %v3261_v1 = vpack.c.bf16 %v3230_v41, %v3229_v57  ;;  %v9231_v57 = vld [vmem:[%s9506_s16 + $0x38] sm:$0xf]  ;;  %v9232_v41 = vld [vmem:[%s9506_s16 + $0x3c] sm:$0xf] }
 0x217   : > { %7975 = vmatpush3.bf16.msra.mxu1 %v9104_v33  ;;  %7946 = vmatprep.mubr.bf16.mxu1 %v2957_v2  ;;  %v9107_v33 = vld [vmem:[%s11307_s3 + $0x218] sm:$0xff]  }
 0x218   : > { %7976 = vmatprep.subr.bf16.mxu1 %v9105_v62  ;;  %v3234_v2 = vld [vmem:[#allocation2 + $0x72] sm:$0xff] }
 0x219   : > { %v3263_v28 = vpack.c.bf16 %v3234_v2, %v3233_v42  ;;  %v10319_v42 = vld [vmem:[%s11308_s4] ss:$0 sm:$0xff] }
 0x21a   : > { %v10324_v2 = vld [vmem:[%s11309_s5] ss:$0 sm:$0xff] }
 0x21b   : > { %7977 = vmatpush3.bf16.msra.mxu1 %v9105_v62  ;;  %v3262_v62 = vpack.c.bf16 %v3232_v26, %v3231_v27  ;;  %v9127_v27 = vld [vmem:[%s11310_s6 + $0x78] sm:$0xff]   ;;  %v9128_v26 = vld [vmem:[%s11310_s6] sm:$0xff]  }
 0x21c   : > { %7978 = vmatprep.subr.bf16.mxu1 %v9106_v30 }
 0x21e   : > { %7947 = vmatmul.mubr.bf16.gmra.mrb[20].mxu1 %v2958_v45  ;;  %v3246_v45 = vld [vmem:[#allocation2 + $0x172] sm:$0xff] }
 0x21f   : > { %7950 = vmatprep.mubr.bf16.mxu1 %v2959_v58  ;;  %7979 = vmatpush3.bf16.msra.mxu1 %v9106_v30  ;;  %v3244_v30 = vld [vmem:[#allocation2 + $0x132] sm:$0xff] }
 0x220   : > { %7980 = vmatprep.subr.bf16.mxu1 %v9107_v33  ;;  %v3268_v58 = vpack.c.bf16 %v3244_v30, %v10172_v55  ;;  %v3255_v55 = vld [vmem:[#allocation2 + $0x222] sm:$0xff] }
 0x223   : > { %7981 = vmatpush3.bf16.msra.mxu1 %v9107_v33  ;;  %v3269_v33 = vpack.c.bf16 %v3246_v45, %v3245_v43 }
 0x224   : > { %7982 = vmatprep.subr.bf16.mxu1 %v9108_v12 }
 0x226   : > { %7951 = vmatmul.mubr.bf16.gmra.mrb[24].mxu1 %v2960_v22  ;;  %v3252_v22 = vld [vmem:[#allocation2 + $0x1d2] sm:$0xff] }
 0x227   : > { %7954 = vmatprep.mubr.bf16.mxu1 %v2961_v48  ;;  %7983 = vmatpush3.bf16.msra.mxu1 %v9108_v12  ;;  %v3271_v12 = vpack.c.bf16 %v3250_v61, %v3249_v60  ;;  %v3253_v48 = vld [vmem:[#allocation2 + $0x202] sm:$0xff]  ;;  %v3272_v49 = vpack.c.bf16 %v3252_v22, %v10191_v18  ;;  %v9119_v18 = vld [vmem:[%s11310_s6 + $0x58] sm:$0xff]  }
 0x228   : > { %7984 = vmatprep.subr.bf16.mxu1 %v9109_v0  ;;  %8028 = vmatprep.subr.bf16.mxu0 %v9119_v18  ;;  %v9129_v22 = vld [vmem:[%s11310_s6 + $0x8] sm:$0xff]  }
 0x229   : > { %8029 = vmatpush3.bf16.msra.mxu0 %v9119_v18 }
 0x22b   : > { %7985 = vmatpush3.bf16.msra.mxu1 %v9109_v0  ;;  %v3254_v0 = vld [vmem:[#allocation2 + $0x212] sm:$0xff] }
 0x22c   : > { %7986 = vmatprep.subr.bf16.mxu1 %v9110_v34 }
 0x22e   : > { %7955 = vmatmul.mubr.bf16.gmra.mrb[28].mxu1 %v2962_v17  ;;  %v3256_v17 = vld [vmem:[#allocation2 + $0x232] sm:$0xff] }
 0x22f   : > { %7958 = vmatprep.mubr.bf16.mxu1 %v2963_v59  ;;  %7987 = vmatpush3.bf16.msra.mxu1 %v9110_v34  ;;  %v3273_v34 = vpack.c.bf16 %v3254_v0, %v3253_v48  ;;  %v3257_v59 = vld [vmem:[#allocation2 + $0x242] sm:$0xff] }
 0x230   : > { %7988 = vmatprep.subr.bf16.mxu1 %v9111_v63 }
 0x233   : > { %7989 = vmatpush3.bf16.msra.mxu1 %v9111_v63  ;;  %v3258_v63 = vld [vmem:[#allocation2 + $0x252] sm:$0xff] }
 0x236   : > { %7959 = vmatmul.mubr.bf16.gmra.mrb[32].mxu1 %v2964_v35  ;;  %v3274_v35 = vpack.c.bf16 %v3256_v17, %v3255_v55 }
 0x237   : > { %7962 = vmatprep.mubr.bf16.mxu1 %v2965_v37  ;;  %v3275_v37 = vpack.c.bf16 %v3258_v63, %v3257_v59 }
 0x23e   : > { %7963 = vmatmul.mubr.bf16.gmra.mrb[36].mxu1 %v2966_v14  ;;  %v3276_v14 = vpack.c.bf16 %v3260_v54, %v10201_v44  ;;  %v9123_v44 = vld [vmem:[%s11310_s6 + $0x68] sm:$0xff]  }
 0x23f   : > { %7966 = vmatprep.mubr.bf16.mxu1 %v2967_v24  ;;  %v9228_v24 = vld [vmem:[%s9506_s16 + $0x20] sm:$0xff]  }
 0x240   : > { %7566 = vmatprep.mubr.bf16.mxu0 %v9228_v24 }
 0x246   : > { %7967 = vmatmul.mubr.bf16.gmra.mrb[40].mxu1 %v2968_v53  ;;  %v9229_v53 = vld [vmem:[%s9506_s16 + $0x28] sm:$0xff]   ;;  %s11263_s16 = scalar_lea.sflag [#allocation4], %s326_s14 }
 0x247   : > { %7970 = vmatprep.mubr.bf16.mxu1 %v2969_v25  ;;  %7567 = vmatmul.mubr.bf16.gmra.mrb[8].mxu0 %v9229_v53  ;;  %v9122_v25 = vld [vmem:[%s11310_s6 + $0x60] sm:$0xff]  }
 0x248   : > { %8030 = vmatprep.subr.bf16.mxu0 %v9122_v25  ;;  %7570 = vmatprep.mubr.bf16.mxu0 %v9230_v50 }
 0x249   : > { %8031 = vmatpush3.bf16.msra.mxu0 %v9122_v25 }
 0x24a   : > { %8032 = vmatprep.subr.bf16.mxu0 %v9123_v44 }
 0x24d   : > { %8033 = vmatpush3.bf16.msra.mxu0 %v9123_v44 }
 0x24e   : > { %7971 = vmatmul.mubr.bf16.gmra.mrb[44].mxu1 %v2970_v3  ;;  %v6658_v3 = vcombine.low %v9231_v57, %v9232_v41 }
 0x24f   : > { %7990 = vmatprep.mubr.bf16.mxu1 %v3261_v1  ;;  %v9126_v1 = vld [vmem:[%s11310_s6 + $0x70] sm:$0xff]  }
 0x250   : > { %7571 = vmatmul.mubr.bf16.gmra.mrb[12].mxu0 %v6658_v3  ;;  %8034 = vmatprep.subr.bf16.mxu0 %v9126_v1 }
 0x251   : > { %8035 = vmatpush3.bf16.msra.mxu0 %v9126_v1 }
 0x252   : > { %8036 = vmatprep.subr.bf16.mxu0 %v9127_v27 }
 0x255   : > { %8037 = vmatpush3.bf16.msra.mxu0 %v9127_v27 }
 0x256   : > { %7991 = vmatmul.mubr.bf16.vlgmr.msra.gmra.mrb[16].mxu1 %v3262_v62  ;;  %8070 = vmatprep.subr.bf16.mxu0 %v9128_v26 }
 0x257   : > { %7994 = vmatprep.mubr.bf16.mxu1 %v3263_v28 }
 0x25e   : > { %7995 = vmatmul.mubr.bf16.gmra.mrb[20].mxu1 %v3264_v15 }
 0x25f   : > { %7998 = vmatprep.mubr.bf16.mxu1 %v3265_v31 }
 0x266   : > { %7999 = vmatmul.mubr.bf16.gmra.mrb[24].mxu1 %v3266_v29 }
 0x267   : > { %8002 = vmatprep.mubr.bf16.mxu1 %v3267_v39  ;;  %v3741_v39 = vld [vmem:[#allocation2 + $0x1] sm:$0xff] }
 0x26e   : > { %8003 = vmatmul.mubr.bf16.gmra.mrb[28].mxu1 %v3268_v58 }
 0x26f   : > { %8006 = vmatprep.mubr.bf16.mxu1 %v3269_v33 }
 0x276   : > { %8007 = vmatmul.mubr.bf16.gmra.mrb[32].mxu1 %v3270_v8 }
 0x277   : > { %8010 = vmatprep.mubr.bf16.mxu1 %v3271_v12 }
 0x27e   : > { %8011 = vmatmul.mubr.bf16.gmra.mrb[36].mxu1 %v3272_v49 }
 0x27f   : > { %8014 = vmatprep.mubr.bf16.mxu1 %v3273_v34 }
 0x286   : > { %8015 = vmatmul.mubr.bf16.gmra.mrb[40].mxu1 %v3274_v35 }
 0x287   : > { %8018 = vmatprep.mubr.bf16.mxu1 %v3275_v37  ;;  %v9130_v37 = vld [vmem:[%s11310_s6 + $0x10] sm:$0xff]  }
 0x28e   : > { %8019 = vmatmul.mubr.bf16.gmra.mrb[44].mxu1 %v3276_v14 }
 0x329   : > { %v7992_v62 = vpop.f32.mrb[16].mxu1 }
 0x32a   : > { %v3543_v28 = vmul.f32 %v7992_v62, %v10319_v42  ;;  %v3376_v10 = vpop.f32.mrb[17].mxu1 }
 0x32b   : > { %v3541_v20 = vmul.f32 %v10319_v42, %v3376_v10  ;;  %v7993_v11 = vpop.f32.mrb[18].mxu1 }
 0x32c   : > { %v3581_v15 = vadd.f32 %v10324_v2, %v3543_v28  ;;  %v3544_v31 = vmul.f32 %v7993_v11, %v10319_v42  ;;  %v3379_v16 = vpop.f32.mrb[19].mxu1 }
 0x32d   : > { %v3579_v32 = vadd.f32 %v10324_v2, %v3541_v20  ;;  %v3542_v46 = vmul.f32 %v10319_v42, %v3379_v16  ;;  %v9131_v20 = vld [vmem:[%s11310_s6 + $0x18] sm:$0xff]  }
 0x32e   : > { %v3613_v5 = vmax.f32 %v3581_v15, 0.0  ;;  %v3582_v29 = vadd.f32 %v10324_v2, %v3544_v31 }
 0x32f   : > { %v3611_v30 = vmax.f32 %v3579_v32, 0.0  ;;  %v3580_v43 = vadd.f32 %v10324_v2, %v3542_v46 }
 0x330   : > { %3647 = vst [vmem:[#allocation2 + $0x31] sm:$0xff] %v3613_v5  ;;  %v3614_v45 = vmax.f32 %v3582_v29, 0.0 }
 0x331   : > { %3645 = vst [vmem:[#allocation2 + $0x11] sm:$0xff] %v3611_v30  ;;  %v3612_v58 = vmax.f32 %v3580_v43, 0.0  ;;  %v7996_v33 = vpop.f32.mrb[20].mxu1  ;;  %v3773_v9 = vpack.c.bf16 %v3611_v30, %v3741_v39 }
 0x332   : > { %3648 = vst [vmem:[#allocation2 + $0x41] sm:$0xff] %v3614_v45  ;;  %v3547_v56 = vmul.f32 %v7996_v33, %v10319_v42  ;;  %v3392_v60 = vpop.f32.mrb[21].mxu1  ;;  %v3749_v33 = vld [vmem:[#allocation2 + $0xa1] sm:$0xff] }
 0x333   : > { %3646 = vst [vmem:[#allocation2 + $0x21] sm:$0xff] %v3612_v58  ;;  %v3545_v61 = vmul.f32 %v10319_v42, %v3392_v60  ;;  %v7997_v8 = vpop.f32.mrb[22].mxu1  ;;  %8038 = vmatprep.mubr.bf16.mxu0 %v3773_v9  ;;  %v3774_v12 = vpack.c.bf16 %v3613_v5, %v3612_v58 }
 0x334   : > { %v3585_v48 = vadd.f32 %v10324_v2, %v3547_v56  ;;  %v3548_v0 = vmul.f32 %v7997_v8, %v10319_v42  ;;  %v3395_v49 = vpop.f32.mrb[23].mxu1 }
 0x335   : > { %v3583_v34 = vadd.f32 %v10324_v2, %v3545_v61  ;;  %v3546_v55 = vmul.f32 %v10319_v42, %v3395_v49  ;;  %8039 = vmatmul.mubr.bf16.vlgmr.msra.gmra.mrb[16].mxu0 %v3774_v12  ;;  %v9132_v61 = vld [vmem:[%s11310_s6 + $0x20] sm:$0xff]  }
 0x336   : > { %v3617_v17 = vmax.f32 %v3585_v48, 0.0  ;;  %v3586_v59 = vadd.f32 %v10324_v2, %v3548_v0  ;;  %8071 = vmatpush3.bf16.msra.mxu0 %v9128_v26 }
 0x337   : > { %v3615_v63 = vmax.f32 %v3583_v34, 0.0  ;;  %v3584_v35 = vadd.f32 %v10324_v2, %v3546_v55  ;;  %8072 = vmatprep.subr.bf16.mxu0 %v9129_v22  ;;  %v10348_v14 = vld [vmem:[#allocation2 + $0x30] sm:$0xff] }
 0x338   : > { %3651 = vst [vmem:[#allocation2 + $0x71] sm:$0xff] %v3617_v17  ;;  %v3618_v54 = vmax.f32 %v3586_v59, 0.0  ;;  %v10352_v44 = vld [vmem:[#allocation2 + $0x32] sm:$0xff] }
 0x339   : > { %3649 = vst [vmem:[#allocation2 + $0x51] sm:$0xff] %v3615_v63  ;;  %v3616_v18 = vmax.f32 %v3584_v35, 0.0  ;;  %v8000_v24 = vpop.f32.mrb[24].mxu1  ;;  %v3775_v53 = vpack.c.bf16 %v3615_v63, %v3614_v45  ;;  %v10350_v25 = vld [vmem:[#allocation2 + $0x40] sm:$0xff]  ;;  %v10369_v11 = vld [vmem:[#allocation2 + $0x10] sm:$0xff]  ;;  %v9133_v35 = vld [vmem:[%s11310_s6 + $0x28] sm:$0xff]  }
 0x33a   : > { %v10354_v50 = vld [vmem:[#allocation2 + $0x42] sm:$0xff]  ;;  %3652 = vst [vmem:[#allocation2 + $0x81] sm:$0xff] %v3618_v54  ;;  %v3551_v57 = vmul.f32 %v8000_v24, %v10319_v42  ;;  %v3408_v41 = vpop.f32.mrb[25].mxu1  ;;  %8073 = vmatpush3.bf16.msra.mxu0 %v9129_v22  ;;  %v10375_v46 = vld [vmem:[#allocation2 + $0x12] sm:$0xff] }
 0x33b   : > { %v10357_v3 = vld [vmem:[#allocation2 + $0x20] sm:$0xff]  ;;  %3650 = vst [vmem:[#allocation2 + $0x61] sm:$0xff] %v3616_v18  ;;  %v3549_v62 = vmul.f32 %v10319_v42, %v3408_v41  ;;  %v8001_v28 = vpop.f32.mrb[26].mxu1  ;;  %8042 = vmatprep.mubr.bf16.mxu0 %v3775_v53  ;;  %v3776_v10 = vpack.c.bf16 %v3617_v17, %v3616_v18  ;;  %8074 = vmatprep.subr.bf16.mxu0 %v9130_v37  ;;  %v10381_v30 = vld [vmem:[#allocation2 + $0x31] sm:$0xff] }
 0x33c   : > { %v10359_v1 = vld [vmem:[#allocation2 + $0x22] sm:$0xff]  ;;  %v3589_v31 = vadd.f32 %v10324_v2, %v3551_v57  ;;  %v3552_v16 = vmul.f32 %v8001_v28, %v10319_v42  ;;  %v3411_v32 = vpop.f32.mrb[27].mxu1 }
 0x33d   : > { %v10371_v15 = vld [vmem:[#allocation2 + $0x21] sm:$0xff]  ;;  %v3587_v29 = vadd.f32 %v10324_v2, %v3549_v62  ;;  %v3550_v39 = vmul.f32 %v10319_v42, %v3411_v32  ;;  %8043 = vmatmul.mubr.bf16.gmra.mrb[20].mxu0 %v3776_v10 }
 0x33e   : > { %v3621_v45 = vmax.f32 %v3589_v31, 0.0  ;;  %v3590_v58 = vadd.f32 %v10324_v2, %v3552_v16  ;;  %8075 = vmatpush3.bf16.msra.mxu0 %v9130_v37  ;;  %v10418_v32 = vld [vmem:[#allocation2 + $0x41] sm:$0xff] }
 0x33f   : > { %v3619_v56 = vmax.f32 %v3587_v29, 0.0  ;;  %v3588_v60 = vadd.f32 %v10324_v2, %v3550_v39  ;;  %8076 = vmatprep.subr.bf16.mxu0 %v9131_v20 }
 0x340   : > { %3655 = vst [vmem:[#allocation2 + $0xd1] sm:$0xff] %v3621_v45  ;;  %v3622_v8 = vmax.f32 %v3590_v58, 0.0  ;;  %v10401_v37 = vld [vmem:[#allocation2 + $0x50] sm:$0xff] }
 0x341   : > { %3653 = vst [vmem:[#allocation2 + $0xb1] sm:$0xff] %v3619_v56  ;;  %v3620_v12 = vmax.f32 %v3588_v60, 0.0  ;;  %v8004_v22 = vpop.f32.mrb[28].mxu1  ;;  %v3777_v48 = vpack.c.bf16 %v3619_v56, %v3749_v33  ;;  %v10405_v53 = vld [vmem:[#allocation2 + $0x52] sm:$0xff] }
 0x342   : > { %3656 = vst [vmem:[#allocation2 + $0xe1] sm:$0xff] %v3622_v8  ;;  %v3555_v0 = vmul.f32 %v8004_v22, %v10319_v42  ;;  %v3424_v49 = vpop.f32.mrb[29].mxu1  ;;  %8077 = vmatpush3.bf16.msra.mxu0 %v9131_v20  ;;  %v10393_v34 = vld [vmem:[#allocation2 + $0x60] sm:$0xff]  ;;  %v10409_v41 = vld [vmem:[#allocation2 + $0x51] sm:$0xff] }
 0x343   : > { %v10395_v55 = vld [vmem:[#allocation2 + $0x62] sm:$0xff]  ;;  %3654 = vst [vmem:[#allocation2 + $0xc1] sm:$0xff] %v3620_v12  ;;  %v3553_v17 = vmul.f32 %v10319_v42, %v3424_v49  ;;  %v8005_v59 = vpop.f32.mrb[30].mxu1  ;;  %8046 = vmatprep.mubr.bf16.mxu0 %v3777_v48  ;;  %v3778_v63 = vpack.c.bf16 %v3621_v45, %v3620_v12  ;;  %8078 = vmatprep.subr.bf16.mxu0 %v9132_v61  ;;  %11387 = vst [vmem:[#allocation7_spill] sm:$0xff] %v10409_v41  ;;  %v9134_v45 = vld [vmem:[%s11310_s6 + $0x30] sm:$0xff]  }
 0x344   : > { %v3593_v54 = vadd.f32 %v10324_v2, %v3555_v0  ;;  %v3556_v18 = vmul.f32 %v8005_v59, %v10319_v42  ;;  %v3427_v24 = vpop.f32.mrb[31].mxu1  ;;  %v10413_v10 = vld [vmem:[#allocation2 + $0x61] sm:$0xff]  ;;  %v10424_v58 = vld [vmem:[#allocation2 + $0x71] sm:$0xff] }
 0x345   : > { %v3591_v62 = vadd.f32 %v10324_v2, %v3553_v17  ;;  %v3554_v28 = vmul.f32 %v10319_v42, %v3427_v24  ;;  %8047 = vmatmul.mubr.bf16.gmra.mrb[24].mxu0 %v3778_v63  ;;  %11388 = vst [vmem:[#allocation8_spill] sm:$0xff] %v10413_v10  ;;  %11389 = vst [vmem:[#allocation9_spill] sm:$0xff] %v10424_v58 }
 0x346   : > { %v3625_v31 = vmax.f32 %v3593_v54, 0.0  ;;  %v3594_v16 = vadd.f32 %v10324_v2, %v3556_v18  ;;  %8079 = vmatpush3.bf16.msra.mxu0 %v9132_v61 }
 0x347   : > { %v3623_v29 = vmax.f32 %v3591_v62, 0.0  ;;  %v3592_v39 = vadd.f32 %v10324_v2, %v3554_v28  ;;  %8080 = vmatprep.subr.bf16.mxu0 %v9133_v35  ;;  %v10428_v60 = vld [vmem:[#allocation2 + $0xd0] sm:$0xff] }
 0x348   : > { %3659 = vst [vmem:[#allocation2 + $0x111] sm:$0xff] %v3625_v31  ;;  %v3626_v56 = vmax.f32 %v3594_v16, 0.0  ;;  %v10434_v49 = vld [vmem:[#allocation2 + $0xd2] sm:$0xff] }
 0x349   : > { %3657 = vst [vmem:[#allocation2 + $0xf1] sm:$0xff] %v3623_v29  ;;  %v3624_v12 = vmax.f32 %v3592_v39, 0.0  ;;  %v8008_v22 = vpop.f32.mrb[32].mxu1  ;;  %v3779_v48 = vpack.c.bf16 %v3623_v29, %v3622_v8  ;;  %v10432_v0 = vld [vmem:[#allocation2 + $0xe0] sm:$0xff]  ;;  %v10451_v29 = vld [vmem:[#allocation2 + $0xb0] sm:$0xff] }
 0x34a   : > { %v10436_v17 = vld [vmem:[#allocation2 + $0xe2] sm:$0xff]  ;;  %3660 = vst [vmem:[#allocation2 + $0x121] sm:$0xff] %v3626_v56  ;;  %v3559_v59 = vmul.f32 %v8008_v22, %v10319_v42  ;;  %v3440_v63 = vpop.f32.mrb[33].mxu1  ;;  %8081 = vmatpush3.bf16.msra.mxu0 %v9133_v35  ;;  %v9135_v35 = vld [vmem:[%s11310_s6 + $0x38] sm:$0xff]  }
 0x34b   : > { %v10439_v54 = vld [vmem:[#allocation2 + $0xc0] sm:$0xff]  ;;  %3658 = vst [vmem:[#allocation2 + $0x101] sm:$0xff] %v3624_v12  ;;  %v3557_v62 = vmul.f32 %v10319_v42, %v3440_v63  ;;  %v8009_v28 = vpop.f32.mrb[34].mxu1  ;;  %8050 = vmatprep.mubr.bf16.mxu0 %v3779_v48  ;;  %v3780_v16 = vpack.c.bf16 %v3625_v31, %v3624_v12  ;;  %8082 = vmatprep.subr.bf16.mxu0 %v9134_v45  ;;  %v10457_v33 = vld [vmem:[#allocation2 + $0xb2] sm:$0xff] }
 0x34c   : > { %v10441_v18 = vld [vmem:[#allocation2 + $0xc2] sm:$0xff]  ;;  %v3597_v56 = vadd.f32 %v10324_v2, %v3559_v59  ;;  %v3560_v22 = vmul.f32 %v8009_v28, %v10319_v42  ;;  %v3443_v61 = vpop.f32.mrb[35].mxu1  ;;  %v10463_v63 = vld [vmem:[#allocation2 + $0xd1] sm:$0xff] }
 0x34d   : > { %v10453_v39 = vld [vmem:[#allocation2 + $0xc1] sm:$0xff]  ;;  %v3595_v31 = vadd.f32 %v10324_v2, %v3557_v62  ;;  %v3558_v12 = vmul.f32 %v10319_v42, %v3443_v61  ;;  %8051 = vmatmul.mubr.bf16.gmra.mrb[28].mxu0 %v3780_v16  ;;  %11391 = vst [vmem:[#allocation6_spill] sm:$0xff] %v10463_v63 }
 0x34e   : > { %11390 = vst [vmem:[#allocation10_spill] sm:$0xff] %v10453_v39  ;;  %v3629_v8 = vmax.f32 %v3597_v56, 0.0  ;;  %v3598_v59 = vadd.f32 %v10324_v2, %v3560_v22  ;;  %v3757_v28 = vld [vmem:[#allocation2 + $0x141] sm:$0xff]  ;;  %8083 = vmatpush3.bf16.msra.mxu0 %v9134_v45 }
 0x34f   : > { %v3627_v26 = vmax.f32 %v3595_v31, 0.0  ;;  %v3596_v43 = vadd.f32 %v10324_v2, %v3558_v12  ;;  %8084 = vmatprep.subr.bf16.mxu0 %v9135_v35  ;;  %v10474_v61 = vld [vmem:[%s11310_s6 + $0x80] sm:$0xff]   ;;  %v10503_v21 = vld [vmem:[#allocation2 + $0x111] sm:$0xff] }
 0x350   : > { %3663 = vst [vmem:[#allocation2 + $0x171] sm:$0xff] %v3629_v8  ;;  %v3630_v62 = vmax.f32 %v3598_v59, 0.0  ;;  %v10491_v57 = vld [vmem:[#allocation2 + $0xf1] sm:$0xff]  ;;  %v10500_v27 = vld [vmem:[#allocation2 + $0xe1] sm:$0xff]  ;;  %11396 = vst [vmem:[#allocation31_spill] sm:$0xff] %v10503_v21 }
 0x351   : > { %3661 = vst [vmem:[#allocation2 + $0x151] sm:$0xff] %v3627_v26  ;;  %v3628_v16 = vmax.f32 %v3596_v43, 0.0  ;;  %v8012_v56 = vpop.f32.mrb[36].mxu1  ;;  %v3781_v22 = vpack.c.bf16 %v3627_v26, %v3757_v28  ;;  %v10483_v43 = vld [vmem:[#allocation2 + $0xf0] sm:$0xff]  ;;  %11393 = vst [vmem:[#allocation28_spill] sm:$0xff] %v10491_v57 }
 0x352   : > { %3664 = vst [vmem:[#allocation2 + $0x181] sm:$0xff] %v3630_v62  ;;  %v3563_v45 = vmul.f32 %v8012_v56, %v10319_v42  ;;  %v3456_v9 = vpop.f32.mrb[37].mxu1  ;;  %8085 = vmatpush3.bf16.msra.mxu0 %v9135_v35  ;;  %v10477_v31 = vld [vmem:[#allocation2 + $0x100] sm:$0xff]  ;;  %v10487_v35 = vld [vmem:[#allocation2 + $0xf2] sm:$0xff]  ;;  %11395 = vst [vmem:[#allocation30_spill] sm:$0xff] %v10500_v27 }
 0x353   : > { %v10479_v12 = vld [vmem:[#allocation2 + $0x102] sm:$0xff]  ;;  %3662 = vst [vmem:[#allocation2 + $0x161] sm:$0xff] %v3628_v16  ;;  %v3561_v20 = vmul.f32 %v10319_v42, %v3456_v9  ;;  %v8013_v24 = vpop.f32.mrb[38].mxu1  ;;  %8054 = vmatprep.mubr.bf16.mxu0 %v3781_v22  ;;  %v3782_v48 = vpack.c.bf16 %v3629_v8, %v3628_v16  ;;  %8118 = vmatprep.subr.bf16.mxu0 %v10474_v61  ;;  %11392 = vst [vmem:[#allocation27_spill] sm:$0xff] %v10487_v35 }
 0x354   : > { %v3601_v26 = vadd.f32 %v10324_v2, %v3563_v45  ;;  %v3564_v59 = vmul.f32 %v8013_v24, %v10319_v42  ;;  %v3459_v28 = vpop.f32.mrb[39].mxu1  ;;  %v10495_v16 = vld [vmem:[#allocation2 + $0x101] sm:$0xff] }
 0x355   : > { %v3599_v9 = vadd.f32 %v10324_v2, %v3561_v20  ;;  %v3562_v8 = vmul.f32 %v10319_v42, %v3459_v28  ;;  %8055 = vmatmul.mubr.bf16.gmra.mrb[32].mxu0 %v3782_v48  ;;  %11394 = vst [vmem:[#allocation29_spill] sm:$0xff] %v10495_v16 }
 0x356   : > { %v3633_v45 = vmax.f32 %v3601_v26, 0.0  ;;  %v3602_v24 = vadd.f32 %v10324_v2, %v3564_v59 }
 0x357   : > { %v3631_v5 = vmax.f32 %v3599_v9, 0.0  ;;  %v3600_v56 = vadd.f32 %v10324_v2, %v3562_v8  ;;  %v10507_v28 = vld [vmem:[#allocation2 + $0x170] sm:$0xff] }
 0x358   : > { %3667 = vst [vmem:[#allocation2 + $0x1b1] sm:$0xff] %v3633_v45  ;;  %v3634_v48 = vmax.f32 %v3602_v24, 0.0  ;;  %v10515_v8 = vld [vmem:[#allocation2 + $0x172] sm:$0xff] }
 0x359   : > { %3665 = vst [vmem:[#allocation2 + $0x191] sm:$0xff] %v3631_v5  ;;  %v10511_v26 = vmax.f32 %v3600_v56, 0.0  ;;  %v8016_v59 = vpop.f32.mrb[40].mxu1  ;;  %v3783_v47 = vpack.c.bf16 %v3631_v5, %v3630_v62  ;;  %v10513_v9 = vld [vmem:[#allocation2 + $0x180] sm:$0xff]  ;;  %v10537_v13 = vld [vmem:[#allocation2 + $0x152] sm:$0xff] }
 0x35a   : > { %v10517_v6 = vld [vmem:[#allocation2 + $0x182] sm:$0xff]  ;;  %3668 = vst [vmem:[#allocation2 + $0x1c1] sm:$0xff] %v3634_v48  ;;  %v3567_v20 = vmul.f32 %v8016_v59, %v10319_v42  ;;  %v3472_v24 = vpop.f32.mrb[41].mxu1  ;;  %v10531_v59 = vld [vmem:[#allocation2 + $0x150] sm:$0xff] }
 0x35b   : > { %11397 = vst [vmem:[#allocation32_spill] sm:$0xff] %v10511_v26  ;;  %v10520_v7 = vld [vmem:[#allocation2 + $0x160] sm:$0xff]  ;;  %3666 = vst [vmem:[#allocation2 + $0x1a1] sm:$0xff] %v10511_v26  ;;  %v3565_v62 = vmul.f32 %v10319_v42, %v3472_v24  ;;  %v8017_v22 = vpop.f32.mrb[42].mxu1  ;;  %8058 = vmatprep.mubr.bf16.mxu0 %v3783_v47  ;;  %v3784_v48 = vpack.c.bf16 %v3633_v45, %v10511_v26  ;;  %v10543_v45 = vld [vmem:[#allocation2 + $0x171] sm:$0xff] }
 0x35c   : > { %v10522_v40 = vld [vmem:[#allocation2 + $0x162] sm:$0xff]  ;;  %v3605_v36 = vadd.f32 %v10324_v2, %v3567_v20  ;;  %v3568_v4 = vmul.f32 %v8017_v22, %v10319_v42  ;;  %v3475_v56 = vpop.f32.mrb[43].mxu1  ;;  %11399 = vst [vmem:[#allocation34_spill] sm:$0xff] %v10543_v45 }
 0x35d   : > { %v10533_v19 = vld [vmem:[#allocation2 + $0x161] sm:$0xff]  ;;  %v3603_v24 = vadd.f32 %v10324_v2, %v3565_v62  ;;  %v3566_v47 = vmul.f32 %v10319_v42, %v3475_v56  ;;  %8059 = vmatmul.mubr.bf16.gmra.mrb[36].mxu0 %v3784_v48 }
 0x35e   : > { %11398 = vst [vmem:[#allocation33_spill] sm:$0xff] %v10533_v19  ;;  %v3637_v51 = vmax.f32 %v3605_v36, 0.0  ;;  %v3606_v20 = vadd.f32 %v10324_v2, %v3568_v4  ;;  %v3765_v22 = vld [vmem:[#allocation2 + $0x1e1] sm:$0xff] }
 0x35f   : > { %v10550_v26 = vmax.f32 %v3603_v24, 0.0  ;;  %v3604_v5 = vadd.f32 %v10324_v2, %v3566_v47 }
 0x360   : > { %3671 = vst [vmem:[#allocation2 + $0x211] sm:$0xff] %v3637_v51  ;;  %v10553_v62 = vmax.f32 %v3606_v20, 0.0  ;;  %v10568_v45 = vld [vmem:[#allocation2 + $0x190] sm:$0xff] }
 0x361   : > { %11400 = vst [vmem:[#allocation35_spill] sm:$0xff] %v10550_v26  ;;  %3669 = vst [vmem:[#allocation2 + $0x1f1] sm:$0xff] %v10550_v26  ;;  %v10556_v56 = vmax.f32 %v3604_v5, 0.0  ;;  %v8020_v48 = vpop.f32.mrb[44].mxu1  ;;  %v3785_v36 = vpack.c.bf16 %v10550_v26, %v3765_v22  ;;  %v10572_v21 = vld [vmem:[#allocation2 + $0x192] sm:$0xff] }
 0x362   : > { %11401 = vst [vmem:[#allocation36_spill] sm:$0xff] %v10553_v62  ;;  %3672 = vst [vmem:[#allocation2 + $0x221] sm:$0xff] %v10553_v62  ;;  %v3571_v4 = vmul.f32 %v8020_v48, %v10319_v42  ;;  %v3488_v52 = vpop.f32.mrb[45].mxu1  ;;  %v10561_v23 = vld [vmem:[#allocation2 + $0x1a0] sm:$0xff] }
 0x363   : > { %11402 = vst [vmem:[#allocation37_spill] sm:$0xff] %v10556_v56  ;;  %v10563_v24 = vld [vmem:[#allocation2 + $0x1a2] sm:$0xff]  ;;  %3670 = vst [vmem:[#allocation2 + $0x201] sm:$0xff] %v10556_v56  ;;  %v3569_v47 = vmul.f32 %v10319_v42, %v3488_v52  ;;  %v8021_v20 = vpop.f32.mrb[46].mxu1  ;;  %8062 = vmatprep.mubr.bf16.mxu0 %v3785_v36  ;;  %v3786_v5 = vpack.c.bf16 %v3637_v51, %v10556_v56  ;;  %v10580_v51 = vpop.f32.mrb[0].mxu0 }
 0x364   : > { %v3609_v22 = vadd.f32 %v10324_v2, %v3571_v4  ;;  %v3572_v19 = vmul.f32 %v8021_v20, %v10319_v42  ;;  %v3491_v48 = vpop.f32.mrb[47].mxu1  ;;  %11403 = vst [vmem:[#allocation38_spill] sm:$0xff] %v10580_v51  ;;  %v10585_v63 = vpop.f32.mrb[1].mxu0  ;;  %v10627_v56 = vld [vmem:[#allocation2 + $0x181] sm:$0xff] }
 0x365   : > { %v3607_v52 = vadd.f32 %v10324_v2, %v3569_v47  ;;  %v3570_v36 = vmul.f32 %v10319_v42, %v3491_v48  ;;  %8063 = vmatmul.mubr.bf16.gmra.mrb[40].mxu0 %v3786_v5  ;;  %11404 = vst [vmem:[#allocation39_spill] sm:$0xff] %v10585_v63  ;;  %v10590_v57 = vpop.f32.mrb[2].mxu0  ;;  %v10596_v48 = vld [vmem:[#allocation2 + $0x191] sm:$0xff]  ;;  %11411 = vst [vmem:[#allocation46_spill] sm:$0xff] %v10627_v56  ;;  %v3714_v56 = vpack.c.bf16 %v10428_v60, %v10439_v54 }
 0x366   : > { %v3641_v20 = vmax.f32 %v3609_v22, 0.0  ;;  %v3610_v27 = vadd.f32 %v10324_v2, %v3572_v19  ;;  %11406 = vst [vmem:[#allocation41_spill] sm:$0xff] %v10590_v57  ;;  %v10594_v5 = vpop.f32.mrb[3].mxu0  ;;  %11408 = vst [vmem:[#allocation43_spill] sm:$0xff] %v10596_v48 }
 0x367   : > { %v10587_v39 = vmax.f32 %v3607_v52, 0.0  ;;  %v3608_v16 = vadd.f32 %v10324_v2, %v3570_v36  ;;  %v10592_v42 = vld [vmem:[#allocation2 + $0x210] sm:$0xff]  ;;  %11407 = vst [vmem:[#allocation42_spill] sm:$0xff] %v10594_v5 }
 0x368   : > { %3675 = vst [vmem:[#allocation2 + $0x251] sm:$0xff] %v3641_v20  ;;  %v3642_v47 = vmax.f32 %v3610_v27, 0.0  ;;  %v10605_v2 = vld [vmem:[#allocation2 + $0x212] sm:$0xff] }
 0x369   : > { %11405 = vst [vmem:[#allocation40_spill] sm:$0xff] %v10587_v39  ;;  %3673 = vst [vmem:[#allocation2 + $0x231] sm:$0xff] %v10587_v39  ;;  %v10599_v22 = vmax.f32 %v3608_v16, 0.0  ;;  %v3787_v19 = vpack.c.bf16 %v10587_v39, %v10553_v62  ;;  %v10603_v52 = vld [vmem:[#allocation2 + $0x220] sm:$0xff]  ;;  %v10609_v27 = vld [vmem:[#allocation2 + $0x1f0] sm:$0xff]  ;;  %v3709_v16 = vpack.c.bf16 %v10369_v11, %v10233_v38 }
 0x36a   : > { %v10607_v36 = vld [vmem:[#allocation2 + $0x222] sm:$0xff]  ;;  %3676 = vst [vmem:[#allocation2 + $0x261] sm:$0xff] %v3642_v47  ;;  %v10617_v57 = vpack.c.bf16 %v3642_v47, %v3641_v20  ;;  %v10623_v62 = vld [vmem:[#allocation2 + $0x1f2] sm:$0xff] }
 0x36b   : > { %11409 = vst [vmem:[#allocation44_spill] sm:$0xff] %v10599_v22  ;;  %v10611_v4 = vld [vmem:[#allocation2 + $0x200] sm:$0xff]  ;;  %3674 = vst [vmem:[#allocation2 + $0x241] sm:$0xff] %v10599_v22  ;;  %8066 = vmatprep.mubr.bf16.mxu0 %v3787_v19  ;;  %v3788_v51 = vpack.c.bf16 %v3641_v20, %v10599_v22  ;;  %v10637_v20 = vpop.f32.mrb[4].mxu0 }
 0x36c   : > { %v10613_v5 = vld [vmem:[#allocation2 + $0x202] sm:$0xff]  ;;  %11410 = vst [vmem:[#allocation45_spill] sm:$0xff] %v10617_v57  ;;  %11412 = vst [vmem:[#allocation47_spill] sm:$0xff] %v10637_v20  ;;  %v10639_v57 = vpop.f32.mrb[5].mxu0  ;;  %v9138_v20 = vld [vmem:[%s11310_s6 + $0x90] sm:$0xff]  }
 0x36d   : > { %8067 = vmatmul.mubr.bf16.gmra.mrb[44].mxu0 %v3788_v51  ;;  %11413 = vst [vmem:[#allocation48_spill] sm:$0xff] %v10639_v57  ;;  %v10641_v26 = vpop.f32.mrb[6].mxu0  ;;  %v3710_v51 = vpack.c.bf16 %v10348_v14, %v10357_v3 }
 0x36e   : > { %8086 = vmatprep.mubr.bf16.mxu0 %v3709_v16  ;;  %11414 = vst [vmem:[#allocation49_spill] sm:$0xff] %v10641_v26  ;;  %v10643_v58 = vpop.f32.mrb[7].mxu0  ;;  %v9137_v16 = vld [vmem:[%s11310_s6 + $0x88] sm:$0xff]   ;;  %v3711_v26 = vpack.c.bf16 %v10401_v37, %v10350_v25 }
 0x36f   : > { %11415 = vst [vmem:[#allocation50_spill] sm:$0xff] %v10643_v58  ;;  %v10665_v57 = vpop.f32.mrb[8].mxu0  ;;  %v10676_v58 = vld [vmem:[#allocation2 + $0x70] sm:$0xff] }
 0x370   : > { %v10645_v38 = vld [vmem:[#allocation2 + $0x230] sm:$0xff]  ;;  %11416 = vst [vmem:[#allocation51_spill] sm:$0xff] %v10665_v57  ;;  %v10670_v39 = vpop.f32.mrb[9].mxu0 }
 0x371   : > { %v10649_v47 = vld [vmem:[#allocation2 + $0x232] sm:$0xff]  ;;  %11417 = vst [vmem:[#allocation52_spill] sm:$0xff] %v10670_v39  ;;  %v10672_v19 = vpop.f32.mrb[10].mxu0 }
 0x372   : > { %v10647_v10 = vld [vmem:[#allocation2 + $0x240] sm:$0xff]  ;;  %11418 = vst [vmem:[#allocation53_spill] sm:$0xff] %v10672_v19  ;;  %v10674_v22 = vpop.f32.mrb[11].mxu0 }
 0x373   : > { %v10651_v63 = vld [vmem:[#allocation2 + $0x242] sm:$0xff]  ;;  %11419 = vst [vmem:[#allocation54_spill] sm:$0xff] %v10674_v22  ;;  %v10687_v22 = vpop.f32.mrb[12].mxu0 }
 0x374   : > { %11421 = vst [vmem:[#allocation56_spill] sm:$0xff] %v10687_v22  ;;  %v10692_v19 = vpop.f32.mrb[13].mxu0 }
 0x375   : > { %8087 = vmatmul.mubr.bf16.vlgmr.msra.gmra.mrb[16].mxu0 %v3710_v51  ;;  %v10683_v51 = vld [vmem:[#allocation2] sm:$0xff]  ;;  %11422 = vst [vmem:[#allocation57_spill] sm:$0xff] %v10692_v19  ;;  %v10694_v57 = vpop.f32.mrb[14].mxu0  ;;  %v10724_v19 = vld [vmem:[#allocation2 + $0x1b0] sm:$0xff] }
 0x376   : > { %8090 = vmatprep.mubr.bf16.mxu0 %v3711_v26  ;;  %8119 = vmatpush3.bf16.msra.mxu0 %v10474_v61  ;;  %v3712_v26 = vpack.c.bf16 %v10676_v58, %v10393_v34  ;;  %v9139_v61 = vld [vmem:[%s11310_s6 + $0x98] sm:$0xff]   ;;  %11420 = vst [vmem:[#allocation55_spill] sm:$0xff] %v10683_v51  ;;  %v3713_v39 = vpack.c.bf16 %v10451_v29, %v10683_v51  ;;  %11423 = vst [vmem:[#allocation58_spill] sm:$0xff] %v10694_v57  ;;  %v10696_v48 = vpop.f32.mrb[15].mxu0 }
 0x377   : > { %8120 = vmatprep.subr.bf16.mxu0 %v9137_v16  ;;  %11424 = vst [vmem:[#allocation59_spill] sm:$0xff] %v10696_v48  ;;  %v9143_v57 = vld [vmem:[%s11310_s6 + $0xb8] sm:$0xff]  }
 0x37a   : > { %8121 = vmatpush3.bf16.msra.mxu0 %v9137_v16  ;;  %v9140_v16 = vld [vmem:[%s11310_s6 + $0xa0] sm:$0xff]  }
 0x37b   : > { %8122 = vmatprep.subr.bf16.mxu0 %v9138_v20 }
 0x37d   : > { %8091 = vmatmul.mubr.bf16.gmra.mrb[20].mxu0 %v3712_v26  ;;  %v9142_v26 = vld [vmem:[%s11310_s6 + $0xb0] sm:$0xff]  }
 0x37e   : > { %8094 = vmatprep.mubr.bf16.mxu0 %v3713_v39  ;;  %8123 = vmatpush3.bf16.msra.mxu0 %v9138_v20  ;;  %v9141_v39 = vld [vmem:[%s11310_s6 + $0xa8] sm:$0xff]   ;;  %v3715_v20 = vpack.c.bf16 %v10483_v43, %v10432_v0 }
 0x37f   : > { %8124 = vmatprep.subr.bf16.mxu0 %v9139_v61 }
 0x382   : > { %8125 = vmatpush3.bf16.msra.mxu0 %v9139_v61  ;;  %v10708_v61 = vld [vmem:[#allocation2 + $0x110] sm:$0xff] }
 0x383   : > { %8126 = vmatprep.subr.bf16.mxu0 %v9140_v16  ;;  %v3716_v48 = vpack.c.bf16 %v10708_v61, %v10477_v31 }
 0x385   : > { %8095 = vmatmul.mubr.bf16.gmra.mrb[24].mxu0 %v3714_v56  ;;  %v3717_v56 = vpack.c.bf16 %v10531_v59, %v10683_v51 }
 0x386   : > { %8098 = vmatprep.mubr.bf16.mxu0 %v3715_v20  ;;  %8127 = vmatpush3.bf16.msra.mxu0 %v9140_v16  ;;  %v9144_v16 = vld [vmem:[%s11310_s6 + $0xc0] sm:$0xff]   ;;  %v3719_v20 = vpack.c.bf16 %v10568_v45, %v10513_v9 }
 0x387   : > { %8128 = vmatprep.subr.bf16.mxu0 %v9141_v39 }
 0x38a   : > { %8129 = vmatpush3.bf16.msra.mxu0 %v9141_v39  ;;  %v3718_v39 = vpack.c.bf16 %v10507_v28, %v10520_v7 }
 0x38b   : > { %8130 = vmatprep.subr.bf16.mxu0 %v9142_v26 }
 0x38d   : > { %8099 = vmatmul.mubr.bf16.gmra.mrb[28].mxu0 %v3716_v48  ;;  %v3720_v48 = vpack.c.bf16 %v10724_v19, %v10561_v23 }
 0x38e   : > { %8102 = vmatprep.mubr.bf16.mxu0 %v3717_v56  ;;  %8131 = vmatpush3.bf16.msra.mxu0 %v9142_v26  ;;  %v3721_v26 = vpack.c.bf16 %v10609_v27, %v10683_v51  ;;  %v3723_v56 = vpack.c.bf16 %v10645_v38, %v10603_v52  ;;  %v9147_v51 = vld [vmem:[%s11310_s6 + $0xd8] sm:$0xff]  }
 0x38f   : > { %8132 = vmatprep.subr.bf16.mxu0 %v9143_v57 }
 0x392   : > { %8133 = vmatpush3.bf16.msra.mxu0 %v9143_v57  ;;  %v3722_v57 = vpack.c.bf16 %v10592_v42, %v10611_v4 }
 0x393   : > { %8166 = vmatprep.subr.bf16.mxu0 %v9144_v16 }
 0x395   : > { %8103 = vmatmul.mubr.bf16.gmra.mrb[32].mxu0 %v3718_v39  ;;  %v4224_v39 = vld [vmem:[#allocation2 + $0x2] sm:$0xff] }
 0x396   : > { %8106 = vmatprep.mubr.bf16.mxu0 %v3719_v20  ;;  %v10734_v20 = vld [vmem:[#allocation2 + $0x250] sm:$0xff]  ;;  %v4256_v41 = vpack.c.bf16 %v10375_v46, %v4224_v39 }
 0x397   : > { %v3724_v22 = vpack.c.bf16 %v10734_v20, %v10647_v10 }
 0x39d   : > { %8107 = vmatmul.mubr.bf16.gmra.mrb[36].mxu0 %v3720_v48  ;;  %v4257_v48 = vpack.c.bf16 %v10352_v44, %v10359_v1 }
 0x39e   : > { %8110 = vmatprep.mubr.bf16.mxu0 %v3721_v26  ;;  %v9145_v26 = vld [vmem:[%s11310_s6 + $0xc8] sm:$0xff]  }
 0x3a5   : > { %8111 = vmatmul.mubr.bf16.gmra.mrb[40].mxu0 %v3722_v57  ;;  %v4258_v57 = vpack.c.bf16 %v10405_v53, %v10354_v50 }
 0x3a6   : > { %8114 = vmatprep.mubr.bf16.mxu0 %v3723_v56  ;;  %v9146_v56 = vld [vmem:[%s11310_s6 + $0xd0] sm:$0xff]  }
 0x3ad   : > { %8115 = vmatmul.mubr.bf16.gmra.mrb[44].mxu0 %v3724_v22  ;;  %v4232_v22 = vld [vmem:[#allocation2 + $0xa2] sm:$0xff] }
 0x3ae   : > { %8134 = vmatprep.mubr.bf16.mxu0 %v4256_v41  ;;  %v10749_v41 = vld [vmem:[#allocation2 + $0x72] sm:$0xff] }
 0x3af   : > { %v4259_v39 = vpack.c.bf16 %v10749_v41, %v10395_v55 }
 0x3b5   : > { %8135 = vmatmul.mubr.bf16.vlgmr.msra.gmra.mrb[16].mxu0 %v4257_v48  ;;  %v4260_v48 = vpack.c.bf16 %v10457_v33, %v4232_v22  ;;  %v4262_v22 = vpack.c.bf16 %v10487_v35, %v10436_v17  ;;  %v9151_v35 = vld [vmem:[%s11310_s6 + $0xf8] sm:$0xff]  }
 0x3b6   : > { %8138 = vmatprep.mubr.bf16.mxu0 %v4258_v57  ;;  %8167 = vmatpush3.bf16.msra.mxu0 %v9144_v16  ;;  %v9148_v16 = vld [vmem:[%s11310_s6 + $0xe0] sm:$0xff]   ;;  %v9149_v57 = vld [vmem:[%s11310_s6 + $0xe8] sm:$0xff]  }
 0x3b7   : > { %8168 = vmatprep.subr.bf16.mxu0 %v9145_v26 }
 0x3ba   : > { %8169 = vmatpush3.bf16.msra.mxu0 %v9145_v26  ;;  %v4261_v26 = vpack.c.bf16 %v10434_v49, %v10441_v18 }
 0x3bb   : > { %8170 = vmatprep.subr.bf16.mxu0 %v9146_v56 }
 0x3bd   : > { %8139 = vmatmul.mubr.bf16.gmra.mrb[20].mxu0 %v4259_v39  ;;  %v10770_v39 = vld [vmem:[#allocation2 + $0x112] sm:$0xff] }
 0x3be   : > { %8142 = vmatprep.mubr.bf16.mxu0 %v4260_v48  ;;  %8171 = vmatpush3.bf16.msra.mxu0 %v9146_v56  ;;  %v9150_v56 = vld [vmem:[%s11310_s6 + $0xf0] sm:$0xff]   ;;  %11425 = vst [vmem:[#allocation60_spill] sm:$0xff] %v10770_v39  ;;  %v4263_v48 = vpack.c.bf16 %v10770_v39, %v10479_v12  ;;  %v4248_v39 = vld [vmem:[#allocation2 + $0x1e2] sm:$0xff] }
 0x3bf   : > { %8172 = vmatprep.subr.bf16.mxu0 %v9147_v51 }
 0x3c2   : > { %8173 = vmatpush3.bf16.msra.mxu0 %v9147_v51  ;;  %v4240_v51 = vld [vmem:[#allocation2 + $0x142] sm:$0xff] }
 0x3c3   : > { %8174 = vmatprep.subr.bf16.mxu0 %v9148_v16 }
 0x3c5   : > { %8143 = vmatmul.mubr.bf16.gmra.mrb[24].mxu0 %v4261_v26  ;;  %v4264_v26 = vpack.c.bf16 %v10537_v13, %v4240_v51  ;;  %v10785_v51 = vld [vmem:[#allocation2 + $0x1b2] sm:$0xff] }
 0x3c6   : > { %8146 = vmatprep.mubr.bf16.mxu0 %v4262_v22  ;;  %8175 = vmatpush3.bf16.msra.mxu0 %v9148_v16  ;;  %v9152_v16 = vld [vmem:[%s11310_s6 + $0x100] sm:$0xff]   ;;  %v4266_v22 = vpack.c.bf16 %v10572_v21, %v10517_v6  ;;  %11426 = vst [vmem:[#allocation61_spill] sm:$0xff] %v10785_v51 }
 0x3c7   : > { %8176 = vmatprep.subr.bf16.mxu0 %v9149_v57 }
 0x3ca   : > { %8177 = vmatpush3.bf16.msra.mxu0 %v9149_v57  ;;  %v4265_v57 = vpack.c.bf16 %v10515_v8, %v10522_v40 }
 0x3cb   : > { %8178 = vmatprep.subr.bf16.mxu0 %v9150_v56 }
 0x3cd   : > { %8147 = vmatmul.mubr.bf16.gmra.mrb[28].mxu0 %v4263_v48  ;;  %v4268_v48 = vpack.c.bf16 %v10623_v62, %v4248_v39  ;;  %v9153_v39 = vld [vmem:[%s11310_s6 + $0x108] sm:$0xff]  }
 0x3ce   : > { %8150 = vmatprep.mubr.bf16.mxu0 %v4264_v26  ;;  %8179 = vmatpush3.bf16.msra.mxu0 %v9150_v56  ;;  %v4267_v56 = vpack.c.bf16 %v10785_v51, %v10563_v24  ;;  %v4270_v26 = vpack.c.bf16 %v10649_v47, %v10607_v36  ;;  %v11427_v51 = vpack.c.bf16 %v10357_v3, %v10369_v11  ;;  %v10813_v3 = vld [vmem:[#allocation2 + $0x80] sm:$0xff] }
 0x3cf   : > { %8180 = vmatprep.subr.bf16.mxu0 %v9151_v35  ;;  %v4565_v11 = vpack.c.bf16 %v10813_v3, %v10676_v58  ;;  %v11431_v58 = vpack.c.bf16 %v10432_v0, %v10428_v60  ;;  %v9159_v60 = vld [vmem:[%s11310_s6 + $0x138] sm:$0xff]   ;;  %v11433_v0 = vpack.c.bf16 %v10520_v7, %v10531_v59  ;;  %v11436_v59 = vpack.c.bf16 %v10611_v4, %v10609_v27 }
 0x3d0   : > { %v4869_v4 = vpack.c.bf16 %v10418_v32, %v10381_v30 }
 0x3d2   : > { %8181 = vmatpush3.bf16.msra.mxu0 %v9151_v35  ;;  %v4269_v35 = vpack.c.bf16 %v10605_v2, %v10613_v5 }
 0x3d3   : > { %8214 = vmatprep.subr.bf16.mxu0 %v9152_v16 }
 0x3d5   : > { %8151 = vmatmul.mubr.bf16.gmra.mrb[32].mxu0 %v4265_v57  ;;  %v10794_v57 = vld [vmem:[#allocation2 + $0x252] sm:$0xff] }
 0x3d6   : > { %8154 = vmatprep.mubr.bf16.mxu0 %v4266_v22  ;;  %v4271_v22 = vpack.c.bf16 %v10794_v57, %v10651_v63 }
 0x3dd   : > { %8155 = vmatmul.mubr.bf16.gmra.mrb[36].mxu0 %v4267_v56  ;;  %v11428_v56 = vpack.c.bf16 %v10350_v25, %v10348_v14  ;;  %v9155_v14 = vld [vmem:[%s11310_s6 + $0x118] sm:$0xff]   ;;  %v11430_v25 = vpack.c.bf16 %v10439_v54, %v10451_v29  ;;  %v11432_v54 = vpack.c.bf16 %v10477_v31, %v10483_v43  ;;  %v9158_v29 = vld [vmem:[%s11310_s6 + $0x130] sm:$0xff]   ;;  %v9160_v31 = vld [vmem:[%s11310_s6 + $0x140] sm:$0xff]   ;;  %v11434_v43 = vpack.c.bf16 %v10513_v9, %v10507_v28 }
 0x3de   : > { %8158 = vmatprep.mubr.bf16.mxu0 %v4268_v48  ;;  %v11429_v48 = vpack.c.bf16 %v10393_v34, %v10401_v37  ;;  %v9156_v34 = vld [vmem:[%s11310_s6 + $0x120] sm:$0xff]   ;;  %v9157_v37 = vld [vmem:[%s11310_s6 + $0x128] sm:$0xff]   ;;  %v11438_v28 = vpack.c.bf16 %v10647_v10, %v10645_v38  ;;  %v11440_v10 = vld [vmem:[#allocation8_spill] sm:$0xff] }
 0x3df   : > { %v9162_v38 = vld [vmem:[%s11310_s6 + $0x150] sm:$0xff]  }
 0x3e5   : > { %8159 = vmatmul.mubr.bf16.gmra.mrb[40].mxu0 %v4269_v35  ;;  %v9154_v35 = vld [vmem:[%s11310_s6 + $0x110] sm:$0xff]  }
 0x3e6   : > { %8162 = vmatprep.mubr.bf16.mxu0 %v4270_v26  ;;  %v10857_v26 = vld [vmem:[#allocation2 + $0x1c0] sm:$0xff] }
 0x3e7   : > { %v4573_v7 = vpack.c.bf16 %v10857_v26, %v10724_v19 }
 0x3ed   : > { %8163 = vmatmul.mubr.bf16.gmra.mrb[44].mxu0 %v4271_v22  ;;  %v11437_v22 = vpack.c.bf16 %v10603_v52, %v10592_v42  ;;  %v9161_v42 = vld [vmem:[%s11310_s6 + $0x148] sm:$0xff]   ;;  %v11439_v52 = vld [vmem:[#allocation7_spill] sm:$0xff] }
 0x3ee   : > { %8182 = vmatprep.mubr.bf16.mxu0 %v11427_v51  ;;  %v4870_v27 = vpack.c.bf16 %v11440_v10, %v11439_v52 }
 0x3f5   : > { %8183 = vmatmul.mubr.bf16.vlgmr.msra.gmra.mrb[16].mxu0 %v11428_v56 }
 0x3f6   : > { %8186 = vmatprep.mubr.bf16.mxu0 %v11429_v48  ;;  %8215 = vmatpush3.bf16.msra.mxu0 %v9152_v16  ;;  %v10838_v16 = vld [vmem:[#allocation2 + $0x120] sm:$0xff]  ;;  %v4844_v48 = vld [vmem:[#allocation2 + $0xb1] sm:$0xff] }
 0x3f7   : > { %8216 = vmatprep.subr.bf16.mxu0 %v9153_v39  ;;  %v4569_v51 = vpack.c.bf16 %v10838_v16, %v10708_v61  ;;  %v11435_v61 = vpack.c.bf16 %v10561_v23, %v10568_v45  ;;  %v10870_v23 = vld [vmem:[#allocation2 + $0x260] sm:$0xff]  ;;  %v4836_v45 = vld [vmem:[#allocation2 + $0x11] sm:$0xff] }
 0x3f8   : > { %v4577_v9 = vpack.c.bf16 %v10870_v23, %v10734_v20  ;;  %v4868_v19 = vpack.c.bf16 %v10371_v15, %v4836_v45  ;;  %v10885_v20 = vld [vmem:[#allocation2 + $0x81] sm:$0xff] }
 0x3f9   : > { %v11449_v45 = vld [vmem:[#allocation34_spill] sm:$0xff] }
 0x3fa   : > { %8217 = vmatpush3.bf16.msra.mxu0 %v9153_v39  ;;  %v11441_v39 = vld [vmem:[#allocation9_spill] sm:$0xff] }
 0x3fb   : > { %8218 = vmatprep.subr.bf16.mxu0 %v9154_v35  ;;  %v4871_v56 = vpack.c.bf16 %v10885_v20, %v11441_v39 }
 0x3fd   : > { %8187 = vmatmul.mubr.bf16.gmra.mrb[20].mxu0 %v4565_v11  ;;  %v11442_v11 = vld [vmem:[#allocation10_spill] sm:$0xff] }
 0x3fe   : > { %8190 = vmatprep.mubr.bf16.mxu0 %v11430_v25  ;;  %8219 = vmatpush3.bf16.msra.mxu0 %v9154_v35  ;;  %v9163_v35 = vld [vmem:[%s11310_s6 + $0x158] sm:$0xff]   ;;  %v9164_v25 = vld [vmem:[%s11310_s6 + $0x160] sm:$0xff]  }
 0x3ff   : > { %8220 = vmatprep.subr.bf16.mxu0 %v9155_v14 }
 0x402   : > { %8221 = vmatpush3.bf16.msra.mxu0 %v9155_v14  ;;  %v4872_v14 = vpack.c.bf16 %v11442_v11, %v4844_v48  ;;  %v10923_v48 = vld [vmem:[#allocation2 + $0x1b1] sm:$0xff] }
 0x403   : > { %8222 = vmatprep.subr.bf16.mxu0 %v9156_v34 }
 0x405   : > { %8191 = vmatmul.mubr.bf16.gmra.mrb[24].mxu0 %v11431_v58 }
 0x406   : > { %8194 = vmatprep.mubr.bf16.mxu0 %v11432_v54  ;;  %8223 = vmatpush3.bf16.msra.mxu0 %v9156_v34  ;;  %v11443_v34 = vld [vmem:[#allocation6_spill] sm:$0xff] }
 0x407   : > { %8224 = vmatprep.subr.bf16.mxu0 %v9157_v37  ;;  %v9165_v54 = vld [vmem:[%s11310_s6 + $0x168] sm:$0xff]  }
 0x40a   : > { %8225 = vmatpush3.bf16.msra.mxu0 %v9157_v37  ;;  %v11444_v37 = vld [vmem:[#allocation30_spill] sm:$0xff] }
 0x40b   : > { %8226 = vmatprep.subr.bf16.mxu0 %v9158_v29  ;;  %v4873_v58 = vpack.c.bf16 %v11444_v37, %v11443_v34 }
 0x40d   : > { %8195 = vmatmul.mubr.bf16.gmra.mrb[28].mxu0 %v4569_v51  ;;  %v11446_v51 = vld [vmem:[#allocation29_spill] sm:$0xff] }
 0x40e   : > { %8198 = vmatprep.mubr.bf16.mxu0 %v11433_v0  ;;  %8227 = vmatpush3.bf16.msra.mxu0 %v9158_v29  ;;  %v11445_v29 = vld [vmem:[#allocation28_spill] sm:$0xff]  ;;  %v9166_v0 = vld [vmem:[%s11310_s6 + $0x170] sm:$0xff]  }
 0x40f   : > { %8228 = vmatprep.subr.bf16.mxu0 %v9159_v60 }
 0x412   : > { %8229 = vmatpush3.bf16.msra.mxu0 %v9159_v60  ;;  %v4874_v60 = vpack.c.bf16 %v11446_v51, %v11445_v29 }
 0x413   : > { %8262 = vmatprep.subr.bf16.mxu0 %v9160_v31 }
 0x415   : > { %8199 = vmatmul.mubr.bf16.gmra.mrb[32].mxu0 %v11434_v43  ;;  %v11447_v43 = vld [vmem:[#allocation31_spill] sm:$0xff] }
 0x416   : > { %8202 = vmatprep.mubr.bf16.mxu0 %v11435_v61 }
 0x41d   : > { %8203 = vmatmul.mubr.bf16.gmra.mrb[36].mxu0 %v4573_v7  ;;  %v4852_v7 = vld [vmem:[#allocation2 + $0x151] sm:$0xff] }
 0x41e   : > { %8206 = vmatprep.mubr.bf16.mxu0 %v11436_v59  ;;  %v9167_v59 = vld [vmem:[%s11310_s6 + $0x178] sm:$0xff]  }
 0x425   : > { %8207 = vmatmul.mubr.bf16.gmra.mrb[40].mxu0 %v11437_v22  ;;  %v11448_v22 = vld [vmem:[#allocation33_spill] sm:$0xff] }
 0x426   : > { %8210 = vmatprep.mubr.bf16.mxu0 %v11438_v28  ;;  %v4876_v28 = vpack.c.bf16 %v11448_v22, %v4852_v7  ;;  %v11458_v7 = vld [vmem:[#allocation40_spill] sm:$0xff] }
 0x42d   : > { %8211 = vmatmul.mubr.bf16.gmra.mrb[44].mxu0 %v4577_v9  ;;  %v9168_v9 = vld [vmem:[%s11310_s6 + $0x180] sm:$0xff]  }
 0x42e   : > { %8230 = vmatprep.mubr.bf16.mxu0 %v4868_v19  ;;  %v11450_v19 = vld [vmem:[#allocation46_spill] sm:$0xff] }
 0x435   : > { %8231 = vmatmul.mubr.bf16.vlgmr.msra.gmra.mrb[16].mxu0 %v4869_v4  ;;  %v4877_v4 = vpack.c.bf16 %v11450_v19, %v11449_v45 }
 0x436   : > { %8234 = vmatprep.mubr.bf16.mxu0 %v4870_v27  ;;  %8263 = vmatpush3.bf16.msra.mxu0 %v9160_v31  ;;  %v10906_v31 = vld [vmem:[#allocation2 + $0x121] sm:$0xff]  ;;  %v11452_v27 = vld [vmem:[#allocation32_spill] sm:$0xff] }
 0x437   : > { %8264 = vmatprep.subr.bf16.mxu0 %v9161_v42  ;;  %v4875_v61 = vpack.c.bf16 %v10906_v31, %v11447_v43 }
 0x43a   : > { %8265 = vmatpush3.bf16.msra.mxu0 %v9161_v42  ;;  %v11451_v42 = vld [vmem:[#allocation43_spill] sm:$0xff] }
 0x43b   : > { %8266 = vmatprep.subr.bf16.mxu0 %v9162_v38 }
 0x43d   : > { %8235 = vmatmul.mubr.bf16.gmra.mrb[20].mxu0 %v4871_v56  ;;  %v10921_v56 = vld [vmem:[#allocation2 + $0x1c1] sm:$0xff] }
 0x43e   : > { %8238 = vmatprep.mubr.bf16.mxu0 %v4872_v14  ;;  %8267 = vmatpush3.bf16.msra.mxu0 %v9162_v38  ;;  %v4878_v38 = vpack.c.bf16 %v11452_v27, %v11451_v42  ;;  %v11453_v14 = vld [vmem:[#allocation37_spill] sm:$0xff]  ;;  %v9169_v27 = vld [vmem:[%s11310_s6 + $0x188] sm:$0xff]  }
 0x43f   : > { %8268 = vmatprep.subr.bf16.mxu0 %v9163_v35 }
 0x442   : > { %8269 = vmatpush3.bf16.msra.mxu0 %v9163_v35  ;;  %v4879_v35 = vpack.c.bf16 %v10921_v56, %v10923_v48 }
 0x443   : > { %8270 = vmatprep.subr.bf16.mxu0 %v9164_v25 }
 0x445   : > { %8239 = vmatmul.mubr.bf16.gmra.mrb[24].mxu0 %v4873_v58 }
 0x446   : > { %8242 = vmatprep.mubr.bf16.mxu0 %v4874_v60  ;;  %8271 = vmatpush3.bf16.msra.mxu0 %v9164_v25  ;;  %v11454_v25 = vld [vmem:[#allocation35_spill] sm:$0xff]  ;;  %v11456_v60 = vld [vmem:[#allocation36_spill] sm:$0xff] }
 0x447   : > { %8272 = vmatprep.subr.bf16.mxu0 %v9165_v54  ;;  %v11455_v58 = vpack.c.bf16 %v11453_v14, %v11454_v25  ;;  %v9170_v14 = vld [vmem:[%s11310_s6 + $0x190] sm:$0xff]   ;;  %v10978_v25 = vld [vmem:[#allocation2 + $0x122] sm:$0xff] }
 0x44a   : > { %8273 = vmatpush3.bf16.msra.mxu0 %v9165_v54  ;;  %v10930_v54 = vld [vmem:[#allocation2 + $0x211] sm:$0xff] }
 0x44b   : > { %8274 = vmatprep.subr.bf16.mxu0 %v9166_v0 }
 0x44d   : > { %8243 = vmatmul.mubr.bf16.gmra.mrb[28].mxu0 %v4875_v61  ;;  %v11457_v61 = vld [vmem:[#allocation44_spill] sm:$0xff] }
 0x44e   : > { %8246 = vmatprep.mubr.bf16.mxu0 %v4876_v28  ;;  %8275 = vmatpush3.bf16.msra.mxu0 %v9166_v0  ;;  %v4881_v0 = vpack.c.bf16 %v11456_v60, %v10930_v54  ;;  %v11460_v28 = vld [vmem:[#allocation45_spill] sm:$0xff] }
 0x44f   : > { %8276 = vmatprep.subr.bf16.mxu0 %v9167_v59 }
 0x452   : > { %8277 = vmatpush3.bf16.msra.mxu0 %v9167_v59  ;;  %v11459_v59 = vpack.c.bf16 %v11457_v61, %v11458_v7  ;;  %v11471_v61 = vpack.c.bf16 %v10563_v24, %v10572_v21  ;;  %v10997_v7 = vld [vmem:[#allocation2 + $0x1c2] sm:$0xff] }
 0x453   : > { %8310 = vmatprep.subr.bf16.mxu0 %v9168_v9  ;;  %v11010_v21 = vld [vmem:[#allocation2 + $0x262] sm:$0xff] }
 0x454   : > { %v5189_v24 = vpack.c.bf16 %v11010_v21, %v10794_v57  ;;  %v5456_v57 = vld [vmem:[#allocation2 + $0xc0] sm:$0xff] }
 0x455   : > { %8247 = vmatmul.mubr.bf16.gmra.mrb[32].mxu0 %v4877_v4  ;;  %v11461_v4 = vpack.c.bf16 %v10359_v1, %v10375_v46  ;;  %v10953_v1 = vld [vmem:[#allocation2 + $0x82] sm:$0xff] }
 0x456   : > { %8250 = vmatprep.mubr.bf16.mxu0 %v4878_v38  ;;  %v11462_v38 = vpack.c.bf16 %v10354_v50, %v10352_v44  ;;  %v5177_v46 = vpack.c.bf16 %v10953_v1, %v10749_v41  ;;  %v9171_v44 = vld [vmem:[%s11310_s6 + $0x198] sm:$0xff]   ;;  %v11464_v50 = vpack.c.bf16 %v10441_v18, %v10457_v33  ;;  %v11465_v41 = vpack.c.bf16 %v10436_v17, %v10434_v49  ;;  %v9174_v18 = vld [vmem:[%s11310_s6 + $0x1b0] sm:$0xff]  }
 0x457   : > { %v9175_v49 = vld [vmem:[%s11310_s6 + $0x1b8] sm:$0xff]   ;;  %v11469_v17 = vpack.c.bf16 %v10522_v40, %v10537_v13  ;;  %v11472_v13 = vld [vmem:[#allocation61_spill] sm:$0xff] }
 0x458   : > { %v5185_v40 = vpack.c.bf16 %v10997_v7, %v11472_v13 }
 0x45d   : > { %8251 = vmatmul.mubr.bf16.gmra.mrb[36].mxu0 %v4879_v35  ;;  %v11463_v35 = vpack.c.bf16 %v10395_v55, %v10405_v53  ;;  %v9172_v55 = vld [vmem:[%s11310_s6 + $0x1a0] sm:$0xff]   ;;  %v9173_v53 = vld [vmem:[%s11310_s6 + $0x1a8] sm:$0xff]  }
 0x45e   : > { %8254 = vmatprep.mubr.bf16.mxu0 %v11455_v58  ;;  %v11468_v58 = vld [vmem:[#allocation60_spill] sm:$0xff] }
 0x45f   : > { %v5181_v60 = vpack.c.bf16 %v10978_v25, %v11468_v58  ;;  %v9181_v58 = vld [vmem:[%s11310_s6 + $0x1e8] sm:$0xff]  }
 0x465   : > { %8255 = vmatmul.mubr.bf16.gmra.mrb[40].mxu0 %v4881_v0  ;;  %v11470_v0 = vpack.c.bf16 %v10517_v6, %v10515_v8  ;;  %v11475_v6 = vpack.c.bf16 %v10651_v63, %v10649_v47  ;;  %v5448_v8 = vld [vmem:[#allocation2 + $0x20] sm:$0xff]  ;;  %v9177_v63 = vld [vmem:[%s11310_s6 + $0x1c8] sm:$0xff]   ;;  %v9178_v47 = vld [vmem:[%s11310_s6 + $0x1d0] sm:$0xff]  }
 0x466   : > { %8258 = vmatprep.mubr.bf16.mxu0 %v11459_v59  ;;  %v11473_v59 = vpack.c.bf16 %v10613_v5, %v10623_v62  ;;  %v5451_v62 = vld [vmem:[#allocation2 + $0x50] sm:$0xff]  ;;  %v5452_v5 = vld [vmem:[#allocation2 + $0x60] sm:$0xff] }
 0x46d   : > { %8259 = vmatmul.mubr.bf16.gmra.mrb[44].mxu0 %v11460_v28  ;;  %v11474_v28 = vpack.c.bf16 %v10607_v36, %v10605_v2  ;;  %v5453_v2 = vld [vmem:[#allocation2 + $0x70] sm:$0xff] }
 0x46e   : > { %8278 = vmatprep.mubr.bf16.mxu0 %v11461_v4  ;;  %v5449_v4 = vld [vmem:[#allocation2 + $0x30] sm:$0xff]  ;;  %v5482_v36 = vpack.c.bf16 %v5453_v2, %v5452_v5  ;;  %v5474_v2 = vld [vmem:[#allocation2 + $0x220] sm:$0xff] }
 0x475   : > { %8279 = vmatmul.mubr.bf16.vlgmr.msra.gmra.mrb[16].mxu0 %v11462_v38  ;;  %v5450_v38 = vld [vmem:[#allocation2 + $0x40] sm:$0xff] }
 0x476   : > { %8282 = vmatprep.mubr.bf16.mxu0 %v11463_v35  ;;  %8311 = vmatpush3.bf16.msra.mxu0 %v9168_v9  ;;  %v11466_v9 = vld [vmem:[#allocation27_spill] sm:$0xff]  ;;  %v5481_v35 = vpack.c.bf16 %v5451_v62, %v5450_v38 }
 0x477   : > { %8312 = vmatprep.subr.bf16.mxu0 %v9169_v27  ;;  %v11467_v33 = vpack.c.bf16 %v10479_v12, %v11466_v9  ;;  %v9176_v12 = vld [vmem:[%s11310_s6 + $0x1c0] sm:$0xff]   ;;  %v5473_v62 = vld [vmem:[#allocation2 + $0x210] sm:$0xff] }
 0x478   : > { %v5460_v9 = vld [vmem:[#allocation2 + $0x100] sm:$0xff]  ;;  %v5475_v38 = vld [vmem:[#allocation2 + $0x230] sm:$0xff] }
 0x47a   : > { %8313 = vmatpush3.bf16.msra.mxu0 %v9169_v27  ;;  %v5480_v27 = vpack.c.bf16 %v5449_v4, %v5448_v8  ;;  %v5469_v8 = vld [vmem:[#allocation2 + $0x1b0] sm:$0xff]  ;;  %v5472_v4 = vld [vmem:[#allocation2 + $0x200] sm:$0xff] }
 0x47b   : > { %8314 = vmatprep.subr.bf16.mxu0 %v9170_v14  ;;  %v5492_v5 = vpack.c.bf16 %v5473_v62, %v5472_v4  ;;  %v6072_v4 = vld [vmem:[#allocation2 + $0x102] sm:$0xff] }
 0x47d   : > { %8283 = vmatmul.mubr.bf16.gmra.mrb[20].mxu0 %v5177_v46 }
 0x47e   : > { %8286 = vmatprep.mubr.bf16.mxu0 %v11464_v50  ;;  %8315 = vmatpush3.bf16.msra.mxu0 %v9170_v14  ;;  %v11476_v14 = vld [vmem:[#allocation55_spill] sm:$0xff]  ;;  %v9179_v50 = vld [vmem:[%s11310_s6 + $0x1d8] sm:$0xff]  }
 0x47f   : > { %8316 = vmatprep.subr.bf16.mxu0 %v9171_v44  ;;  %v5483_v46 = vpack.c.bf16 %v11476_v14, %v10813_v3 }
 0x482   : > { %8317 = vmatpush3.bf16.msra.mxu0 %v9171_v44  ;;  %v5457_v44 = vld [vmem:[#allocation2 + $0xd0] sm:$0xff] }
 0x483   : > { %8318 = vmatprep.subr.bf16.mxu0 %v9172_v55 }
 0x485   : > { %8287 = vmatmul.mubr.bf16.gmra.mrb[24].mxu0 %v11465_v41  ;;  %v5459_v41 = vld [vmem:[#allocation2 + $0xf0] sm:$0xff] }
 0x486   : > { %8290 = vmatprep.mubr.bf16.mxu0 %v11467_v33  ;;  %8319 = vmatpush3.bf16.msra.mxu0 %v9172_v55  ;;  %v5484_v55 = vpack.c.bf16 %v5457_v44, %v5456_v57  ;;  %v5458_v33 = vld [vmem:[#allocation2 + $0xe0] sm:$0xff]  ;;  %v5495_v57 = vpack.c.bf16 %v11476_v14, %v10870_v23  ;;  %v11478_v44 = vpack.c.bf16 %v11439_v52, %v10418_v32  ;;  %v9186_v23 = vld [vmem:[%s11310_s6 + $0x210] sm:$0xff]   ;;  %v9187_v32 = vld [vmem:[%s11310_s6 + $0x218] sm:$0xff]  }
 0x487   : > { %8320 = vmatprep.subr.bf16.mxu0 %v9173_v53  ;;  %v5485_v3 = vpack.c.bf16 %v5459_v41, %v5458_v33  ;;  %v11480_v52 = vpack.c.bf16 %v11443_v34, %v11442_v11  ;;  %v11482_v11 = vpack.c.bf16 %v11447_v43, %v11446_v51  ;;  %v9190_v34 = vld [vmem:[%s11310_s6 + $0x230] sm:$0xff]   ;;  %v5774_v51 = vld [vmem:[#allocation2 + $0x1a1] sm:$0xff] }
 0x488   : > { %v5796_v43 = vpack.c.bf16 %v10923_v48, %v5774_v51  ;;  %v5778_v41 = vld [vmem:[#allocation2 + $0x201] sm:$0xff] }
 0x489   : > { %v5798_v33 = vpack.c.bf16 %v10930_v54, %v5778_v41  ;;  %v5784_v48 = vld [vmem:[#allocation2 + $0x261] sm:$0xff] }
 0x48a   : > { %8321 = vmatpush3.bf16.msra.mxu0 %v9173_v53  ;;  %v9180_v53 = vld [vmem:[%s11310_s6 + $0x1e0] sm:$0xff]  }
 0x48b   : > { %8322 = vmatprep.subr.bf16.mxu0 %v9174_v18  ;;  %v6064_v54 = vld [vmem:[#allocation2 + $0x62] sm:$0xff] }
 0x48d   : > { %8291 = vmatmul.mubr.bf16.gmra.mrb[28].mxu0 %v5181_v60 }
 0x48e   : > { %8294 = vmatprep.mubr.bf16.mxu0 %v11469_v17  ;;  %8323 = vmatpush3.bf16.msra.mxu0 %v9174_v18  ;;  %v5461_v18 = vld [vmem:[#allocation2 + $0x110] sm:$0xff]  ;;  %v5464_v17 = vld [vmem:[#allocation2 + $0x160] sm:$0xff] }
 0x48f   : > { %8324 = vmatprep.subr.bf16.mxu0 %v9175_v49  ;;  %v5486_v60 = vpack.c.bf16 %v5461_v18, %v5460_v9 }
 0x492   : > { %8325 = vmatpush3.bf16.msra.mxu0 %v9175_v49  ;;  %v9182_v49 = vld [vmem:[%s11310_s6 + $0x1f0] sm:$0xff]  }
 0x493   : > { %8358 = vmatprep.subr.bf16.mxu0 %v9176_v12 }
 0x495   : > { %8295 = vmatmul.mubr.bf16.gmra.mrb[32].mxu0 %v11470_v0  ;;  %v5465_v0 = vld [vmem:[#allocation2 + $0x170] sm:$0xff] }
 0x496   : > { %8298 = vmatprep.mubr.bf16.mxu0 %v11471_v61  ;;  %v9183_v61 = vld [vmem:[%s11310_s6 + $0x1f8] sm:$0xff]   ;;  %v5488_v13 = vpack.c.bf16 %v5465_v0, %v5464_v17  ;;  %v6062_v0 = vld [vmem:[#allocation2 + $0x42] sm:$0xff] }
 0x497   : > { %v6061_v17 = vld [vmem:[#allocation2 + $0x32] sm:$0xff] }
 0x49d   : > { %8299 = vmatmul.mubr.bf16.gmra.mrb[36].mxu0 %v5185_v40  ;;  %v9184_v40 = vld [vmem:[%s11310_s6 + $0x200] sm:$0xff]  }
 0x49e   : > { %8302 = vmatprep.mubr.bf16.mxu0 %v11473_v59  ;;  %v5467_v59 = vld [vmem:[#allocation2 + $0x190] sm:$0xff] }
 0x4a5   : > { %8303 = vmatmul.mubr.bf16.gmra.mrb[40].mxu0 %v11474_v28  ;;  %v5468_v28 = vld [vmem:[#allocation2 + $0x1a0] sm:$0xff] }
 0x4a6   : > { %8306 = vmatprep.mubr.bf16.mxu0 %v11475_v6  ;;  %v5466_v6 = vld [vmem:[#allocation2 + $0x180] sm:$0xff] }
 0x4ad   : > { %8307 = vmatmul.mubr.bf16.gmra.mrb[44].mxu0 %v5189_v24  ;;  %v5490_v24 = vpack.c.bf16 %v5469_v8, %v5468_v28  ;;  %v6068_v28 = vld [vmem:[#allocation2 + $0xc2] sm:$0xff] }
 0x4ae   : > { %8326 = vmatprep.mubr.bf16.mxu0 %v5480_v27  ;;  %v5491_v27 = vpack.c.bf16 %v11476_v14, %v10857_v26  ;;  %v9185_v26 = vld [vmem:[%s11310_s6 + $0x208] sm:$0xff]  }
 0x4b5   : > { %8327 = vmatmul.mubr.bf16.vlgmr.msra.gmra.mrb[16].mxu0 %v5481_v35  ;;  %v5476_v35 = vld [vmem:[#allocation2 + $0x240] sm:$0xff] }
 0x4b6   : > { %8330 = vmatprep.mubr.bf16.mxu0 %v5482_v36  ;;  %8359 = vmatpush3.bf16.msra.mxu0 %v9176_v12  ;;  %v5487_v12 = vpack.c.bf16 %v11476_v14, %v10838_v16  ;;  %v5489_v16 = vpack.c.bf16 %v5467_v59, %v5466_v6  ;;  %v5477_v36 = vld [vmem:[#allocation2 + $0x250] sm:$0xff] }
 0x4b7   : > { %8360 = vmatprep.subr.bf16.mxu0 %v9177_v63  ;;  %v5769_v14 = vld [vmem:[#allocation2 + $0x131] sm:$0xff] }
 0x4b8   : > { %v6067_v59 = vld [vmem:[#allocation2 + $0x92] sm:$0xff] }
 0x4b9   : > { %v6095_v6 = vpack.c.bf16 %v6067_v59, %v10953_v1  ;;  %v6079_v1 = vld [vmem:[#allocation2 + $0x192] sm:$0xff] }
 0x4ba   : > { %8361 = vmatpush3.bf16.msra.mxu0 %v9177_v63  ;;  %v5493_v63 = vpack.c.bf16 %v5475_v38, %v5474_v2  ;;  %v6076_v2 = vld [vmem:[#allocation2 + $0x162] sm:$0xff] }
 0x4bb   : > { %8362 = vmatprep.subr.bf16.mxu0 %v9178_v47 }
 0x4bd   : > { %8331 = vmatmul.mubr.bf16.gmra.mrb[20].mxu0 %v5483_v46  ;;  %v11477_v46 = vpack.c.bf16 %v10381_v30, %v10371_v15  ;;  %v5761_v15 = vld [vmem:[#allocation2 + $0x91] sm:$0xff] }
 0x4be   : > { %8334 = vmatprep.mubr.bf16.mxu0 %v5484_v55  ;;  %8363 = vmatpush3.bf16.msra.mxu0 %v9178_v47  ;;  %v5494_v47 = vpack.c.bf16 %v5477_v36, %v5476_v35  ;;  %v5789_v30 = vpack.c.bf16 %v5761_v15, %v10885_v20  ;;  %v9189_v20 = vld [vmem:[%s11310_s6 + $0x228] sm:$0xff]   ;;  %v5793_v55 = vpack.c.bf16 %v5769_v14, %v10906_v31  ;;  %v5777_v31 = vld [vmem:[#allocation2 + $0x1d1] sm:$0xff] }
 0x4bf   : > { %8364 = vmatprep.subr.bf16.mxu0 %v9179_v50  ;;  %v5797_v9 = vpack.c.bf16 %v5777_v31, %v10921_v56  ;;  %v6063_v56 = vld [vmem:[#allocation2 + $0x52] sm:$0xff]  ;;  %v6084_v15 = vld [vmem:[#allocation2 + $0x202] sm:$0xff] }
 0x4c0   : > { %v6075_v35 = vld [vmem:[#allocation2 + $0x132] sm:$0xff] }
 0x4c1   : > { %v6077_v36 = vld [vmem:[#allocation2 + $0x172] sm:$0xff] }
 0x4c2   : > { %8365 = vmatpush3.bf16.msra.mxu0 %v9179_v50  ;;  %v11479_v50 = vpack.c.bf16 %v11441_v39, %v11440_v10  ;;  %v9188_v10 = vld [vmem:[%s11310_s6 + $0x220] sm:$0xff]   ;;  %v11481_v39 = vpack.c.bf16 %v11445_v29, %v11444_v37  ;;  %v9191_v37 = vld [vmem:[%s11310_s6 + $0x238] sm:$0xff]   ;;  %v11483_v29 = vpack.c.bf16 %v11449_v45, %v11448_v22 }
 0x4c3   : > { %8366 = vmatprep.subr.bf16.mxu0 %v9180_v53  ;;  %v5781_v22 = vld [vmem:[#allocation2 + $0x231] sm:$0xff]  ;;  %v5782_v45 = vld [vmem:[#allocation2 + $0x241] sm:$0xff] }
 0x4c4   : > { %v6091_v14 = vld [vmem:[#allocation2 + $0x272] sm:$0xff] }
 0x4c5   : > { %8335 = vmatmul.mubr.bf16.gmra.mrb[24].mxu0 %v5485_v3  ;;  %v5780_v3 = vld [vmem:[#allocation2 + $0x221] sm:$0xff] }
 0x4c6   : > { %8338 = vmatprep.mubr.bf16.mxu0 %v5486_v60  ;;  %8367 = vmatpush3.bf16.msra.mxu0 %v9180_v53  ;;  %v11484_v53 = vpack.c.bf16 %v11451_v42, %v11450_v19  ;;  %v5799_v18 = vpack.c.bf16 %v5781_v22, %v5780_v3  ;;  %v5785_v19 = vld [vmem:[#allocation2 + $0x271] sm:$0xff]  ;;  %v6060_v42 = vld [vmem:[#allocation2 + $0x22] sm:$0xff] }
 0x4c7   : > { %8368 = vmatprep.subr.bf16.mxu0 %v9181_v58  ;;  %v11485_v3 = vld [vmem:[#allocation38_spill] sm:$0xff] }
 0x4ca   : > { %8369 = vmatpush3.bf16.msra.mxu0 %v9181_v58  ;;  %v5783_v58 = vld [vmem:[#allocation2 + $0x251] sm:$0xff] }
 0x4cb   : > { %8370 = vmatprep.subr.bf16.mxu0 %v9182_v49  ;;  %v5800_v60 = vpack.c.bf16 %v5783_v58, %v5782_v45 }
 0x4cd   : > { %8339 = vmatmul.mubr.bf16.gmra.mrb[28].mxu0 %v5487_v12  ;;  %v6092_v12 = vpack.c.bf16 %v6061_v17, %v6060_v42  ;;  %v11487_v17 = vld [vmem:[#allocation41_spill] sm:$0xff] }
 0x4ce   : > { %8342 = vmatprep.mubr.bf16.mxu0 %v5488_v13  ;;  %8371 = vmatpush3.bf16.msra.mxu0 %v9182_v49  ;;  %v5801_v49 = vpack.c.bf16 %v5785_v19, %v5784_v48  ;;  %v6065_v13 = vld [vmem:[#allocation2 + $0x72] sm:$0xff] }
 0x4cf   : > { %8372 = vmatprep.subr.bf16.mxu0 %v9183_v61  ;;  %v11486_v48 = vld [vmem:[#allocation39_spill] sm:$0xff] }
 0x4d2   : > { %8373 = vmatpush3.bf16.msra.mxu0 %v9183_v61  ;;  %v6093_v61 = vpack.c.bf16 %v6063_v56, %v6062_v0  ;;  %v11488_v0 = vld [vmem:[#allocation42_spill] sm:$0xff] }
 0x4d3   : > { %8406 = vmatprep.subr.bf16.mxu0 %v9184_v40 }
 0x4d5   : > { %8343 = vmatmul.mubr.bf16.gmra.mrb[32].mxu0 %v5489_v16  ;;  %v6069_v16 = vld [vmem:[#allocation2 + $0xd2] sm:$0xff] }
 0x4d6   : > { %8346 = vmatprep.mubr.bf16.mxu0 %v5490_v24  ;;  %v6096_v8 = vpack.c.bf16 %v6069_v16, %v6068_v28  ;;  %v6071_v24 = vld [vmem:[#allocation2 + $0xf2] sm:$0xff] }
 0x4dd   : > { %8347 = vmatmul.mubr.bf16.gmra.mrb[36].mxu0 %v5491_v27  ;;  %v6070_v27 = vld [vmem:[#allocation2 + $0xe2] sm:$0xff] }
 0x4de   : > { %8350 = vmatprep.mubr.bf16.mxu0 %v5492_v5  ;;  %v6097_v62 = vpack.c.bf16 %v6071_v24, %v6070_v27  ;;  %v6073_v5 = vld [vmem:[#allocation2 + $0x112] sm:$0xff] }
 0x4df   : > { %v6098_v38 = vpack.c.bf16 %v6073_v5, %v6072_v4 }
 0x4e5   : > { %8351 = vmatmul.mubr.bf16.gmra.mrb[40].mxu0 %v5493_v63  ;;  %v6099_v63 = vpack.c.bf16 %v6075_v35, %v10978_v25  ;;  %v6087_v25 = vld [vmem:[#allocation2 + $0x232] sm:$0xff] }
 0x4e6   : > { %8354 = vmatprep.mubr.bf16.mxu0 %v5494_v47  ;;  %v6100_v47 = vpack.c.bf16 %v6077_v36, %v6076_v2 }
 0x4ed   : > { %8355 = vmatmul.mubr.bf16.gmra.mrb[44].mxu0 %v5495_v57  ;;  %v6080_v57 = vld [vmem:[#allocation2 + $0x1a2] sm:$0xff] }
 0x4ee   : > { %8374 = vmatprep.mubr.bf16.mxu0 %v11477_v46  ;;  %v6078_v46 = vld [vmem:[#allocation2 + $0x182] sm:$0xff] }
 0x4f5   : > { %8375 = vmatmul.mubr.bf16.vlgmr.msra.gmra.mrb[16].mxu0 %v11478_v44  ;;  %v6081_v44 = vld [vmem:[#allocation2 + $0x1b2] sm:$0xff] }
 0x4f6   : > { %8378 = vmatprep.mubr.bf16.mxu0 %v11479_v50  ;;  %8407 = vmatpush3.bf16.msra.mxu0 %v9184_v40  ;;  %v6094_v40 = vpack.c.bf16 %v6065_v13, %v6064_v54  ;;  %v6102_v50 = vpack.c.bf16 %v6081_v44, %v6080_v57  ;;  %v11490_v57 = vld [vmem:[#allocation48_spill] sm:$0xff] }
 0x4f7   : > { %8408 = vmatprep.subr.bf16.mxu0 %v9185_v26 }
 0x4fa   : > { %8409 = vmatpush3.bf16.msra.mxu0 %v9185_v26  ;;  %v6101_v26 = vpack.c.bf16 %v6079_v1, %v6078_v46 }
 0x4fb   : > { %8410 = vmatprep.subr.bf16.mxu0 %v9186_v23 }
 0x4fd   : > { %8379 = vmatmul.mubr.bf16.gmra.mrb[20].mxu0 %v5789_v30 }
 0x4fe   : > { %8382 = vmatprep.mubr.bf16.mxu0 %v11480_v52  ;;  %8411 = vmatpush3.bf16.msra.mxu0 %v9186_v23  ;;  %v6083_v23 = vld [vmem:[#allocation2 + $0x1d2] sm:$0xff] }
 0x4ff   : > { %8412 = vmatprep.subr.bf16.mxu0 %v9187_v32  ;;  %v6103_v30 = vpack.c.bf16 %v6083_v23, %v10997_v7  ;;  %v11103_v7 = vld [vmem:[%s11311_s7] ss:$0 sm:$0xff] }
 0x500   : > { %v11491_v23 = vld [vmem:[#allocation49_spill] sm:$0xff] }
 0x502   : > { %8413 = vmatpush3.bf16.msra.mxu0 %v9187_v32  ;;  %v6085_v32 = vld [vmem:[#allocation2 + $0x212] sm:$0xff] }
 0x503   : > { %8414 = vmatprep.subr.bf16.mxu0 %v9188_v10  ;;  %v6104_v52 = vpack.c.bf16 %v6085_v32, %v6084_v15 }
 0x505   : > { %8383 = vmatmul.mubr.bf16.gmra.mrb[24].mxu0 %v11481_v39 }
 0x506   : > { %8386 = vmatprep.mubr.bf16.mxu0 %v11482_v11  ;;  %8415 = vmatpush3.bf16.msra.mxu0 %v9188_v10  ;;  %v6088_v10 = vld [vmem:[#allocation2 + $0x242] sm:$0xff]  ;;  %v6089_v11 = vld [vmem:[#allocation2 + $0x252] sm:$0xff] }
 0x507   : > { %8416 = vmatprep.subr.bf16.mxu0 %v9189_v20 }
 0x50a   : > { %8417 = vmatpush3.bf16.msra.mxu0 %v9189_v20  ;;  %v6086_v20 = vld [vmem:[#allocation2 + $0x222] sm:$0xff] }
 0x50b   : > { %8418 = vmatprep.subr.bf16.mxu0 %v9190_v34  ;;  %v6105_v39 = vpack.c.bf16 %v6087_v25, %v6086_v20 }
 0x50d   : > { %8387 = vmatmul.mubr.bf16.gmra.mrb[28].mxu0 %v5793_v55  ;;  %v6107_v55 = vpack.c.bf16 %v6091_v14, %v11010_v21 }
 0x50e   : > { %8390 = vmatprep.mubr.bf16.mxu0 %v11483_v29  ;;  %8419 = vmatpush3.bf16.msra.mxu0 %v9190_v34  ;;  %v6106_v34 = vpack.c.bf16 %v6089_v11, %v6088_v10 }
 0x50f   : > { %8420 = vmatprep.subr.bf16.mxu0 %v9191_v37 }
 0x512   : > { %8421 = vmatpush3.bf16.msra.mxu0 %v9191_v37  ;;  %v11108_v37 = vld [vmem:[%s11312_s8] ss:$0 sm:$0xff] }
 0x515   : > { %8391 = vmatmul.mubr.bf16.gmra.mrb[32].mxu0 %v11484_v53 }
 0x516   : > { %8394 = vmatprep.mubr.bf16.mxu0 %v5796_v43 }
 0x51d   : > { %8395 = vmatmul.mubr.bf16.gmra.mrb[36].mxu0 %v5797_v9 }
 0x51e   : > { %8398 = vmatprep.mubr.bf16.mxu0 %v5798_v33  ;;  %v11117_v33 = vld [vmem:[%s11306_s2] ss:$0 sm:$0xff] }
 0x51f   : > { %v652_v19 = vadd.f32 %v11117_v33, %v11486_v48  ;;  %v668_v46 = vadd.f32 %v11117_v33, %v11490_v57  ;;  %v679_v15 = vadd.f32 %v11491_v23, %v11117_v33  ;;  %v11494_v48 = vld [vmem:[#allocation52_spill] sm:$0xff] }
 0x520   : > { %v11497_v57 = vld [vmem:[#allocation56_spill] sm:$0xff] }
 0x525   : > { %8399 = vmatmul.mubr.bf16.gmra.mrb[40].mxu0 %v5799_v18  ;;  %v660_v18 = vadd.f32 %v11485_v3, %v11117_v33  ;;  %v11493_v3 = vld [vmem:[#allocation51_spill] sm:$0xff] }
 0x526   : > { %8402 = vmatprep.mubr.bf16.mxu0 %v5800_v60 }
 0x52d   : > { %8403 = vmatmul.mubr.bf16.gmra.mrb[44].mxu0 %v5801_v49 }
 0x52e   : > { %8422 = vmatprep.mubr.bf16.mxu0 %v6092_v12  ;;  %v663_v12 = vadd.f32 %v11487_v17, %v11117_v33 }
 0x535   : > { %8423 = vmatmul.mubr.bf16.vlgmr.msra.gmra.mrb[16].mxu0 %v6093_v61  ;;  %v655_v61 = vadd.f32 %v11117_v33, %v11488_v0 }
 0x536   : > { %8426 = vmatprep.mubr.bf16.mxu0 %v6094_v40 }
 0x53d   : > { %8427 = vmatmul.mubr.bf16.gmra.mrb[20].mxu0 %v6095_v6 }
 0x53e   : > { %8430 = vmatprep.mubr.bf16.mxu0 %v6096_v8 }
 0x545   : > { %8431 = vmatmul.mubr.bf16.gmra.mrb[24].mxu0 %v6097_v62 }
 0x546   : > { %8434 = vmatprep.mubr.bf16.mxu0 %v6098_v38 }
 0x54d   : > { %8435 = vmatmul.mubr.bf16.gmra.mrb[28].mxu0 %v6099_v63  ;;  %v11489_v63 = vld [vmem:[#allocation47_spill] sm:$0xff] }
 0x54e   : > { %8438 = vmatprep.mubr.bf16.mxu0 %v6100_v47  ;;  %v676_v36 = vadd.f32 %v11489_v63, %v11117_v33 }
 0x555   : > { %8439 = vmatmul.mubr.bf16.gmra.mrb[32].mxu0 %v6101_v26 }
 0x556   : > { %8442 = vmatprep.mubr.bf16.mxu0 %v6102_v50 }
 0x55d   : > { %8443 = vmatmul.mubr.bf16.gmra.mrb[36].mxu0 %v6103_v30 }
 0x55e   : > { %8446 = vmatprep.mubr.bf16.mxu0 %v6104_v52  ;;  %v11492_v52 = vld [vmem:[#allocation50_spill] sm:$0xff] }
 0x55f   : > { %v671_v25 = vadd.f32 %v11117_v33, %v11492_v52 }
 0x565   : > { %8447 = vmatmul.mubr.bf16.gmra.mrb[40].mxu0 %v6105_v39 }
 0x566   : > { %8450 = vmatprep.mubr.bf16.mxu0 %v6106_v34 }
 0x56d   : > { %8451 = vmatmul.mubr.bf16.gmra.mrb[44].mxu0 %v6107_v55 }
 0x608   : > { %v8424_v29 = vpop.f32.mrb[16].mxu0 }
 0x609   : > { %v6374_v51 = vmul.f32 %v8424_v29, %v11103_v7  ;;  %v6207_v43 = vpop.f32.mrb[17].mxu0 }
 0x60a   : > { %v6372_v53 = vmul.f32 %v11103_v7, %v6207_v43  ;;  %v8425_v31 = vpop.f32.mrb[18].mxu0 }
 0x60b   : > { %v6412_v21 = vadd.f32 %v11108_v37, %v6374_v51  ;;  %v6375_v41 = vmul.f32 %v8425_v31, %v11103_v7  ;;  %v6210_v9 = vpop.f32.mrb[19].mxu0 }
 0x60c   : > { %v6410_v22 = vadd.f32 %v11108_v37, %v6372_v53  ;;  %v6373_v45 = vmul.f32 %v11103_v7, %v6210_v9 }
 0x60d   : > { %v6444_v58 = vmax.f32 %v6412_v21, 0.0  ;;  %v6413_v60 = vadd.f32 %v11108_v37, %v6375_v41 }
 0x60e   : > { %v6442_v42 = vmax.f32 %v6410_v22, 0.0  ;;  %v6411_v49 = vadd.f32 %v11108_v37, %v6373_v45 }
 0x60f   : > { %v6476_v56 = vadd.f32 %v6444_v58, %v660_v18  ;;  %v6445_v54 = vmax.f32 %v6413_v60, 0.0  ;;  %v692_v18 = vadd.f32 %v11493_v3, %v11117_v33 }
 0x610   : > { %v6474_v13 = vadd.f32 %v6442_v42, %v652_v19  ;;  %v6443_v40 = vmax.f32 %v6411_v49, 0.0  ;;  %v8428_v59 = vpop.f32.mrb[20].mxu0  ;;  %v684_v19 = vadd.f32 %v11117_v33, %v11494_v48 }
 0x611   : > { %v6477_v28 = vadd.f32 %v6445_v54, %v663_v12  ;;  %v6378_v6 = vmul.f32 %v8428_v59, %v11103_v7  ;;  %v6223_v16 = vpop.f32.mrb[21].mxu0  ;;  %v11495_v12 = vld [vmem:[#allocation53_spill] sm:$0xff] }
 0x612   : > { %v6475_v8 = vadd.f32 %v6443_v40, %v655_v61  ;;  %v6376_v24 = vmul.f32 %v11103_v7, %v6223_v16  ;;  %v8429_v4 = vpop.f32.mrb[22].mxu0  ;;  %v11496_v61 = vld [vmem:[#allocation54_spill] sm:$0xff] }
 0x613   : > { %v6416_v27 = vadd.f32 %v11108_v37, %v6378_v6  ;;  %v6379_v62 = vmul.f32 %v8429_v4, %v11103_v7  ;;  %v6226_v5 = vpop.f32.mrb[23].mxu0 }
 0x614   : > { %v6506_v38 = vadd.f32 %v6475_v8, %v6474_v13  ;;  %v6414_v35 = vadd.f32 %v11108_v37, %v6376_v24  ;;  %v6377_v2 = vmul.f32 %v11103_v7, %v6226_v5  ;;  %v687_v13 = vadd.f32 %v11117_v33, %v11496_v61 }
 0x615   : > { %v6448_v47 = vmax.f32 %v6416_v27, 0.0  ;;  %v6417_v1 = vadd.f32 %v11108_v37, %v6379_v62 }
 0x616   : > { %v6507_v26 = vadd.f32 %v6506_v38, %v6476_v56  ;;  %v6446_v44 = vmax.f32 %v6414_v35, 0.0  ;;  %v6415_v50 = vadd.f32 %v11108_v37, %v6377_v2  ;;  %v695_v56 = vadd.f32 %v11495_v12, %v11117_v33 }
 0x617   : > { %v6480_v30 = vadd.f32 %v6448_v47, %v676_v36  ;;  %v6449_v32 = vmax.f32 %v6417_v1, 0.0 }
 0x618   : > { %v6478_v10 = vadd.f32 %v6446_v44, %v668_v46  ;;  %v6508_v20 = vadd.f32 %v6507_v26, %v6477_v28  ;;  %v6447_v39 = vmax.f32 %v6415_v50, 0.0  ;;  %v8432_v11 = vpop.f32.mrb[24].mxu0  ;;  %v708_v46 = vadd.f32 %v11497_v57, %v11117_v33  ;;  %v11498_v26 = vld [vmem:[#allocation57_spill] sm:$0xff] }
 0x619   : > { %v6481_v34 = vadd.f32 %v6449_v32, %v679_v15  ;;  %v6382_v14 = vmul.f32 %v8432_v11, %v11103_v7  ;;  %v6239_v55 = vpop.f32.mrb[25].mxu0  ;;  %v700_v44 = vadd.f32 %v11117_v33, %v11498_v26 }
 0x61a   : > { %v6509_v29 = vadd.f32 %v6508_v20, %v6478_v10  ;;  %v6479_v51 = vadd.f32 %v6447_v39, %v671_v25  ;;  %v6380_v43 = vmul.f32 %v11103_v7, %v6239_v55  ;;  %v8433_v53 = vpop.f32.mrb[26].mxu0  ;;  %v11499_v25 = vld [vmem:[#allocation58_spill] sm:$0xff]  ;;  %v11500_v20 = vld [vmem:[#allocation59_spill] sm:$0xff] }
 0x61b   : > { %v6420_v31 = vadd.f32 %v11108_v37, %v6382_v14  ;;  %v6383_v21 = vmul.f32 %v8433_v53, %v11103_v7  ;;  %v6242_v41 = vpop.f32.mrb[27].mxu0  ;;  %v711_v10 = vadd.f32 %v11499_v25, %v11117_v33  ;;  %v703_v39 = vadd.f32 %v11117_v33, %v11500_v20 }
 0x61c   : > { %v6510_v9 = vadd.f32 %v6509_v29, %v6479_v51  ;;  %v6418_v22 = vadd.f32 %v11108_v37, %v6380_v43  ;;  %v6381_v45 = vmul.f32 %v11103_v7, %v6242_v41 }
 0x61d   : > { %v6452_v58 = vmax.f32 %v6420_v31, 0.0  ;;  %v6421_v60 = vadd.f32 %v11108_v37, %v6383_v21 }
 0x61e   : > { %v6511_v42 = vadd.f32 %v6510_v9, %v6480_v30  ;;  %v6450_v49 = vmax.f32 %v6418_v22, 0.0  ;;  %v6419_v17 = vadd.f32 %v11108_v37, %v6381_v45 }
 0x61f   : > { %v6484_v54 = vadd.f32 %v6452_v58, %v692_v18  ;;  %v6453_v0 = vmax.f32 %v6421_v60, 0.0 }
 0x620   : > { %v6512_v40 = vadd.f32 %v6511_v42, %v6481_v34  ;;  %v6482_v59 = vadd.f32 %v6450_v49, %v684_v19  ;;  %v6451_v28 = vmax.f32 %v6419_v17, 0.0  ;;  %v8436_v6 = vpop.f32.mrb[28].mxu0  ;;  %v11501_v17 = vld [vmem:[#allocation11_spill] sm:$0xff] }
 0x621   : > { %v6485_v16 = vadd.f32 %v6453_v0, %v695_v56  ;;  %v6386_v8 = vmul.f32 %v8436_v6, %v11103_v7  ;;  %v6255_v24 = vpop.f32.mrb[29].mxu0  ;;  %v724_v12 = vadd.f32 %v11501_v17, %v11117_v33  ;;  %v11502_v56 = vld [vmem:[#allocation12_spill] sm:$0xff]  ;;  %v11503_v6 = vld [vmem:[#allocation13_spill] sm:$0xff] }
 0x622   : > { %v6513_v4 = vrot.slane %v6512_v40, 4  ;;  %v6483_v27 = vadd.f32 %v6451_v28, %v687_v13  ;;  %v6384_v62 = vmul.f32 %v11103_v7, %v6255_v24  ;;  %v8437_v5 = vpop.f32.mrb[30].mxu0 }
 0x623   : > { %v6424_v38 = vadd.f32 %v11108_v37, %v6386_v8  ;;  %v6387_v35 = vmul.f32 %v8437_v5, %v11103_v7  ;;  %v6258_v2 = vpop.f32.mrb[31].mxu0 }
 0x624   : > { %v6514_v63 = vadd.f32 %v6513_v4, %v6512_v40  ;;  %v6519_v36 = vadd.f32 %v6483_v27, %v6482_v59  ;;  %v6422_v47 = vadd.f32 %v11108_v37, %v6384_v62  ;;  %v6385_v1 = vmul.f32 %v11103_v7, %v6258_v2  ;;  %v11504_v4 = vld [vmem:[#allocation14_spill] sm:$0xff] }
 0x625   : > { %v6456_v50 = vmax.f32 %v6424_v38, 0.0  ;;  %v6425_v23 = vadd.f32 %v11108_v37, %v6387_v35  ;;  %v719_v27 = vadd.f32 %v11117_v33, %v11504_v4 }
 0x626   : > { %v6515_v15 = vrot.slane %v6514_v63, 2  ;;  %v6520_v30 = vadd.f32 %v6519_v36, %v6484_v54  ;;  %v6454_v32 = vmax.f32 %v6422_v47, 0.0  ;;  %v6423_v52 = vadd.f32 %v11108_v37, %v6385_v1 }
 0x627   : > { %v6488_v11 = vadd.f32 %v6456_v50, %v708_v46  ;;  %v6457_v34 = vmax.f32 %v6425_v23, 0.0  ;;  %v716_v54 = vadd.f32 %v11117_v33, %v11502_v56 }
 0x628   : > { %v6516_v14 = vadd.f32 %v6515_v15, %v6514_v63  ;;  %v6486_v55 = vadd.f32 %v6454_v32, %v700_v44  ;;  %v6521_v29 = vadd.f32 %v6520_v30, %v6485_v16  ;;  %v6455_v51 = vmax.f32 %v6423_v52, 0.0  ;;  %v8440_v43 = vpop.f32.mrb[32].mxu0  ;;  %v11505_v52 = vld [vmem:[#allocation15_spill] sm:$0xff] }
 0x629   : > { %v6489_v53 = vadd.f32 %v6457_v34, %v711_v10  ;;  %v6390_v31 = vmul.f32 %v8440_v43, %v11103_v7  ;;  %v6271_v21 = vpop.f32.mrb[33].mxu0  ;;  %v727_v16 = vadd.f32 %v11503_v6, %v11117_v33  ;;  %v740_v25 = vadd.f32 %v11505_v52, %v11117_v33  ;;  %v11506_v10 = vld [vmem:[#allocation16_spill] sm:$0xff] }
 0x62a   : > { %v6517_v41 = vrot.slane %v6516_v14, 1  ;;  %v6522_v9 = vadd.f32 %v6521_v29, %v6486_v55  ;;  %v6487_v22 = vadd.f32 %v6455_v51, %v703_v39  ;;  %v6388_v45 = vmul.f32 %v11103_v7, %v6271_v21  ;;  %v8441_v3 = vpop.f32.mrb[34].mxu0  ;;  %v11507_v51 = vld [vmem:[#allocation17_spill] sm:$0xff] }
 0x62b   : > { %v6428_v18 = vadd.f32 %v11108_v37, %v6390_v31  ;;  %v6391_v58 = vmul.f32 %v8441_v3, %v11103_v7  ;;  %v6274_v60 = vpop.f32.mrb[35].mxu0  ;;  %v732_v20 = vadd.f32 %v11117_v33, %v11506_v10  ;;  %v743_v43 = vadd.f32 %v11507_v51, %v11117_v33 }
 0x62c   : > { %v6518_v48 = vadd.f32 %v6517_v41, %v6516_v14  ;;  %v6523_v19 = vadd.f32 %v6522_v9, %v6487_v22  ;;  %v6426_v42 = vadd.f32 %v11108_v37, %v6388_v45  ;;  %v6389_v49 = vmul.f32 %v11103_v7, %v6274_v60 }
 0x62d   : > { %v6460_v0 = vmax.f32 %v6428_v18, 0.0  ;;  %v6429_v61 = vadd.f32 %v11108_v37, %v6391_v58 }
 0x62e   : > { %v6558_v13 = vmul.f32 0.015625, %v6518_v48  ;;  %v6524_v40 = vadd.f32 %v6523_v19, %v6488_v11  ;;  %v6458_v59 = vmax.f32 %v6426_v42, 0.0  ;;  %v6427_v28 = vadd.f32 %v11108_v37, %v6389_v49 }
 0x62f   : > { %v6492_v8 = vadd.f32 %v6460_v0, %v724_v12  ;;  %v6461_v24 = vmax.f32 %v6429_v61, 0.0 }
 0x630   : > { %6562 = vst [vmem:[%s11198_s21] sm:$0x1] %v6558_v13  ;;  %v6525_v62 = vadd.f32 %v6524_v40, %v6489_v53  ;;  %v6490_v5 = vadd.f32 %v6458_v59, %v716_v54  ;;  %v6459_v38 = vmax.f32 %v6427_v28, 0.0  ;;  %v8444_v35 = vpop.f32.mrb[36].mxu0  ;;  %v11508_v53 = vld [vmem:[#allocation18_spill] sm:$0xff]  ;;  %v11509_v28 = vld [vmem:[#allocation19_spill] sm:$0xff] }
 0x631   : > { %v6493_v2 = vadd.f32 %v6461_v24, %v727_v16  ;;  %v6394_v63 = vmul.f32 %v8444_v35, %v11103_v7  ;;  %v6287_v36 = vpop.f32.mrb[37].mxu0  ;;  %v735_v31 = vadd.f32 %v11117_v33, %v11508_v53  ;;  %v756_v6 = vadd.f32 %v11509_v28, %v11117_v33  ;;  %v11510_v16 = vld [vmem:[#allocation20_spill] sm:$0xff]  ;;  %v11511_v35 = vld [vmem:[#allocation21_spill] sm:$0xff] }
 0x632   : > { %v6526_v47 = vrot.slane %v6525_v62, 4  ;;  %v6491_v1 = vadd.f32 %v6459_v38, %v719_v27  ;;  %v6392_v57 = vmul.f32 %v11103_v7, %v6287_v36  ;;  %v8445_v46 = vpop.f32.mrb[38].mxu0 }
 0x633   : > { %v6432_v26 = vadd.f32 %v11108_v37, %v6394_v63  ;;  %v6395_v44 = vmul.f32 %v8445_v46, %v11103_v7  ;;  %v6290_v50 = vpop.f32.mrb[39].mxu0 }
 0x634   : > { %v6527_v23 = vadd.f32 %v6526_v47, %v6525_v62  ;;  %v6532_v15 = vadd.f32 %v6491_v1, %v6490_v5  ;;  %v6430_v30 = vadd.f32 %v11108_v37, %v6392_v57  ;;  %v6393_v32 = vmul.f32 %v11103_v7, %v6290_v50  ;;  %v11512_v47 = vld [vmem:[#allocation22_spill] sm:$0xff] }
 0x635   : > { %v6464_v39 = vmax.f32 %v6432_v26, 0.0  ;;  %v6433_v11 = vadd.f32 %v11108_v37, %v6395_v44  ;;  %v751_v1 = vadd.f32 %v11117_v33, %v11512_v47 }
 0x636   : > { %v6528_v34 = vrot.slane %v6527_v23, 2  ;;  %v6533_v14 = vadd.f32 %v6532_v15, %v6492_v8  ;;  %v6462_v55 = vmax.f32 %v6430_v30, 0.0  ;;  %v6431_v29 = vadd.f32 %v11108_v37, %v6393_v32 }
 0x637   : > { %v6496_v21 = vadd.f32 %v6464_v39, %v740_v25  ;;  %v6465_v41 = vmax.f32 %v6433_v11, 0.0  ;;  %v748_v8 = vadd.f32 %v11117_v33, %v11510_v16 }
 0x638   : > { %v6529_v9 = vadd.f32 %v6528_v34, %v6527_v23  ;;  %v6494_v22 = vadd.f32 %v6462_v55, %v732_v20  ;;  %v6534_v45 = vadd.f32 %v6533_v14, %v6493_v2  ;;  %v6463_v3 = vmax.f32 %v6431_v29, 0.0  ;;  %v8448_v18 = vpop.f32.mrb[40].mxu0  ;;  %v11513_v29 = vld [vmem:[#allocation23_spill] sm:$0xff] }
 0x639   : > { %v6497_v58 = vadd.f32 %v6465_v41, %v743_v43  ;;  %v6398_v60 = vmul.f32 %v8448_v18, %v11103_v7  ;;  %v6303_v48 = vpop.f32.mrb[41].mxu0  ;;  %v759_v2 = vadd.f32 %v11511_v35, %v11117_v33  ;;  %v772_v51 = vadd.f32 %v11513_v29, %v11117_v33  ;;  %v11514_v43 = vld [vmem:[#allocation24_spill] sm:$0xff] }
 0x63a   : > { %v6530_v19 = vrot.slane %v6529_v9, 1  ;;  %v6535_v42 = vadd.f32 %v6534_v45, %v6494_v22  ;;  %v6495_v49 = vadd.f32 %v6463_v3, %v735_v31  ;;  %v6396_v17 = vmul.f32 %v11103_v7, %v6303_v48  ;;  %v8449_v12 = vpop.f32.mrb[42].mxu0  ;;  %v11515_v3 = vld [vmem:[#allocation25_spill] sm:$0xff] }
 0x63b   : > { %v6436_v56 = vadd.f32 %v11108_v37, %v6398_v60  ;;  %v6399_v54 = vmul.f32 %v8449_v12, %v11103_v7  ;;  %v6306_v0 = vpop.f32.mrb[43].mxu0  ;;  %v764_v53 = vadd.f32 %v11117_v33, %v11514_v43  ;;  %v775_v18 = vadd.f32 %v11515_v3, %v11117_v33 }
 0x63c   : > { %v6531_v61 = vadd.f32 %v6530_v19, %v6529_v9  ;;  %v6536_v13 = vadd.f32 %v6535_v42, %v6495_v49  ;;  %v6434_v40 = vadd.f32 %v11108_v37, %v6396_v17  ;;  %v6397_v59 = vmul.f32 %v11103_v7, %v6306_v0 }
 0x63d   : > { %v6468_v24 = vmax.f32 %v6436_v56, 0.0  ;;  %v6437_v4 = vadd.f32 %v11108_v37, %v6399_v54 }
 0x63e   : > { %v6559_v27 = vmul.f32 0.015625, %v6531_v61  ;;  %v6537_v62 = vadd.f32 %v6536_v13, %v6496_v21  ;;  %v6466_v5 = vmax.f32 %v6434_v40, 0.0  ;;  %v6435_v38 = vadd.f32 %v11108_v37, %v6397_v59 }
 0x63f   : > { %v6500_v63 = vadd.f32 %v6468_v24, %v756_v6  ;;  %v6469_v36 = vmax.f32 %v6437_v4, 0.0 }
 0x640   : > { %6563 = vst [vmem:[%s11198_s21 + $0x1] sm:$0x1] %v6559_v27  ;;  %v6538_v57 = vadd.f32 %v6537_v62, %v6497_v58  ;;  %v6498_v46 = vadd.f32 %v6466_v5, %v748_v8  ;;  %v6467_v26 = vmax.f32 %v6435_v38, 0.0  ;;  %v8452_v44 = vpop.f32.mrb[44].mxu0  ;;  %v11516_v58 = vld [vmem:[#allocation26_spill] sm:$0xff] }
 0x641   : > { %v6501_v50 = vadd.f32 %v6469_v36, %v759_v2  ;;  %v6402_v23 = vmul.f32 %v8452_v44, %v11103_v7  ;;  %v6319_v15 = vpop.f32.mrb[45].mxu0 }
 0x642   : > { %v6539_v30 = vrot.slane %v6538_v57, 4  ;;  %v6499_v32 = vadd.f32 %v6467_v26, %v751_v1  ;;  %v6400_v52 = vmul.f32 %v11103_v7, %v6319_v15  ;;  %v8453_v25 = vpop.f32.mrb[46].mxu0 }
 0x643   : > { %v6440_v10 = vadd.f32 %v11108_v37, %v6402_v23  ;;  %v6403_v20 = vmul.f32 %v8453_v25, %v11103_v7  ;;  %v6322_v39 = vpop.f32.mrb[47].mxu0 }
 0x644   : > { %v6540_v11 = vadd.f32 %v6539_v30, %v6538_v57  ;;  %v6545_v34 = vadd.f32 %v6499_v32, %v6498_v46  ;;  %v6438_v14 = vadd.f32 %v11108_v37, %v6400_v52  ;;  %v6401_v55 = vmul.f32 %v11103_v7, %v6322_v39 }
 0x645   : > { %v6472_v31 = vmax.f32 %v6440_v10, 0.0  ;;  %v6441_v21 = vadd.f32 %v11108_v37, %v6403_v20  ;;  %v767_v7 = vadd.f32 %v11117_v33, %v11516_v58 }
 0x646   : > { %v6541_v41 = vrot.slane %v6540_v11, 2  ;;  %v6546_v9 = vadd.f32 %v6545_v34, %v6500_v63  ;;  %v6470_v22 = vmax.f32 %v6438_v14, 0.0  ;;  %v6439_v45 = vadd.f32 %v11108_v37, %v6401_v55 }
 0x647   : > { %v6504_v60 = vadd.f32 %v6472_v31, %v772_v51  ;;  %v6473_v48 = vmax.f32 %v6441_v21, 0.0 }
 0x648   : > { %v6542_v19 = vadd.f32 %v6541_v41, %v6540_v11  ;;  %v6502_v42 = vadd.f32 %v6470_v22, %v764_v53  ;;  %v6547_v49 = vadd.f32 %v6546_v9, %v6501_v50  ;;  %v6471_v17 = vmax.f32 %v6439_v45, 0.0 }
 0x649   : > { %v6505_v12 = vadd.f32 %v6473_v48, %v775_v18 }
 0x64a   : > { %v6543_v56 = vrot.slane %v6542_v19, 1  ;;  %v6548_v54 = vadd.f32 %v6547_v49, %v6502_v42  ;;  %v6503_v0 = vadd.f32 %v6471_v17, %v767_v7 }
 0x64c   : > { %v6544_v37 = vadd.f32 %v6543_v56, %v6542_v19  ;;  %v6549_v61 = vadd.f32 %v6548_v54, %v6503_v0 }
 0x64e   : > { %v6560_v13 = vmul.f32 0.015625, %v6544_v37  ;;  %v6550_v40 = vadd.f32 %v6549_v61, %v6504_v60 }
 0x650   : > { %6564 = vst [vmem:[%s11198_s21 + $0x2] sm:$0x1] %v6560_v13  ;;  %v6551_v33 = vadd.f32 %v6550_v40, %v6505_v12 }
 0x652   : > { %v6552_v59 = vrot.slane %v6551_v33, 4 }
 0x654   : > { %v6553_v28 = vadd.f32 %v6552_v59, %v6551_v33 }
 0x656   : > { %v6554_v6 = vrot.slane %v6553_v28, 2 }
 0x658   : > { %v6555_v16 = vadd.f32 %v6554_v6, %v6553_v28 }
 0x65a   : > { %v6556_v8 = vrot.slane %v6555_v16, 1 }
 0x65c   : > { %v6557_v24 = vadd.f32 %v6556_v8, %v6555_v16 }
 0x65e   : > { %v6561_v4 = vmul.f32 0.015625, %v6557_v24 }
 0x660   : > { %6565 = vst [vmem:[%s11198_s21 + $0x3] sm:$0x1] %v6561_v4 }
 0x661   : > { %9247 = shalt.err (!%p9244_p3)
}
 0x662   : > { %s9248_s14 = scalar_lea.hbm %s11256_s26, 64  ;;  %s9252_s22 = scalar_lea.hbm %s11313_s9, 128 }
 0x663   : > { %p9249_p4 = scmp.ne.s32.totalorder %s11256_s26, %s9248_s14  ;;  %p9253_p9 = scmp.lt.u32.totalorder %s11256_s26, %s11313_s9 }
 0x664   : > { %p9254_p10 = scmp.lt.u32.totalorder %s9252_s22, %s9248_s14  ;;  %p9256_p12 = scmp.lt.u32.totalorder %s9248_s14, %s11256_s26 }
 0x665   : > { %p9250_p7 = pnand %p9249_p4, %p9390_p5 }
 0x666   : > { %p9255_p11 = por %p9254_p10, %p9253_p9 }
 0x667   : > { %p9251_p8 = pneg %p9250_p7 }
 0x668   : > { %p9257_p13 = por %p9256_p12, %p9255_p11 }
 0x66a   : > { %p9258_p0 = pnand %p9257_p13, %p9251_p8 }
 0x66c   : > { %9261 = shalt.err (!%p9258_p0)
}
 0x66d   : > { %s9300_s27 = smov 16   ;;  %s9301_s13 = smov 1  }
 0x66e   : > { %8982 = dma.vmem_to_hbm [thread:$0]  (%p9390_p5), %s11258_s23, 64, %s11256_s26, %s11263_s16, %s9300_s27, %s9300_s27, %s9301_s13  }
 0x66f PF: > { %p8988_p1 = scmp.ge.s32.totalorder %s9296_s12, 2  ;;  %s6595_s28 = sand.u32 1, %s9284_s30  }
 0x670   : > { %s6596_s29 = scalar_lea.sflag [#allocation4], %s6595_s28 }
 0x671   : > { %p8985_p2 = pnand %p8988_p1, %p9394_p6 }
 0x673   : > { %9279 = dma.done.wait (!%p8985_p2), %s6596_s29, 64  }
 0x674   : > { %9281 = vsyncadd (!%p8985_p2), %s6596_s29, 4294967232  ;;  %p19_p3 = scmp.ge.s32.totalorder %s9377_s15, 4   ;;  %s11517_s30 = smov %s9288_s10 }
 0x675   : > { %s11518_s10 = smov %s9292_s11  ;;  %s11519_s11 = smov %s9388_s18 }
 0x676   : > { %s11520_s12 = smov %s9377_s15  ;;  %21 = sbr.rel (!%p19_p3) target bundleno = 3 (0x3), region = 109 }
 0x67d   :  { %6601 = vsyncpa [#allocation4], 1 }
 0x67e   :  { %6603 = vsyncpa [#allocation4 + $0x1], 1 }

</bundles_post_ra>
